<compile_context>
chip_gen: v5e
topology: v5e:2x2
jax: 0.10.0
libtpu: 0.0.40
codegen_flags: <defaults>
</compile_context>

<pallas_src>
import functools

import jax
import jax.numpy as jnp
from jax.experimental import pallas as pl
from jax.experimental.pallas import tpu as pltpu

EPS = 1e-5


def _tpu_tuning():
    """(row_tile_target, vmem_limit_bytes), generation-aware with a safe fallback."""
    try:
        vmem = pltpu.get_tpu_info().vmem_capacity_bytes
    except Exception:
        vmem = 64 * 1024 * 1024          # conservative: assume v7x-sized VMEM
    if vmem >= 128 * 1024 * 1024:        # v5e / v6e: bigger tiles, higher cap
        return 2048, 96 * 1024 * 1024
    return 1024, 48 * 1024 * 1024        # v7x: >=16 MiB headroom below physical


# ----------------------------------------------------------------------------
# Kernels
# ----------------------------------------------------------------------------
def conv1x1_stats_kernel(x_ref, w_ref, y_ref, st_ref):
    """y = x @ w (bf16 MXU, f32 acc); bf16 store + f32 per-tile channel stats."""
    y = jnp.dot(x_ref[...], w_ref[...], preferred_element_type=jnp.float32)
    y_ref[...] = y.astype(y_ref.dtype)
    # Two separate row stores (friendlier to v5e's single vector-store slot).
    st_ref[0:1, :] = jnp.sum(y, axis=0, keepdims=True)
    st_ref[1:2, :] = jnp.sum(y * y, axis=0, keepdims=True)


def bn_relu_conv1x1_stats_kernel(h_ref, s_ref, b_ref, w_ref, y_ref, st_ref, *,
                                 tile_rows, valid_rows):
    """y = relu(h*scale+shift) @ w; bf16 store + f32 stats (row-mask if padded)."""
    h = jnp.maximum(h_ref[...].astype(jnp.float32) * s_ref[...] + b_ref[...], 0.0)
    y = jnp.dot(h.astype(jnp.bfloat16), w_ref[...],
                preferred_element_type=jnp.float32)
    y_ref[...] = y.astype(y_ref.dtype)
    if valid_rows is not None:
        # Zero row-padding is NOT neutral here (relu(shift) != 0 after BN fold),
        # so mask padded rows out of the stats.  Only generated when needed.
        row = (pl.program_id(0) * tile_rows
               + jax.lax.broadcasted_iota(jnp.int32, (tile_rows, 1), 0))
        y = jnp.where(row < valid_rows, y, 0.0)
    st_ref[0:1, :] = jnp.sum(y, axis=0, keepdims=True)
    st_ref[1:2, :] = jnp.sum(y * y, axis=0, keepdims=True)


def conv3x3_kernel(y1_ref, s_ref, b_ref, w2_ref, y2_ref, st_ref, col_ref):
    """Per image: BN1(fold)+ReLU, 3x3 conv (pad=1) as 3 im2col matmuls, stats."""
    H, W, C = y1_ref.shape
    h = jnp.maximum(y1_ref[...].astype(jnp.float32) * s_ref[...] + b_ref[...], 0.0)
    hb = h.astype(col_ref.dtype)

    # im2col scratch: col[r, x, dx*C:(dx+1)*C] = padded_input[r, x+dx, :].
    # Written once per image; each dy tap then reads a leading-dim slice (no
    # per-dy (HW, 3C) concatenate copies).  The halo rows/columns are re-zeroed
    # every step (tiny: ~2*W*3C + 2*H*C elems) so it stays correct when the
    # "parallel" grid axis is split across TensorCores (each core's own scratch).
    col_ref[0:1, :, :] = jnp.zeros((1, W, 3 * C), col_ref.dtype)
    col_ref[H + 1:H + 2, :, :] = jnp.zeros((1, W, 3 * C), col_ref.dtype)
    # centre tap (dx=1): sublane-aligned, full-width store
    col_ref[1:H + 1, :, C:2 * C] = hb
    # left tap (dx=0): x = 0 is the left zero-pad column
    col_ref[1:H + 1, 0:1, 0:C] = jnp.zeros((H, 1, C), col_ref.dtype)
    col_ref[1:H + 1, 1:W, 0:C] = hb[:, 0:W - 1, :]
    # right tap (dx=2): x = W-1 is the right zero-pad column
    col_ref[1:H + 1, W - 1:W, 2 * C:3 * C] = jnp.zeros((H, 1, C), col_ref.dtype)
    col_ref[1:H + 1, 0:W - 1, 2 * C:3 * C] = hb[:, 1:W, :]

    acc = jnp.zeros((H * W, C), jnp.float32)
    for dy in range(3):                          # 3 matmuls with K = 3*C
        win = col_ref[dy:dy + H, :, :].reshape(H * W, 3 * C)
        acc = acc + jnp.dot(win, w2_ref[dy], preferred_element_type=jnp.float32)

    y2_ref[...] = acc.astype(y2_ref.dtype)
    st_ref[0:1, :] = jnp.sum(acc, axis=0, keepdims=True)
    st_ref[1:2, :] = jnp.sum(acc * acc, axis=0, keepdims=True)


def bn_add_drs_kernel(y3_ref, xid_ref, s_ref, b_ref, wfc_ref, out_ref):
    """Per image: BN3(fold) + residual add + DRS_learnable (relu/max/avg/fc/min)."""
    z = jnp.maximum(y3_ref[...].astype(jnp.float32) * s_ref[...] + b_ref[...]
                    + xid_ref[...].astype(jnp.float32), 0.0)
    x_max = jnp.max(z, axis=0, keepdims=True)         # (1, C) global max pool
    avg = jnp.mean(z, axis=0, keepdims=True)          # (1, C) global avg pool
    ctrl = jax.nn.sigmoid(jnp.dot(avg.astype(jnp.bfloat16), wfc_ref[...],
                                  preferred_element_type=jnp.float32))
    out_ref[...] = jnp.minimum(z, x_max * ctrl)


# ----------------------------------------------------------------------------
# Wrapper helpers
# ----------------------------------------------------------------------------
def _rup(x, m=128):
    return ((x + m - 1) // m) * m


def _pad2(w, r, c):
    return jnp.pad(w, ((0, r - w.shape[0]), (0, c - w.shape[1])))


def _finalize_bn(partials, n_rows, gamma, beta, c_pad):
    """Reduce per-tile (sum, sum_sq) partials -> folded (scale, shift)."""
    tot = jnp.sum(partials, axis=0)                        # (2, C_pad)
    mean = tot[0] / n_rows
    var = jnp.maximum(tot[1] / n_rows - mean * mean, 0.0)  # biased, clamp >= 0
    rstd = jax.lax.rsqrt(var + EPS)
    g = jnp.pad(gamma, (0, c_pad - gamma.shape[0]))
    b = jnp.pad(beta, (0, c_pad - beta.shape[0]))
    scale = g * rstd
    shift = b - mean * scale
    return scale.reshape(1, -1), shift.reshape(1, -1)


# ----------------------------------------------------------------------------
# Parameters (PyTorch-equivalent init)
# ----------------------------------------------------------------------------
def init_params(key, inplanes, planes, base_width=64, groups=1):
    expansion = 4
    width = int(planes * (base_width / 64.0)) * groups
    cout = planes * expansion
    k1, k2, k3, k4 = jax.random.split(key, 4)
    return {
        # conv weights stored as (Cin, Cout) / (kh, kw, Cin, Cout)
        "w1": jax.random.normal(k1, (inplanes, width), jnp.float32)
              * (2.0 / inplanes) ** 0.5,
        "w2": jax.random.normal(k2, (3, 3, width, width), jnp.float32)
              * (2.0 / (9 * width)) ** 0.5,
        "w3": jax.random.normal(k3, (width, cout), jnp.float32)
              * (2.0 / width) ** 0.5,
        # BatchNorm affine params (default init weight=1, bias=0)
        "g1": jnp.ones((width,), jnp.float32), "b1": jnp.zeros((width,), jnp.float32),
        "g2": jnp.ones((width,), jnp.float32), "b2": jnp.zeros((width,), jnp.float32),
        "g3": jnp.ones((cout,), jnp.float32),  "b3": jnp.zeros((cout,), jnp.float32),
        # DRS fc: nn.Linear(C, C, bias=False), weight ~ N(0, 0.01); y = x @ W^T
        "wfc_t": (jax.random.normal(k4, (cout, cout), jnp.float32) * 0.01).T,
    }


# ----------------------------------------------------------------------------
# Forward
# ----------------------------------------------------------------------------
def bottleneck_forward(x_nchw, params):
    x = jnp.transpose(x_nchw, (0, 2, 3, 1)).astype(jnp.float32)   # NCHW -> NHWC
    N, H, W, Cin = x.shape
    width = params["w1"].shape[1]
    Cout = params["w3"].shape[1]
    assert Cin == Cout, "downsample=None requires inplanes == planes*expansion"
    HW = H * W
    R = N * HW

    Cin_p, Cw_p, Co_p = _rup(Cin), _rup(width), _rup(Cout)

    tile_target, vmem_limit = _tpu_tuning()
    TR = min(tile_target, _rup(R, 8))           # fixed tile -> bounded VMEM
    R_pad = _rup(R, TR)                          # pad rows to a whole grid
    n_tiles = R_pad // TR
    valid_rows = None if R_pad == R else R       # static; enables stats mask
    cparams = pltpu.CompilerParams(dimension_semantics=("parallel",),
                                   vmem_limit_bytes=vmem_limit)

    # --- layout plumbing / weight prep (all in XLA, once) --------------------
    # bf16 for every inter-pass stream; f32 only for BN stats and folding.
    xp = jnp.pad(x.reshape(R, Cin),
                 ((0, 0), (0, Cin_p - Cin))).astype(jnp.bfloat16)   # (R, Cin_p)
    xp_rows = jnp.pad(xp, ((0, R_pad - R), (0, 0)))                 # zero rows
    w1 = _pad2(params["w1"], Cin_p, Cw_p).astype(jnp.bfloat16)
    w3 = _pad2(params["w3"], Cw_p, Co_p).astype(jnp.bfloat16)
    # Constant-index weight specs are not re-fetched per grid step; bf16 keeps
    # even a Cout=2048 wfc double-buffer at ~16 MiB (well under the v7x cap).
    wfc = _pad2(params["wfc_t"], Co_p, Co_p).astype(jnp.bfloat16)
    # w2: (3,3,Cw,Cw) -> (3 dy, 3*Cw_p, Cw_p) with dx-major K blocks (== im2col)
    w2p = jnp.pad(params["w2"],
                  ((0, 0), (0, 0), (0, Cw_p - width), (0, Cw_p - width)))
    w2p = w2p.reshape(3, 3 * Cw_p, Cw_p).astype(jnp.bfloat16)

    # --- pass 1: conv1 (1x1) + BN1 partial stats -----------------------------
    y1, st1 = pl.pallas_call(
        conv1x1_stats_kernel,
        out_shape=(jax.ShapeDtypeStruct((R_pad, Cw_p), jnp.bfloat16),
                   jax.ShapeDtypeStruct((n_tiles, 2, Cw_p), jnp.float32)),
        grid=(n_tiles,),
        in_specs=[pl.BlockSpec((TR, Cin_p), lambda i: (i, 0)),
                  pl.BlockSpec((Cin_p, Cw_p), lambda i: (0, 0))],
        out_specs=(pl.BlockSpec((TR, Cw_p), lambda i: (i, 0)),
                   pl.BlockSpec((None, 2, Cw_p), lambda i: (i, 0, 0))),
        compiler_params=cparams,
    )(xp_rows, w1)
    # Zero-padded rows yield y == 0, so the stats stay exact without masking.
    sc1, sh1 = _finalize_bn(st1, R, params["g1"], params["b1"], Cw_p)

    # --- pass 2: BN1+ReLU + conv2 (3x3, pad=1) + BN2 partial stats -----------
    # TODO(synk): band each image over H (halo refetch) for better v7x megacore
    #             utilisation / pipelining when N is small.
    y2, st2 = pl.pallas_call(
        conv3x3_kernel,
        out_shape=(jax.ShapeDtypeStruct((N, HW, Cw_p), jnp.bfloat16),
                   jax.ShapeDtypeStruct((N, 2, Cw_p), jnp.float32)),
        grid=(N,),
        in_specs=[pl.BlockSpec((None, H, W, Cw_p), lambda n: (n, 0, 0, 0)),
                  pl.BlockSpec((1, Cw_p), lambda n: (0, 0)),
                  pl.BlockSpec((1, Cw_p), lambda n: (0, 0)),
                  pl.BlockSpec((3, 3 * Cw_p, Cw_p), lambda n: (0, 0, 0))],
        out_specs=(pl.BlockSpec((None, HW, Cw_p), lambda n: (n, 0, 0)),
                   pl.BlockSpec((None, 2, Cw_p), lambda n: (n, 0, 0))),
        scratch_shapes=[pltpu.VMEM((H + 2, W, 3 * Cw_p), jnp.bfloat16)],
        compiler_params=cparams,
    )(y1[:R].reshape(N, H, W, Cw_p), sc1, sh1, w2p)
    sc2, sh2 = _finalize_bn(st2, R, params["g2"], params["b2"], Cw_p)

    # --- pass 3: BN2+ReLU + conv3 (1x1) + BN3 partial stats ------------------
    y2_rows = jnp.pad(y2.reshape(R, Cw_p), ((0, R_pad - R), (0, 0)))
    y3, st3 = pl.pallas_call(
        functools.partial(bn_relu_conv1x1_stats_kernel,
                          tile_rows=TR, valid_rows=valid_rows),
        out_shape=(jax.ShapeDtypeStruct((R_pad, Co_p), jnp.bfloat16),
                   jax.ShapeDtypeStruct((n_tiles, 2, Co_p), jnp.float32)),
        grid=(n_tiles,),
        in_specs=[pl.BlockSpec((TR, Cw_p), lambda i: (i, 0)),
                  pl.BlockSpec((1, Cw_p), lambda i: (0, 0)),
                  pl.BlockSpec((1, Cw_p), lambda i: (0, 0)),
                  pl.BlockSpec((Cw_p, Co_p), lambda i: (0, 0))],
        out_specs=(pl.BlockSpec((TR, Co_p), lambda i: (i, 0)),
                   pl.BlockSpec((None, 2, Co_p), lambda i: (i, 0, 0))),
        compiler_params=cparams,
    )(y2_rows, sc2, sh2, w3)
    sc3, sh3 = _finalize_bn(st3, R, params["g3"], params["b3"], Co_p)

    # --- pass 4: BN3 + residual add + DRS_learnable (per image) --------------
    out_p = pl.pallas_call(
        bn_add_drs_kernel,
        out_shape=jax.ShapeDtypeStruct((N, HW, Co_p), jnp.float32),
        grid=(N,),
        in_specs=[pl.BlockSpec((None, HW, Co_p), lambda n: (n, 0, 0)),
                  pl.BlockSpec((None, HW, Co_p), lambda n: (n, 0, 0)),
                  pl.BlockSpec((1, Co_p), lambda n: (0, 0)),
                  pl.BlockSpec((1, Co_p), lambda n: (0, 0)),
                  pl.BlockSpec((Co_p, Co_p), lambda n: (0, 0))],
        out_specs=pl.BlockSpec((None, HW, Co_p), lambda n: (n, 0, 0)),
        compiler_params=cparams,
    )(y3[:R].reshape(N, HW, Co_p), xp.reshape(N, HW, Cin_p), sc3, sh3, wfc)

    out = out_p[:, :, :Cout].reshape(N, H, W, Cout)
    return jnp.transpose(out, (0, 3, 1, 2))                       # NHWC -> NCHW


if __name__ == "__main__":
    key = jax.random.PRNGKey(0)
    kx, kp = jax.random.split(key)

    # Small shapes consistent with the module: downsample=None requires
    # inplanes == planes*4, so inplanes=16, planes=4 -> width=4, Cout=16.
    N, inplanes, planes, H, W = 2, 16, 4, 16, 16
    x = jax.random.normal(kx, (N, inplanes, H, W), jnp.float32)   # NCHW
    params = init_params(kp, inplanes, planes)

    fwd = jax.jit(bottleneck_forward)
    out = fwd(x, params)
    jax.block_until_ready(out)
    assert out.shape == (N, planes * 4, H, W)
    print("KERNEL_OK")
</pallas_src>

<mosaic_0001>
module attributes {stable_mosaic.version = 11 : i64} {
  func.func @conv1x1_stats_kernel(%arg0: i32, %arg1: memref<512x128xbf16, #tpu.memory_space<vmem>>, %arg2: memref<128x128xbf16, #tpu.memory_space<vmem>>, %arg3: memref<512x128xbf16, #tpu.memory_space<vmem>>, %arg4: memref<1x2x128xf32, #tpu.memory_space<vmem>>) attributes {dimension_semantics = [#tpu.dimension_semantics<parallel>], iteration_bounds = array<i64: 1>, scalar_prefetch = 0 : i64, scratch_operands = 0 : i64, tpu.core_type = #tpu.core_type<tc>, window_params = [{transform_indices = @transform_0, window_bounds = array<i64: 512, 128>}, {pipeline_mode = #tpu.pipeline_mode<synchronous>, transform_indices = @transform_1, window_bounds = array<i64: 128, 128>}, {transform_indices = @transform_2, window_bounds = array<i64: 512, 128>}, {transform_indices = @transform_3, window_bounds = array<i64: 1, 2, 128>}]} {
    %c0 = arith.constant 0 : index
    %c0_0 = arith.constant 0 : index
    %0 = vector.load %arg1[%c0, %c0_0] : memref<512x128xbf16, #tpu.memory_space<vmem>>, vector<512x128xbf16>
    %c0_1 = arith.constant 0 : index
    %c0_2 = arith.constant 0 : index
    %1 = vector.load %arg2[%c0_1, %c0_2] : memref<128x128xbf16, #tpu.memory_space<vmem>>, vector<128x128xbf16>
    %cst = arith.constant dense<0.000000e+00> : vector<512x128xf32>
    %2 = tpu.matmul %0, %1, %cst {dimension_numbers = #tpu.dot_dimension_numbers<[1], [0], [0], [1], [0, 0, 1, 1], [], []>} : vector<512x128xbf16>, vector<128x128xbf16>, vector<512x128xf32> -> vector<512x128xf32>
    %3 = arith.truncf %2 : vector<512x128xf32> to vector<512x128xbf16>
    %c0_3 = arith.constant 0 : index
    %c0_4 = arith.constant 0 : index
    %4 = vector.load %arg3[%c0_3, %c0_4] : memref<512x128xbf16, #tpu.memory_space<vmem>>, vector<512x128xbf16>
    tpu.vector_store %arg3[%c0_3, %c0_4], %3 {strides = array<i32>} : memref<512x128xbf16, #tpu.memory_space<vmem>>, vector<512x128xbf16>,
    %cst_5 = arith.constant dense<0.000000e+00> : vector<128xf32>
    %5 = vector.multi_reduction <add>, %2, %cst_5 [0] : vector<512x128xf32> to vector<128xf32>
    %6 = vector.shape_cast %5 : vector<128xf32> to vector<1x128xf32>
    %c0_6 = arith.constant 0 : index
    %c0_7 = arith.constant 0 : index
    %c0_8 = arith.constant 0 : index
    %7 = vector.load %arg4[%c0_6, %c0_7, %c0_8] : memref<1x2x128xf32, #tpu.memory_space<vmem>>, vector<1x1x128xf32>
    %8 = vector.shape_cast %7 : vector<1x1x128xf32> to vector<1x128xf32>
    %9 = vector.shape_cast %6 : vector<1x128xf32> to vector<1x1x128xf32>
    tpu.vector_store %arg4[%c0_6, %c0_7, %c0_8], %9 {strides = array<i32>} : memref<1x2x128xf32, #tpu.memory_space<vmem>>, vector<1x1x128xf32>,
    %10 = arith.mulf %2, %2 : vector<512x128xf32>
    %cst_9 = arith.constant dense<0.000000e+00> : vector<128xf32>
    %11 = vector.multi_reduction <add>, %10, %cst_9 [0] : vector<512x128xf32> to vector<128xf32>
    %12 = vector.shape_cast %11 : vector<128xf32> to vector<1x128xf32>
    %c0_10 = arith.constant 0 : index
    %c1 = arith.constant 1 : index
    %c0_11 = arith.constant 0 : index
    %13 = vector.load %arg4[%c0_10, %c1, %c0_11] : memref<1x2x128xf32, #tpu.memory_space<vmem>>, vector<1x1x128xf32>
    %14 = vector.shape_cast %13 : vector<1x1x128xf32> to vector<1x128xf32>
    %15 = vector.shape_cast %12 : vector<1x128xf32> to vector<1x1x128xf32>
    tpu.vector_store %arg4[%c0_10, %c1, %c0_11], %15 {strides = array<i32>} : memref<1x2x128xf32, #tpu.memory_space<vmem>>, vector<1x1x128xf32>,
    return
  }
  func.func @transform_0(%arg0: i32) -> (i32, i32) {
    %c0_i32 = arith.constant 0 : i32
    %c0_i32_0 = arith.constant 0 : i32
    return %arg0, %c0_i32 : i32, i32
  }
  func.func @transform_1(%arg0: i32) -> (i32, i32) {
    %c0_i32 = arith.constant 0 : i32
    %c0_i32_0 = arith.constant 0 : i32
    %c0_i32_1 = arith.constant 0 : i32
    return %c0_i32, %c0_i32_0 : i32, i32
  }
  func.func @transform_2(%arg0: i32) -> (i32, i32) {
    %c0_i32 = arith.constant 0 : i32
    %c0_i32_0 = arith.constant 0 : i32
    return %arg0, %c0_i32 : i32, i32
  }
  func.func @transform_3(%arg0: i32) -> (i32, i32, i32) {
    %c0_i32 = arith.constant 0 : i32
    %c0_i32_0 = arith.constant 0 : i32
    %c0_i32_1 = arith.constant 0 : i32
    return %arg0, %c0_i32, %c0_i32_0 : i32, i32, i32
  }
}

module attributes {stable_mosaic.version = 11 : i64} {
  func.func @conv3x3_kernel(%arg0: i32, %arg1: memref<1x16x16x128xbf16, #tpu.memory_space<vmem>>, %arg2: memref<1x128xf32, #tpu.memory_space<vmem>>, %arg3: memref<1x128xf32, #tpu.memory_space<vmem>>, %arg4: memref<3x384x128xbf16, #tpu.memory_space<vmem>>, %arg5: memref<1x256x128xbf16, #tpu.memory_space<vmem>>, %arg6: memref<1x2x128xf32, #tpu.memory_space<vmem>>, %arg7: memref<18x16x384xbf16, #tpu.memory_space<vmem>>) attributes {dimension_semantics = [#tpu.dimension_semantics<parallel>], iteration_bounds = array<i64: 2>, scalar_prefetch = 0 : i64, scratch_operands = 1 : i64, tpu.core_type = #tpu.core_type<tc>, window_params = [{transform_indices = @transform_0, window_bounds = array<i64: 1, 16, 16, 128>}, {pipeline_mode = #tpu.pipeline_mode<synchronous>, transform_indices = @transform_1, window_bounds = array<i64: 1, 128>}, {pipeline_mode = #tpu.pipeline_mode<synchronous>, transform_indices = @transform_2, window_bounds = array<i64: 1, 128>}, {pipeline_mode = #tpu.pipeline_mode<synchronous>, transform_indices = @transform_3, window_bounds = array<i64: 3, 384, 128>}, {transform_indices = @transform_4, window_bounds = array<i64: 1, 256, 128>}, {transform_indices = @transform_5, window_bounds = array<i64: 1, 2, 128>}]} {
    %c0 = arith.constant 0 : index
    %c0_0 = arith.constant 0 : index
    %c0_1 = arith.constant 0 : index
    %c0_2 = arith.constant 0 : index
    %0 = vector.load %arg1[%c0, %c0_0, %c0_1, %c0_2] : memref<1x16x16x128xbf16, #tpu.memory_space<vmem>>, vector<1x16x16x128xbf16>
    %1 = vector.shape_cast %0 : vector<1x16x16x128xbf16> to vector<16x16x128xbf16>
    %2 = arith.extf %1 : vector<16x16x128xbf16> to vector<16x16x128xf32>
    %c0_3 = arith.constant 0 : index
    %c0_4 = arith.constant 0 : index
    %3 = vector.load %arg2[%c0_3, %c0_4] : memref<1x128xf32, #tpu.memory_space<vmem>>, vector<1x128xf32>
    %4 = vector.shape_cast %3 : vector<1x128xf32> to vector<1x1x128xf32>
    %5 = vector.broadcast %4 : vector<1x1x128xf32> to vector<16x16x128xf32>
    %6 = arith.mulf %2, %5 : vector<16x16x128xf32>
    %c0_5 = arith.constant 0 : index
    %c0_6 = arith.constant 0 : index
    %7 = vector.load %arg3[%c0_5, %c0_6] : memref<1x128xf32, #tpu.memory_space<vmem>>, vector<1x128xf32>
    %8 = vector.shape_cast %7 : vector<1x128xf32> to vector<1x1x128xf32>
    %9 = vector.broadcast %8 : vector<1x1x128xf32> to vector<16x16x128xf32>
    %10 = arith.addf %6, %9 : vector<16x16x128xf32>
    %cst = arith.constant 0.000000e+00 : f32
    %11 = vector.broadcast %cst : f32 to vector<16x16x128xf32>
    %12 = arith.maximumf %10, %11 : vector<16x16x128xf32>
    %13 = arith.truncf %12 : vector<16x16x128xf32> to vector<16x16x128xbf16>
    %cst_7 = arith.constant 0.000000e+00 : bf16
    %14 = vector.broadcast %cst_7 : bf16 to vector<1x16x384xbf16>
    %c0_8 = arith.constant 0 : index
    %c0_9 = arith.constant 0 : index
    %c0_10 = arith.constant 0 : index
    %15 = vector.load %arg7[%c0_8, %c0_9, %c0_10] : memref<18x16x384xbf16, #tpu.memory_space<vmem>>, vector<1x16x384xbf16>
    tpu.vector_store %arg7[%c0_8, %c0_9, %c0_10], %14 {strides = array<i32>} : memref<18x16x384xbf16, #tpu.memory_space<vmem>>, vector<1x16x384xbf16>,
    %cst_11 = arith.constant 0.000000e+00 : bf16
    %16 = vector.broadcast %cst_11 : bf16 to vector<1x16x384xbf16>
    %c17 = arith.constant 17 : index
    %c0_12 = arith.constant 0 : index
    %c0_13 = arith.constant 0 : index
    %17 = vector.load %arg7[%c17, %c0_12, %c0_13] : memref<18x16x384xbf16, #tpu.memory_space<vmem>>, vector<1x16x384xbf16>
    tpu.vector_store %arg7[%c17, %c0_12, %c0_13], %16 {strides = array<i32>} : memref<18x16x384xbf16, #tpu.memory_space<vmem>>, vector<1x16x384xbf16>,
    %c1 = arith.constant 1 : index
    %c0_14 = arith.constant 0 : index
    %c128 = arith.constant 128 : index
    %18 = vector.load %arg7[%c1, %c0_14, %c128] : memref<18x16x384xbf16, #tpu.memory_space<vmem>>, vector<16x16x128xbf16>
    tpu.vector_store %arg7[%c1, %c0_14, %c128], %13 {strides = array<i32>} : memref<18x16x384xbf16, #tpu.memory_space<vmem>>, vector<16x16x128xbf16>,
    %cst_15 = arith.constant 0.000000e+00 : bf16
    %19 = vector.broadcast %cst_15 : bf16 to vector<16x1x128xbf16>
    %c1_16 = arith.constant 1 : index
    %c0_17 = arith.constant 0 : index
    %c0_18 = arith.constant 0 : index
    %20 = vector.load %arg7[%c1_16, %c0_17, %c0_18] : memref<18x16x384xbf16, #tpu.memory_space<vmem>>, vector<16x1x128xbf16>
    tpu.vector_store %arg7[%c1_16, %c0_17, %c0_18], %19 {strides = array<i32>} : memref<18x16x384xbf16, #tpu.memory_space<vmem>>, vector<16x1x128xbf16>,
    %21 = vector.extract_strided_slice %13 {offsets = [0, 0, 0], sizes = [16, 15, 128], strides = [1, 1, 1]} : vector<16x16x128xbf16> to vector<16x15x128xbf16>
    %c1_19 = arith.constant 1 : index
    %c1_20 = arith.constant 1 : index
    %c0_21 = arith.constant 0 : index
    %22 = vector.load %arg7[%c1_19, %c1_20, %c0_21] : memref<18x16x384xbf16, #tpu.memory_space<vmem>>, vector<16x15x128xbf16>
    tpu.vector_store %arg7[%c1_19, %c1_20, %c0_21], %21 {strides = array<i32>} : memref<18x16x384xbf16, #tpu.memory_space<vmem>>, vector<16x15x128xbf16>,
    %cst_22 = arith.constant 0.000000e+00 : bf16
    %23 = vector.broadcast %cst_22 : bf16 to vector<16x1x128xbf16>
    %c1_23 = arith.constant 1 : index
    %c15 = arith.constant 15 : index
    %c256 = arith.constant 256 : index
    %24 = vector.load %arg7[%c1_23, %c15, %c256] : memref<18x16x384xbf16, #tpu.memory_space<vmem>>, vector<16x1x128xbf16>
    tpu.vector_store %arg7[%c1_23, %c15, %c256], %23 {strides = array<i32>} : memref<18x16x384xbf16, #tpu.memory_space<vmem>>, vector<16x1x128xbf16>,
    %25 = vector.extract_strided_slice %13 {offsets = [0, 1, 0], sizes = [16, 15, 128], strides = [1, 1, 1]} : vector<16x16x128xbf16> to vector<16x15x128xbf16>
    %c1_24 = arith.constant 1 : index
    %c0_25 = arith.constant 0 : index
    %c256_26 = arith.constant 256 : index
    %26 = vector.load %arg7[%c1_24, %c0_25, %c256_26] : memref<18x16x384xbf16, #tpu.memory_space<vmem>>, vector<16x15x128xbf16>
    tpu.vector_store %arg7[%c1_24, %c0_25, %c256_26], %25 {strides = array<i32>} : memref<18x16x384xbf16, #tpu.memory_space<vmem>>, vector<16x15x128xbf16>,
    %cst_27 = arith.constant 0.000000e+00 : f32
    %27 = vector.broadcast %cst_27 : f32 to vector<256x128xf32>
    %c0_28 = arith.constant 0 : index
    %c0_29 = arith.constant 0 : index
    %c0_30 = arith.constant 0 : index
    %28 = vector.load %arg7[%c0_28, %c0_29, %c0_30] : memref<18x16x384xbf16, #tpu.memory_space<vmem>>, vector<16x16x384xbf16>
    %29 = vector.shape_cast %28 : vector<16x16x384xbf16> to vector<256x384xbf16>
    %c0_31 = arith.constant 0 : index
    %c0_32 = arith.constant 0 : index
    %c0_33 = arith.constant 0 : index
    %30 = vector.load %arg4[%c0_31, %c0_32, %c0_33] : memref<3x384x128xbf16, #tpu.memory_space<vmem>>, vector<1x384x128xbf16>
    %31 = vector.shape_cast %30 : vector<1x384x128xbf16> to vector<384x128xbf16>
    %cst_34 = arith.constant dense<0.000000e+00> : vector<256x128xf32>
    %32 = tpu.matmul %29, %31, %cst_34 {dimension_numbers = #tpu.dot_dimension_numbers<[1], [0], [0], [1], [0, 0, 1, 1], [], []>} : vector<256x384xbf16>, vector<384x128xbf16>, vector<256x128xf32> -> vector<256x128xf32>
    %33 = arith.addf %27, %32 : vector<256x128xf32>
    %c1_35 = arith.constant 1 : index
    %c0_36 = arith.constant 0 : index
    %c0_37 = arith.constant 0 : index
    %34 = vector.load %arg7[%c1_35, %c0_36, %c0_37] : memref<18x16x384xbf16, #tpu.memory_space<vmem>>, vector<16x16x384xbf16>
    %35 = vector.shape_cast %34 : vector<16x16x384xbf16> to vector<256x384xbf16>
    %c1_38 = arith.constant 1 : index
    %c0_39 = arith.constant 0 : index
    %c0_40 = arith.constant 0 : index
    %36 = vector.load %arg4[%c1_38, %c0_39, %c0_40] : memref<3x384x128xbf16, #tpu.memory_space<vmem>>, vector<1x384x128xbf16>
    %37 = vector.shape_cast %36 : vector<1x384x128xbf16> to vector<384x128xbf16>
    %cst_41 = arith.constant dense<0.000000e+00> : vector<256x128xf32>
    %38 = tpu.matmul %35, %37, %cst_41 {dimension_numbers = #tpu.dot_dimension_numbers<[1], [0], [0], [1], [0, 0, 1, 1], [], []>} : vector<256x384xbf16>, vector<384x128xbf16>, vector<256x128xf32> -> vector<256x128xf32>
    %39 = arith.addf %33, %38 : vector<256x128xf32>
    %c2 = arith.constant 2 : index
    %c0_42 = arith.constant 0 : index
    %c0_43 = arith.constant 0 : index
    %40 = vector.load %arg7[%c2, %c0_42, %c0_43] : memref<18x16x384xbf16, #tpu.memory_space<vmem>>, vector<16x16x384xbf16>
    %41 = vector.shape_cast %40 : vector<16x16x384xbf16> to vector<256x384xbf16>
    %c2_44 = arith.constant 2 : index
    %c0_45 = arith.constant 0 : index
    %c0_46 = arith.constant 0 : index
    %42 = vector.load %arg4[%c2_44, %c0_45, %c0_46] : memref<3x384x128xbf16, #tpu.memory_space<vmem>>, vector<1x384x128xbf16>
    %43 = vector.shape_cast %42 : vector<1x384x128xbf16> to vector<384x128xbf16>
    %cst_47 = arith.constant dense<0.000000e+00> : vector<256x128xf32>
    %44 = tpu.matmul %41, %43, %cst_47 {dimension_numbers = #tpu.dot_dimension_numbers<[1], [0], [0], [1], [0, 0, 1, 1], [], []>} : vector<256x384xbf16>, vector<384x128xbf16>, vector<256x128xf32> -> vector<256x128xf32>
    %45 = arith.addf %39, %44 : vector<256x128xf32>
    %46 = arith.truncf %45 : vector<256x128xf32> to vector<256x128xbf16>
    %c0_48 = arith.constant 0 : index
    %c0_49 = arith.constant 0 : index
    %c0_50 = arith.constant 0 : index
    %47 = vector.load %arg5[%c0_48, %c0_49, %c0_50] : memref<1x256x128xbf16, #tpu.memory_space<vmem>>, vector<1x256x128xbf16>
    %48 = vector.shape_cast %47 : vector<1x256x128xbf16> to vector<256x128xbf16>
    %49 = vector.shape_cast %46 : vector<256x128xbf16> to vector<1x256x128xbf16>
    tpu.vector_store %arg5[%c0_48, %c0_49, %c0_50], %49 {strides = array<i32>} : memref<1x256x128xbf16, #tpu.memory_space<vmem>>, vector<1x256x128xbf16>,
    %cst_51 = arith.constant dense<0.000000e+00> : vector<128xf32>
    %50 = vector.multi_reduction <add>, %45, %cst_51 [0] : vector<256x128xf32> to vector<128xf32>
    %51 = vector.shape_cast %50 : vector<128xf32> to vector<1x128xf32>
    %c0_52 = arith.constant 0 : index
    %c0_53 = arith.constant 0 : index
    %c0_54 = arith.constant 0 : index
    %52 = vector.load %arg6[%c0_52, %c0_53, %c0_54] : memref<1x2x128xf32, #tpu.memory_space<vmem>>, vector<1x1x128xf32>
    %53 = vector.shape_cast %52 : vector<1x1x128xf32> to vector<1x128xf32>
    %54 = vector.shape_cast %51 : vector<1x128xf32> to vector<1x1x128xf32>
    tpu.vector_store %arg6[%c0_52, %c0_53, %c0_54], %54 {strides = array<i32>} : memref<1x2x128xf32, #tpu.memory_space<vmem>>, vector<1x1x128xf32>,
    %55 = arith.mulf %45, %45 : vector<256x128xf32>
    %cst_55 = arith.constant dense<0.000000e+00> : vector<128xf32>
    %56 = vector.multi_reduction <add>, %55, %cst_55 [0] : vector<256x128xf32> to vector<128xf32>
    %57 = vector.shape_cast %56 : vector<128xf32> to vector<1x128xf32>
    %c0_56 = arith.constant 0 : index
    %c1_57 = arith.constant 1 : index
    %c0_58 = arith.constant 0 : index
    %58 = vector.load %arg6[%c0_56, %c1_57, %c0_58] : memref<1x2x128xf32, #tpu.memory_space<vmem>>, vector<1x1x128xf32>
    %59 = vector.shape_cast %58 : vector<1x1x128xf32> to vector<1x128xf32>
    %60 = vector.shape_cast %57 : vector<1x128xf32> to vector<1x1x128xf32>
    tpu.vector_store %arg6[%c0_56, %c1_57, %c0_58], %60 {strides = array<i32>} : memref<1x2x128xf32, #tpu.memory_space<vmem>>, vector<1x1x128xf32>,
    return
  }
  func.func @transform_0(%arg0: i32) -> (i32, i32, i32, i32) {
    %c0_i32 = arith.constant 0 : i32
    %c0_i32_0 = arith.constant 0 : i32
    %c0_i32_1 = arith.constant 0 : i32
    %c0_i32_2 = arith.constant 0 : i32
    return %arg0, %c0_i32, %c0_i32_0, %c0_i32_1 : i32, i32, i32, i32
  }
  func.func @transform_1(%arg0: i32) -> (i32, i32) {
    %c0_i32 = arith.constant 0 : i32
    %c0_i32_0 = arith.constant 0 : i32
    %c0_i32_1 = arith.constant 0 : i32
    return %c0_i32, %c0_i32_0 : i32, i32
  }
  func.func @transform_2(%arg0: i32) -> (i32, i32) {
    %c0_i32 = arith.constant 0 : i32
    %c0_i32_0 = arith.constant 0 : i32
    %c0_i32_1 = arith.constant 0 : i32
    return %c0_i32, %c0_i32_0 : i32, i32
  }
  func.func @transform_3(%arg0: i32) -> (i32, i32, i32) {
    %c0_i32 = arith.constant 0 : i32
    %c0_i32_0 = arith.constant 0 : i32
    %c0_i32_1 = arith.constant 0 : i32
    %c0_i32_2 = arith.constant 0 : i32
    return %c0_i32, %c0_i32_0, %c0_i32_1 : i32, i32, i32
  }
  func.func @transform_4(%arg0: i32) -> (i32, i32, i32) {
    %c0_i32 = arith.constant 0 : i32
    %c0_i32_0 = arith.constant 0 : i32
    %c0_i32_1 = arith.constant 0 : i32
    return %arg0, %c0_i32, %c0_i32_0 : i32, i32, i32
  }
  func.func @transform_5(%arg0: i32) -> (i32, i32, i32) {
    %c0_i32 = arith.constant 0 : i32
    %c0_i32_0 = arith.constant 0 : i32
    %c0_i32_1 = arith.constant 0 : i32
    return %arg0, %c0_i32, %c0_i32_0 : i32, i32, i32
  }
}

module attributes {stable_mosaic.version = 11 : i64} {
  func.func @bn_relu_conv1x1_stats_kernel(%arg0: i32, %arg1: memref<512x128xbf16, #tpu.memory_space<vmem>>, %arg2: memref<1x128xf32, #tpu.memory_space<vmem>>, %arg3: memref<1x128xf32, #tpu.memory_space<vmem>>, %arg4: memref<128x128xbf16, #tpu.memory_space<vmem>>, %arg5: memref<512x128xbf16, #tpu.memory_space<vmem>>, %arg6: memref<1x2x128xf32, #tpu.memory_space<vmem>>) attributes {dimension_semantics = [#tpu.dimension_semantics<parallel>], iteration_bounds = array<i64: 1>, scalar_prefetch = 0 : i64, scratch_operands = 0 : i64, tpu.core_type = #tpu.core_type<tc>, window_params = [{transform_indices = @transform_0, window_bounds = array<i64: 512, 128>}, {pipeline_mode = #tpu.pipeline_mode<synchronous>, transform_indices = @transform_1, window_bounds = array<i64: 1, 128>}, {pipeline_mode = #tpu.pipeline_mode<synchronous>, transform_indices = @transform_2, window_bounds = array<i64: 1, 128>}, {pipeline_mode = #tpu.pipeline_mode<synchronous>, transform_indices = @transform_3, window_bounds = array<i64: 128, 128>}, {transform_indices = @transform_4, window_bounds = array<i64: 512, 128>}, {transform_indices = @transform_5, window_bounds = array<i64: 1, 2, 128>}]} {
    %c0 = arith.constant 0 : index
    %c0_0 = arith.constant 0 : index
    %0 = vector.load %arg1[%c0, %c0_0] : memref<512x128xbf16, #tpu.memory_space<vmem>>, vector<512x128xbf16>
    %1 = arith.extf %0 : vector<512x128xbf16> to vector<512x128xf32>
    %c0_1 = arith.constant 0 : index
    %c0_2 = arith.constant 0 : index
    %2 = vector.load %arg2[%c0_1, %c0_2] : memref<1x128xf32, #tpu.memory_space<vmem>>, vector<1x128xf32>
    %3 = vector.broadcast %2 : vector<1x128xf32> to vector<512x128xf32>
    %4 = arith.mulf %1, %3 : vector<512x128xf32>
    %c0_3 = arith.constant 0 : index
    %c0_4 = arith.constant 0 : index
    %5 = vector.load %arg3[%c0_3, %c0_4] : memref<1x128xf32, #tpu.memory_space<vmem>>, vector<1x128xf32>
    %6 = vector.broadcast %5 : vector<1x128xf32> to vector<512x128xf32>
    %7 = arith.addf %4, %6 : vector<512x128xf32>
    %cst = arith.constant 0.000000e+00 : f32
    %8 = vector.broadcast %cst : f32 to vector<512x128xf32>
    %9 = arith.maximumf %7, %8 : vector<512x128xf32>
    %10 = arith.truncf %9 : vector<512x128xf32> to vector<512x128xbf16>
    %c0_5 = arith.constant 0 : index
    %c0_6 = arith.constant 0 : index
    %11 = vector.load %arg4[%c0_5, %c0_6] : memref<128x128xbf16, #tpu.memory_space<vmem>>, vector<128x128xbf16>
    %cst_7 = arith.constant dense<0.000000e+00> : vector<512x128xf32>
    %12 = tpu.matmul %10, %11, %cst_7 {dimension_numbers = #tpu.dot_dimension_numbers<[1], [0], [0], [1], [0, 0, 1, 1], [], []>} : vector<512x128xbf16>, vector<128x128xbf16>, vector<512x128xf32> -> vector<512x128xf32>
    %13 = arith.truncf %12 : vector<512x128xf32> to vector<512x128xbf16>
    %c0_8 = arith.constant 0 : index
    %c0_9 = arith.constant 0 : index
    %14 = vector.load %arg5[%c0_8, %c0_9] : memref<512x128xbf16, #tpu.memory_space<vmem>>, vector<512x128xbf16>
    tpu.vector_store %arg5[%c0_8, %c0_9], %13 {strides = array<i32>} : memref<512x128xbf16, #tpu.memory_space<vmem>>, vector<512x128xbf16>,
    %cst_10 = arith.constant dense<0.000000e+00> : vector<128xf32>
    %15 = vector.multi_reduction <add>, %12, %cst_10 [0] : vector<512x128xf32> to vector<128xf32>
    %16 = vector.shape_cast %15 : vector<128xf32> to vector<1x128xf32>
    %c0_11 = arith.constant 0 : index
    %c0_12 = arith.constant 0 : index
    %c0_13 = arith.constant 0 : index
    %17 = vector.load %arg6[%c0_11, %c0_12, %c0_13] : memref<1x2x128xf32, #tpu.memory_space<vmem>>, vector<1x1x128xf32>
    %18 = vector.shape_cast %17 : vector<1x1x128xf32> to vector<1x128xf32>
    %19 = vector.shape_cast %16 : vector<1x128xf32> to vector<1x1x128xf32>
    tpu.vector_store %arg6[%c0_11, %c0_12, %c0_13], %19 {strides = array<i32>} : memref<1x2x128xf32, #tpu.memory_space<vmem>>, vector<1x1x128xf32>,
    %20 = arith.mulf %12, %12 : vector<512x128xf32>
    %cst_14 = arith.constant dense<0.000000e+00> : vector<128xf32>
    %21 = vector.multi_reduction <add>, %20, %cst_14 [0] : vector<512x128xf32> to vector<128xf32>
    %22 = vector.shape_cast %21 : vector<128xf32> to vector<1x128xf32>
    %c0_15 = arith.constant 0 : index
    %c1 = arith.constant 1 : index
    %c0_16 = arith.constant 0 : index
    %23 = vector.load %arg6[%c0_15, %c1, %c0_16] : memref<1x2x128xf32, #tpu.memory_space<vmem>>, vector<1x1x128xf32>
    %24 = vector.shape_cast %23 : vector<1x1x128xf32> to vector<1x128xf32>
    %25 = vector.shape_cast %22 : vector<1x128xf32> to vector<1x1x128xf32>
    tpu.vector_store %arg6[%c0_15, %c1, %c0_16], %25 {strides = array<i32>} : memref<1x2x128xf32, #tpu.memory_space<vmem>>, vector<1x1x128xf32>,
    return
  }
  func.func @transform_0(%arg0: i32) -> (i32, i32) {
    %c0_i32 = arith.constant 0 : i32
    %c0_i32_0 = arith.constant 0 : i32
    return %arg0, %c0_i32 : i32, i32
  }
  func.func @transform_1(%arg0: i32) -> (i32, i32) {
    %c0_i32 = arith.constant 0 : i32
    %c0_i32_0 = arith.constant 0 : i32
    %c0_i32_1 = arith.constant 0 : i32
    return %c0_i32, %c0_i32_0 : i32, i32
  }
  func.func @transform_2(%arg0: i32) -> (i32, i32) {
    %c0_i32 = arith.constant 0 : i32
    %c0_i32_0 = arith.constant 0 : i32
    %c0_i32_1 = arith.constant 0 : i32
    return %c0_i32, %c0_i32_0 : i32, i32
  }
  func.func @transform_3(%arg0: i32) -> (i32, i32) {
    %c0_i32 = arith.constant 0 : i32
    %c0_i32_0 = arith.constant 0 : i32
    %c0_i32_1 = arith.constant 0 : i32
    return %c0_i32, %c0_i32_0 : i32, i32
  }
  func.func @transform_4(%arg0: i32) -> (i32, i32) {
    %c0_i32 = arith.constant 0 : i32
    %c0_i32_0 = arith.constant 0 : i32
    return %arg0, %c0_i32 : i32, i32
  }
  func.func @transform_5(%arg0: i32) -> (i32, i32, i32) {
    %c0_i32 = arith.constant 0 : i32
    %c0_i32_0 = arith.constant 0 : i32
    %c0_i32_1 = arith.constant 0 : i32
    return %arg0, %c0_i32, %c0_i32_0 : i32, i32, i32
  }
}

module attributes {stable_mosaic.version = 11 : i64} {
  func.func @bn_add_drs_kernel(%arg0: i32, %arg1: memref<1x256x128xbf16, #tpu.memory_space<vmem>>, %arg2: memref<1x256x128xbf16, #tpu.memory_space<vmem>>, %arg3: memref<1x128xf32, #tpu.memory_space<vmem>>, %arg4: memref<1x128xf32, #tpu.memory_space<vmem>>, %arg5: memref<128x128xbf16, #tpu.memory_space<vmem>>, %arg6: memref<1x256x128xf32, #tpu.memory_space<vmem>>) attributes {dimension_semantics = [#tpu.dimension_semantics<parallel>], iteration_bounds = array<i64: 2>, scalar_prefetch = 0 : i64, scratch_operands = 0 : i64, tpu.core_type = #tpu.core_type<tc>, window_params = [{transform_indices = @transform_0, window_bounds = array<i64: 1, 256, 128>}, {transform_indices = @transform_1, window_bounds = array<i64: 1, 256, 128>}, {pipeline_mode = #tpu.pipeline_mode<synchronous>, transform_indices = @transform_2, window_bounds = array<i64: 1, 128>}, {pipeline_mode = #tpu.pipeline_mode<synchronous>, transform_indices = @transform_3, window_bounds = array<i64: 1, 128>}, {pipeline_mode = #tpu.pipeline_mode<synchronous>, transform_indices = @transform_4, window_bounds = array<i64: 128, 128>}, {transform_indices = @transform_5, window_bounds = array<i64: 1, 256, 128>}]} {
    %c0 = arith.constant 0 : index
    %c0_0 = arith.constant 0 : index
    %c0_1 = arith.constant 0 : index
    %0 = vector.load %arg1[%c0, %c0_0, %c0_1] : memref<1x256x128xbf16, #tpu.memory_space<vmem>>, vector<1x256x128xbf16>
    %1 = vector.shape_cast %0 : vector<1x256x128xbf16> to vector<256x128xbf16>
    %2 = arith.extf %1 : vector<256x128xbf16> to vector<256x128xf32>
    %c0_2 = arith.constant 0 : index
    %c0_3 = arith.constant 0 : index
    %3 = vector.load %arg3[%c0_2, %c0_3] : memref<1x128xf32, #tpu.memory_space<vmem>>, vector<1x128xf32>
    %4 = vector.broadcast %3 : vector<1x128xf32> to vector<256x128xf32>
    %5 = arith.mulf %2, %4 : vector<256x128xf32>
    %c0_4 = arith.constant 0 : index
    %c0_5 = arith.constant 0 : index
    %6 = vector.load %arg4[%c0_4, %c0_5] : memref<1x128xf32, #tpu.memory_space<vmem>>, vector<1x128xf32>
    %7 = vector.broadcast %6 : vector<1x128xf32> to vector<256x128xf32>
    %8 = arith.addf %5, %7 : vector<256x128xf32>
    %c0_6 = arith.constant 0 : index
    %c0_7 = arith.constant 0 : index
    %c0_8 = arith.constant 0 : index
    %9 = vector.load %arg2[%c0_6, %c0_7, %c0_8] : memref<1x256x128xbf16, #tpu.memory_space<vmem>>, vector<1x256x128xbf16>
    %10 = vector.shape_cast %9 : vector<1x256x128xbf16> to vector<256x128xbf16>
    %11 = arith.extf %10 : vector<256x128xbf16> to vector<256x128xf32>
    %12 = arith.addf %8, %11 : vector<256x128xf32>
    %cst = arith.constant 0.000000e+00 : f32
    %13 = vector.broadcast %cst : f32 to vector<256x128xf32>
    %14 = arith.maximumf %12, %13 : vector<256x128xf32>
    %cst_9 = arith.constant dense<0xFF800000> : vector<128xf32>
    %15 = vector.multi_reduction <maximumf>, %14, %cst_9 [0] : vector<256x128xf32> to vector<128xf32>
    %16 = vector.shape_cast %15 : vector<128xf32> to vector<1x128xf32>
    %cst_10 = arith.constant dense<0.000000e+00> : vector<128xf32>
    %17 = vector.multi_reduction <add>, %14, %cst_10 [0] : vector<256x128xf32> to vector<128xf32>
    %18 = vector.shape_cast %17 : vector<128xf32> to vector<1x128xf32>
    %cst_11 = arith.constant 2.560000e+02 : f32
    %19 = vector.broadcast %cst_11 : f32 to vector<1x128xf32>
    %20 = arith.divf %18, %19 : vector<1x128xf32>
    %21 = arith.truncf %20 : vector<1x128xf32> to vector<1x128xbf16>
    %c0_12 = arith.constant 0 : index
    %c0_13 = arith.constant 0 : index
    %22 = vector.load %arg5[%c0_12, %c0_13] : memref<128x128xbf16, #tpu.memory_space<vmem>>, vector<128x128xbf16>
    %cst_14 = arith.constant dense<0.000000e+00> : vector<1x128xf32>
    %23 = tpu.matmul %21, %22, %cst_14 {dimension_numbers = #tpu.dot_dimension_numbers<[1], [0], [0], [1], [0, 0, 1, 1], [], []>} : vector<1x128xbf16>, vector<128x128xbf16>, vector<1x128xf32> -> vector<1x128xf32>
    %24 = arith.negf %23 : vector<1x128xf32>
    %25 = math.exp %24 : vector<1x128xf32>
    %cst_15 = arith.constant 1.000000e+00 : f32
    %26 = vector.broadcast %cst_15 : f32 to vector<1x128xf32>
    %27 = arith.addf %26, %25 : vector<1x128xf32>
    %28 = arith.divf %26, %27 : vector<1x128xf32>
    %29 = arith.mulf %16, %28 : vector<1x128xf32>
    %30 = vector.broadcast %29 : vector<1x128xf32> to vector<256x128xf32>
    %31 = arith.minimumf %14, %30 : vector<256x128xf32>
    %c0_16 = arith.constant 0 : index
    %c0_17 = arith.constant 0 : index
    %c0_18 = arith.constant 0 : index
    %32 = vector.load %arg6[%c0_16, %c0_17, %c0_18] : memref<1x256x128xf32, #tpu.memory_space<vmem>>, vector<1x256x128xf32>
    %33 = vector.shape_cast %32 : vector<1x256x128xf32> to vector<256x128xf32>
    %34 = vector.shape_cast %31 : vector<256x128xf32> to vector<1x256x128xf32>
    tpu.vector_store %arg6[%c0_16, %c0_17, %c0_18], %34 {strides = array<i32>} : memref<1x256x128xf32, #tpu.memory_space<vmem>>, vector<1x256x128xf32>,
    return
  }
  func.func @transform_0(%arg0: i32) -> (i32, i32, i32) {
    %c0_i32 = arith.constant 0 : i32
    %c0_i32_0 = arith.constant 0 : i32
    %c0_i32_1 = arith.constant 0 : i32
    return %arg0, %c0_i32, %c0_i32_0 : i32, i32, i32
  }
  func.func @transform_1(%arg0: i32) -> (i32, i32, i32) {
    %c0_i32 = arith.constant 0 : i32
    %c0_i32_0 = arith.constant 0 : i32
    %c0_i32_1 = arith.constant 0 : i32
    return %arg0, %c0_i32, %c0_i32_0 : i32, i32, i32
  }
  func.func @transform_2(%arg0: i32) -> (i32, i32) {
    %c0_i32 = arith.constant 0 : i32
    %c0_i32_0 = arith.constant 0 : i32
    %c0_i32_1 = arith.constant 0 : i32
    return %c0_i32, %c0_i32_0 : i32, i32
  }
  func.func @transform_3(%arg0: i32) -> (i32, i32) {
    %c0_i32 = arith.constant 0 : i32
    %c0_i32_0 = arith.constant 0 : i32
    %c0_i32_1 = arith.constant 0 : i32
    return %c0_i32, %c0_i32_0 : i32, i32
  }
  func.func @transform_4(%arg0: i32) -> (i32, i32) {
    %c0_i32 = arith.constant 0 : i32
    %c0_i32_0 = arith.constant 0 : i32
    %c0_i32_1 = arith.constant 0 : i32
    return %c0_i32, %c0_i32_0 : i32, i32
  }
  func.func @transform_5(%arg0: i32) -> (i32, i32, i32) {
    %c0_i32 = arith.constant 0 : i32
    %c0_i32_0 = arith.constant 0 : i32
    %c0_i32_1 = arith.constant 0 : i32
    return %arg0, %c0_i32, %c0_i32_0 : i32, i32, i32
  }
}

</mosaic_0001>

<bundles_post_ra>
// kernel: bottleneck_forward.4
= control target key start
LH: loop header
LB: loop body
LE: loop exit
PB: predicated region body
PF: predicated region fallthrough
CT: control target
= control target key end

     0   :  { %s1787_s1 = inlined_call_operand.vmem [shape: bf16[128,128], index: 1, kind: input, shape index: {}]   ;;  %s1788_s0 = inlined_call_operand.vmem [shape: bf16[512,128], index: 0, kind: input, shape index: {}]   ;;  %s1789_s2 = inlined_call_operand.vmem [shape: bf16[512,128], index: 2, kind: output, shape index: {0}]   ;;  %s1790_s3 = inlined_call_operand.vmem [shape: f32[1,2,128], index: 3, kind: output, shape index: {1}]  }
   0x1   :  { %v1041_v0 = vld [vmem:[%s1787_s1 + $0x38] sm:$0xff]  ;;  %v1040_v1 = vld [vmem:[%s1787_s1 + $0x30] sm:$0xff]  ;;  %v1039_v2 = vld [vmem:[%s1787_s1 + $0x28] sm:$0xff] }
   0x2   :  { %333 = vmatpush.bf16.msra.mxu0 %v1041_v0  ;;  %1233 = vmatpush.bf16.msra.mxu1 %v1041_v0  ;;  %v1038_v3 = vld [vmem:[%s1787_s1 + $0x20] sm:$0xff]  ;;  %v1037_v4 = vld [vmem:[%s1787_s1 + $0x18] sm:$0xff]  ;;  %v1036_v5 = vld [vmem:[%s1787_s1 + $0x10] sm:$0xff] }
   0x3   :  { %1234 = vmatpush.bf16.msra.mxu2 %v1041_v0  ;;  %1235 = vmatpush.bf16.msra.mxu3 %v1041_v0  ;;  %v1035_v6 = vld [vmem:[%s1787_s1 + $0x8] sm:$0xff]  ;;  %v1034_v7 = vld [vmem:[%s1787_s1] sm:$0xff]  ;;  %v1004_v13 = vld [vmem:[%s1788_s0 + $0x10] sm:$0xff] }
   0x4   :  { %v1002_v8 = vld [vmem:[%s1788_s0] sm:$0xff]  ;;  %v1003_v10 = vld [vmem:[%s1788_s0 + $0x8] sm:$0xff]  ;;  %v1012_v14 = vld [vmem:[%s1788_s0 + $0x50] sm:$0xff] }
   0x5   :  { %v1010_v9 = vld [vmem:[%s1788_s0 + $0x40] sm:$0xff]  ;;  %v1011_v11 = vld [vmem:[%s1788_s0 + $0x48] sm:$0xff]  ;;  %v1005_v16 = vld [vmem:[%s1788_s0 + $0x18] sm:$0xff] }
   0x6   :  { %334 = vmatpush.bf16.msra.mxu0 %v1040_v1  ;;  %1236 = vmatpush.bf16.msra.mxu1 %v1040_v1  ;;  %v1018_v12 = vld [vmem:[%s1788_s0 + $0x80] sm:$0xff]  ;;  %v1019_v15 = vld [vmem:[%s1788_s0 + $0x88] sm:$0xff]  ;;  %v1013_v17 = vld [vmem:[%s1788_s0 + $0x58] sm:$0xff] }
   0x7   :  { %1237 = vmatpush.bf16.msra.mxu2 %v1040_v1  ;;  %1238 = vmatpush.bf16.msra.mxu3 %v1040_v1  ;;  %v1020_v18 = vld [vmem:[%s1788_s0 + $0x90] sm:$0xff]  ;;  %v1026_v19 = vld [vmem:[%s1788_s0 + $0xc0] sm:$0xff]  ;;  %v1021_v22 = vld [vmem:[%s1788_s0 + $0x98] sm:$0xff] }
   0x8   :  { %v1006_v20 = vld [vmem:[%s1788_s0 + $0x20] sm:$0xff]  ;;  %v1027_v23 = vld [vmem:[%s1788_s0 + $0xc8] sm:$0xff]  ;;  %v1028_v27 = vld [vmem:[%s1788_s0 + $0xd0] sm:$0xff] }
   0x9   :  { %v1014_v21 = vld [vmem:[%s1788_s0 + $0x60] sm:$0xff]  ;;  %v1007_v24 = vld [vmem:[%s1788_s0 + $0x28] sm:$0xff]  ;;  %v1008_v28 = vld [vmem:[%s1788_s0 + $0x30] sm:$0xff] }
   0xa   :  { %335 = vmatpush.bf16.msra.mxu0 %v1039_v2  ;;  %1239 = vmatpush.bf16.msra.mxu1 %v1039_v2  ;;  %v1015_v25 = vld [vmem:[%s1788_s0 + $0x68] sm:$0xff]  ;;  %v1022_v26 = vld [vmem:[%s1788_s0 + $0xa0] sm:$0xff]  ;;  %v1016_v29 = vld [vmem:[%s1788_s0 + $0x70] sm:$0xff] }
   0xb   :  { %1240 = vmatpush.bf16.msra.mxu2 %v1039_v2  ;;  %1241 = vmatpush.bf16.msra.mxu3 %v1039_v2  ;;  %v1023_v30 = vld [vmem:[%s1788_s0 + $0xa8] sm:$0xff]  ;;  %v1029_v31 = vld [vmem:[%s1788_s0 + $0xd8] sm:$0xff]  ;;  %v1024_v34 = vld [vmem:[%s1788_s0 + $0xb0] sm:$0xff] }
   0xc   :  { %v1009_v32 = vld [vmem:[%s1788_s0 + $0x38] sm:$0xff]  ;;  %v1030_v35 = vld [vmem:[%s1788_s0 + $0xe0] sm:$0xff]  ;;  %v1031_v39 = vld [vmem:[%s1788_s0 + $0xe8] sm:$0xff] }
   0xd   :  { %v1017_v33 = vld [vmem:[%s1788_s0 + $0x78] sm:$0xff]  ;;  %v1032_v53 = vld [vmem:[%s1788_s0 + $0xf0] sm:$0xff] }
   0xe   :  { %336 = vmatpush.bf16.msra.mxu0 %v1038_v3  ;;  %1242 = vmatpush.bf16.msra.mxu1 %v1038_v3  ;;  %v1025_v38 = vld [vmem:[%s1788_s0 + $0xb8] sm:$0xff] }
   0xf   :  { %1243 = vmatpush.bf16.msra.mxu2 %v1038_v3  ;;  %1244 = vmatpush.bf16.msra.mxu3 %v1038_v3 }
  0x12   :  { %337 = vmatpush.bf16.msra.mxu0 %v1037_v4  ;;  %1245 = vmatpush.bf16.msra.mxu1 %v1037_v4 }
  0x13   :  { %1246 = vmatpush.bf16.msra.mxu2 %v1037_v4  ;;  %1247 = vmatpush.bf16.msra.mxu3 %v1037_v4 }
  0x16   :  { %338 = vmatpush.bf16.msra.mxu0 %v1036_v5  ;;  %1248 = vmatpush.bf16.msra.mxu1 %v1036_v5 }
  0x17   :  { %1249 = vmatpush.bf16.msra.mxu2 %v1036_v5  ;;  %1250 = vmatpush.bf16.msra.mxu3 %v1036_v5  ;;  %v1033_v5 = vld [vmem:[%s1788_s0 + $0xf8] sm:$0xff] }
  0x1a   :  { %339 = vmatpush.bf16.msra.mxu0 %v1035_v6  ;;  %1251 = vmatpush.bf16.msra.mxu1 %v1035_v6 }
  0x1b   :  { %1252 = vmatpush.bf16.msra.mxu2 %v1035_v6  ;;  %1253 = vmatpush.bf16.msra.mxu3 %v1035_v6 }
  0x1e   :  { %340 = vmatpush.bf16.msra.mxu0 %v1034_v7  ;;  %1254 = vmatpush.bf16.msra.mxu1 %v1034_v7 }
  0x1f   :  { %1255 = vmatpush.bf16.msra.mxu2 %v1034_v7  ;;  %1256 = vmatpush.bf16.msra.mxu3 %v1034_v7 }
  0x21   :  { %341 = vmatmul.bf16.vlgmr.msra.gmra.mxu0 %v1002_v8  ;;  %381 = vmatmul.bf16.vlgmr.msra.gmra.mxu1 %v1010_v9 }
  0x22   :  { %421 = vmatmul.bf16.vlgmr.msra.gmra.mxu2 %v1018_v12  ;;  %461 = vmatmul.bf16.vlgmr.msra.gmra.mxu3 %v1026_v19 }
  0x31   :  { %346 = vmatmul.bf16.gmra.mxu0 %v1003_v10  ;;  %386 = vmatmul.bf16.gmra.mxu1 %v1011_v11 }
  0x32   :  { %426 = vmatmul.bf16.gmra.mxu2 %v1019_v15  ;;  %466 = vmatmul.bf16.gmra.mxu3 %v1027_v23 }
  0x41   :  { %351 = vmatmul.bf16.gmra.mxu0 %v1004_v13  ;;  %391 = vmatmul.bf16.gmra.mxu1 %v1012_v14 }
  0x42   :  { %431 = vmatmul.bf16.gmra.mxu2 %v1020_v18  ;;  %471 = vmatmul.bf16.gmra.mxu3 %v1028_v27 }
  0x51   :  { %356 = vmatmul.bf16.gmra.mxu0 %v1005_v16  ;;  %396 = vmatmul.bf16.gmra.mxu1 %v1013_v17 }
  0x52   :  { %436 = vmatmul.bf16.gmra.mxu2 %v1021_v22  ;;  %476 = vmatmul.bf16.gmra.mxu3 %v1029_v31 }
  0x61   :  { %361 = vmatmul.bf16.gmra.mxu0 %v1006_v20  ;;  %401 = vmatmul.bf16.gmra.mxu1 %v1014_v21 }
  0x62   :  { %441 = vmatmul.bf16.gmra.mxu2 %v1022_v26  ;;  %481 = vmatmul.bf16.gmra.mxu3 %v1030_v35 }
  0x71   :  { %366 = vmatmul.bf16.gmra.mxu0 %v1007_v24  ;;  %406 = vmatmul.bf16.gmra.mxu1 %v1015_v25 }
  0x72   :  { %446 = vmatmul.bf16.gmra.mxu2 %v1023_v30  ;;  %486 = vmatmul.bf16.gmra.mxu3 %v1031_v39 }
  0x81   :  { %371 = vmatmul.bf16.gmra.mxu0 %v1008_v28  ;;  %411 = vmatmul.bf16.gmra.mxu1 %v1016_v29 }
  0x82   :  { %451 = vmatmul.bf16.gmra.mxu2 %v1024_v34  ;;  %491 = vmatmul.bf16.gmra.mxu3 %v1032_v53 }
  0x91   :  { %376 = vmatmul.bf16.gmra.mxu0 %v1009_v32  ;;  %416 = vmatmul.bf16.gmra.mxu1 %v1017_v33 }
  0x92   :  { %456 = vmatmul.bf16.gmra.mxu2 %v1025_v38  ;;  %496 = vmatmul.bf16.gmra.mxu3 %v1033_v5 }
  0x9e   :  { %v342_v36 = vpop.f32.mrf.mxu0  ;;  %v1385_v37 = vpop.f32.mrf.mxu1 }
  0x9f   :  { %v700_v40 = vmul.f32 %v342_v36, %v342_v36 }
  0xa5   :  { %v1412_v60 = vpop.f32.mrf.mxu2  ;;  %v1463_v20 = vpop.f32.mrf.mxu3 }
  0xa6   :  { %v344_v41 = vpop.f32.mrf.mxu0  ;;  %v1393_v42 = vpop.f32.mrf.mxu1 }
  0xa7   :  { %v1045_v43 = vpack.c.bf16 %v344_v41, %v342_v36  ;;  %v630_v44 = vadd.f32 %v344_v41, %v342_v36  ;;  %v701_v45 = vmul.f32 %v344_v41, %v344_v41  ;;  %v1085_v46 = vpack.c.bf16 %v1393_v42, %v1385_v37 }
  0xa9   :  { %1046 = vst [vmem:[%s1789_s2] sm:$0xff] %v1045_v43   ;;  %v764_v47 = vadd.f32 %v701_v45, %v700_v40 }
  0xaa   :  { %1209 = vst [vmem:[%s1789_s2 + $0x40] sm:$0xff] %v1085_v46  }
  0xad   :  { %v1424_v2 = vpop.f32.mrf.mxu2  ;;  %v1475_v24 = vpop.f32.mrf.mxu3 }
  0xae   :  { %v347_v48 = vpop.f32.mrf.mxu0  ;;  %v1403_v49 = vpop.f32.mrf.mxu1  ;;  %v1125_v3 = vpack.c.bf16 %v1424_v2, %v1412_v60  ;;  %v1165_v26 = vpack.c.bf16 %v1475_v24, %v1463_v20 }
  0xaf   :  { %v631_v50 = vadd.f32 %v630_v44, %v347_v48  ;;  %v702_v51 = vmul.f32 %v347_v48, %v347_v48 }
  0xb0   :  { %1217 = vst [vmem:[%s1789_s2 + $0x80] sm:$0xff] %v1125_v3  }
  0xb1   :  { %v765_v52 = vadd.f32 %v764_v47, %v702_v51  ;;  %1225 = vst [vmem:[%s1789_s2 + $0xc0] sm:$0xff] %v1165_v26  }
  0xb5   :  { %v1440_v10 = vpop.f32.mrf.mxu2  ;;  %v1493_v32 = vpop.f32.mrf.mxu3 }
  0xb6   :  { %v349_v54 = vpop.f32.mrf.mxu0  ;;  %v1408_v55 = vpop.f32.mrf.mxu1 }
  0xb7   :  { %v1050_v56 = vpack.c.bf16 %v349_v54, %v347_v48  ;;  %v632_v57 = vadd.f32 %v631_v50, %v349_v54  ;;  %v703_v58 = vmul.f32 %v349_v54, %v349_v54  ;;  %v1090_v59 = vpack.c.bf16 %v1408_v55, %v1403_v49 }
  0xb9   :  { %1202 = vst [vmem:[%s1789_s2 + $0x8] sm:$0xff] %v1050_v56   ;;  %v766_v61 = vadd.f32 %v765_v52, %v703_v58 }
  0xba   :  { %1210 = vst [vmem:[%s1789_s2 + $0x48] sm:$0xff] %v1090_v59  }
  0xbd   :  { %v1450_v13 = vpop.f32.mrf.mxu2  ;;  %v1505_v36 = vpop.f32.mrf.mxu3 }
  0xbe   :  { %v352_v62 = vpop.f32.mrf.mxu0  ;;  %v1420_v63 = vpop.f32.mrf.mxu1  ;;  %v1130_v14 = vpack.c.bf16 %v1450_v13, %v1440_v10  ;;  %v1170_v39 = vpack.c.bf16 %v1505_v36, %v1493_v32 }
  0xbf   :  { %v1422_v0 = vadd.f32 %v632_v57, %v352_v62  ;;  %v704_v1 = vmul.f32 %v352_v62, %v352_v62 }
  0xc0   :  { %1218 = vst [vmem:[%s1789_s2 + $0x88] sm:$0xff] %v1130_v14  }
  0xc1   :  { %v1428_v4 = vadd.f32 %v766_v61, %v704_v1  ;;  %1226 = vst [vmem:[%s1789_s2 + $0xc8] sm:$0xff] %v1170_v39  }
  0xc5   :  { %v1461_v19 = vpop.f32.mrf.mxu2  ;;  %v1523_v46 = vpop.f32.mrf.mxu3 }
  0xc6   :  { %v354_v6 = vpop.f32.mrf.mxu0  ;;  %v1436_v7 = vpop.f32.mrf.mxu1 }
  0xc7   :  { %v1055_v8 = vpack.c.bf16 %v354_v6, %v352_v62  ;;  %v1095_v9 = vpack.c.bf16 %v1436_v7, %v1420_v63  ;;  %v705_v52 = vmul.f32 %v354_v6, %v354_v6  ;;  %v634_v57 = vadd.f32 %v1422_v0, %v354_v6 }
  0xc9   :  { %1203 = vst [vmem:[%s1789_s2 + $0x10] sm:$0xff] %v1055_v8   ;;  %v768_v58 = vadd.f32 %v1428_v4, %v705_v52 }
  0xca   :  { %1211 = vst [vmem:[%s1789_s2 + $0x50] sm:$0xff] %v1095_v9  }
  0xcd   :  { %v1473_v23 = vpop.f32.mrf.mxu2  ;;  %v1535_v51 = vpop.f32.mrf.mxu3 }
  0xce   :  { %v357_v11 = vpop.f32.mrf.mxu0  ;;  %v1448_v12 = vpop.f32.mrf.mxu1  ;;  %v1135_v25 = vpack.c.bf16 %v1473_v23, %v1461_v19  ;;  %v1175_v54 = vpack.c.bf16 %v1535_v51, %v1523_v46 }
  0xcf   :  { %v706_v56 = vmul.f32 %v357_v11, %v357_v11  ;;  %v635_v61 = vadd.f32 %v634_v57, %v357_v11 }
  0xd0   :  { %1219 = vst [vmem:[%s1789_s2 + $0x90] sm:$0xff] %v1135_v25  }
  0xd1   :  { %1227 = vst [vmem:[%s1789_s2 + $0xd0] sm:$0xff] %v1175_v54   ;;  %v769_v62 = vadd.f32 %v768_v58, %v706_v56 }
  0xd5   :  { %v1491_v31 = vpop.f32.mrf.mxu2  ;;  %v1555_v0 = vpop.f32.mrf.mxu3 }
  0xd6   :  { %v359_v15 = vpop.f32.mrf.mxu0  ;;  %v1457_v16 = vpop.f32.mrf.mxu1 }
  0xd7   :  { %v1060_v17 = vpack.c.bf16 %v359_v15, %v357_v11  ;;  %v1100_v18 = vpack.c.bf16 %v1457_v16, %v1448_v12  ;;  %v707_v59 = vmul.f32 %v359_v15, %v359_v15  ;;  %v636_v8 = vadd.f32 %v635_v61, %v359_v15 }
  0xd9   :  { %1204 = vst [vmem:[%s1789_s2 + $0x18] sm:$0xff] %v1060_v17   ;;  %v770_v6 = vadd.f32 %v769_v62, %v707_v59 }
  0xda   :  { %1212 = vst [vmem:[%s1789_s2 + $0x58] sm:$0xff] %v1100_v18  }
  0xdd   :  { %v1503_v35 = vpop.f32.mrf.mxu2 }
  0xde   :  { %v362_v21 = vpop.f32.mrf.mxu0  ;;  %v1471_v22 = vpop.f32.mrf.mxu1  ;;  %v1140_v38 = vpack.c.bf16 %v1503_v35, %v1491_v31 }
  0xdf   :  { %v708_v1 = vmul.f32 %v362_v21, %v362_v21  ;;  %v637_v25 = vadd.f32 %v636_v8, %v362_v21 }
  0xe0   :  { %1220 = vst [vmem:[%s1789_s2 + $0x98] sm:$0xff] %v1140_v38  }
  0xe1   :  { %v771_v4 = vadd.f32 %v770_v6, %v708_v1 }
  0xe5   :  { %v1521_v45 = vpop.f32.mrf.mxu2 }
  0xe6   :  { %v364_v27 = vpop.f32.mrf.mxu0  ;;  %v1487_v28 = vpop.f32.mrf.mxu1 }
  0xe7   :  { %v1065_v29 = vpack.c.bf16 %v364_v27, %v362_v21  ;;  %v1105_v30 = vpack.c.bf16 %v1487_v28, %v1471_v22  ;;  %v709_v18 = vmul.f32 %v364_v27, %v364_v27  ;;  %v638_v15 = vadd.f32 %v637_v25, %v364_v27 }
  0xe9   :  { %1205 = vst [vmem:[%s1789_s2 + $0x20] sm:$0xff] %v1065_v29   ;;  %v772_v26 = vadd.f32 %v771_v4, %v709_v18 }
  0xea   :  { %1213 = vst [vmem:[%s1789_s2 + $0x60] sm:$0xff] %v1105_v30  }
  0xed   :  { %v1533_v50 = vpop.f32.mrf.mxu2 }
  0xee   :  { %v367_v33 = vpop.f32.mrf.mxu0  ;;  %v1501_v34 = vpop.f32.mrf.mxu1  ;;  %v1145_v53 = vpack.c.bf16 %v1533_v50, %v1521_v45 }
  0xef   :  { %v710_v11 = vmul.f32 %v367_v33, %v367_v33  ;;  %v639_v30 = vadd.f32 %v638_v15, %v367_v33 }
  0xf0   :  { %1221 = vst [vmem:[%s1789_s2 + $0xa0] sm:$0xff] %v1145_v53   ;;  %v1567_v53 = vpop.f32.mrf.mxu3 }
  0xf1   :  { %v773_v38 = vadd.f32 %v772_v26, %v710_v11  ;;  %v1180_v27 = vpack.c.bf16 %v1567_v53, %v1555_v0  ;;  %v717_v26 = vmul.f32 %v1393_v42, %v1393_v42 }
  0xf3   :  { %1228 = vst [vmem:[%s1789_s2 + $0xd8] sm:$0xff] %v1180_v27  }
  0xf5   :  { %v1553_v17 = vpop.f32.mrf.mxu2 }
  0xf6   :  { %v369_v40 = vpop.f32.mrf.mxu0  ;;  %v1517_v41 = vpop.f32.mrf.mxu1 }
  0xf7   :  { %v1070_v43 = vpack.c.bf16 %v369_v40, %v367_v33  ;;  %v1110_v44 = vpack.c.bf16 %v1517_v41, %v1501_v34  ;;  %v711_v29 = vmul.f32 %v369_v40, %v369_v40  ;;  %v640_v21 = vadd.f32 %v639_v30, %v369_v40 }
  0xf8   :  { %v1585_v4 = vpop.f32.mrf.mxu3 }
  0xf9   :  { %1206 = vst [vmem:[%s1789_s2 + $0x28] sm:$0xff] %v1070_v43   ;;  %v774_v54 = vadd.f32 %v773_v38, %v711_v29  ;;  %v718_v38 = vmul.f32 %v1403_v49, %v1403_v49 }
  0xfa   :  { %1214 = vst [vmem:[%s1789_s2 + $0x68] sm:$0xff] %v1110_v44  }
  0xfd   :  { %v1565_v52 = vpop.f32.mrf.mxu2 }
  0xfe   :  { %v372_v47 = vpop.f32.mrf.mxu0  ;;  %v1531_v48 = vpop.f32.mrf.mxu1  ;;  %v1150_v57 = vpack.c.bf16 %v1565_v52, %v1553_v17 }
  0xff   :  { %v712_v39 = vmul.f32 %v372_v47, %v372_v47  ;;  %v641_v58 = vadd.f32 %v640_v21, %v372_v47 }
 0x100   :  { %1222 = vst [vmem:[%s1789_s2 + $0xa8] sm:$0xff] %v1150_v57   ;;  %v1607_v57 = vpop.f32.mrf.mxu3 }
 0x101   :  { %v775_v33 = vadd.f32 %v774_v54, %v712_v39  ;;  %v1185_v27 = vpack.c.bf16 %v1607_v57, %v1585_v4 }
 0x103   :  { %1229 = vst [vmem:[%s1789_s2 + $0xe0] sm:$0xff] %v1185_v27  }
 0x105   :  { %v1583_v25 = vpop.f32.mrf.mxu2 }
 0x106   :  { %v374_v3 = vpop.f32.mrf.mxu0  ;;  %v1549_v5 = vpop.f32.mrf.mxu1 }
 0x107   :  { %v1075_v9 = vpack.c.bf16 %v374_v3, %v372_v47  ;;  %v1115_v14 = vpack.c.bf16 %v1549_v5, %v1531_v48  ;;  %v713_v56 = vmul.f32 %v374_v3, %v374_v3  ;;  %v642_v40 = vadd.f32 %v641_v58, %v374_v3 }
 0x108   :  { %v716_v3 = vmul.f32 %v1385_v37, %v1385_v37  ;;  %v729_v27 = vmul.f32 %v1549_v5, %v1549_v5 }
 0x109   :  { %1207 = vst [vmem:[%s1789_s2 + $0x30] sm:$0xff] %v1075_v9   ;;  %v776_v61 = vadd.f32 %v775_v33, %v713_v56 }
 0x10a   :  { %1215 = vst [vmem:[%s1789_s2 + $0x70] sm:$0xff] %v1115_v14  }
 0x10d   :  { %v1605_v56 = vpop.f32.mrf.mxu2 }
 0x10e   :  { %v377_v43 = vpop.f32.mrf.mxu0  ;;  %v1563_v44 = vpop.f32.mrf.mxu1 }
 0x10f   :  { %v714_v59 = vmul.f32 %v377_v43, %v377_v43  ;;  %v643_v62 = vadd.f32 %v642_v40, %v377_v43 }
 0x111   :  { %v777_v1 = vadd.f32 %v776_v61, %v714_v59  ;;  %v722_v61 = vmul.f32 %v1448_v12, %v1448_v12 }
 0x116   :  { %v379_v8 = vpop.f32.mrf.mxu0  ;;  %v1579_v9 = vpop.f32.mrf.mxu1 }
 0x117   :  { %v1080_v14 = vpack.c.bf16 %v379_v8, %v377_v43  ;;  %v644_v6 = vadd.f32 %v643_v62, %v379_v8  ;;  %v715_v47 = vmul.f32 %v379_v8, %v379_v8  ;;  %v1120_v18 = vpack.c.bf16 %v1579_v9, %v1563_v44 }
 0x119   :  { %1208 = vst [vmem:[%s1789_s2 + $0x38] sm:$0xff] %v1080_v14   ;;  %v645_v11 = vadd.f32 %v644_v6, %v1385_v37  ;;  %v778_v15 = vadd.f32 %v777_v1, %v715_v47  ;;  %v719_v37 = vmul.f32 %v1408_v55, %v1408_v55  ;;  %v723_v1 = vmul.f32 %v1457_v16, %v1457_v16  ;;  %v1631_v6 = vpop.f32.mrf.mxu2 }
 0x11a   :  { %1216 = vst [vmem:[%s1789_s2 + $0x78] sm:$0xff] %v1120_v18   ;;  %v724_v47 = vmul.f32 %v1471_v22, %v1471_v22 }
 0x11b   :  { %v646_v29 = vadd.f32 %v645_v11, %v1393_v42  ;;  %v779_v30 = vadd.f32 %v778_v15, %v716_v3  ;;  %v1155_v42 = vpack.c.bf16 %v1605_v56, %v1583_v25  ;;  %v725_v11 = vmul.f32 %v1487_v28, %v1487_v28 }
 0x11d   :  { %v647_v39 = vadd.f32 %v646_v29, %v1403_v49  ;;  %v780_v43 = vadd.f32 %v779_v30, %v717_v26  ;;  %v720_v49 = vmul.f32 %v1420_v63, %v1420_v63  ;;  %1223 = vst [vmem:[%s1789_s2 + $0xb0] sm:$0xff] %v1155_v42   ;;  %v727_v30 = vmul.f32 %v1517_v41, %v1517_v41 }
 0x11f   :  { %v648_v21 = vadd.f32 %v647_v39, %v1408_v55  ;;  %v781_v54 = vadd.f32 %v780_v43, %v718_v38  ;;  %v721_v55 = vmul.f32 %v1436_v7, %v1436_v7 }
 0x121   :  { %v649_v58 = vadd.f32 %v648_v21, %v1420_v63  ;;  %v782_v33 = vadd.f32 %v781_v54, %v719_v37 }
 0x123   :  { %v650_v59 = vadd.f32 %v649_v58, %v1436_v7  ;;  %v783_v40 = vadd.f32 %v782_v33, %v720_v49  ;;  %v1633_v7 = vpop.f32.mrf.mxu3 }
 0x125   :  { %v784_v62 = vadd.f32 %v783_v40, %v721_v55  ;;  %v651_v63 = vadd.f32 %v650_v59, %v1448_v12  ;;  %v731_v59 = vmul.f32 %v1579_v9, %v1579_v9 }
 0x127   :  { %v652_v8 = vadd.f32 %v651_v63, %v1457_v16  ;;  %v785_v14 = vadd.f32 %v784_v62, %v722_v61  ;;  %v726_v16 = vmul.f32 %v1501_v34, %v1501_v34  ;;  %v733_v63 = vmul.f32 %v1424_v2, %v1424_v2 }
 0x129   :  { %v653_v18 = vadd.f32 %v652_v8, %v1471_v22  ;;  %v786_v3 = vadd.f32 %v785_v14, %v723_v1  ;;  %v1647_v22 = vpop.f32.mrf.mxu2  ;;  %v734_v8 = vmul.f32 %v1440_v10, %v1440_v10 }
 0x12b   :  { %v654_v12 = vadd.f32 %v653_v18, %v1487_v28  ;;  %v787_v15 = vadd.f32 %v786_v3, %v724_v47  ;;  %v1649_v43 = vpop.f32.mrf.mxu3  ;;  %v1160_v28 = vpack.c.bf16 %v1647_v22, %v1631_v6  ;;  %v735_v47 = vmul.f32 %v1450_v13, %v1450_v13 }
 0x12c   :  { %v1190_v37 = vpack.c.bf16 %v1649_v43, %v1633_v7 }
 0x12d   :  { %v655_v26 = vadd.f32 %v654_v12, %v1501_v34  ;;  %v788_v29 = vadd.f32 %v787_v15, %v725_v11  ;;  %v728_v34 = vmul.f32 %v1531_v48, %v1531_v48  ;;  %1224 = vst [vmem:[%s1789_s2 + $0xb8] sm:$0xff] %v1160_v28  }
 0x12e   :  { %1230 = vst [vmem:[%s1789_s2 + $0xe8] sm:$0xff] %v1190_v37   ;;  %v740_v37 = vmul.f32 %v1521_v45, %v1521_v45 }
 0x12f   :  { %v656_v38 = vadd.f32 %v655_v26, %v1517_v41  ;;  %v789_v39 = vadd.f32 %v788_v29, %v726_v16  ;;  %v738_v26 = vmul.f32 %v1491_v31, %v1491_v31 }
 0x131   :  { %v657_v21 = vadd.f32 %v656_v38, %v1531_v48  ;;  %v790_v54 = vadd.f32 %v789_v39, %v727_v30  ;;  %v730_v48 = vmul.f32 %v1563_v44, %v1563_v44 }
 0x133   :  { %v791_v41 = vadd.f32 %v790_v54, %v728_v34  ;;  %v658_v42 = vadd.f32 %v657_v21, %v1549_v5  ;;  %v1673_v40 = vpop.f32.mrf.mxu3  ;;  %v732_v5 = vmul.f32 %v1412_v60, %v1412_v60  ;;  %v741_v34 = vmul.f32 %v1533_v50, %v1533_v50 }
 0x135   :  { %v792_v49 = vadd.f32 %v791_v41, %v729_v27  ;;  %v659_v58 = vadd.f32 %v658_v42, %v1563_v44  ;;  %v742_v41 = vmul.f32 %v1553_v17, %v1553_v17 }
 0x137   :  { %v793_v33 = vadd.f32 %v792_v49, %v730_v48  ;;  %v660_v55 = vadd.f32 %v659_v58, %v1579_v9  ;;  %v743_v49 = vmul.f32 %v1565_v52, %v1565_v52 }
 0x139   :  { %v661_v61 = vadd.f32 %v660_v55, %v1412_v60  ;;  %v794_v62 = vadd.f32 %v793_v33, %v731_v59 }
 0x13b   :  { %v662_v1 = vadd.f32 %v661_v61, %v1424_v2  ;;  %v795_v44 = vadd.f32 %v794_v62, %v732_v5  ;;  %v1687_v60 = vpop.f32.mrf.mxu3  ;;  %v736_v2 = vmul.f32 %v1461_v19, %v1461_v19  ;;  %v746_v62 = vmul.f32 %v1631_v6, %v1631_v6 }
 0x13c   :  { %v1195_v11 = vpack.c.bf16 %v1687_v60, %v1673_v40 }
 0x13d   :  { %v663_v14 = vadd.f32 %v662_v1, %v1440_v10  ;;  %v796_v9 = vadd.f32 %v795_v44, %v733_v63  ;;  %v737_v10 = vmul.f32 %v1473_v23, %v1473_v23  ;;  %v748_v44 = vmul.f32 %v1463_v20, %v1463_v20 }
 0x13e   :  { %1231 = vst [vmem:[%s1789_s2 + $0xf0] sm:$0xff] %v1195_v11  }
 0x13f   :  { %v664_v18 = vadd.f32 %v663_v14, %v1450_v13  ;;  %v797_v3 = vadd.f32 %v796_v9, %v734_v8 }
 0x141   :  { %v665_v12 = vadd.f32 %v664_v18, %v1461_v19  ;;  %v798_v15 = vadd.f32 %v797_v3, %v735_v47  ;;  %v739_v19 = vmul.f32 %v1503_v35, %v1503_v35 }
 0x143   :  { %v666_v13 = vadd.f32 %v665_v12, %v1473_v23  ;;  %v799_v16 = vadd.f32 %v798_v15, %v736_v2  ;;  %v1706_v28 = vpop.f32.mrf.mxu3 }
 0x145   :  { %v800_v29 = vadd.f32 %v799_v16, %v737_v10  ;;  %v667_v30 = vadd.f32 %v666_v13, %v1491_v31 }
 0x147   :  { %v668_v38 = vadd.f32 %v667_v30, %v1503_v35  ;;  %v801_v39 = vadd.f32 %v800_v29, %v738_v26 }
 0x149   :  { %v669_v23 = vadd.f32 %v668_v38, %v1521_v45  ;;  %v802_v21 = vadd.f32 %v801_v39, %v739_v19 }
 0x14b   :  { %v670_v54 = vadd.f32 %v669_v23, %v1533_v50  ;;  %v803_v31 = vadd.f32 %v802_v21, %v740_v37  ;;  %v499_v45 = vpop.f32.mrf.mxu3  ;;  %v744_v50 = vmul.f32 %v1583_v25, %v1583_v25 }
 0x14c   :  { %v1200_v48 = vpack.c.bf16 %v499_v45, %v1706_v28 }
 0x14d   :  { %v671_v35 = vadd.f32 %v670_v54, %v1553_v17  ;;  %v804_v42 = vadd.f32 %v803_v31, %v741_v34  ;;  %v759_v34 = vmul.f32 %v1649_v43, %v1649_v43 }
 0x14e   :  { %1232 = vst [vmem:[%s1789_s2 + $0xf8] sm:$0xff] %v1200_v48   ;;  %v763_v48 = vmul.f32 %v499_v45, %v499_v45 }
 0x14f   :  { %v672_v27 = vadd.f32 %v671_v35, %v1565_v52  ;;  %v805_v58 = vadd.f32 %v804_v42, %v742_v41  ;;  %v745_v52 = vmul.f32 %v1605_v56, %v1605_v56  ;;  %v760_v41 = vmul.f32 %v1673_v40, %v1673_v40 }
 0x150   :  { %v761_v42 = vmul.f32 %v1687_v60, %v1687_v60 }
 0x151   :  { %v806_v33 = vadd.f32 %v805_v58, %v743_v49  ;;  %v673_v55 = vadd.f32 %v672_v27, %v1583_v25  ;;  %v747_v25 = vmul.f32 %v1647_v22, %v1647_v22  ;;  %v762_v49 = vmul.f32 %v1706_v28, %v1706_v28 }
 0x153   :  { %v807_v17 = vadd.f32 %v806_v33, %v744_v50  ;;  %v674_v59 = vadd.f32 %v673_v55, %v1605_v56  ;;  %v749_v56 = vmul.f32 %v1475_v24, %v1475_v24 }
 0x155   :  { %v808_v5 = vadd.f32 %v807_v17, %v745_v52  ;;  %v675_v61 = vadd.f32 %v674_v59, %v1631_v6  ;;  %v750_v6 = vmul.f32 %v1493_v32, %v1493_v32 }
 0x157   :  { %v809_v63 = vadd.f32 %v808_v5, %v746_v62  ;;  %v676_v1 = vadd.f32 %v675_v61, %v1647_v22  ;;  %v751_v22 = vmul.f32 %v1505_v36, %v1505_v36 }
 0x159   :  { %v677_v8 = vadd.f32 %v676_v1, %v1463_v20  ;;  %v810_v14 = vadd.f32 %v809_v63, %v747_v25  ;;  %v752_v20 = vmul.f32 %v1523_v46, %v1523_v46 }
 0x15b   :  { %v678_v9 = vadd.f32 %v677_v8, %v1475_v24  ;;  %v811_v47 = vadd.f32 %v810_v14, %v748_v44  ;;  %v753_v24 = vmul.f32 %v1535_v51, %v1535_v51 }
 0x15d   :  { %v679_v18 = vadd.f32 %v678_v9, %v1493_v32  ;;  %v812_v3 = vadd.f32 %v811_v47, %v749_v56  ;;  %v754_v32 = vmul.f32 %v1555_v0, %v1555_v0 }
 0x15f   :  { %v680_v11 = vadd.f32 %v679_v18, %v1505_v36  ;;  %v813_v2 = vadd.f32 %v812_v3, %v750_v6  ;;  %v755_v36 = vmul.f32 %v1567_v53, %v1567_v53 }
 0x161   :  { %v681_v12 = vadd.f32 %v680_v11, %v1523_v46  ;;  %v814_v15 = vadd.f32 %v813_v2, %v751_v22  ;;  %v756_v46 = vmul.f32 %v1585_v4, %v1585_v4 }
 0x163   :  { %v682_v10 = vadd.f32 %v681_v12, %v1535_v51  ;;  %v815_v13 = vadd.f32 %v814_v15, %v752_v20  ;;  %v757_v51 = vmul.f32 %v1607_v57, %v1607_v57 }
 0x165   :  { %v816_v16 = vadd.f32 %v815_v13, %v753_v24  ;;  %v683_v26 = vadd.f32 %v682_v10, %v1555_v0  ;;  %v758_v0 = vmul.f32 %v1633_v7, %v1633_v7 }
 0x167   :  { %v684_v29 = vadd.f32 %v683_v26, %v1567_v53  ;;  %v817_v30 = vadd.f32 %v816_v16, %v754_v32 }
 0x169   :  { %v685_v19 = vadd.f32 %v684_v29, %v1585_v4  ;;  %v818_v38 = vadd.f32 %v817_v30, %v755_v36 }
 0x16b   :  { %v686_v39 = vadd.f32 %v685_v19, %v1607_v57  ;;  %v819_v37 = vadd.f32 %v818_v38, %v756_v46 }
 0x16d   :  { %v687_v23 = vadd.f32 %v686_v39, %v1633_v7  ;;  %v820_v21 = vadd.f32 %v819_v37, %v757_v51 }
 0x16f   :  { %v688_v53 = vadd.f32 %v687_v23, %v1649_v43  ;;  %v821_v54 = vadd.f32 %v820_v21, %v758_v0 }
 0x171   :  { %v822_v4 = vadd.f32 %v821_v54, %v759_v34  ;;  %v689_v31 = vadd.f32 %v688_v53, %v1673_v40 }
 0x173   :  { %v823_v57 = vadd.f32 %v822_v4, %v760_v41  ;;  %v690_v35 = vadd.f32 %v689_v31, %v1687_v60 }
 0x175   :  { %v824_v7 = vadd.f32 %v823_v57, %v761_v42  ;;  %v691_v27 = vadd.f32 %v690_v35, %v1706_v28 }
 0x177   :  { %v825_v43 = vadd.f32 %v824_v7, %v762_v49  ;;  %v692_v58 = vadd.f32 %v691_v27, %v499_v45 }
 0x179   :  { %v693_v33 = vrot.slane %v692_v58, 4  ;;  %v826_v55 = vadd.f32 %v825_v43, %v763_v48 }
 0x17b   :  { %v694_v50 = vadd.f32 %v693_v33, %v692_v58  ;;  %v827_v17 = vrot.slane %v826_v55, 4 }
 0x17d   :  { %v695_v40 = vrot.slane %v694_v50, 2  ;;  %v828_v59 = vadd.f32 %v827_v17, %v826_v55 }
 0x17f   :  { %v696_v52 = vadd.f32 %v695_v40, %v694_v50  ;;  %v829_v5 = vrot.slane %v828_v59, 2 }
 0x181   :  { %v697_v61 = vrot.slane %v696_v52, 1  ;;  %v830_v62 = vadd.f32 %v829_v5, %v828_v59 }
 0x183   :  { %v698_v60 = vadd.f32 %v697_v61, %v696_v52  ;;  %v831_v63 = vrot.slane %v830_v62, 1 }
 0x185   :  { %699 = vst [vmem:[%s1790_s3] sm:$0x1] %v698_v60  ;;  %v832_v28 = vadd.f32 %v831_v63, %v830_v62 }
 0x187   :  { %833 = vst [vmem:[%s1790_s3 + $0x1] sm:$0x1] %v832_v28 }

// kernel: bottleneck_forward.6
= control target key start
LH: loop header
LB: loop body
LE: loop exit
PB: predicated region body
PF: predicated region fallthrough
CT: control target
= control target key end

     0   :  { %s2046_s3 = inlined_call_operand.vmem [shape: bf16[128,128], index: 3, kind: input, shape index: {}]   ;;  %s2047_s1 = inlined_call_operand.vmem [shape: f32[1,128], index: 1, kind: input, shape index: {}]   ;;  %s2048_s2 = inlined_call_operand.vmem [shape: f32[1,128], index: 2, kind: input, shape index: {}]   ;;  %s2049_s0 = inlined_call_operand.vmem [shape: bf16[512,128], index: 0, kind: input, shape index: {}]   ;;  %s2050_s4 = inlined_call_operand.vmem [shape: bf16[512,128], index: 4, kind: output, shape index: {0}]   ;;  %s2051_s5 = inlined_call_operand.vmem [shape: f32[1,2,128], index: 5, kind: output, shape index: {1}]  }
   0x1   :  { %v991_v0 = vld [vmem:[%s2046_s3 + $0x38] sm:$0xff]  ;;  %v990_v1 = vld [vmem:[%s2046_s3 + $0x30] sm:$0xff]  ;;  %v989_v2 = vld [vmem:[%s2046_s3 + $0x28] sm:$0xff] }
   0x2   :  { %443 = vmatpush.bf16.msra.mxu0 %v991_v0  ;;  %1342 = vmatpush.bf16.msra.mxu1 %v991_v0  ;;  %v988_v3 = vld [vmem:[%s2046_s3 + $0x20] sm:$0xff]  ;;  %v987_v8 = vld [vmem:[%s2046_s3 + $0x18] sm:$0xff]  ;;  %v986_v17 = vld [vmem:[%s2046_s3 + $0x10] sm:$0xff] }
   0x3   :  { %1343 = vmatpush.bf16.msra.mxu2 %v991_v0  ;;  %1344 = vmatpush.bf16.msra.mxu3 %v991_v0  ;;  %v993_v4 = vld [vmem:[%s2049_s0] sm:$0xff]   ;;  %v985_v22 = vld [vmem:[%s2046_s3 + $0x8] sm:$0xff]  ;;  %v1281_v47 = vld [vmem:[%s2049_s0 + $0x10] sm:$0xff]  }
   0x4   :  { %v994_v5 = vunpack.c.l.bf16 %v993_v4  ;;  %v995_v6 = vunpack.c.h.bf16 %v993_v4  ;;  %v1416_v7 = vld [vmem:[%s2047_s1] ss:$0 sm:$0xff]  ;;  %v1280_v25 = vld [vmem:[%s2049_s0 + $0x8] sm:$0xff]   ;;  %v1002_v54 = vunpack.c.l.bf16 %v1281_v47  ;;  %v1003_v55 = vunpack.c.h.bf16 %v1281_v47  ;;  %v1289_v60 = vld [vmem:[%s2049_s0 + $0x50] sm:$0xff]  }
   0x5   :  { %v1287_v9 = vld [vmem:[%s2049_s0 + $0x40] sm:$0xff]   ;;  %v998_v29 = vunpack.c.l.bf16 %v1280_v25  ;;  %v999_v30 = vunpack.c.h.bf16 %v1280_v25  ;;  %v1288_v33 = vld [vmem:[%s2049_s0 + $0x48] sm:$0xff]   ;;  %v1034_v63 = vunpack.c.l.bf16 %v1289_v60  ;;  %v1035_v0 = vunpack.c.h.bf16 %v1289_v60 }
   0x6   :  { %444 = vmatpush.bf16.msra.mxu0 %v990_v1  ;;  %1345 = vmatpush.bf16.msra.mxu1 %v990_v1  ;;  %v1026_v10 = vunpack.c.l.bf16 %v1287_v9  ;;  %v1027_v11 = vunpack.c.h.bf16 %v1287_v9  ;;  %v151_v12 = vmul.f32 %v1416_v7, %v994_v5  ;;  %v152_v13 = vmul.f32 %v1416_v7, %v995_v6  ;;  %v1429_v14 = vld [vmem:[%s2048_s2] ss:$0 sm:$0xff] }
   0x7   :  { %1346 = vmatpush.bf16.msra.mxu2 %v990_v1  ;;  %1347 = vmatpush.bf16.msra.mxu3 %v990_v1  ;;  %v984_v28 = vld [vmem:[%s2046_s3] sm:$0xff]  ;;  %v1030_v34 = vunpack.c.l.bf16 %v1288_v33  ;;  %v1031_v35 = vunpack.c.h.bf16 %v1288_v33  ;;  %v153_v36 = vmul.f32 %v1416_v7, %v998_v29  ;;  %v154_v37 = vmul.f32 %v1416_v7, %v999_v30 }
   0x8   :  { %v167_v15 = vmul.f32 %v1416_v7, %v1026_v10  ;;  %v168_v16 = vmul.f32 %v1416_v7, %v1027_v11  ;;  %v219_v18 = vadd.f32 %v1429_v14, %v151_v12  ;;  %v220_v19 = vadd.f32 %v1429_v14, %v152_v13  ;;  %v1295_v46 = vld [vmem:[%s2049_s0 + $0x80] sm:$0xff]   ;;  %v1296_v13 = vld [vmem:[%s2049_s0 + $0x88] sm:$0xff]  }
   0x9   :  { %v169_v38 = vmul.f32 %v1416_v7, %v1030_v34  ;;  %v170_v39 = vmul.f32 %v1416_v7, %v1031_v35  ;;  %v221_v40 = vadd.f32 %v1429_v14, %v153_v36  ;;  %v222_v41 = vadd.f32 %v1429_v14, %v154_v37  ;;  %v1303_v47 = vld [vmem:[%s2049_s0 + $0xc0] sm:$0xff]  }
   0xa   :  { %445 = vmatpush.bf16.msra.mxu0 %v989_v2  ;;  %1348 = vmatpush.bf16.msra.mxu1 %v989_v2  ;;  %v235_v20 = vadd.f32 %v1429_v14, %v167_v15  ;;  %v236_v21 = vadd.f32 %v1429_v14, %v168_v16  ;;  %v283_v23 = vmax.f32 %v219_v18, 0.0  ;;  %v284_v24 = vmax.f32 %v220_v19, 0.0  ;;  %v1282_v15 = vld [vmem:[%s2049_s0 + $0x18] sm:$0xff]  }
   0xb   :  { %1349 = vmatpush.bf16.msra.mxu2 %v989_v2  ;;  %1350 = vmatpush.bf16.msra.mxu3 %v989_v2  ;;  %v237_v42 = vadd.f32 %v1429_v14, %v169_v38  ;;  %v238_v43 = vadd.f32 %v1429_v14, %v170_v39  ;;  %v285_v44 = vmax.f32 %v221_v40, 0.0  ;;  %v286_v45 = vmax.f32 %v222_v41, 0.0 }
   0xc   :  { %v299_v26 = vmax.f32 %v235_v20, 0.0  ;;  %v300_v27 = vmax.f32 %v236_v21, 0.0  ;;  %v347_v31 = vpack.c.bf16 %v284_v24, %v283_v23  ;;  %v1058_v50 = vunpack.c.l.bf16 %v1295_v46 }
   0xd   :  { %v301_v48 = vmax.f32 %v237_v42, 0.0  ;;  %v302_v49 = vmax.f32 %v238_v43, 0.0  ;;  %v1059_v51 = vunpack.c.h.bf16 %v1295_v46  ;;  %v348_v56 = vpack.c.bf16 %v286_v45, %v285_v44  ;;  %v1297_v46 = vld [vmem:[%s2049_s0 + $0x90] sm:$0xff]  }
   0xe   :  { %446 = vmatpush.bf16.msra.mxu0 %v988_v3  ;;  %1351 = vmatpush.bf16.msra.mxu1 %v988_v3  ;;  %v355_v32 = vpack.c.bf16 %v300_v27, %v299_v26  ;;  %v183_v52 = vmul.f32 %v1416_v7, %v1058_v50  ;;  %v155_v1 = vmul.f32 %v1416_v7, %v1002_v54  ;;  %v1062_v18 = vunpack.c.l.bf16 %v1296_v13 }
   0xf   :  { %1352 = vmatpush.bf16.msra.mxu2 %v988_v3  ;;  %1353 = vmatpush.bf16.msra.mxu3 %v988_v3  ;;  %v184_v53 = vmul.f32 %v1416_v7, %v1059_v51  ;;  %v356_v57 = vpack.c.bf16 %v302_v49, %v301_v48  ;;  %v156_v2 = vmul.f32 %v1416_v7, %v1003_v55  ;;  %v1063_v19 = vunpack.c.h.bf16 %v1296_v13  ;;  %v1283_v48 = vld [vmem:[%s2049_s0 + $0x20] sm:$0xff]  }
  0x10   :  { %v251_v58 = vadd.f32 %v1429_v14, %v183_v52  ;;  %v171_v4 = vmul.f32 %v1416_v7, %v1034_v63  ;;  %v172_v5 = vmul.f32 %v1416_v7, %v1035_v0  ;;  %v223_v6 = vadd.f32 %v1429_v14, %v155_v1  ;;  %v1291_v1 = vld [vmem:[%s2049_s0 + $0x60] sm:$0xff]  }
  0x11   :  { %v252_v59 = vadd.f32 %v1429_v14, %v184_v53  ;;  %v185_v20 = vmul.f32 %v1416_v7, %v1062_v18  ;;  %v186_v21 = vmul.f32 %v1416_v7, %v1063_v19  ;;  %v1007_v23 = vunpack.c.h.bf16 %v1282_v15 }
  0x12   :  { %447 = vmatpush.bf16.msra.mxu0 %v987_v8  ;;  %1354 = vmatpush.bf16.msra.mxu1 %v987_v8  ;;  %v315_v61 = vmax.f32 %v251_v58, 0.0  ;;  %v239_v9 = vadd.f32 %v1429_v14, %v171_v4  ;;  %v240_v10 = vadd.f32 %v1429_v14, %v172_v5  ;;  %v287_v11 = vmax.f32 %v223_v6, 0.0 }
  0x13   :  { %1355 = vmatpush.bf16.msra.mxu2 %v987_v8  ;;  %1356 = vmatpush.bf16.msra.mxu3 %v987_v8  ;;  %v316_v62 = vmax.f32 %v252_v59, 0.0  ;;  %v224_v8 = vadd.f32 %v1429_v14, %v156_v2  ;;  %v253_v26 = vadd.f32 %v1429_v14, %v185_v20  ;;  %v254_v27 = vadd.f32 %v1429_v14, %v186_v21 }
  0x14   :  { %v303_v16 = vmax.f32 %v239_v9, 0.0  ;;  %v158_v34 = vmul.f32 %v1416_v7, %v1007_v23  ;;  %v1066_v49 = vunpack.c.l.bf16 %v1297_v46  ;;  %v1067_v50 = vunpack.c.h.bf16 %v1297_v46 }
  0x15   :  { %v363_v3 = vpack.c.bf16 %v316_v62, %v315_v61  ;;  %v288_v12 = vmax.f32 %v224_v8, 0.0  ;;  %v317_v29 = vmax.f32 %v253_v26, 0.0  ;;  %v318_v30 = vmax.f32 %v254_v27, 0.0  ;;  %v1284_v26 = vld [vmem:[%s2049_s0 + $0x28] sm:$0xff]  }
  0x16   :  { %448 = vmatpush.bf16.msra.mxu0 %v986_v17  ;;  %1357 = vmatpush.bf16.msra.mxu1 %v986_v17  ;;  %v226_v39 = vadd.f32 %v1429_v14, %v158_v34  ;;  %v1090_v51 = vunpack.c.l.bf16 %v1303_v47  ;;  %v1091_v52 = vunpack.c.h.bf16 %v1303_v47  ;;  %v187_v53 = vmul.f32 %v1416_v7, %v1066_v49 }
  0x17   :  { %1358 = vmatpush.bf16.msra.mxu2 %v986_v17  ;;  %1359 = vmatpush.bf16.msra.mxu3 %v986_v17  ;;  %v304_v17 = vmax.f32 %v240_v10, 0.0  ;;  %v349_v24 = vpack.c.bf16 %v288_v12, %v287_v11  ;;  %v364_v35 = vpack.c.bf16 %v318_v30, %v317_v29  ;;  %v188_v54 = vmul.f32 %v1416_v7, %v1067_v50 }
  0x18   :  { %v290_v43 = vmax.f32 %v226_v39, 0.0  ;;  %v199_v55 = vmul.f32 %v1416_v7, %v1090_v51  ;;  %v1010_v58 = vunpack.c.l.bf16 %v1283_v48  ;;  %v1011_v59 = vunpack.c.h.bf16 %v1283_v48 }
  0x19   :  { %v357_v25 = vpack.c.bf16 %v304_v17, %v303_v16  ;;  %v255_v61 = vadd.f32 %v1429_v14, %v187_v53  ;;  %v256_v62 = vadd.f32 %v1429_v14, %v188_v54  ;;  %v1042_v9 = vunpack.c.l.bf16 %v1291_v1 }
  0x1a   :  { %449 = vmatpush.bf16.msra.mxu0 %v985_v22  ;;  %1360 = vmatpush.bf16.msra.mxu1 %v985_v22  ;;  %v267_v63 = vadd.f32 %v1429_v14, %v199_v55  ;;  %v159_v6 = vmul.f32 %v1416_v7, %v1010_v58  ;;  %v160_v8 = vmul.f32 %v1416_v7, %v1011_v59  ;;  %v1043_v10 = vunpack.c.h.bf16 %v1291_v1  ;;  %v1305_v1 = vld [vmem:[%s2049_s0 + $0xd0] sm:$0xff]  }
  0x1b   :  { %1361 = vmatpush.bf16.msra.mxu2 %v985_v22  ;;  %1362 = vmatpush.bf16.msra.mxu3 %v985_v22  ;;  %v1006_v22 = vunpack.c.l.bf16 %v1282_v15  ;;  %v319_v2 = vmax.f32 %v255_v61, 0.0  ;;  %v175_v13 = vmul.f32 %v1416_v7, %v1042_v9 }
  0x1c   :  { %v331_v4 = vmax.f32 %v267_v63, 0.0  ;;  %v176_v15 = vmul.f32 %v1416_v7, %v1043_v10  ;;  %v227_v16 = vadd.f32 %v1429_v14, %v159_v6  ;;  %v228_v17 = vadd.f32 %v1429_v14, %v160_v8 }
  0x1d   :  { %v157_v33 = vmul.f32 %v1416_v7, %v1006_v22  ;;  %v243_v18 = vadd.f32 %v1429_v14, %v175_v13  ;;  %v1099_v6 = vunpack.c.h.bf16 %v1305_v1 }
  0x1e   :  { %450 = vmatpush.bf16.msra.mxu0 %v984_v28  ;;  %1363 = vmatpush.bf16.msra.mxu1 %v984_v28  ;;  %v244_v19 = vadd.f32 %v1429_v14, %v176_v15  ;;  %v291_v20 = vmax.f32 %v227_v16, 0.0  ;;  %v292_v21 = vmax.f32 %v228_v17, 0.0 }
  0x1f   :  { %1364 = vmatpush.bf16.msra.mxu2 %v984_v28  ;;  %1365 = vmatpush.bf16.msra.mxu3 %v984_v28  ;;  %v1290_v28 = vld [vmem:[%s2049_s0 + $0x58] sm:$0xff]   ;;  %v225_v38 = vadd.f32 %v1429_v14, %v157_v33  ;;  %v307_v22 = vmax.f32 %v243_v18, 0.0 }
  0x20   :  { %v308_v23 = vmax.f32 %v244_v19, 0.0 }
  0x21   :  { %451 = vmatmul.bf16.vlgmr.msra.gmra.mxu0 %v347_v31  ;;  %491 = vmatmul.bf16.vlgmr.msra.gmra.mxu1 %v355_v32  ;;  %v1038_v31 = vunpack.c.l.bf16 %v1290_v28  ;;  %v1039_v32 = vunpack.c.h.bf16 %v1290_v28  ;;  %v289_v42 = vmax.f32 %v225_v38, 0.0 }
  0x22   :  { %531 = vmatmul.bf16.vlgmr.msra.gmra.mxu2 %v363_v3  ;;  %v320_v3 = vmax.f32 %v256_v62, 0.0  ;;  %v359_v38 = vpack.c.bf16 %v308_v23, %v307_v22 }
  0x23   :  { %v173_v36 = vmul.f32 %v1416_v7, %v1038_v31  ;;  %v174_v37 = vmul.f32 %v1416_v7, %v1039_v32 }
  0x24   :  { %v365_v11 = vpack.c.bf16 %v320_v3, %v319_v2  ;;  %v1285_v2 = vld [vmem:[%s2049_s0 + $0x30] sm:$0xff]  }
  0x25   :  { %v241_v40 = vadd.f32 %v1429_v14, %v173_v36  ;;  %v242_v41 = vadd.f32 %v1429_v14, %v174_v37  ;;  %v1014_v36 = vunpack.c.l.bf16 %v1284_v26  ;;  %v1015_v37 = vunpack.c.h.bf16 %v1284_v26 }
  0x26   :  { %v1018_v13 = vunpack.c.l.bf16 %v1285_v2  ;;  %v1019_v15 = vunpack.c.h.bf16 %v1285_v2 }
  0x27   :  { %v305_v44 = vmax.f32 %v241_v40, 0.0  ;;  %v306_v45 = vmax.f32 %v242_v41, 0.0  ;;  %v161_v48 = vmul.f32 %v1416_v7, %v1014_v36  ;;  %v162_v49 = vmul.f32 %v1416_v7, %v1015_v37 }
  0x28   :  { %v163_v26 = vmul.f32 %v1416_v7, %v1018_v13 }
  0x29   :  { %v358_v60 = vpack.c.bf16 %v306_v45, %v305_v44 }
  0x31   :  { %456 = vmatmul.bf16.gmra.mxu0 %v348_v56  ;;  %496 = vmatmul.bf16.gmra.mxu1 %v356_v57  ;;  %v200_v56 = vmul.f32 %v1416_v7, %v1091_v52  ;;  %v350_v57 = vpack.c.bf16 %v290_v43, %v289_v42  ;;  %v1292_v43 = vld [vmem:[%s2049_s0 + $0x68] sm:$0xff]  }
  0x32   :  { %536 = vmatmul.bf16.gmra.mxu2 %v364_v35  ;;  %v351_v35 = vpack.c.bf16 %v292_v21, %v291_v20  ;;  %v1046_v50 = vunpack.c.l.bf16 %v1292_v43  ;;  %v1047_v51 = vunpack.c.h.bf16 %v1292_v43  ;;  %v1293_v21 = vld [vmem:[%s2049_s0 + $0x70] sm:$0xff]   ;;  %v1306_v43 = vld [vmem:[%s2049_s0 + $0xd8] sm:$0xff]  }
  0x33   :  { %v268_v0 = vadd.f32 %v1429_v14, %v200_v56  ;;  %v229_v56 = vadd.f32 %v1429_v14, %v161_v48  ;;  %v1103_v48 = vunpack.c.h.bf16 %v1306_v43 }
  0x34   :  { %v177_v54 = vmul.f32 %v1416_v7, %v1046_v50  ;;  %v178_v55 = vmul.f32 %v1416_v7, %v1047_v51 }
  0x35   :  { %v332_v5 = vmax.f32 %v268_v0, 0.0  ;;  %v1299_v0 = vld [vmem:[%s2049_s0 + $0xa0] sm:$0xff]  }
  0x36   :  { %v245_v58 = vadd.f32 %v1429_v14, %v177_v54  ;;  %v246_v59 = vadd.f32 %v1429_v14, %v178_v55  ;;  %v1074_v3 = vunpack.c.l.bf16 %v1299_v0 }
  0x37   :  { %v371_v12 = vpack.c.bf16 %v332_v5, %v331_v4  ;;  %v1075_v4 = vunpack.c.h.bf16 %v1299_v0  ;;  %v1098_v5 = vunpack.c.l.bf16 %v1305_v1 }
  0x38   :  { %v309_v62 = vmax.f32 %v245_v58, 0.0  ;;  %v310_v63 = vmax.f32 %v246_v59, 0.0  ;;  %v191_v8 = vmul.f32 %v1416_v7, %v1074_v3 }
  0x39   :  { %571 = vmatmul.bf16.vlgmr.msra.gmra.mxu3 %v371_v12  ;;  %v192_v9 = vmul.f32 %v1416_v7, %v1075_v4  ;;  %v203_v10 = vmul.f32 %v1416_v7, %v1098_v5 }
  0x3a   :  { %v360_v16 = vpack.c.bf16 %v310_v63, %v309_v62  ;;  %v259_v17 = vadd.f32 %v1429_v14, %v191_v8 }
  0x3b   :  { %v260_v18 = vadd.f32 %v1429_v14, %v192_v9  ;;  %v271_v19 = vadd.f32 %v1429_v14, %v203_v10 }
  0x3c   :  { %v323_v22 = vmax.f32 %v259_v17, 0.0 }
  0x3d   :  { %v324_v23 = vmax.f32 %v260_v18, 0.0 }
  0x41   :  { %461 = vmatmul.bf16.gmra.mxu0 %v349_v24  ;;  %501 = vmatmul.bf16.gmra.mxu1 %v357_v25  ;;  %v1298_v24 = vld [vmem:[%s2049_s0 + $0x98] sm:$0xff]   ;;  %v1304_v25 = vld [vmem:[%s2049_s0 + $0xc8] sm:$0xff]  }
  0x42   :  { %541 = vmatmul.bf16.gmra.mxu2 %v365_v11  ;;  %v1070_v27 = vunpack.c.l.bf16 %v1298_v24  ;;  %v1071_v28 = vunpack.c.h.bf16 %v1298_v24  ;;  %v1094_v29 = vunpack.c.l.bf16 %v1304_v25  ;;  %v1095_v30 = vunpack.c.h.bf16 %v1304_v25 }
  0x43   :  { %v204_v11 = vmul.f32 %v1416_v7, %v1099_v6  ;;  %v335_v24 = vmax.f32 %v271_v19, 0.0 }
  0x44   :  { %v189_v31 = vmul.f32 %v1416_v7, %v1070_v27  ;;  %v190_v32 = vmul.f32 %v1416_v7, %v1071_v28  ;;  %v201_v33 = vmul.f32 %v1416_v7, %v1094_v29  ;;  %v202_v34 = vmul.f32 %v1416_v7, %v1095_v30 }
  0x45   :  { %v272_v20 = vadd.f32 %v1429_v14, %v204_v11  ;;  %v164_v27 = vmul.f32 %v1416_v7, %v1019_v15  ;;  %v1050_v28 = vunpack.c.l.bf16 %v1293_v21  ;;  %v1051_v29 = vunpack.c.h.bf16 %v1293_v21  ;;  %v1307_v21 = vld [vmem:[%s2049_s0 + $0xe0] sm:$0xff]  }
  0x46   :  { %v257_v39 = vadd.f32 %v1429_v14, %v189_v31  ;;  %v258_v40 = vadd.f32 %v1429_v14, %v190_v32  ;;  %v269_v41 = vadd.f32 %v1429_v14, %v201_v33  ;;  %v270_v42 = vadd.f32 %v1429_v14, %v202_v34 }
  0x47   :  { %v336_v25 = vmax.f32 %v272_v20, 0.0  ;;  %v367_v30 = vpack.c.bf16 %v324_v23, %v323_v22  ;;  %v179_v32 = vmul.f32 %v1416_v7, %v1050_v28  ;;  %v180_v33 = vmul.f32 %v1416_v7, %v1051_v29  ;;  %v1301_v20 = vld [vmem:[%s2049_s0 + $0xb0] sm:$0xff]  }
  0x48   :  { %v321_v44 = vmax.f32 %v257_v39, 0.0  ;;  %v322_v45 = vmax.f32 %v258_v40, 0.0  ;;  %v333_v46 = vmax.f32 %v269_v41, 0.0  ;;  %v334_v47 = vmax.f32 %v270_v42, 0.0  ;;  %v1300_v42 = vld [vmem:[%s2049_s0 + $0xa8] sm:$0xff]  }
  0x49   :  { %v373_v31 = vpack.c.bf16 %v336_v25, %v335_v24  ;;  %v231_v34 = vadd.f32 %v1429_v14, %v163_v26  ;;  %v247_v36 = vadd.f32 %v1429_v14, %v179_v32  ;;  %v248_v37 = vadd.f32 %v1429_v14, %v180_v33 }
  0x4a   :  { %v366_v52 = vpack.c.bf16 %v322_v45, %v321_v44  ;;  %v372_v53 = vpack.c.bf16 %v334_v47, %v333_v46  ;;  %v1286_v44 = vld [vmem:[%s2049_s0 + $0x38] sm:$0xff]   ;;  %v1078_v45 = vunpack.c.l.bf16 %v1300_v42  ;;  %v1079_v46 = vunpack.c.h.bf16 %v1300_v42 }
  0x4b   :  { %v311_v40 = vmax.f32 %v247_v36, 0.0  ;;  %v312_v41 = vmax.f32 %v248_v37, 0.0  ;;  %v1102_v47 = vunpack.c.l.bf16 %v1306_v43  ;;  %v1022_v54 = vunpack.c.l.bf16 %v1286_v44  ;;  %v1302_v42 = vld [vmem:[%s2049_s0 + $0xb8] sm:$0xff]   ;;  %v1308_v43 = vld [vmem:[%s2049_s0 + $0xe8] sm:$0xff]  }
  0x4c   :  { %576 = vmatmul.bf16.gmra.mxu3 %v372_v53  ;;  %v194_v50 = vmul.f32 %v1416_v7, %v1079_v46  ;;  %v1023_v55 = vunpack.c.h.bf16 %v1286_v44  ;;  %v1082_v22 = vunpack.c.l.bf16 %v1301_v20  ;;  %v1083_v23 = vunpack.c.h.bf16 %v1301_v20 }
  0x4d   :  { %v205_v51 = vmul.f32 %v1416_v7, %v1102_v47  ;;  %v165_v2 = vmul.f32 %v1416_v7, %v1022_v54  ;;  %v1106_v24 = vunpack.c.l.bf16 %v1307_v21  ;;  %v1107_v25 = vunpack.c.h.bf16 %v1307_v21 }
  0x4e   :  { %v262_v58 = vadd.f32 %v1429_v14, %v194_v50  ;;  %v166_v3 = vmul.f32 %v1416_v7, %v1023_v55  ;;  %v195_v26 = vmul.f32 %v1416_v7, %v1082_v22  ;;  %v1086_v44 = vunpack.c.l.bf16 %v1302_v42 }
  0x4f   :  { %v273_v59 = vadd.f32 %v1429_v14, %v205_v51  ;;  %v233_v11 = vadd.f32 %v1429_v14, %v165_v2  ;;  %v207_v28 = vmul.f32 %v1416_v7, %v1106_v24  ;;  %v208_v29 = vmul.f32 %v1416_v7, %v1107_v25 }
  0x50   :  { %v326_v63 = vmax.f32 %v262_v58, 0.0  ;;  %v263_v32 = vadd.f32 %v1429_v14, %v195_v26  ;;  %v1110_v46 = vunpack.c.l.bf16 %v1308_v43  ;;  %v1111_v47 = vunpack.c.h.bf16 %v1308_v43 }
  0x51   :  { %466 = vmatmul.bf16.gmra.mxu0 %v350_v57  ;;  %506 = vmatmul.bf16.gmra.mxu1 %v358_v60  ;;  %v230_v57 = vadd.f32 %v1429_v14, %v162_v49  ;;  %v293_v60 = vmax.f32 %v229_v56, 0.0  ;;  %v193_v49 = vmul.f32 %v1416_v7, %v1078_v45  ;;  %v361_v56 = vpack.c.bf16 %v312_v41, %v311_v40 }
  0x52   :  { %546 = vmatmul.bf16.gmra.mxu2 %v366_v52  ;;  %v206_v52 = vmul.f32 %v1416_v7, %v1103_v48  ;;  %v337_v0 = vmax.f32 %v273_v59, 0.0  ;;  %v327_v36 = vmax.f32 %v263_v32, 0.0  ;;  %v1087_v45 = vunpack.c.h.bf16 %v1302_v42  ;;  %v1310_v32 = vld [vmem:[%s2049_s0 + $0xf8] sm:$0xff]  }
  0x53   :  { %v294_v61 = vmax.f32 %v230_v57, 0.0  ;;  %v261_v57 = vadd.f32 %v1429_v14, %v193_v49  ;;  %v197_v48 = vmul.f32 %v1416_v7, %v1086_v44  ;;  %v209_v50 = vmul.f32 %v1416_v7, %v1110_v46 }
  0x54   :  { %v198_v49 = vmul.f32 %v1416_v7, %v1087_v45  ;;  %v210_v51 = vmul.f32 %v1416_v7, %v1111_v47 }
  0x55   :  { %v352_v12 = vpack.c.bf16 %v294_v61, %v293_v60  ;;  %v274_v60 = vadd.f32 %v1429_v14, %v206_v52  ;;  %v1294_v61 = vld [vmem:[%s2049_s0 + $0x78] sm:$0xff]   ;;  %v325_v62 = vmax.f32 %v261_v57, 0.0  ;;  %v265_v52 = vadd.f32 %v1429_v14, %v197_v48 }
  0x56   :  { %v1054_v4 = vunpack.c.l.bf16 %v1294_v61  ;;  %v1055_v5 = vunpack.c.h.bf16 %v1294_v61  ;;  %v277_v54 = vadd.f32 %v1429_v14, %v209_v50  ;;  %v278_v55 = vadd.f32 %v1429_v14, %v210_v51 }
  0x57   :  { %v338_v1 = vmax.f32 %v274_v60, 0.0  ;;  %v368_v6 = vpack.c.bf16 %v326_v63, %v325_v62  ;;  %v329_v58 = vmax.f32 %v265_v52, 0.0 }
  0x58   :  { %v181_v9 = vmul.f32 %v1416_v7, %v1054_v4  ;;  %v182_v10 = vmul.f32 %v1416_v7, %v1055_v5  ;;  %v341_v60 = vmax.f32 %v277_v54, 0.0  ;;  %v342_v61 = vmax.f32 %v278_v55, 0.0 }
  0x59   :  { %v374_v8 = vpack.c.bf16 %v338_v1, %v337_v0 }
  0x5a   :  { %v249_v13 = vadd.f32 %v1429_v14, %v181_v9  ;;  %v250_v15 = vadd.f32 %v1429_v14, %v182_v10  ;;  %v376_v63 = vpack.c.bf16 %v342_v61, %v341_v60 }
  0x5c   :  { %581 = vmatmul.bf16.gmra.mxu3 %v373_v31  ;;  %v313_v18 = vmax.f32 %v249_v13, 0.0  ;;  %v314_v19 = vmax.f32 %v250_v15, 0.0 }
  0x5e   :  { %v362_v31 = vpack.c.bf16 %v314_v19, %v313_v18 }
  0x61   :  { %471 = vmatmul.bf16.gmra.mxu0 %v351_v35  ;;  %511 = vmatmul.bf16.gmra.mxu1 %v359_v38  ;;  %v232_v35 = vadd.f32 %v1429_v14, %v164_v27  ;;  %v295_v38 = vmax.f32 %v231_v34, 0.0  ;;  %v196_v27 = vmul.f32 %v1416_v7, %v1083_v23  ;;  %v275_v34 = vadd.f32 %v1429_v14, %v207_v28 }
  0x62   :  { %551 = vmatmul.bf16.gmra.mxu2 %v367_v30 }
  0x63   :  { %v296_v39 = vmax.f32 %v232_v35, 0.0  ;;  %v264_v33 = vadd.f32 %v1429_v14, %v196_v27  ;;  %v276_v35 = vadd.f32 %v1429_v14, %v208_v29 }
  0x65   :  { %v353_v53 = vpack.c.bf16 %v296_v39, %v295_v38  ;;  %v328_v37 = vmax.f32 %v264_v33, 0.0  ;;  %v339_v38 = vmax.f32 %v275_v34, 0.0  ;;  %v340_v39 = vmax.f32 %v276_v35, 0.0 }
  0x66   :  { %v1118_v34 = vunpack.c.l.bf16 %v1310_v32  ;;  %v1119_v35 = vunpack.c.h.bf16 %v1310_v32 }
  0x67   :  { %v369_v40 = vpack.c.bf16 %v328_v37, %v327_v36  ;;  %v375_v41 = vpack.c.bf16 %v340_v39, %v339_v38 }
  0x68   :  { %v213_v36 = vmul.f32 %v1416_v7, %v1118_v34  ;;  %v214_v37 = vmul.f32 %v1416_v7, %v1119_v35 }
  0x6a   :  { %v281_v38 = vadd.f32 %v1429_v14, %v213_v36  ;;  %v282_v39 = vadd.f32 %v1429_v14, %v214_v37 }
  0x6c   :  { %586 = vmatmul.bf16.gmra.mxu3 %v374_v8  ;;  %v1309_v8 = vld [vmem:[%s2049_s0 + $0xf0] sm:$0xff]   ;;  %v345_v45 = vmax.f32 %v281_v38, 0.0  ;;  %v346_v47 = vmax.f32 %v282_v39, 0.0 }
  0x6d   :  { %v1114_v10 = vunpack.c.l.bf16 %v1309_v8 }
  0x71   :  { %476 = vmatmul.bf16.gmra.mxu0 %v352_v12  ;;  %516 = vmatmul.bf16.gmra.mxu1 %v360_v16  ;;  %v234_v12 = vadd.f32 %v1429_v14, %v166_v3  ;;  %v297_v16 = vmax.f32 %v233_v11, 0.0  ;;  %v1115_v11 = vunpack.c.h.bf16 %v1309_v8 }
  0x72   :  { %556 = vmatmul.bf16.gmra.mxu2 %v368_v6 }
  0x73   :  { %v298_v17 = vmax.f32 %v234_v12, 0.0  ;;  %v211_v12 = vmul.f32 %v1416_v7, %v1114_v10  ;;  %v212_v13 = vmul.f32 %v1416_v7, %v1115_v11  ;;  %v378_v7 = vpack.c.bf16 %v346_v47, %v345_v45 }
  0x75   :  { %v354_v30 = vpack.c.bf16 %v298_v17, %v297_v16  ;;  %v279_v15 = vadd.f32 %v1429_v14, %v211_v12  ;;  %v280_v16 = vadd.f32 %v1429_v14, %v212_v13 }
  0x77   :  { %v343_v21 = vmax.f32 %v279_v15, 0.0  ;;  %v344_v22 = vmax.f32 %v280_v16, 0.0 }
  0x79   :  { %v377_v24 = vpack.c.bf16 %v344_v22, %v343_v21 }
  0x7c   :  { %591 = vmatmul.bf16.gmra.mxu3 %v375_v41 }
  0x81   :  { %481 = vmatmul.bf16.gmra.mxu0 %v353_v53  ;;  %521 = vmatmul.bf16.gmra.mxu1 %v361_v56  ;;  %v266_v53 = vadd.f32 %v1429_v14, %v198_v49 }
  0x82   :  { %561 = vmatmul.bf16.gmra.mxu2 %v369_v40 }
  0x83   :  { %v330_v59 = vmax.f32 %v266_v53, 0.0 }
  0x85   :  { %v370_v62 = vpack.c.bf16 %v330_v59, %v329_v58 }
  0x8c   :  { %596 = vmatmul.bf16.gmra.mxu3 %v376_v63 }
  0x91   :  { %486 = vmatmul.bf16.gmra.mxu0 %v354_v30  ;;  %526 = vmatmul.bf16.gmra.mxu1 %v362_v31 }
  0x92   :  { %566 = vmatmul.bf16.gmra.mxu2 %v370_v62 }
  0x9c   :  { %601 = vmatmul.bf16.gmra.mxu3 %v377_v24 }
  0x9e   :  { %v452_v56 = vpop.f32.mrf.mxu0  ;;  %v1642_v57 = vpop.f32.mrf.mxu1 }
  0x9f   :  { %v810_v0 = vmul.f32 %v452_v56, %v452_v56 }
  0xa5   :  { %v1667_v31 = vpop.f32.mrf.mxu2 }
  0xa6   :  { %v454_v1 = vpop.f32.mrf.mxu0  ;;  %v1644_v2 = vpop.f32.mrf.mxu1 }
  0xa7   :  { %v1123_v3 = vpack.c.bf16 %v454_v1, %v452_v56  ;;  %v740_v4 = vadd.f32 %v454_v1, %v452_v56  ;;  %v811_v5 = vmul.f32 %v454_v1, %v454_v1  ;;  %v1163_v6 = vpack.c.bf16 %v1644_v2, %v1642_v57 }
  0xa9   :  { %1124 = vst [vmem:[%s2050_s4] sm:$0xff] %v1123_v3   ;;  %v874_v9 = vadd.f32 %v811_v5, %v810_v0 }
  0xaa   :  { %1318 = vst [vmem:[%s2050_s4 + $0x40] sm:$0xff] %v1163_v6  }
  0xac   :  { %606 = vmatmul.bf16.gmra.mxu3 %v378_v7 }
  0xad   :  { %v1686_v44 = vpop.f32.mrf.mxu2 }
  0xae   :  { %v457_v17 = vpop.f32.mrf.mxu0  ;;  %v1661_v18 = vpop.f32.mrf.mxu1  ;;  %v1203_v46 = vpack.c.bf16 %v1686_v44, %v1667_v31 }
  0xaf   :  { %v741_v19 = vadd.f32 %v740_v4, %v457_v17  ;;  %v812_v20 = vmul.f32 %v457_v17, %v457_v17 }
  0xb0   :  { %1326 = vst [vmem:[%s2050_s4 + $0x80] sm:$0xff] %v1203_v46  }
  0xb1   :  { %v875_v23 = vadd.f32 %v874_v9, %v812_v20 }
  0xb5   :  { %v1699_v52 = vpop.f32.mrf.mxu2 }
  0xb6   :  { %v459_v25 = vpop.f32.mrf.mxu0  ;;  %v1663_v26 = vpop.f32.mrf.mxu1 }
  0xb7   :  { %v1128_v27 = vpack.c.bf16 %v459_v25, %v457_v17  ;;  %v742_v28 = vadd.f32 %v741_v19, %v459_v25  ;;  %v813_v29 = vmul.f32 %v459_v25, %v459_v25  ;;  %v1168_v30 = vpack.c.bf16 %v1663_v26, %v1661_v18 }
  0xb9   :  { %1311 = vst [vmem:[%s2050_s4 + $0x8] sm:$0xff] %v1128_v27   ;;  %v876_v33 = vadd.f32 %v875_v23, %v813_v29 }
  0xba   :  { %1319 = vst [vmem:[%s2050_s4 + $0x48] sm:$0xff] %v1168_v30  }
  0xbc   :  { %v1722_v63 = vpop.f32.mrf.mxu3 }
  0xbd   :  { %v1709_v55 = vpop.f32.mrf.mxu2 }
  0xbe   :  { %v462_v40 = vpop.f32.mrf.mxu0  ;;  %v1682_v41 = vpop.f32.mrf.mxu1  ;;  %v1208_v56 = vpack.c.bf16 %v1709_v55, %v1699_v52 }
  0xbf   :  { %v1684_v42 = vadd.f32 %v742_v28, %v462_v40  ;;  %v814_v43 = vmul.f32 %v462_v40, %v462_v40 }
  0xc0   :  { %1327 = vst [vmem:[%s2050_s4 + $0x88] sm:$0xff] %v1208_v56  }
  0xc1   :  { %v1690_v48 = vadd.f32 %v876_v33, %v814_v43 }
  0xc4   :  { %v1734_v4 = vpop.f32.mrf.mxu3 }
  0xc5   :  { %v1720_v62 = vpop.f32.mrf.mxu2  ;;  %v1243_v6 = vpack.c.bf16 %v1734_v4, %v1722_v63 }
  0xc6   :  { %v464_v14 = vpop.f32.mrf.mxu0  ;;  %v1695_v49 = vpop.f32.mrf.mxu1 }
  0xc7   :  { %v1133_v50 = vpack.c.bf16 %v464_v14, %v462_v40  ;;  %v1173_v51 = vpack.c.bf16 %v1695_v49, %v1682_v41  ;;  %1334 = vst [vmem:[%s2050_s4 + $0xc0] sm:$0xff] %v1243_v6   ;;  %v815_v34 = vmul.f32 %v464_v14, %v464_v14  ;;  %v744_v38 = vadd.f32 %v1684_v42, %v464_v14 }
  0xc9   :  { %1312 = vst [vmem:[%s2050_s4 + $0x10] sm:$0xff] %v1133_v50   ;;  %v878_v39 = vadd.f32 %v1690_v48, %v815_v34 }
  0xca   :  { %1320 = vst [vmem:[%s2050_s4 + $0x50] sm:$0xff] %v1173_v51  }
  0xcd   :  { %v1732_v3 = vpop.f32.mrf.mxu2 }
  0xce   :  { %v467_v53 = vpop.f32.mrf.mxu0  ;;  %v1707_v54 = vpop.f32.mrf.mxu1  ;;  %v1213_v5 = vpack.c.bf16 %v1732_v3, %v1720_v62 }
  0xcf   :  { %v1752_v13 = vpop.f32.mrf.mxu3  ;;  %v816_v37 = vmul.f32 %v467_v53, %v467_v53  ;;  %v745_v43 = vadd.f32 %v744_v38, %v467_v53 }
  0xd0   :  { %1328 = vst [vmem:[%s2050_s4 + $0x90] sm:$0xff] %v1213_v5  }
  0xd1   :  { %v879_v45 = vadd.f32 %v878_v39, %v816_v37 }
  0xd5   :  { %v1750_v12 = vpop.f32.mrf.mxu2 }
  0xd6   :  { %v469_v58 = vpop.f32.mrf.mxu0  ;;  %v1716_v59 = vpop.f32.mrf.mxu1 }
  0xd7   :  { %v1138_v60 = vpack.c.bf16 %v469_v58, %v467_v53  ;;  %v1178_v61 = vpack.c.bf16 %v1716_v59, %v1707_v54  ;;  %v1764_v19 = vpop.f32.mrf.mxu3  ;;  %v817_v40 = vmul.f32 %v469_v58, %v469_v58  ;;  %v746_v50 = vadd.f32 %v745_v43, %v469_v58 }
  0xd8   :  { %v1248_v21 = vpack.c.bf16 %v1764_v19, %v1752_v13 }
  0xd9   :  { %1313 = vst [vmem:[%s2050_s4 + $0x18] sm:$0xff] %v1138_v60   ;;  %v880_v14 = vadd.f32 %v879_v45, %v817_v40 }
  0xda   :  { %1321 = vst [vmem:[%s2050_s4 + $0x58] sm:$0xff] %v1178_v61  }
  0xdb   :  { %1335 = vst [vmem:[%s2050_s4 + $0xc8] sm:$0xff] %v1248_v21  }
  0xdd   :  { %v1762_v17 = vpop.f32.mrf.mxu2 }
  0xde   :  { %v472_v0 = vpop.f32.mrf.mxu0  ;;  %v1730_v1 = vpop.f32.mrf.mxu1  ;;  %v1218_v20 = vpack.c.bf16 %v1762_v17, %v1750_v12 }
  0xdf   :  { %v1782_v28 = vpop.f32.mrf.mxu3  ;;  %v818_v46 = vmul.f32 %v472_v0, %v472_v0  ;;  %v747_v5 = vadd.f32 %v746_v50, %v472_v0 }
  0xe0   :  { %1329 = vst [vmem:[%s2050_s4 + $0x98] sm:$0xff] %v1218_v20  }
  0xe1   :  { %v881_v48 = vadd.f32 %v880_v14, %v818_v46 }
  0xe5   :  { %v1780_v27 = vpop.f32.mrf.mxu2 }
  0xe6   :  { %v474_v8 = vpop.f32.mrf.mxu0  ;;  %v1746_v9 = vpop.f32.mrf.mxu1 }
  0xe7   :  { %v1143_v10 = vpack.c.bf16 %v474_v8, %v472_v0  ;;  %v1183_v11 = vpack.c.bf16 %v1746_v9, %v1730_v1  ;;  %v1794_v33 = vpop.f32.mrf.mxu3  ;;  %v819_v61 = vmul.f32 %v474_v8, %v474_v8  ;;  %v748_v58 = vadd.f32 %v747_v5, %v474_v8 }
  0xe8   :  { %v1253_v36 = vpack.c.bf16 %v1794_v33, %v1782_v28 }
  0xe9   :  { %1314 = vst [vmem:[%s2050_s4 + $0x20] sm:$0xff] %v1143_v10   ;;  %v882_v6 = vadd.f32 %v881_v48, %v819_v61 }
  0xea   :  { %1322 = vst [vmem:[%s2050_s4 + $0x60] sm:$0xff] %v1183_v11  }
  0xeb   :  { %1336 = vst [vmem:[%s2050_s4 + $0xd0] sm:$0xff] %v1253_v36  }
  0xed   :  { %v1792_v32 = vpop.f32.mrf.mxu2 }
  0xee   :  { %v477_v15 = vpop.f32.mrf.mxu0  ;;  %v1760_v16 = vpop.f32.mrf.mxu1  ;;  %v1223_v35 = vpack.c.bf16 %v1792_v32, %v1780_v27 }
  0xef   :  { %v1814_v42 = vpop.f32.mrf.mxu3  ;;  %v820_v53 = vmul.f32 %v477_v15, %v477_v15  ;;  %v749_v11 = vadd.f32 %v748_v58, %v477_v15 }
  0xf0   :  { %1330 = vst [vmem:[%s2050_s4 + $0xa0] sm:$0xff] %v1223_v35  }
  0xf1   :  { %v883_v20 = vadd.f32 %v882_v6, %v820_v53  ;;  %v827_v6 = vmul.f32 %v1644_v2, %v1644_v2 }
  0xf5   :  { %v1812_v60 = vpop.f32.mrf.mxu2 }
  0xf6   :  { %v479_v22 = vpop.f32.mrf.mxu0  ;;  %v1776_v23 = vpop.f32.mrf.mxu1 }
  0xf7   :  { %v1148_v24 = vpack.c.bf16 %v479_v22, %v477_v15  ;;  %v1188_v25 = vpack.c.bf16 %v1776_v23, %v1760_v16  ;;  %v821_v10 = vmul.f32 %v479_v22, %v479_v22  ;;  %v750_v0 = vadd.f32 %v749_v11, %v479_v22  ;;  %v1826_v35 = vpop.f32.mrf.mxu3 }
  0xf8   :  { %v1258_v8 = vpack.c.bf16 %v1826_v35, %v1814_v42 }
  0xf9   :  { %1315 = vst [vmem:[%s2050_s4 + $0x28] sm:$0xff] %v1148_v24   ;;  %v884_v36 = vadd.f32 %v883_v20, %v821_v10  ;;  %v828_v20 = vmul.f32 %v1661_v18, %v1661_v18 }
  0xfa   :  { %1323 = vst [vmem:[%s2050_s4 + $0x68] sm:$0xff] %v1188_v25  }
  0xfb   :  { %1337 = vst [vmem:[%s2050_s4 + $0xd8] sm:$0xff] %v1258_v8  }
  0xfd   :  { %v1824_v34 = vpop.f32.mrf.mxu2 }
  0xfe   :  { %v482_v29 = vpop.f32.mrf.mxu0  ;;  %v1790_v30 = vpop.f32.mrf.mxu1  ;;  %v1228_v38 = vpack.c.bf16 %v1824_v34, %v1812_v60 }
  0xff   :  { %v822_v21 = vmul.f32 %v482_v29, %v482_v29  ;;  %v751_v39 = vadd.f32 %v750_v0, %v482_v29  ;;  %v1844_v48 = vpop.f32.mrf.mxu3 }
 0x100   :  { %1331 = vst [vmem:[%s2050_s4 + $0xa8] sm:$0xff] %v1228_v38  }
 0x101   :  { %v885_v15 = vadd.f32 %v884_v36, %v822_v21 }
 0x105   :  { %v1842_v5 = vpop.f32.mrf.mxu2 }
 0x106   :  { %v484_v47 = vpop.f32.mrf.mxu0  ;;  %v1808_v7 = vpop.f32.mrf.mxu1 }
 0x107   :  { %v1153_v51 = vpack.c.bf16 %v484_v47, %v482_v29  ;;  %v1193_v56 = vpack.c.bf16 %v1808_v7, %v1790_v30  ;;  %v823_v37 = vmul.f32 %v484_v47, %v484_v47  ;;  %v752_v22 = vadd.f32 %v751_v39, %v484_v47  ;;  %v1866_v38 = vpop.f32.mrf.mxu3 }
 0x108   :  { %v826_v47 = vmul.f32 %v1642_v57, %v1642_v57  ;;  %v1263_v8 = vpack.c.bf16 %v1866_v38, %v1844_v48 }
 0x109   :  { %1316 = vst [vmem:[%s2050_s4 + $0x30] sm:$0xff] %v1153_v51   ;;  %v886_v43 = vadd.f32 %v885_v15, %v823_v37 }
 0x10a   :  { %1324 = vst [vmem:[%s2050_s4 + $0x70] sm:$0xff] %v1193_v56  }
 0x10b   :  { %1338 = vst [vmem:[%s2050_s4 + $0xe0] sm:$0xff] %v1263_v8   ;;  %v839_v8 = vmul.f32 %v1808_v7, %v1808_v7 }
 0x10d   :  { %v1864_v37 = vpop.f32.mrf.mxu2 }
 0x10e   :  { %v487_v24 = vpop.f32.mrf.mxu0  ;;  %v1822_v25 = vpop.f32.mrf.mxu1 }
 0x10f   :  { %v824_v40 = vmul.f32 %v487_v24, %v487_v24  ;;  %v753_v45 = vadd.f32 %v752_v22, %v487_v24 }
 0x111   :  { %v887_v46 = vadd.f32 %v886_v43, %v824_v40  ;;  %v832_v43 = vmul.f32 %v1707_v54, %v1707_v54 }
 0x116   :  { %v489_v50 = vpop.f32.mrf.mxu0  ;;  %v1838_v51 = vpop.f32.mrf.mxu1 }
 0x117   :  { %v1158_v56 = vpack.c.bf16 %v489_v50, %v487_v24  ;;  %v754_v14 = vadd.f32 %v753_v45, %v489_v50  ;;  %v825_v29 = vmul.f32 %v489_v50, %v489_v50  ;;  %v1198_v61 = vpack.c.bf16 %v1838_v51, %v1822_v25 }
 0x119   :  { %1317 = vst [vmem:[%s2050_s4 + $0x38] sm:$0xff] %v1158_v56   ;;  %v755_v53 = vadd.f32 %v754_v14, %v1642_v57  ;;  %v888_v58 = vadd.f32 %v887_v46, %v825_v29  ;;  %v829_v57 = vmul.f32 %v1663_v26, %v1663_v26  ;;  %v833_v46 = vmul.f32 %v1716_v59, %v1716_v59  ;;  %v1890_v14 = vpop.f32.mrf.mxu2 }
 0x11a   :  { %1325 = vst [vmem:[%s2050_s4 + $0x78] sm:$0xff] %v1198_v61   ;;  %v834_v29 = vmul.f32 %v1730_v1, %v1730_v1 }
 0x11b   :  { %v756_v10 = vadd.f32 %v755_v53, %v1644_v2  ;;  %v889_v11 = vadd.f32 %v888_v58, %v826_v47  ;;  %v1233_v2 = vpack.c.bf16 %v1864_v37, %v1842_v5  ;;  %v835_v53 = vmul.f32 %v1746_v9, %v1746_v9 }
 0x11d   :  { %v757_v21 = vadd.f32 %v756_v10, %v1661_v18  ;;  %v890_v24 = vadd.f32 %v889_v11, %v827_v6  ;;  %v830_v18 = vmul.f32 %v1682_v41, %v1682_v41  ;;  %1332 = vst [vmem:[%s2050_s4 + $0xb0] sm:$0xff] %v1233_v2   ;;  %v837_v11 = vmul.f32 %v1776_v23, %v1776_v23 }
 0x11f   :  { %v758_v0 = vadd.f32 %v757_v21, %v1663_v26  ;;  %v891_v36 = vadd.f32 %v890_v24, %v828_v20  ;;  %v831_v26 = vmul.f32 %v1695_v49, %v1695_v49 }
 0x121   :  { %v759_v39 = vadd.f32 %v758_v0, %v1682_v41  ;;  %v892_v15 = vadd.f32 %v891_v36, %v829_v57 }
 0x123   :  { %v760_v40 = vadd.f32 %v759_v39, %v1695_v49  ;;  %v893_v22 = vadd.f32 %v892_v15, %v830_v18  ;;  %v1892_v49 = vpop.f32.mrf.mxu3 }
 0x125   :  { %v894_v45 = vadd.f32 %v893_v22, %v831_v26  ;;  %v761_v41 = vadd.f32 %v760_v40, %v1707_v54  ;;  %v841_v40 = vmul.f32 %v1838_v51, %v1838_v51 }
 0x127   :  { %v762_v50 = vadd.f32 %v761_v41, %v1716_v59  ;;  %v895_v56 = vadd.f32 %v894_v45, %v832_v43  ;;  %v836_v59 = vmul.f32 %v1760_v16, %v1760_v16  ;;  %v843_v41 = vmul.f32 %v1686_v44, %v1686_v44 }
 0x129   :  { %v763_v61 = vadd.f32 %v762_v50, %v1730_v1  ;;  %v896_v47 = vadd.f32 %v895_v56, %v833_v46  ;;  %v1906_v1 = vpop.f32.mrf.mxu2  ;;  %v844_v50 = vmul.f32 %v1699_v52, %v1699_v52 }
 0x12b   :  { %v764_v54 = vadd.f32 %v763_v61, %v1746_v9  ;;  %v897_v58 = vadd.f32 %v896_v47, %v834_v29  ;;  %v1908_v24 = vpop.f32.mrf.mxu3  ;;  %v1238_v9 = vpack.c.bf16 %v1906_v1, %v1890_v14  ;;  %v845_v29 = vmul.f32 %v1709_v55, %v1709_v55 }
 0x12c   :  { %v1268_v57 = vpack.c.bf16 %v1908_v24, %v1892_v49 }
 0x12d   :  { %v765_v6 = vadd.f32 %v764_v54, %v1760_v16  ;;  %v898_v10 = vadd.f32 %v897_v58, %v835_v53  ;;  %v838_v16 = vmul.f32 %v1790_v30, %v1790_v30  ;;  %1333 = vst [vmem:[%s2050_s4 + $0xb8] sm:$0xff] %v1238_v9  }
 0x12e   :  { %1339 = vst [vmem:[%s2050_s4 + $0xe8] sm:$0xff] %v1268_v57   ;;  %v850_v57 = vmul.f32 %v1780_v27, %v1780_v27 }
 0x12f   :  { %v766_v20 = vadd.f32 %v765_v6, %v1776_v23  ;;  %v899_v21 = vadd.f32 %v898_v10, %v836_v59  ;;  %v848_v6 = vmul.f32 %v1750_v12, %v1750_v12 }
 0x131   :  { %v767_v0 = vadd.f32 %v766_v20, %v1790_v30  ;;  %v900_v36 = vadd.f32 %v899_v21, %v837_v11  ;;  %v840_v30 = vmul.f32 %v1822_v25, %v1822_v25 }
 0x133   :  { %v901_v23 = vadd.f32 %v900_v36, %v838_v16  ;;  %v768_v2 = vadd.f32 %v767_v0, %v1808_v7  ;;  %v1932_v22 = vpop.f32.mrf.mxu3  ;;  %v842_v7 = vmul.f32 %v1667_v31, %v1667_v31  ;;  %v851_v16 = vmul.f32 %v1792_v32, %v1792_v32 }
 0x135   :  { %v902_v18 = vadd.f32 %v901_v23, %v839_v8  ;;  %v769_v39 = vadd.f32 %v768_v2, %v1822_v25  ;;  %v852_v23 = vmul.f32 %v1812_v60, %v1812_v60 }
 0x137   :  { %v903_v15 = vadd.f32 %v902_v18, %v840_v30  ;;  %v770_v26 = vadd.f32 %v769_v39, %v1838_v51  ;;  %v853_v18 = vmul.f32 %v1824_v34, %v1824_v34 }
 0x139   :  { %v771_v43 = vadd.f32 %v770_v26, %v1667_v31  ;;  %v904_v45 = vadd.f32 %v903_v15, %v841_v40 }
 0x13b   :  { %v772_v46 = vadd.f32 %v771_v43, %v1686_v44  ;;  %v905_v25 = vadd.f32 %v904_v45, %v842_v7  ;;  %v1946_v31 = vpop.f32.mrf.mxu3  ;;  %v846_v44 = vmul.f32 %v1720_v62, %v1720_v62  ;;  %v856_v45 = vmul.f32 %v1890_v14, %v1890_v14 }
 0x13c   :  { %v1273_v53 = vpack.c.bf16 %v1946_v31, %v1932_v22 }
 0x13d   :  { %v773_v56 = vadd.f32 %v772_v46, %v1699_v52  ;;  %v906_v51 = vadd.f32 %v905_v25, %v843_v41  ;;  %v847_v52 = vmul.f32 %v1732_v3, %v1732_v3  ;;  %v858_v25 = vmul.f32 %v1722_v63, %v1722_v63 }
 0x13e   :  { %1340 = vst [vmem:[%s2050_s4 + $0xf0] sm:$0xff] %v1273_v53  }
 0x13f   :  { %v774_v61 = vadd.f32 %v773_v56, %v1709_v55  ;;  %v907_v47 = vadd.f32 %v906_v51, %v844_v50 }
 0x141   :  { %v775_v54 = vadd.f32 %v774_v61, %v1720_v62  ;;  %v908_v58 = vadd.f32 %v907_v47, %v845_v29  ;;  %v849_v62 = vmul.f32 %v1762_v17, %v1762_v17 }
 0x143   :  { %v776_v55 = vadd.f32 %v775_v54, %v1732_v3  ;;  %v909_v59 = vadd.f32 %v908_v58, %v846_v44  ;;  %v1965_v9 = vpop.f32.mrf.mxu3 }
 0x145   :  { %v910_v10 = vadd.f32 %v909_v59, %v847_v52  ;;  %v777_v11 = vadd.f32 %v776_v55, %v1750_v12 }
 0x147   :  { %v778_v20 = vadd.f32 %v777_v11, %v1762_v17  ;;  %v911_v21 = vadd.f32 %v910_v10, %v848_v6 }
 0x149   :  { %v779_v3 = vadd.f32 %v778_v20, %v1780_v27  ;;  %v912_v0 = vadd.f32 %v911_v21, %v849_v62 }
 0x14b   :  { %v780_v36 = vadd.f32 %v779_v3, %v1792_v32  ;;  %v913_v12 = vadd.f32 %v912_v0, %v850_v57  ;;  %v609_v27 = vpop.f32.mrf.mxu3  ;;  %v854_v32 = vmul.f32 %v1842_v5, %v1842_v5 }
 0x14c   :  { %v1278_v30 = vpack.c.bf16 %v609_v27, %v1965_v9 }
 0x14d   :  { %v781_v17 = vadd.f32 %v780_v36, %v1812_v60  ;;  %v914_v2 = vadd.f32 %v913_v12, %v851_v16  ;;  %v869_v16 = vmul.f32 %v1908_v24, %v1908_v24 }
 0x14e   :  { %1341 = vst [vmem:[%s2050_s4 + $0xf8] sm:$0xff] %v1278_v30   ;;  %v873_v30 = vmul.f32 %v609_v27, %v609_v27 }
 0x14f   :  { %v782_v8 = vadd.f32 %v781_v17, %v1824_v34  ;;  %v915_v39 = vadd.f32 %v914_v2, %v852_v23  ;;  %v855_v34 = vmul.f32 %v1864_v37, %v1864_v37  ;;  %v870_v23 = vmul.f32 %v1932_v22, %v1932_v22 }
 0x150   :  { %v871_v2 = vmul.f32 %v1946_v31, %v1946_v31 }
 0x151   :  { %v916_v15 = vadd.f32 %v915_v39, %v853_v18  ;;  %v783_v26 = vadd.f32 %v782_v8, %v1842_v5  ;;  %v857_v5 = vmul.f32 %v1906_v1, %v1906_v1  ;;  %v872_v18 = vmul.f32 %v1965_v9, %v1965_v9 }
 0x153   :  { %v917_v60 = vadd.f32 %v916_v15, %v854_v32  ;;  %v784_v40 = vadd.f32 %v783_v26, %v1864_v37  ;;  %v859_v37 = vmul.f32 %v1734_v4, %v1734_v4 }
 0x155   :  { %v918_v7 = vadd.f32 %v917_v60, %v855_v34  ;;  %v785_v43 = vadd.f32 %v784_v40, %v1890_v14  ;;  %v860_v14 = vmul.f32 %v1752_v13, %v1752_v13 }
 0x157   :  { %v919_v41 = vadd.f32 %v918_v7, %v856_v45  ;;  %v786_v46 = vadd.f32 %v785_v43, %v1906_v1  ;;  %v861_v1 = vmul.f32 %v1764_v19, %v1764_v19 }
 0x159   :  { %v787_v50 = vadd.f32 %v786_v46, %v1722_v63  ;;  %v920_v56 = vadd.f32 %v919_v41, %v857_v5  ;;  %v862_v63 = vmul.f32 %v1782_v28, %v1782_v28 }
 0x15b   :  { %v788_v51 = vadd.f32 %v787_v50, %v1734_v4  ;;  %v921_v29 = vadd.f32 %v920_v56, %v858_v25  ;;  %v863_v4 = vmul.f32 %v1794_v33, %v1794_v33 }
 0x15d   :  { %v789_v61 = vadd.f32 %v788_v51, %v1752_v13  ;;  %v922_v47 = vadd.f32 %v921_v29, %v859_v37  ;;  %v864_v13 = vmul.f32 %v1814_v42, %v1814_v42 }
 0x15f   :  { %v790_v53 = vadd.f32 %v789_v61, %v1764_v19  ;;  %v923_v44 = vadd.f32 %v922_v47, %v860_v14  ;;  %v865_v19 = vmul.f32 %v1826_v35, %v1826_v35 }
 0x161   :  { %v791_v54 = vadd.f32 %v790_v53, %v1782_v28  ;;  %v924_v58 = vadd.f32 %v923_v44, %v861_v1  ;;  %v866_v28 = vmul.f32 %v1844_v48, %v1844_v48 }
 0x163   :  { %v792_v52 = vadd.f32 %v791_v54, %v1794_v33  ;;  %v925_v55 = vadd.f32 %v924_v58, %v862_v63  ;;  %v867_v33 = vmul.f32 %v1866_v38, %v1866_v38 }
 0x165   :  { %v926_v59 = vadd.f32 %v925_v55, %v863_v4  ;;  %v793_v6 = vadd.f32 %v792_v52, %v1814_v42  ;;  %v868_v42 = vmul.f32 %v1892_v49, %v1892_v49 }
 0x167   :  { %v794_v10 = vadd.f32 %v793_v6, %v1826_v35  ;;  %v927_v11 = vadd.f32 %v926_v59, %v864_v13 }
 0x169   :  { %v795_v62 = vadd.f32 %v794_v10, %v1844_v48  ;;  %v928_v20 = vadd.f32 %v927_v11, %v865_v19 }
 0x16b   :  { %v796_v21 = vadd.f32 %v795_v62, %v1866_v38  ;;  %v929_v57 = vadd.f32 %v928_v20, %v866_v28 }
 0x16d   :  { %v797_v3 = vadd.f32 %v796_v21, %v1892_v49  ;;  %v930_v0 = vadd.f32 %v929_v57, %v867_v33 }
 0x16f   :  { %v798_v35 = vadd.f32 %v797_v3, %v1908_v24  ;;  %v931_v36 = vadd.f32 %v930_v0, %v868_v42 }
 0x171   :  { %v932_v48 = vadd.f32 %v931_v36, %v869_v16  ;;  %v799_v12 = vadd.f32 %v798_v35, %v1932_v22 }
 0x173   :  { %v933_v38 = vadd.f32 %v932_v48, %v870_v23  ;;  %v800_v17 = vadd.f32 %v799_v12, %v1946_v31 }
 0x175   :  { %v934_v49 = vadd.f32 %v933_v38, %v871_v2  ;;  %v801_v8 = vadd.f32 %v800_v17, %v1965_v9 }
 0x177   :  { %v935_v24 = vadd.f32 %v934_v49, %v872_v18  ;;  %v802_v39 = vadd.f32 %v801_v8, %v609_v27 }
 0x179   :  { %v803_v15 = vrot.slane %v802_v39, 4  ;;  %v936_v26 = vadd.f32 %v935_v24, %v873_v30 }
 0x17b   :  { %v804_v32 = vadd.f32 %v803_v15, %v802_v39  ;;  %v937_v60 = vrot.slane %v936_v26, 4 }
 0x17d   :  { %v805_v22 = vrot.slane %v804_v32, 2  ;;  %v938_v40 = vadd.f32 %v937_v60, %v936_v26 }
 0x17f   :  { %v806_v34 = vadd.f32 %v805_v22, %v804_v32  ;;  %v939_v7 = vrot.slane %v938_v40, 2 }
 0x181   :  { %v807_v43 = vrot.slane %v806_v34, 1  ;;  %v940_v45 = vadd.f32 %v939_v7, %v938_v40 }
 0x183   :  { %v808_v31 = vadd.f32 %v807_v43, %v806_v34  ;;  %v941_v41 = vrot.slane %v940_v45, 1 }
 0x185   :  { %809 = vst [vmem:[%s2051_s5] sm:$0x1] %v808_v31  ;;  %v942_v9 = vadd.f32 %v941_v41, %v940_v45 }
 0x187   :  { %943 = vst [vmem:[%s2051_s5 + $0x1] sm:$0x1] %v942_v9 }

// kernel: bottleneck_forward.7
= control target key start
LH: loop header
LB: loop body
LE: loop exit
PB: predicated region body
PF: predicated region fallthrough
CT: control target
= control target key end

     0   :  { %s1092_s18 = smov 0   ;;  %s1478_s0 = inlined_call_operand.vmem [shape: bf16[2,256,128], index: 0, kind: input, shape index: {}]   ;;  %s1479_s1 = inlined_call_operand.vmem [shape: bf16[2,256,128], index: 1, kind: input, shape index: {}]   ;;  %s1480_s2 = inlined_call_operand.vmem [shape: f32[1,128], index: 2, kind: input, shape index: {}]   ;;  %s1481_s3 = inlined_call_operand.vmem [shape: f32[1,128], index: 3, kind: input, shape index: {}]   ;;  %s1482_s4 = inlined_call_operand.vmem [shape: bf16[128,128], index: 4, kind: input, shape index: {}]   ;;  %s1483_s5 = inlined_call_operand.vmem [shape: f32[2,256,128], index: 5, kind: output, shape index: {}]  }
   0x1 LB: > { %s821_s19 = sadd.s32 4294967295, %s1059_s18   ;;  %p825_p0 = scmp.ge.s32.totalorder %s1059_s18, 1  ;;  %s1059_s18 = sphi %s1092_s18, %s15_s18  }
   0x2   : > { %p197_p1 = scmp.lt.s32.totalorder %s1059_s18, 3 }
   0x4   : > { %p198_p2 = pnand %p825_p0, %p197_p1 }
   0x5   : > { %p230_p3 = scmp.lt.s32.totalorder (!%p198_p2), %s821_s19, 1 }
   0x6   : > { %201 = sbr.rel (%p198_p2) target bundleno = 306 (0x132), region = 40 }
   0xb   : > { %v877_v0 = vld [vmem:[%s1482_s4 + $0x38] sm:$0xff]  ;;  %v876_v1 = vld [vmem:[%s1482_s4 + $0x30] sm:$0xff]  ;;  %v875_v2 = vld [vmem:[%s1482_s4 + $0x28] sm:$0xff]  ;;  %s1485_s19 = smov (!%p230_p3, %s821_s19), 1 }
   0xc   : > { %656 = vmatpush.bf16.msra.mxu0 %v877_v0  ;;  %v874_v3 = vld [vmem:[%s1482_s4 + $0x20] sm:$0xff]  ;;  %v873_v4 = vld [vmem:[%s1482_s4 + $0x18] sm:$0xff]  ;;  %v872_v5 = vld [vmem:[%s1482_s4 + $0x10] sm:$0xff]  ;;  %s867_s11 = sshll.u32 %s1485_s19, 7  ;;  %s869_s24 = sshll.u32 %s1485_s19, 8 }
   0xd   : > { %v871_v6 = vld [vmem:[%s1482_s4 + $0x8] sm:$0xff]  ;;  %v870_v7 = vld [vmem:[%s1482_s4] sm:$0xff]  ;;  %s1130_s14 = scalar_lea.vmem %s1478_s0, %s867_s11  ;;  %s1142_s21 = scalar_lea.vmem %s1479_s1, %s867_s11 }
   0xe   : > { %v879_v8 = vld [vmem:[%s1130_s14] sm:$0xff]   ;;  %v1006_v9 = vld [vmem:[%s1130_s14 + $0x8] sm:$0xff]   ;;  %v1007_v15 = vld [vmem:[%s1130_s14 + $0x10] sm:$0xff]   ;;  %s1377_s27 = scalar_lea.vmem %s1483_s5, %s869_s24 }
   0xf   : > { %v880_v10 = vunpack.c.l.bf16 %v879_v8  ;;  %v881_v11 = vunpack.c.h.bf16 %v879_v8  ;;  %v1137_v12 = vld [vmem:[%s1480_s2] ss:$0 sm:$0xff]  ;;  %v884_v13 = vunpack.c.l.bf16 %v1006_v9  ;;  %v885_v14 = vunpack.c.h.bf16 %v1006_v9  ;;  %v1008_v23 = vld [vmem:[%s1130_s14 + $0x18] sm:$0xff]   ;;  %v1021_v25 = vld [vmem:[%s1142_s21 + $0x8] sm:$0xff]  }
  0x10   : > { %657 = vmatpush.bf16.msra.mxu0 %v876_v1  ;;  %v1150_v18 = vld [vmem:[%s1481_s3] ss:$0 sm:$0xff]  ;;  %v888_v20 = vunpack.c.l.bf16 %v1007_v15  ;;  %v889_v22 = vunpack.c.h.bf16 %v1007_v15  ;;  %v892_v30 = vunpack.c.l.bf16 %v1008_v23  ;;  %v948_v34 = vunpack.c.l.bf16 %v1021_v25  ;;  %v1022_v37 = vld [vmem:[%s1142_s21 + $0x10] sm:$0xff]   ;;  %v1010_v43 = vld [vmem:[%s1130_s14 + $0x28] sm:$0xff]  }
  0x11   : > { %v313_v16 = vmul.f32 %v1137_v12, %v880_v10  ;;  %v314_v17 = vmul.f32 %v1137_v12, %v881_v11  ;;  %v943_v19 = vld [vmem:[%s1142_s21] sm:$0xff]   ;;  %v315_v21 = vmul.f32 %v1137_v12, %v884_v13  ;;  %v316_v24 = vmul.f32 %v1137_v12, %v885_v14  ;;  %v1023_v51 = vld [vmem:[%s1142_s21 + $0x18] sm:$0xff]   ;;  %v1011_v58 = vld [vmem:[%s1130_s14 + $0x30] sm:$0xff]  }
  0x12   : > { %v944_v28 = vunpack.c.l.bf16 %v943_v19  ;;  %v945_v29 = vunpack.c.h.bf16 %v943_v19  ;;  %v1009_v31 = vld [vmem:[%s1130_s14 + $0x20] sm:$0xff]   ;;  %v317_v32 = vmul.f32 %v1137_v12, %v888_v20  ;;  %v893_v35 = vunpack.c.h.bf16 %v1008_v23  ;;  %v1012_v10 = vld [vmem:[%s1130_s14 + $0x38] sm:$0xff]   ;;  %v1025_v20 = vld [vmem:[%s1142_s21 + $0x28] sm:$0xff]  }
  0x13   : > { %v349_v26 = vadd.f32 %v1150_v18, %v313_v16  ;;  %v350_v27 = vadd.f32 %v1150_v18, %v314_v17  ;;  %v351_v33 = vadd.f32 %v1150_v18, %v315_v21  ;;  %v318_v36 = vmul.f32 %v1137_v12, %v889_v22 }
  0x14   : > { %658 = vmatpush.bf16.msra.mxu0 %v875_v2  ;;  %v352_v38 = vadd.f32 %v1150_v18, %v316_v24  ;;  %v949_v39 = vunpack.c.h.bf16 %v1021_v25  ;;  %v896_v42 = vunpack.c.l.bf16 %v1009_v31  ;;  %v319_v44 = vmul.f32 %v1137_v12, %v892_v30  ;;  %v1024_v2 = vld [vmem:[%s1142_s21 + $0x20] sm:$0xff]  }
  0x15   : > { %v445_v40 = vadd.f32 %v944_v28, %v349_v26  ;;  %v446_v41 = vadd.f32 %v945_v29, %v350_v27  ;;  %v353_v45 = vadd.f32 %v1150_v18, %v317_v32  ;;  %v952_v46 = vunpack.c.l.bf16 %v1022_v37  ;;  %v1013_v28 = vld [vmem:[%s1130_s14 + $0x40] sm:$0xff]  }
  0x16   : > { %v447_v47 = vadd.f32 %v948_v34, %v351_v33  ;;  %v897_v48 = vunpack.c.h.bf16 %v1009_v31  ;;  %v320_v49 = vmul.f32 %v1137_v12, %v893_v35  ;;  %v354_v50 = vadd.f32 %v1150_v18, %v318_v36  ;;  %v1026_v36 = vld [vmem:[%s1142_s21 + $0x30] sm:$0xff]  }
  0x17   : > { %v953_v52 = vunpack.c.h.bf16 %v1022_v37  ;;  %v448_v53 = vadd.f32 %v949_v39, %v352_v38  ;;  %v1171_v54 = vmax.f32 %v445_v40, 0.0  ;;  %v1173_v55 = vmax.f32 %v446_v41, 0.0 }
  0x18   : > { %659 = vmatpush.bf16.msra.mxu0 %v874_v3  ;;  %v900_v56 = vunpack.c.l.bf16 %v1010_v43  ;;  %v321_v57 = vmul.f32 %v1137_v12, %v896_v42  ;;  %v355_v59 = vadd.f32 %v1150_v18, %v319_v44  ;;  %v956_v60 = vunpack.c.l.bf16 %v1023_v51  ;;  %v1014_v44 = vld [vmem:[%s1130_s14 + $0x48] sm:$0xff]  }
  0x19   : > { %v449_v61 = vadd.f32 %v952_v46, %v353_v45  ;;  %v1178_v62 = vmax.f32 %v447_v47, 0.0  ;;  %v901_v63 = vunpack.c.h.bf16 %v1010_v43  ;;  %v322_v0 = vmul.f32 %v1137_v12, %v897_v48 }
  0x1a   : > { %v356_v1 = vadd.f32 %v1150_v18, %v320_v49  ;;  %v957_v3 = vunpack.c.h.bf16 %v1023_v51  ;;  %v323_v8 = vmul.f32 %v1137_v12, %v900_v56  ;;  %v357_v9 = vadd.f32 %v1150_v18, %v321_v57 }
  0x1b   : > { %v960_v11 = vunpack.c.l.bf16 %v1024_v2  ;;  %v451_v13 = vadd.f32 %v956_v60, %v355_v59  ;;  %v1190_v14 = vmax.f32 %v449_v61, 0.0  ;;  %v905_v16 = vunpack.c.h.bf16 %v1011_v58 }
  0x1c   : > { %660 = vmatpush.bf16.msra.mxu0 %v873_v4  ;;  %v450_v4 = vadd.f32 %v953_v52, %v354_v50  ;;  %v324_v17 = vmul.f32 %v1137_v12, %v901_v63  ;;  %v358_v19 = vadd.f32 %v1150_v18, %v322_v0  ;;  %v961_v21 = vunpack.c.h.bf16 %v1024_v2  ;;  %v1027_v52 = vld [vmem:[%s1142_s21 + $0x38] sm:$0xff]   ;;  %v1015_v63 = vld [vmem:[%s1130_s14 + $0x50] sm:$0xff]  }
  0x1d   : > { %v452_v22 = vadd.f32 %v957_v3, %v356_v1  ;;  %v908_v25 = vunpack.c.l.bf16 %v1012_v10  ;;  %v359_v27 = vadd.f32 %v1150_v18, %v323_v8  ;;  %v964_v29 = vunpack.c.l.bf16 %v1025_v20  ;;  %v1028_v8 = vld [vmem:[%s1142_s21 + $0x40] sm:$0xff]  }
  0x1e   : > { %v1196_v23 = vmax.f32 %v450_v4, 0.0  ;;  %v453_v30 = vadd.f32 %v960_v11, %v357_v9  ;;  %v1202_v31 = vmax.f32 %v451_v13, 0.0  ;;  %v909_v33 = vunpack.c.h.bf16 %v1012_v10 }
  0x1f   : > { %v326_v34 = vmul.f32 %v1137_v12, %v905_v16  ;;  %v360_v35 = vadd.f32 %v1150_v18, %v324_v17  ;;  %v965_v37 = vunpack.c.h.bf16 %v1025_v20  ;;  %v454_v38 = vadd.f32 %v961_v21, %v358_v19  ;;  %v1016_v19 = vld [vmem:[%s1130_s14 + $0x58] sm:$0xff]  }
  0x20   : > { %661 = vmatpush.bf16.msra.mxu0 %v872_v5  ;;  %v1183_v5 = vmax.f32 %v448_v53, 0.0  ;;  %v1208_v39 = vmax.f32 %v452_v22, 0.0  ;;  %v912_v41 = vunpack.c.l.bf16 %v1013_v28  ;;  %v327_v42 = vmul.f32 %v1137_v12, %v908_v25 }
  0x21   : > { %v968_v45 = vunpack.c.l.bf16 %v1026_v36  ;;  %v455_v46 = vadd.f32 %v964_v29, %v359_v27  ;;  %v1214_v47 = vmax.f32 %v453_v30, 0.0  ;;  %v913_v49 = vunpack.c.h.bf16 %v1013_v28  ;;  %v1029_v28 = vld [vmem:[%s1142_s21 + $0x48] sm:$0xff]  }
  0x22   : > { %v328_v50 = vmul.f32 %v1137_v12, %v909_v33  ;;  %v362_v51 = vadd.f32 %v1150_v18, %v326_v34  ;;  %v969_v53 = vunpack.c.h.bf16 %v1026_v36  ;;  %v456_v56 = vadd.f32 %v965_v37, %v360_v35  ;;  %v1017_v37 = vld [vmem:[%s1130_s14 + $0x60] sm:$0xff]  }
  0x23   : > { %v1220_v57 = vmax.f32 %v454_v38, 0.0  ;;  %v916_v59 = vunpack.c.l.bf16 %v1014_v44  ;;  %v329_v60 = vmul.f32 %v1137_v12, %v912_v41  ;;  %v363_v61 = vadd.f32 %v1150_v18, %v327_v42 }
  0x24   : > { %662 = vmatpush.bf16.msra.mxu0 %v871_v6  ;;  %v546_v6 = vadd.f32 %v1173_v55, %v1171_v54  ;;  %v972_v0 = vunpack.c.l.bf16 %v1027_v52  ;;  %v1226_v2 = vmax.f32 %v455_v46, 0.0  ;;  %v917_v4 = vunpack.c.h.bf16 %v1014_v44  ;;  %v1030_v46 = vld [vmem:[%s1142_s21 + $0x50] sm:$0xff]  }
  0x25   : > { %v973_v9 = vunpack.c.h.bf16 %v1027_v52  ;;  %v458_v10 = vadd.f32 %v969_v53, %v362_v51  ;;  %v1232_v11 = vmax.f32 %v456_v56, 0.0  ;;  %v331_v16 = vmul.f32 %v1137_v12, %v916_v59 }
  0x26   : > { %v547_v15 = vadd.f32 %v546_v6, %v1178_v62  ;;  %v330_v6 = vmul.f32 %v1137_v12, %v913_v49  ;;  %v365_v17 = vadd.f32 %v1150_v18, %v329_v60  ;;  %v976_v20 = vunpack.c.l.bf16 %v1028_v8 }
  0x27   : > { %v459_v21 = vadd.f32 %v972_v0, %v363_v61  ;;  %v921_v25 = vunpack.c.h.bf16 %v1015_v63  ;;  %v977_v29 = vunpack.c.h.bf16 %v1028_v8  ;;  %v924_v34 = vunpack.c.l.bf16 %v1016_v19 }
  0x28   : > { %663 = vmatpush.bf16.msra.mxu0 %v870_v7  ;;  %v904_v7 = vunpack.c.l.bf16 %v1011_v58  ;;  %v548_v24 = vadd.f32 %v547_v15, %v1183_v5  ;;  %v920_v15 = vunpack.c.l.bf16 %v1015_v63  ;;  %v366_v27 = vadd.f32 %v1150_v18, %v330_v6 }
  0x29   : > { %v367_v36 = vadd.f32 %v1150_v18, %v331_v16  ;;  %v980_v38 = vunpack.c.l.bf16 %v1029_v28  ;;  %v1250_v41 = vmax.f32 %v459_v21, 0.0  ;;  %v334_v44 = vmul.f32 %v1137_v12, %v921_v25  ;;  %v1019_v16 = vld [vmem:[%s1130_s14 + $0x70] sm:$0xff]  }
  0x2a   : > { %v325_v26 = vmul.f32 %v1137_v12, %v904_v7  ;;  %v549_v32 = vadd.f32 %v548_v24, %v1190_v14  ;;  %v364_v7 = vadd.f32 %v1150_v18, %v328_v50  ;;  %v333_v35 = vmul.f32 %v1137_v12, %v920_v15 }
  0x2b   : > { %v462_v49 = vadd.f32 %v977_v29, %v366_v27  ;;  %v928_v52 = vunpack.c.l.bf16 %v1017_v37  ;;  %v335_v53 = vmul.f32 %v1137_v12, %v924_v34  ;;  %v984_v59 = vunpack.c.l.bf16 %v1030_v46  ;;  %v1032_v27 = vld [vmem:[%s1142_s21 + $0x60] sm:$0xff]  }
  0x2c   : > { %v550_v40 = vadd.f32 %v549_v32, %v1196_v23  ;;  %v361_v43 = vadd.f32 %v1150_v18, %v325_v26  ;;  %v332_v26 = vmul.f32 %v1137_v12, %v917_v4  ;;  %v460_v30 = vadd.f32 %v973_v9, %v364_v7  ;;  %v1031_v4 = vld [vmem:[%s1142_s21 + $0x58] sm:$0xff]  }
  0x2d   : > { %v1244_v32 = vmax.f32 %v458_v10, 0.0  ;;  %v369_v56 = vadd.f32 %v1150_v18, %v333_v35  ;;  %v463_v60 = vadd.f32 %v980_v38, %v367_v36  ;;  %v929_v0 = vunpack.c.h.bf16 %v1017_v37  ;;  %v1020_v37 = vld [vmem:[%s1130_s14 + $0x78] sm:$0xff]  }
  0x2e   : > { %v551_v48 = vadd.f32 %v550_v40, %v1202_v31  ;;  %v457_v1 = vadd.f32 %v968_v45, %v361_v43  ;;  %v461_v40 = vadd.f32 %v976_v20, %v365_v17  ;;  %v925_v43 = vunpack.c.h.bf16 %v1016_v19 }
  0x2f   : > { %v368_v45 = vadd.f32 %v1150_v18, %v332_v26  ;;  %v1256_v50 = vmax.f32 %v460_v30, 0.0  ;;  %v985_v6 = vunpack.c.h.bf16 %v1030_v46  ;;  %v1268_v8 = vmax.f32 %v462_v49, 0.0 }
  0x30   : > { %v552_v58 = vadd.f32 %v551_v48, %v1208_v39  ;;  %v1238_v22 = vmax.f32 %v457_v1, 0.0  ;;  %v981_v48 = vunpack.c.h.bf16 %v1029_v28  ;;  %v1262_v61 = vmax.f32 %v461_v40, 0.0 }
  0x31   : > { %v336_v1 = vmul.f32 %v1137_v12, %v925_v43  ;;  %v371_v15 = vadd.f32 %v1150_v18, %v335_v53  ;;  %v988_v17 = vunpack.c.l.bf16 %v1031_v4  ;;  %v465_v19 = vadd.f32 %v984_v59, %v369_v56 }
  0x32   : > { %v553_v3 = vadd.f32 %v552_v58, %v1214_v47  ;;  %v1018_v58 = vld [vmem:[%s1130_s14 + $0x68] sm:$0xff]   ;;  %v464_v7 = vadd.f32 %v981_v48, %v368_v45  ;;  %v1274_v20 = vmax.f32 %v463_v60, 0.0  ;;  %v338_v25 = vmul.f32 %v1137_v12, %v929_v0 }
  0x33   : > { %v932_v10 = vunpack.c.l.bf16 %v1018_v58  ;;  %v372_v26 = vadd.f32 %v1150_v18, %v336_v1  ;;  %v989_v28 = vunpack.c.h.bf16 %v1031_v4  ;;  %v936_v34 = vunpack.c.l.bf16 %v1019_v16  ;;  %v1033_v48 = vld [vmem:[%s1142_s21 + $0x68] sm:$0xff]  }
  0x34   : > { %v554_v13 = vadd.f32 %v553_v3, %v1220_v57  ;;  %v370_v3 = vadd.f32 %v1150_v18, %v334_v44  ;;  %v1280_v30 = vmax.f32 %v464_v7, 0.0  ;;  %v992_v38 = vunpack.c.l.bf16 %v1032_v27  ;;  %v1034_v7 = vld [vmem:[%s1142_s21 + $0x70] sm:$0xff]  }
  0x35   : > { %v339_v35 = vmul.f32 %v1137_v12, %v932_v10  ;;  %v467_v40 = vadd.f32 %v988_v17, %v371_v15  ;;  %v937_v44 = vunpack.c.h.bf16 %v1019_v16  ;;  %v374_v46 = vadd.f32 %v1150_v18, %v338_v25 }
  0x36   : > { %v555_v24 = vadd.f32 %v554_v13, %v1226_v2  ;;  %v337_v13 = vmul.f32 %v1137_v12, %v928_v52  ;;  %v466_v29 = vadd.f32 %v985_v6, %v370_v3  ;;  %v993_v49 = vunpack.c.h.bf16 %v1032_v27 }
  0x37   : > { %v940_v56 = vunpack.c.l.bf16 %v1020_v37  ;;  %v375_v59 = vadd.f32 %v1150_v18, %v339_v35  ;;  %v996_v60 = vunpack.c.l.bf16 %v1033_v48  ;;  %v1297_v0 = vmax.f32 %v467_v40, 0.0 }
  0x38   : > { %v556_v33 = vadd.f32 %v555_v24, %v1232_v11  ;;  %v933_v24 = vunpack.c.h.bf16 %v1018_v58  ;;  %v373_v36 = vadd.f32 %v1150_v18, %v337_v13  ;;  %v1292_v52 = vmax.f32 %v466_v29, 0.0 }
  0x39   : > { %v341_v58 = vmul.f32 %v1137_v12, %v936_v34  ;;  %v941_v3 = vunpack.c.h.bf16 %v1020_v37  ;;  %v342_v4 = vmul.f32 %v1137_v12, %v937_v44  ;;  %v470_v10 = vadd.f32 %v993_v49, %v374_v46 }
  0x3a   : > { %v557_v42 = vadd.f32 %v556_v33, %v1238_v22  ;;  %v340_v45 = vmul.f32 %v1137_v12, %v933_v24  ;;  %v343_v16 = vmul.f32 %v1137_v12, %v940_v56  ;;  %v471_v24 = vadd.f32 %v996_v60, %v375_v59 }
  0x3b   : > { %v377_v17 = vadd.f32 %v1150_v18, %v341_v58  ;;  %v344_v27 = vmul.f32 %v1137_v12, %v941_v3  ;;  %v1001_v29 = vunpack.c.h.bf16 %v1034_v7  ;;  %v1314_v34 = vmax.f32 %v470_v10, 0.0 }
  0x3c   : > { %v558_v51 = vadd.f32 %v557_v42, %v1244_v32  ;;  %v1286_v42 = vmax.f32 %v465_v19, 0.0  ;;  %v376_v6 = vadd.f32 %v1150_v18, %v340_v45  ;;  %v1000_v19 = vunpack.c.l.bf16 %v1034_v7 }
  0x3d   : > { %v1318_v40 = vmax.f32 %v471_v24, 0.0  ;;  %v1061_v44 = vmov 256.0   ;;  %v380_v12 = vadd.f32 %v1150_v18, %v344_v27 }
  0x3e   : > { %v559_v63 = vadd.f32 %v558_v51, %v1250_v41  ;;  %v468_v51 = vadd.f32 %v989_v28, %v372_v26  ;;  %v378_v28 = vadd.f32 %v1150_v18, %v342_v4  ;;  %1047 = vrcp.f32 %v1061_v44 }
  0x40   : > { %v560_v9 = vadd.f32 %v559_v63, %v1256_v50  ;;  %v469_v63 = vadd.f32 %v992_v38, %v373_v36  ;;  %v1303_v13 = vmax.f32 %v468_v51, 0.0  ;;  %v379_v36 = vadd.f32 %v1150_v18, %v343_v16 }
  0x41   : > { %v473_v38 = vadd.f32 %v1000_v19, %v377_v17  ;;  %v474_v46 = vadd.f32 %v1001_v29, %v378_v28 }
  0x42   : > { %v561_v21 = vadd.f32 %v560_v9, %v1262_v61  ;;  %v997_v9 = vunpack.c.h.bf16 %v1033_v48  ;;  %v1309_v25 = vmax.f32 %v469_v63, 0.0 }
  0x43   : > { %v1328_v60 = vmax.f32 %v474_v46, 0.0 }
  0x44   : > { %v562_v33 = vadd.f32 %v561_v21, %v1268_v8  ;;  %v1035_v21 = vld [vmem:[%s1142_s21 + $0x78] sm:$0xff]   ;;  %v1048_v58 = vpop.eup %1047 }
  0x45   : > { %v1004_v37 = vunpack.c.l.bf16 %v1035_v21  ;;  %v1005_v45 = vunpack.c.h.bf16 %v1035_v21  ;;  %v584_v3 = vmul.f32 256.0, %v1048_v58  ;;  %vm588_vm0 = vweird.f32 %v1048_v58 }
  0x46   : > { %v563_v43 = vadd.f32 %v562_v33, %v1274_v20  ;;  %v472_v33 = vadd.f32 %v997_v9, %v376_v6 }
  0x47   : > { %v475_v51 = vadd.f32 %v1004_v37, %v379_v36  ;;  %v476_v59 = vadd.f32 %v1005_v45, %v380_v12  ;;  %v585_v9 = vsub.f32 1.0, %v584_v3  ;;  %v510_v36 = vmax.f32 %v1173_v55, %v1196_v23 }
  0x48   : > { %v564_v53 = vadd.f32 %v563_v43, %v1280_v30  ;;  %v1322_v48 = vmax.f32 %v472_v33, 0.0  ;;  %v511_v37 = vmax.f32 %v1178_v62, %v1202_v31 }
  0x49   : > { %v1334_v4 = vmax.f32 %v476_v59, 0.0  ;;  %v586_v16 = vmul.f32 %v1048_v58, %v585_v9  ;;  %v514_v44 = vmax.f32 %v510_v36, %v1220_v57 }
  0x4a   : > { %v565_v1 = vadd.f32 %v564_v53, %v1286_v42  ;;  %v1325_v53 = vmax.f32 %v473_v38, 0.0  ;;  %v512_v38 = vmax.f32 %v1183_v5, %v1208_v39  ;;  %v515_v12 = vmax.f32 %v511_v37, %v1226_v2 }
  0x4b   : > { %v587_v21 = vadd.f32 %v1048_v58, %v586_v16 }
  0x4c   : > { %v566_v15 = vadd.f32 %v565_v1, %v1292_v52  ;;  %v1331_v1 = vmax.f32 %v475_v51, 0.0  ;;  %v516_v45 = vmax.f32 %v512_v38, %v1232_v11  ;;  %v519_v51 = vmax.f32 %v515_v12, %v1250_v41 }
  0x4d   : > { %v589_v27 = vsel %vm588_vm0, %v1048_v58, %v587_v21 }
  0x4e   : > { %v567_v26 = vadd.f32 %v566_v15, %v1297_v0 }
  0x50   : > { %v568_v35 = vadd.f32 %v567_v26, %v1303_v13 }
  0x52   : > { %v569_v43 = vadd.f32 %v568_v35, %v1309_v25  ;;  %v509_v35 = vmax.f32 %v1171_v54, %v1190_v14 }
  0x54   : > { %v570_v49 = vadd.f32 %v569_v43, %v1314_v34  ;;  %v513_v43 = vmax.f32 %v509_v35, %v1214_v47 }
  0x56   : > { %v571_v56 = vadd.f32 %v570_v49, %v1318_v40  ;;  %v517_v46 = vmax.f32 %v513_v43, %v1238_v22  ;;  %v518_v49 = vmax.f32 %v514_v44, %v1244_v32 }
  0x58   : > { %v572_v63 = vadd.f32 %v571_v56, %v1322_v48  ;;  %v520_v56 = vmax.f32 %v516_v45, %v1256_v50  ;;  %v521_v58 = vmax.f32 %v517_v46, %v1262_v61  ;;  %v522_v59 = vmax.f32 %v518_v49, %v1268_v8 }
  0x5a   : > { %v573_v18 = vadd.f32 %v572_v63, %v1325_v53  ;;  %v523_v63 = vmax.f32 %v519_v51, %v1274_v20  ;;  %v525_v3 = vmax.f32 %v521_v58, %v1286_v42 }
  0x5c   : > { %v574_v6 = vadd.f32 %v573_v18, %v1328_v60  ;;  %v524_v18 = vmax.f32 %v520_v56, %v1280_v30 }
  0x5e   : > { %v575_v7 = vadd.f32 %v574_v6, %v1331_v1  ;;  %v526_v6 = vmax.f32 %v522_v59, %v1292_v52  ;;  %v528_v9 = vmax.f32 %v524_v18, %v1303_v13 }
  0x60   : > { %v576_v10 = vadd.f32 %v575_v7, %v1334_v4  ;;  %v527_v7 = vmax.f32 %v523_v63, %v1297_v0 }
  0x62   : > { %v577_v15 = vrot.slane %v576_v10, 4  ;;  %v531_v16 = vmax.f32 %v527_v7, %v1318_v40 }
  0x64   : > { %v578_v17 = vadd.f32 %v577_v15, %v576_v10  ;;  %v529_v10 = vmax.f32 %v525_v3, %v1309_v25  ;;  %v530_v15 = vmax.f32 %v526_v6, %v1314_v34 }
  0x66   : > { %v579_v19 = vrot.slane %v578_v17, 2  ;;  %v534_v21 = vmax.f32 %v530_v15, %v1328_v60 }
  0x68   : > { %v580_v24 = vadd.f32 %v579_v19, %v578_v17  ;;  %v532_v17 = vmax.f32 %v528_v9, %v1322_v48  ;;  %v533_v19 = vmax.f32 %v529_v10, %v1325_v53 }
  0x6a   : > { %v581_v26 = vrot.slane %v580_v24, 1 }
  0x6c   : > { %v582_v28 = vadd.f32 %v581_v26, %v580_v24  ;;  %v535_v24 = vmax.f32 %v531_v16, %v1331_v1  ;;  %v536_v26 = vmax.f32 %v532_v17, %v1334_v4 }
  0x6e   : > { %v590_v29 = vmul.f32 %v589_v27, %v582_v28  ;;  %v537_v27 = vmax.f32 %v533_v19, %v534_v21  ;;  %v538_v28 = vmax.f32 %v535_v24, %v536_v26 }
  0x70   : > { %v591_v33 = vpack.c.bf16 %v590_v29, %v590_v29 }
  0x72   : > { %664 = vmatmul.bf16.vlgmr.msra.gmra.mxu0 %v591_v33  ;;  %v539_v33 = vmax.f32 %v537_v27, %v538_v28 }
  0x74   : > { %v540_v36 = vrot.slane %v539_v33, 4 }
  0x76   : > { %v541_v43 = vmax.f32 %v539_v33, %v540_v36 }
  0x78   : > { %v542_v12 = vrot.slane %v541_v43, 2 }
  0x7a   : > { %v543_v45 = vmax.f32 %v541_v43, %v542_v12 }
  0x7c   : > { %v544_v51 = vrot.slane %v543_v45, 1 }
  0x7e   : > { %v545_v18 = vmax.f32 %v543_v45, %v544_v51 }
  0xef   : > { %v665_v29 = vpop.f32.mrf.mxu0 }
  0xf0   : > { %v864_v35 = vmul.f32 -1.442695, %v665_v29 }
  0xf2   : > { %1049 = vpow2.f32 %v864_v35 }
  0xf7   : > { %v667_v37 = vpop.f32.mrf.mxu0 }
  0xf8   : > { %v1050_v38 = vpop.eup %1049 }
  0xf9   : > { %v672_v44 = vadd.f32 1.0, %v1050_v38 }
  0xfb   : > { %1051 = vrcp.f32 %v672_v44  ;;  %v684_v58 = vand.u32 2147483648, %v672_v44  ;;  %v682_v63 = vand.u32 2147483647, %v672_v44  ;;  %vm678_vm2 = vweird.f32 %v672_v44 }
  0xfd   : > { %v685_v6 = vor.u32 1.1754944e-38, %v684_v58  ;;  %vm683_vm4 = vcmp.eq.f32.partialorder %v682_v63, 8.507059e+37 }
 0x101   : > { %v1052_v46 = vpop.eup %1051 }
 0x102   : > { %v674_v49 = vmul.f32 %v1052_v46, %v672_v44  ;;  %vm679_vm1 = vweird.f32 %v1052_v46 }
 0x103   : > { %vm680_vm3 = vmor %vm678_vm2, %vm679_vm1 }
 0x104   : > { %v675_v56 = vsub.f32 1.0, %v674_v49 }
 0x106   : > { %v676_v59 = vmul.f32 %v1052_v46, %v675_v56 }
 0x108   : > { %v677_v3 = vadd.f32 %v1052_v46, %v676_v59 }
 0x10a   : > { %v681_v7 = vsel %vm680_vm3, %v1052_v46, %v677_v3 }
 0x10b   : > { %v686_v9 = vsel %vm683_vm4, %v685_v6, %v681_v7 }
 0x10c   : > { %v688_v10 = vmul.f32 %v686_v9, %v545_v18 }
 0x10e   : > { %v1372_v15 = vperm.slane %v688_v10, 0 }
 0x110   : > { %v690_v16 = vmin.f32 %v1171_v54, %v1372_v15  ;;  %v691_v17 = vmin.f32 %v1173_v55, %v1372_v15  ;;  %v692_v19 = vmin.f32 %v1178_v62, %v1372_v15  ;;  %v693_v21 = vmin.f32 %v1183_v5, %v1372_v15 }
 0x111   : > { %v694_v24 = vmin.f32 %v1190_v14, %v1372_v15  ;;  %v695_v26 = vmin.f32 %v1196_v23, %v1372_v15  ;;  %v696_v54 = vmin.f32 %v1202_v31, %v1372_v15  ;;  %v697_v55 = vmin.f32 %v1208_v39, %v1372_v15 }
 0x112   : > { %722 = vst [vmem:[%s1377_s27] sm:$0xff] %v690_v16  ;;  %v698_v62 = vmin.f32 %v1214_v47, %v1372_v15  ;;  %v699_v5 = vmin.f32 %v1220_v57, %v1372_v15  ;;  %v700_v14 = vmin.f32 %v1226_v2, %v1372_v15  ;;  %v701_v23 = vmin.f32 %v1232_v11, %v1372_v15 }
 0x113   : > { %723 = vst [vmem:[%s1377_s27 + $0x8] sm:$0xff] %v691_v17  ;;  %v702_v31 = vmin.f32 %v1238_v22, %v1372_v15  ;;  %v703_v39 = vmin.f32 %v1244_v32, %v1372_v15  ;;  %v704_v47 = vmin.f32 %v1250_v41, %v1372_v15  ;;  %v705_v57 = vmin.f32 %v1256_v50, %v1372_v15 }
 0x114   : > { %724 = vst [vmem:[%s1377_s27 + $0x10] sm:$0xff] %v692_v19  ;;  %v706_v2 = vmin.f32 %v1262_v61, %v1372_v15  ;;  %v707_v11 = vmin.f32 %v1268_v8, %v1372_v15  ;;  %v708_v22 = vmin.f32 %v1274_v20, %v1372_v15  ;;  %v709_v32 = vmin.f32 %v1280_v30, %v1372_v15 }
 0x115   : > { %725 = vst [vmem:[%s1377_s27 + $0x18] sm:$0xff] %v693_v21  ;;  %v710_v41 = vmin.f32 %v1286_v42, %v1372_v15  ;;  %v711_v50 = vmin.f32 %v1292_v52, %v1372_v15  ;;  %v712_v61 = vmin.f32 %v1297_v0, %v1372_v15  ;;  %v713_v8 = vmin.f32 %v1303_v13, %v1372_v15 }
 0x116   : > { %726 = vst [vmem:[%s1377_s27 + $0x20] sm:$0xff] %v694_v24  ;;  %v714_v20 = vmin.f32 %v1309_v25, %v1372_v15  ;;  %v715_v30 = vmin.f32 %v1314_v34, %v1372_v15  ;;  %v716_v42 = vmin.f32 %v1318_v40, %v1372_v15  ;;  %v717_v52 = vmin.f32 %v1322_v48, %v1372_v15 }
 0x117   : > { %727 = vst [vmem:[%s1377_s27 + $0x28] sm:$0xff] %v695_v26  ;;  %v718_v0 = vmin.f32 %v1325_v53, %v1372_v15  ;;  %v719_v13 = vmin.f32 %v1328_v60, %v1372_v15  ;;  %v720_v25 = vmin.f32 %v1331_v1, %v1372_v15  ;;  %v721_v34 = vmin.f32 %v1334_v4, %v1372_v15 }
 0x118   : > { %728 = vst [vmem:[%s1377_s27 + $0x30] sm:$0xff] %v696_v54 }
 0x119   : > { %729 = vst [vmem:[%s1377_s27 + $0x38] sm:$0xff] %v697_v55 }
 0x11a   : > { %730 = vst [vmem:[%s1377_s27 + $0x40] sm:$0xff] %v698_v62 }
 0x11b   : > { %731 = vst [vmem:[%s1377_s27 + $0x48] sm:$0xff] %v699_v5 }
 0x11c   : > { %732 = vst [vmem:[%s1377_s27 + $0x50] sm:$0xff] %v700_v14 }
 0x11d   : > { %733 = vst [vmem:[%s1377_s27 + $0x58] sm:$0xff] %v701_v23 }
 0x11e   : > { %734 = vst [vmem:[%s1377_s27 + $0x60] sm:$0xff] %v702_v31 }
 0x11f   : > { %735 = vst [vmem:[%s1377_s27 + $0x68] sm:$0xff] %v703_v39 }
 0x120   : > { %736 = vst [vmem:[%s1377_s27 + $0x70] sm:$0xff] %v704_v47 }
 0x121   : > { %737 = vst [vmem:[%s1377_s27 + $0x78] sm:$0xff] %v705_v57 }
 0x122   : > { %738 = vst [vmem:[%s1377_s27 + $0x80] sm:$0xff] %v706_v2 }
 0x123   : > { %739 = vst [vmem:[%s1377_s27 + $0x88] sm:$0xff] %v707_v11 }
 0x124   : > { %740 = vst [vmem:[%s1377_s27 + $0x90] sm:$0xff] %v708_v22 }
 0x125   : > { %741 = vst [vmem:[%s1377_s27 + $0x98] sm:$0xff] %v709_v32 }
 0x126   : > { %742 = vst [vmem:[%s1377_s27 + $0xa0] sm:$0xff] %v710_v41 }
 0x127   : > { %743 = vst [vmem:[%s1377_s27 + $0xa8] sm:$0xff] %v711_v50 }
 0x128   : > { %744 = vst [vmem:[%s1377_s27 + $0xb0] sm:$0xff] %v712_v61 }
 0x129   : > { %745 = vst [vmem:[%s1377_s27 + $0xb8] sm:$0xff] %v713_v8 }
 0x12a   : > { %746 = vst [vmem:[%s1377_s27 + $0xc0] sm:$0xff] %v714_v20 }
 0x12b   : > { %747 = vst [vmem:[%s1377_s27 + $0xc8] sm:$0xff] %v715_v30 }
 0x12c   : > { %748 = vst [vmem:[%s1377_s27 + $0xd0] sm:$0xff] %v716_v42 }
 0x12d   : > { %749 = vst [vmem:[%s1377_s27 + $0xd8] sm:$0xff] %v717_v52 }
 0x12e   : > { %750 = vst [vmem:[%s1377_s27 + $0xe0] sm:$0xff] %v718_v0 }
 0x12f   : > { %751 = vst [vmem:[%s1377_s27 + $0xe8] sm:$0xff] %v719_v13 }
 0x130   : > { %752 = vst [vmem:[%s1377_s27 + $0xf0] sm:$0xff] %v720_v25 }
 0x131   : > { %753 = vst [vmem:[%s1377_s27 + $0xf8] sm:$0xff] %v721_v34 }
 0x132 PF: > { %s15_s18 = sadd.s32 1, %s1059_s18  }
 0x133   : > { %p12_p4 = scmp.ge.s32.totalorder %s15_s18, 4  }
 0x135   :  { %14 = sbr.rel (!%p12_p4) target bundleno = 1 (0x1), region = 73 }

// kernel: bottleneck_forward.5
= control target key start
LH: loop header
LB: loop body
LE: loop exit
PB: predicated region body
PF: predicated region fallthrough
CT: control target
= control target key end

     0   :  { %s5252_s18 = smov 0   ;;  %s6525_s0 = inlined_call_operand.vmem [shape: bf16[2,16,16,128], index: 0, kind: input, shape index: {}]   ;;  %s6526_s1 = inlined_call_operand.vmem [shape: f32[1,128], index: 1, kind: input, shape index: {}]   ;;  %s6527_s2 = inlined_call_operand.vmem [shape: f32[1,128], index: 2, kind: input, shape index: {}]   ;;  %s6528_s3 = inlined_call_operand.vmem [shape: bf16[3,384,128], index: 3, kind: input, shape index: {}]   ;;  %s6529_s4 = inlined_call_operand.vmem [shape: bf16[2,256,128], index: 4, kind: output, shape index: {0}]   ;;  %s6530_s5 = inlined_call_operand.vmem [shape: f32[2,2,128], index: 5, kind: output, shape index: {1}]  }
   0x1 LB: > { %s3812_s19 = sadd.s32 4294967295, %s5219_s18   ;;  %p3816_p0 = scmp.ge.s32.totalorder %s5219_s18, 1  ;;  %s5219_s18 = sphi %s5252_s18, %s16_s18  }
   0x2   : > { %p190_p1 = scmp.lt.s32.totalorder %s5219_s18, 3 }
   0x4   : > { %p191_p2 = pnand %p3816_p0, %p190_p1 }
   0x6   : > { %194 = sbr.rel (%p191_p2) target bundleno = 801 (0x321), region = 36 }
   0xb   : > { %v4913_v0 = vld [vmem:[%s6528_s3 + $0xf8] sm:$0xff]  ;;  %p222_p3 = scmp.lt.s32.totalorder %s3812_s19, 1  ;;  %vm479_vm0 = vcmask 1040384   ;;  %vm480_vm1 = vsmask.f32 256  ;;  %v4912_v1 = vld [vmem:[%s6528_s3 + $0xf0] sm:$0xff] }
   0xc   : > { %1807 = vmatpush.bf16.msra.mxu0 %v4913_v0  ;;  %5176 = vmatpush.bf16.msra.mxu1 %v4913_v0  ;;  %v5272_v2 = vld [vmem:[%s6526_s1] ss:$0 sm:$0xff]  ;;  %vm5275_vm2 = vmand %vm479_vm0, %vm480_vm1  ;;  %v482_v4 = vld [vmem:[#allocation2 + $0x18] sm:$0x1]  ;;  %vm530_vm3 = vsmask.f32 4368 }
   0xd   : > { %s6670_s19 = smov (!%p222_p3, %s3812_s19), 1  ;;  %5177 = vmatpush.bf16.msra.mxu2 %v4913_v0  ;;  %5178 = vmatpush.bf16.msra.mxu3 %v4913_v0  ;;  %v5289_v5 = vld [vmem:[%s6527_s2] ss:$0 sm:$0xff]  ;;  %v483_v6 = vsel %vm5275_vm2, 0, %v482_v4  ;;  %v494_v7 = vld [vmem:[#allocation2 + $0x78] sm:$0x1]  ;;  %vm5360_vm6 = vmor %vm480_vm1, %vm530_vm3 }
   0xe   : > { %s4784_s24 = sshll.u32 %s6670_s19, 7  ;;  %v4911_v8 = vld [vmem:[%s6528_s3 + $0xe8] sm:$0xff]  ;;  %484 = vst [vmem:[#allocation2 + $0x18] sm:$0x1] %v483_v6  ;;  %v495_v11 = vsel %vm5275_vm2, 0, %v494_v7  ;;  %vm820_vm4 = vcmask 1043456  }
   0xf   : > { %s5284_s29 = scalar_lea.vmem %s6525_s0, %s4784_s24  ;;  %496 = vst [vmem:[#allocation2 + $0x78] sm:$0x1] %v495_v11  ;;  %v506_v17 = vld [vmem:[#allocation2 + $0xd8] sm:$0x1]  ;;  %v4910_v28 = vld [vmem:[%s6528_s3 + $0xe0] sm:$0xff]  ;;  %v4908_v53 = vld [vmem:[%s6528_s3 + $0xd0] sm:$0xff]  ;;  %s6457_s26 = scalar_lea.vmem %s6529_s4, %s4784_s24 }
  0x10   : > { %1808 = vmatpush.bf16.msra.mxu0 %v4912_v1  ;;  %5179 = vmatpush.bf16.msra.mxu1 %v4912_v1  ;;  %v5003_v9 = vld [vmem:[%s5284_s29] sm:$0xff]   ;;  %v507_v21 = vsel %vm5275_vm2, 0, %v506_v17  ;;  %v518_v23 = vld [vmem:[#allocation2 + $0x138] sm:$0x1]  ;;  %vm821_vm5 = vsmask.f32 7938 }
  0x11   : > { %v5149_v10 = vld [vmem:[%s5284_s29 + $0x20] sm:$0xff]   ;;  %5180 = vmatpush.bf16.msra.mxu2 %v4912_v1  ;;  %5181 = vmatpush.bf16.msra.mxu3 %v4912_v1  ;;  %v5004_v12 = vunpack.c.l.bf16 %v5003_v9  ;;  %v5005_v13 = vunpack.c.h.bf16 %v5003_v9  ;;  %508 = vst [vmem:[#allocation2 + $0xd8] sm:$0x1] %v507_v21  ;;  %v519_v36 = vsel %vm5275_vm2, 0, %v518_v23  ;;  %v4909_v45 = vld [vmem:[%s6528_s3 + $0xd8] sm:$0xff]  ;;  %v4907_v11 = vld [vmem:[%s6528_s3 + $0xc8] sm:$0xff] }
  0x12   : > { %v5020_v14 = vunpack.c.l.bf16 %v5149_v10  ;;  %v5021_v15 = vunpack.c.h.bf16 %v5149_v10  ;;  %v5153_v16 = vld [vmem:[%s5284_s29 + $0x40] sm:$0xff]   ;;  %520 = vst [vmem:[#allocation2 + $0x138] sm:$0x1] %v519_v36  ;;  %vm5376_vm7 = vmand %vm820_vm4, %vm821_vm5  ;;  %v5146_v17 = vld [vmem:[%s5284_s29 + $0x8] sm:$0xff]   ;;  %vm887_vm8 = vcmask 1043459   ;;  %s3821_s24 = sshll.u32 %s6670_s19, 1 }
  0x13   : > { %v5157_v18 = vld [vmem:[%s5284_s29 + $0x60] sm:$0xff]   ;;  %v5036_v19 = vunpack.c.l.bf16 %v5153_v16  ;;  %v5037_v20 = vunpack.c.h.bf16 %v5153_v16  ;;  %v305_v24 = vmul.f32 %v5272_v2, %v5004_v12  ;;  %v306_v25 = vmul.f32 %v5272_v2, %v5005_v13  ;;  %s235_s28 = scalar_lea.vmem %s6530_s5, %s3821_s24 }
  0x14   : > { %v5052_v22 = vunpack.c.l.bf16 %v5157_v18  ;;  %v313_v26 = vmul.f32 %v5272_v2, %v5020_v14  ;;  %v314_v27 = vmul.f32 %v5272_v2, %v5021_v15  ;;  %1809 = vmatpush.bf16.msra.mxu0 %v4911_v8  ;;  %5182 = vmatpush.bf16.msra.mxu1 %v4911_v8  ;;  %v5053_v31 = vunpack.c.h.bf16 %v5157_v18  ;;  %v4906_v36 = vld [vmem:[%s6528_s3 + $0xc0] sm:$0xff] }
  0x15   : > { %v321_v29 = vmul.f32 %v5272_v2, %v5036_v19  ;;  %v322_v30 = vmul.f32 %v5272_v2, %v5037_v20  ;;  %5183 = vmatpush.bf16.msra.mxu2 %v4911_v8  ;;  %5184 = vmatpush.bf16.msra.mxu3 %v4911_v8  ;;  %v341_v33 = vadd.f32 %v5289_v5, %v305_v24  ;;  %v823_v62 = vld [vmem:[#allocation2 + $0x18] sm:$0xf]  ;;  %vm888_vm9 = vsmask.f32 7950 }
  0x16   : > { %v329_v32 = vmul.f32 %v5272_v2, %v5052_v22  ;;  %v342_v34 = vadd.f32 %v5289_v5, %v306_v25  ;;  %v349_v35 = vadd.f32 %v5289_v5, %v313_v26  ;;  %v350_v37 = vadd.f32 %v5289_v5, %v314_v27  ;;  %v839_v21 = vld [vmem:[#allocation2 + $0x78] sm:$0xf]  ;;  %vm5902_vm11 = vmand %vm887_vm8, %vm888_vm9 }
  0x17   : > { %v357_v38 = vadd.f32 %v5289_v5, %v321_v29  ;;  %v358_v39 = vadd.f32 %v5289_v5, %v322_v30  ;;  %v330_v40 = vmul.f32 %v5272_v2, %v5053_v31  ;;  %v373_v41 = vmax.f32 %v341_v33, 0.0  ;;  %v5150_v31 = vld [vmem:[%s5284_s29 + $0x28] sm:$0xff]  }
  0x18   : > { %v374_v42 = vmax.f32 %v342_v34, 0.0  ;;  %v381_v43 = vmax.f32 %v349_v35, 0.0  ;;  %v5324_v44 = vadd.f32 %v5289_v5, %v329_v32  ;;  %1810 = vmatpush.bf16.msra.mxu0 %v4910_v28  ;;  %5185 = vmatpush.bf16.msra.mxu1 %v4910_v28  ;;  %v382_v46 = vmax.f32 %v350_v37, 0.0  ;;  %v855_v27 = vld [vmem:[#allocation2 + $0xd8] sm:$0xf] }
  0x19   : > { %v389_v47 = vmax.f32 %v357_v38, 0.0  ;;  %v390_v48 = vmax.f32 %v358_v39, 0.0  ;;  %v5330_v49 = vadd.f32 %v5289_v5, %v330_v40  ;;  %5186 = vmatpush.bf16.msra.mxu2 %v4910_v28  ;;  %5187 = vmatpush.bf16.msra.mxu3 %v4910_v28  ;;  %v5332_v50 = vpack.c.bf16 %v373_v41, %v373_v41 }
  0x1a   : > { %v5334_v51 = vpack.c.bf16 %v374_v42, %v374_v42  ;;  %v5336_v52 = vpack.c.bf16 %v381_v43, %v381_v43  ;;  %v5341_v54 = vpack.c.bf16 %v382_v46, %v382_v46  ;;  %v397_v57 = vmax.f32 %v5324_v44, 0.0  ;;  %v485_v43 = vld [vmem:[#allocation2 + $0x30] sm:$0x1] }
  0x1b   : > { %v5343_v55 = vpack.c.bf16 %v389_v47, %v389_v47  ;;  %v5345_v56 = vpack.c.bf16 %v390_v48, %v390_v48  ;;  %v533_v58 = vshrl.u32 %v5332_v50, 16  ;;  %v536_v59 = vshll.u32 %v5332_v50, 16  ;;  %447 = vst [vmem:[#allocation2 + $0x1c] sm:$0xf] %v5332_v50 }
  0x1c   : > { %v541_v60 = vshrl.u32 %v5334_v51, 16  ;;  %v544_v61 = vshll.u32 %v5334_v51, 16  ;;  %1811 = vmatpush.bf16.msra.mxu0 %v4909_v45  ;;  %5188 = vmatpush.bf16.msra.mxu1 %v4909_v45  ;;  %448 = vst [vmem:[#allocation2 + $0x28] sm:$0xf] %v5334_v51  ;;  %v6563_v63 = vshrl.u32 %v5336_v52, 16  ;;  %v6562_v0 = vshll.u32 %v5336_v52, 16 }
  0x1d   : > { %v6554_v1 = vshrl.u32 %v5341_v54, 16  ;;  %v6555_v4 = vshll.u32 %v5341_v54, 16  ;;  %5189 = vmatpush.bf16.msra.mxu2 %v4909_v45  ;;  %5190 = vmatpush.bf16.msra.mxu3 %v4909_v45  ;;  %v535_v7 = vrot.slane %v533_v58, 7  ;;  %455 = vst [vmem:[#allocation2 + $0x7c] sm:$0xf] %v5336_v52  ;;  %v6545_v9 = vshrl.u32 %v5343_v55, 16 }
  0x1e   : > { %v543_v8 = vrot.slane %v541_v60, 7  ;;  %v398_v10 = vmax.f32 %v5330_v49, 0.0  ;;  %v599_v13 = vrot.slane %v6563_v63, 7  ;;  %456 = vst [vmem:[#allocation2 + $0x88] sm:$0xf] %v5341_v54  ;;  %v6544_v15 = vshll.u32 %v5343_v55, 16 }
  0x1f   : > { %v607_v14 = vrot.slane %v6554_v1, 7  ;;  %v6546_v16 = vshrl.u32 %v5345_v56, 16  ;;  %v538_v18 = vor.u32 %v536_v59, %v535_v7  ;;  %v539_v19 = vrot.slane %v535_v7, 4  ;;  %463 = vst [vmem:[#allocation2 + $0xdc] sm:$0xf] %v5343_v55  ;;  %v4921_v7 = vld [vmem:[%s6528_s3 + $0x138] sm:$0xff] }
  0x20   : > { %v546_v20 = vor.u32 %v544_v61, %v543_v8  ;;  %v663_v22 = vrot.slane %v6545_v9, 7  ;;  %1812 = vmatpush.bf16.msra.mxu0 %v4908_v53  ;;  %5191 = vmatpush.bf16.msra.mxu1 %v4908_v53  ;;  %v602_v23 = vor.u32 %v6562_v0, %v599_v13  ;;  %v603_v24 = vrot.slane %v599_v13, 4  ;;  %464 = vst [vmem:[#allocation2 + $0xe8] sm:$0xf] %v5345_v56  ;;  %v497_v45 = vld [vmem:[#allocation2 + $0x90] sm:$0x1] }
  0x21   : > { %v610_v25 = vor.u32 %v6555_v4, %v607_v14  ;;  %v671_v26 = vrot.slane %v6546_v16, 7  ;;  %5192 = vmatpush.bf16.msra.mxu2 %v4908_v53  ;;  %5193 = vmatpush.bf16.msra.mxu3 %v4908_v53  ;;  %v824_v29 = vsel %vm5376_vm7, %v538_v18, %v823_v62  ;;  %v6543_v35 = vshll.u32 %v5345_v56, 16  ;;  %v4841_v62 = vld [vmem:[%s6528_s3 + $0x38] sm:$0xff] }
  0x22   : > { %v547_v28 = vsel %vm5360_vm6, %v539_v19, %v546_v20  ;;  %v666_v30 = vor.u32 %v6544_v15, %v663_v22  ;;  %825 = vst [vmem:[#allocation2 + $0x18] sm:$0xf] %v824_v29  ;;  %v840_v33 = vsel %vm5376_vm7, %v602_v23, %v839_v21  ;;  %v667_v34 = vrot.slane %v663_v22, 4  ;;  %v871_v20 = vld [vmem:[#allocation2 + $0x138] sm:$0xf]  ;;  %v4928_v21 = vld [vmem:[%s6528_s3 + $0x170] sm:$0xff] }
  0x23   : > { %v611_v32 = vsel %vm5360_vm6, %v603_v24, %v610_v25  ;;  %826 = vst [vmem:[#allocation2 + $0x24] sm:$0xf] %v547_v28  ;;  %v5419_v38 = vpack.c.bf16 %v397_v57, %v397_v57  ;;  %v5421_v39 = vpack.c.bf16 %v398_v10, %v398_v10  ;;  %v5008_v40 = vunpack.c.l.bf16 %v5146_v17  ;;  %v4929_v57 = vld [vmem:[%s6528_s3 + $0x178] sm:$0xff]  ;;  %v4840_v22 = vld [vmem:[%s6528_s3 + $0x30] sm:$0xff] }
  0x24   : > { %v856_v37 = vsel %vm5376_vm7, %v666_v30, %v855_v27  ;;  %1813 = vmatpush.bf16.msra.mxu0 %v4907_v11  ;;  %5194 = vmatpush.bf16.msra.mxu1 %v4907_v11  ;;  %841 = vst [vmem:[#allocation2 + $0x78] sm:$0xf] %v840_v33  ;;  %v674_v41 = vor.u32 %v6543_v35, %v671_v26  ;;  %v5009_v42 = vunpack.c.h.bf16 %v5146_v17  ;;  %v5024_v44 = vunpack.c.l.bf16 %v5150_v31  ;;  %v4849_v17 = vld [vmem:[%s6528_s3 + $0x78] sm:$0xff]  ;;  %v5154_v26 = vld [vmem:[%s5284_s29 + $0x48] sm:$0xff]   ;;  %v5463_v27 = vld [vmem:[#allocation2 + $0xf0] sm:$0x1] }
  0x25   : > { %5195 = vmatpush.bf16.msra.mxu2 %v4907_v11  ;;  %5196 = vmatpush.bf16.msra.mxu3 %v4907_v11  ;;  %842 = vst [vmem:[#allocation2 + $0x84] sm:$0xf] %v611_v32  ;;  %v6533_v46 = vshrl.u32 %v5419_v38, 16  ;;  %v6532_v47 = vshll.u32 %v5419_v38, 16  ;;  %v6534_v48 = vshrl.u32 %v5421_v39, 16  ;;  %v6531_v49 = vshll.u32 %v5421_v39, 16 }
  0x26   : > { %v675_v53 = vsel %vm5360_vm6, %v667_v34, %v674_v41  ;;  %857 = vst [vmem:[#allocation2 + $0xd8] sm:$0xf] %v856_v37  ;;  %v307_v8 = vmul.f32 %v5272_v2, %v5008_v40  ;;  %v308_v10 = vmul.f32 %v5272_v2, %v5009_v42  ;;  %v5025_v11 = vunpack.c.h.bf16 %v5150_v31 }
  0x27   : > { %858 = vst [vmem:[#allocation2 + $0xe4] sm:$0xf] %v675_v53  ;;  %v727_v13 = vrot.slane %v6533_v46, 7  ;;  %v735_v14 = vrot.slane %v6534_v48, 7  ;;  %v486_v18 = vsel %vm5275_vm2, 0, %v485_v43  ;;  %v315_v19 = vmul.f32 %v5272_v2, %v5024_v44 }
  0x28   : > { %1814 = vmatpush.bf16.msra.mxu0 %v4906_v36  ;;  %5197 = vmatpush.bf16.msra.mxu1 %v4906_v36  ;;  %471 = vst [vmem:[#allocation2 + $0x13c] sm:$0xf] %v5419_v38  ;;  %v343_v23 = vadd.f32 %v5289_v5, %v307_v8  ;;  %v344_v24 = vadd.f32 %v5289_v5, %v308_v10  ;;  %v498_v32 = vsel %vm5275_vm2, 0, %v497_v45  ;;  %v5479_v45 = vld [vmem:[%s5284_s29 + $0x68] sm:$0xff]   ;;  %v5756_v0 = vrot.slane %v541_v60, 4 }
  0x29   : > { %v316_v25 = vmul.f32 %v5272_v2, %v5025_v11  ;;  %5198 = vmatpush.bf16.msra.mxu2 %v4906_v36  ;;  %5199 = vmatpush.bf16.msra.mxu3 %v4906_v36  ;;  %v3872_v28 = vld [vmem:[#allocation2 + $0x18] sm:$0xf]  ;;  %v730_v29 = vor.u32 %v6532_v47, %v727_v13  ;;  %v731_v30 = vrot.slane %v727_v13, 4  ;;  %v738_v31 = vor.u32 %v6531_v49, %v735_v14 }
  0x2a   : > { %472 = vst [vmem:[#allocation2 + $0x148] sm:$0xf] %v5421_v39  ;;  %v4859_v33 = vld [vmem:[#allocation2 + $0x20] sm:$0xf0]  ;;  %v375_v34 = vmax.f32 %v343_v23, 0.0  ;;  %v376_v37 = vmax.f32 %v344_v24, 0.0  ;;  %v351_v36 = vadd.f32 %v5289_v5, %v315_v19  ;;  %v5040_v14 = vunpack.c.l.bf16 %v5154_v26 }
  0x2b   : > { %487 = vst [vmem:[#allocation2 + $0x30] sm:$0x1] %v486_v18  ;;  %v352_v40 = vadd.f32 %v5289_v5, %v316_v25  ;;  %v3873_v41 = vor.u32 %v4859_v33, %v3872_v28  ;;  %v3920_v42 = vld [vmem:[#allocation2 + $0x78] sm:$0xf]  ;;  %v739_v43 = vsel %vm5360_vm6, %v731_v30, %v738_v31  ;;  %v872_v44 = vsel %vm5376_vm7, %v730_v29, %v871_v20 }
  0x2c   : > { %1896 = vmatpush.bf16.msrb.mxu1 %v4921_v7  ;;  %2563 = vmatpush.bf16.msrb.mxu0 %v4849_v17  ;;  %499 = vst [vmem:[#allocation2 + $0x90] sm:$0x1] %v498_v32  ;;  %v4871_v53 = vld [vmem:[#allocation2 + $0x80] sm:$0xf0]  ;;  %v383_v8 = vmax.f32 %v351_v36, 0.0  ;;  %v5041_v18 = vunpack.c.h.bf16 %v5154_v26  ;;  %v510_v7 = vsel %vm5275_vm2, 0, %v5463_v27  ;;  %v5056_v27 = vunpack.c.l.bf16 %v5479_v45 }
  0x2d   : > { %1985 = vmatpush.bf16.msrb.mxu2 %v4929_v57  ;;  %2474 = vmatpush.bf16.msrb.mxu3 %v4841_v62  ;;  %873 = vst [vmem:[#allocation2 + $0x138] sm:$0xf] %v872_v44  ;;  %v5481_v57 = vpack.c.bf16 %v375_v34, %v375_v34  ;;  %v5483_v62 = vpack.c.bf16 %v376_v37, %v376_v37  ;;  %v384_v10 = vmax.f32 %v352_v40, 0.0  ;;  %v3968_v13 = vld [vmem:[#allocation2 + $0xd8] sm:$0xf]  ;;  %v4920_v44 = vld [vmem:[%s6528_s3 + $0x130] sm:$0xff] }
  0x2e   : > { %1815 = vmatmul.bf16.vlgmr.msra.gmra.mxu0 %v3873_v41  ;;  %v3921_v11 = vor.u32 %v4871_v53, %v3920_v42  ;;  %874 = vst [vmem:[#allocation2 + $0x144] sm:$0xf] %v739_v43  ;;  %v4883_v17 = vld [vmem:[#allocation2 + $0xe0] sm:$0xf0]  ;;  %v5493_v26 = vpack.c.bf16 %v383_v8, %v383_v8  ;;  %v323_v29 = vmul.f32 %v5272_v2, %v5040_v14  ;;  %v5519_v53 = vld [vmem:[%s5284_s29 + $0x10] sm:$0xff]   ;;  %v5057_v14 = vunpack.c.h.bf16 %v5479_v45 }
  0x2f   : > { %v549_v19 = vshrl.u32 %v5481_v57, 16  ;;  %v552_v20 = vshll.u32 %v5481_v57, 16  ;;  %v6578_v23 = vshrl.u32 %v5483_v62, 16  ;;  %v560_v24 = vshll.u32 %v5483_v62, 16  ;;  %449 = vst [vmem:[#allocation2 + $0x34] sm:$0xf] %v5481_v57 }
  0x30   : > { %1835 = vmatmul.bf16.vlgmr.msra.gmra.mxu1 %v3921_v11  ;;  %v3969_v25 = vor.u32 %v4883_v17, %v3968_v13  ;;  %v5495_v28 = vpack.c.bf16 %v384_v10, %v384_v10  ;;  %450 = vst [vmem:[#allocation2 + $0x40] sm:$0xf] %v5483_v62  ;;  %v324_v30 = vmul.f32 %v5272_v2, %v5041_v18  ;;  %v6550_v32 = vshrl.u32 %v5493_v26, 16 }
  0x31   : > { %1986 = vmatpush.bf16.msrb.mxu2 %v4928_v21  ;;  %2475 = vmatpush.bf16.msrb.mxu3 %v4840_v22  ;;  %v551_v21 = vrot.slane %v549_v19, 7  ;;  %v559_v22 = vrot.slane %v6578_v23, 7  ;;  %v6549_v33 = vshll.u32 %v5493_v26, 16  ;;  %457 = vst [vmem:[#allocation2 + $0x94] sm:$0xf] %v5493_v26  ;;  %v359_v43 = vadd.f32 %v5289_v5, %v323_v29  ;;  %v4927_v29 = vld [vmem:[%s6528_s3 + $0x168] sm:$0xff] }
  0x32   : > { %1855 = vmatmul.bf16.vlgmr.msra.gmra.mxu2 %v3969_v25  ;;  %v827_v31 = vld [vmem:[#allocation2 + $0x30] sm:$0xf]  ;;  %v6547_v34 = vshrl.u32 %v5495_v28, 16  ;;  %v6548_v37 = vshll.u32 %v5495_v28, 16  ;;  %v615_v10 = vrot.slane %v6550_v32, 7  ;;  %v360_v13 = vadd.f32 %v5289_v5, %v324_v30  ;;  %1897 = vmatpush.bf16.msrb.mxu1 %v4920_v44 }
  0x33   : > { %v554_v36 = vor.u32 %v552_v20, %v551_v21  ;;  %v555_v40 = vrot.slane %v551_v21, 4  ;;  %v562_v41 = vor.u32 %v560_v24, %v559_v22  ;;  %v843_v42 = vld [vmem:[#allocation2 + $0x90] sm:$0xf]  ;;  %458 = vst [vmem:[#allocation2 + $0xa0] sm:$0xf] %v5495_v28  ;;  %v391_v21 = vmax.f32 %v359_v43, 0.0 }
  0x34   : > { %v4016_v8 = vld [vmem:[#allocation2 + $0x138] sm:$0xf]  ;;  %v623_v11 = vrot.slane %v6547_v34, 7  ;;  %511 = vst [vmem:[#allocation2 + $0xf0] sm:$0x1] %v510_v7  ;;  %v331_v22 = vmul.f32 %v5272_v2, %v5056_v27  ;;  %v618_v45 = vor.u32 %v6549_v33, %v615_v10  ;;  %v619_v30 = vrot.slane %v615_v10, 4 }
  0x35   : > { %v4895_v18 = vld [vmem:[#allocation2 + $0x140] sm:$0xf0]  ;;  %v563_v17 = vsel %vm5360_vm6, %v555_v40, %v562_v41  ;;  %v828_v25 = vsel %vm5376_vm7, %v554_v36, %v827_v31  ;;  %v4839_v7 = vld [vmem:[%s6528_s3 + $0x28] sm:$0xff]  ;;  %v4848_v27 = vld [vmem:[%s6528_s3 + $0x70] sm:$0xff]  ;;  %v392_v36 = vmax.f32 %v360_v13, 0.0  ;;  %v5549_v41 = vpack.c.bf16 %v391_v21, %v391_v21  ;;  %1987 = vmatpush.bf16.msrb.mxu2 %v4927_v29 }
  0x36   : > { %v4017_v49 = vor.u32 %v4895_v18, %v4016_v8  ;;  %829 = vst [vmem:[#allocation2 + $0x30] sm:$0xf] %v828_v25  ;;  %v626_v40 = vor.u32 %v6548_v37, %v623_v11  ;;  %v4919_v31 = vld [vmem:[%s6528_s3 + $0x128] sm:$0xff]  ;;  %v332_v43 = vmul.f32 %v5272_v2, %v5057_v14  ;;  %v367_v44 = vadd.f32 %v5289_v5, %v331_v22  ;;  %v521_v8 = vld [vmem:[#allocation2 + $0x150] sm:$0x1]  ;;  %v4926_v10 = vld [vmem:[%s6528_s3 + $0x160] sm:$0xff] }
  0x37   : > { %830 = vst [vmem:[#allocation2 + $0x3c] sm:$0xf] %v563_v17  ;;  %v844_v13 = vsel %vm5376_vm7, %v618_v45, %v843_v42  ;;  %2564 = vmatpush.bf16.msrb.mxu0 %v4848_v27  ;;  %v4847_v14 = vld [vmem:[%s6528_s3 + $0x68] sm:$0xff]  ;;  %v5012_v18 = vunpack.c.l.bf16 %v5519_v53  ;;  %v5564_v17 = vpack.c.bf16 %v392_v36, %v392_v36  ;;  %v6535_v25 = vshrl.u32 %v5549_v41, 16  ;;  %2476 = vmatpush.bf16.msrb.mxu3 %v4839_v7  ;;  %v4838_v42 = vld [vmem:[%s6528_s3 + $0x20] sm:$0xff]  ;;  %v5573_v22 = vld [vmem:[%s5284_s29 + $0x30] sm:$0xff]  }
  0x38   : > { %1875 = vmatmul.bf16.vlgmr.msra.gmra.mxu3 %v4017_v49  ;;  %v627_v11 = vsel %vm5360_vm6, %v619_v30, %v626_v40  ;;  %845 = vst [vmem:[#allocation2 + $0x90] sm:$0xf] %v844_v13  ;;  %v6536_v49 = vshll.u32 %v5549_v41, 16  ;;  %v368_v21 = vadd.f32 %v5289_v5, %v332_v43  ;;  %1898 = vmatpush.bf16.msrb.mxu1 %v4919_v31  ;;  %v399_v29 = vmax.f32 %v367_v44, 0.0  ;;  %v488_v27 = vld [vmem:[#allocation2 + $0x48] sm:$0x1] }
  0x39   : > { %846 = vst [vmem:[#allocation2 + $0x9c] sm:$0xf] %v627_v11  ;;  %v522_v45 = vsel %vm5275_vm2, 0, %v521_v8  ;;  %v5013_v30 = vunpack.c.h.bf16 %v5519_v53  ;;  %v309_v40 = vmul.f32 %v5272_v2, %v5012_v18  ;;  %v679_v7 = vrot.slane %v6535_v25, 7  ;;  %1988 = vmatpush.bf16.msrb.mxu2 %v4926_v10 }
  0x3a   : > { %v6537_v31 = vshrl.u32 %v5564_v17, 16  ;;  %v6539_v36 = vshll.u32 %v5564_v17, 16  ;;  %465 = vst [vmem:[#allocation2 + $0xf4] sm:$0xf] %v5549_v41  ;;  %v400_v43 = vmax.f32 %v368_v21, 0.0  ;;  %v5585_v8 = vpack.c.bf16 %v399_v29, %v399_v29 }
  0x3b   : > { %v859_v44 = vld [vmem:[#allocation2 + $0xf0] sm:$0xf]  ;;  %466 = vst [vmem:[#allocation2 + $0x100] sm:$0xf] %v5564_v17  ;;  %2565 = vmatpush.bf16.msrb.mxu0 %v4847_v14  ;;  %v310_v53 = vmul.f32 %v5272_v2, %v5013_v30  ;;  %v345_v11 = vadd.f32 %v5289_v5, %v309_v40  ;;  %v5028_v13 = vunpack.c.l.bf16 %v5573_v22  ;;  %v682_v47 = vor.u32 %v6536_v49, %v679_v7  ;;  %v500_v49 = vld [vmem:[#allocation2 + $0xa8] sm:$0x1] }
  0x3c   : > { %v683_v46 = vrot.slane %v679_v7, 4  ;;  %v687_v10 = vrot.slane %v6537_v31, 7  ;;  %2477 = vmatpush.bf16.msrb.mxu3 %v4838_v42  ;;  %v489_v21 = vsel %vm5275_vm2, 0, %v488_v27  ;;  %v5596_v14 = vpack.c.bf16 %v400_v43, %v400_v43  ;;  %523 = vst [vmem:[#allocation2 + $0x150] sm:$0x1] %v522_v45 }
  0x3d   : > { %v3884_v18 = vld [vmem:[#allocation2 + $0x30] sm:$0xf]  ;;  %v6538_v30 = vshrl.u32 %v5585_v8, 16  ;;  %v6541_v40 = vshll.u32 %v5585_v8, 16  ;;  %v346_v48 = vadd.f32 %v5289_v5, %v310_v53  ;;  %v860_v42 = vsel %vm5376_vm7, %v682_v47, %v859_v44  ;;  %473 = vst [vmem:[#allocation2 + $0x154] sm:$0xf] %v5585_v8 }
  0x3e   : > { %v4862_v29 = vld [vmem:[#allocation2 + $0x38] sm:$0xf0]  ;;  %v690_v7 = vor.u32 %v6539_v36, %v687_v10  ;;  %v377_v27 = vmax.f32 %v345_v11, 0.0  ;;  %861 = vst [vmem:[#allocation2 + $0xf0] sm:$0xf] %v860_v42  ;;  %v6542_v31 = vshrl.u32 %v5596_v14, 16  ;;  %v5029_v53 = vunpack.c.h.bf16 %v5573_v22 }
  0x3f   : > { %v3885_v25 = vor.u32 %v4862_v29, %v3884_v18  ;;  %v3932_v43 = vld [vmem:[#allocation2 + $0x90] sm:$0xf]  ;;  %v743_v45 = vrot.slane %v6538_v30, 7  ;;  %v317_v18 = vmul.f32 %v5272_v2, %v5028_v13  ;;  %v6540_v44 = vshll.u32 %v5596_v14, 16  ;;  %474 = vst [vmem:[#allocation2 + $0x160] sm:$0xf] %v5596_v14 }
  0x40   : > { %v4874_v10 = vld [vmem:[#allocation2 + $0x98] sm:$0xf0]  ;;  %v691_v47 = vsel %vm5360_vm6, %v683_v46, %v690_v7  ;;  %v378_v11 = vmax.f32 %v346_v48, 0.0  ;;  %v5615_v29 = vpack.c.bf16 %v377_v27, %v377_v27  ;;  %v5155_v13 = vld [vmem:[%s5284_s29 + $0x50] sm:$0xff]   ;;  %490 = vst [vmem:[#allocation2 + $0x48] sm:$0x1] %v489_v21  ;;  %v318_v27 = vmul.f32 %v5272_v2, %v5029_v53 }
  0x41   : > { %1820 = vmatmul.bf16.gmra.mxu0 %v3885_v25  ;;  %v3933_v42 = vor.u32 %v4874_v10, %v3932_v43  ;;  %862 = vst [vmem:[#allocation2 + $0xfc] sm:$0xf] %v691_v47  ;;  %v746_v30 = vor.u32 %v6541_v40, %v743_v45  ;;  %v747_v22 = vrot.slane %v743_v45, 4  ;;  %v751_v25 = vrot.slane %v6542_v31, 7  ;;  %v512_v10 = vld [vmem:[#allocation2 + $0x108] sm:$0x1] }
  0x42   : > { %v5622_v36 = vpack.c.bf16 %v378_v11, %v378_v11  ;;  %v6575_v46 = vshrl.u32 %v5615_v29, 16  ;;  %v6570_v7 = vshll.u32 %v5615_v29, 16  ;;  %451 = vst [vmem:[#allocation2 + $0x4c] sm:$0xf] %v5615_v29  ;;  %v353_v43 = vadd.f32 %v5289_v5, %v317_v18  ;;  %v5159_v40 = vld [vmem:[%s5284_s29 + $0x70] sm:$0xff]  }
  0x43   : > { %1840 = vmatmul.bf16.gmra.mxu1 %v3933_v42  ;;  %v754_v48 = vor.u32 %v6540_v44, %v751_v25  ;;  %v501_v45 = vsel %vm5275_vm2, 0, %v500_v49  ;;  %v875_v21 = vld [vmem:[#allocation2 + $0x150] sm:$0xf]  ;;  %v5044_v25 = vunpack.c.l.bf16 %v5155_v13  ;;  %v354_v49 = vadd.f32 %v5289_v5, %v318_v27 }
  0x44   : > { %v567_v47 = vrot.slane %v6575_v46, 7  ;;  %v6564_v11 = vshrl.u32 %v5622_v36, 16  ;;  %v6569_v42 = vshll.u32 %v5622_v36, 16  ;;  %v876_v53 = vsel %vm5376_vm7, %v746_v30, %v875_v21  ;;  %452 = vst [vmem:[#allocation2 + $0x58] sm:$0xf] %v5622_v36  ;;  %v4918_v21 = vld [vmem:[%s6528_s3 + $0x120] sm:$0xff] }
  0x45   : > { %v755_v44 = vsel %vm5360_vm6, %v747_v22, %v754_v48  ;;  %v385_v18 = vmax.f32 %v353_v43, 0.0  ;;  %v3980_v31 = vld [vmem:[#allocation2 + $0xf0] sm:$0xf]  ;;  %877 = vst [vmem:[#allocation2 + $0x150] sm:$0xf] %v876_v53  ;;  %v5045_v16 = vunpack.c.h.bf16 %v5155_v13  ;;  %v386_v22 = vmax.f32 %v354_v49, 0.0  ;;  %1899 = vmatpush.bf16.msrb.mxu1 %v4918_v21 }
  0x46   : > { %v570_v35 = vor.u32 %v6570_v7, %v567_v47  ;;  %v571_v15 = vrot.slane %v567_v47, 4  ;;  %v575_v9 = vrot.slane %v6564_v11, 7  ;;  %878 = vst [vmem:[#allocation2 + $0x15c] sm:$0xf] %v755_v44  ;;  %v325_v30 = vmul.f32 %v5272_v2, %v5044_v25  ;;  %v524_v43 = vld [vmem:[#allocation2 + $0x168] sm:$0x1] }
  0x47   : > { %v5648_v48 = vpack.c.bf16 %v385_v18, %v385_v18  ;;  %v513_v27 = vsel %vm5275_vm2, 0, %v512_v10  ;;  %v4925_v47 = vld [vmem:[%s6528_s3 + $0x158] sm:$0xff]  ;;  %502 = vst [vmem:[#allocation2 + $0xa8] sm:$0x1] %v501_v45  ;;  %v326_v13 = vmul.f32 %v5272_v2, %v5045_v16  ;;  %v5060_v25 = vunpack.c.l.bf16 %v5159_v40  ;;  %v4846_v18 = vld [vmem:[%s6528_s3 + $0x60] sm:$0xff]  ;;  %v4924_v21 = vld [vmem:[%s6528_s3 + $0x150] sm:$0xff] }
  0x48   : > { %v4886_v53 = vld [vmem:[#allocation2 + $0xf8] sm:$0xf0]  ;;  %v578_v44 = vor.u32 %v6569_v42, %v575_v9  ;;  %v5061_v49 = vunpack.c.h.bf16 %v5159_v40  ;;  %v831_v37 = vld [vmem:[#allocation2 + $0x48] sm:$0xf]  ;;  %v5668_v33 = vpack.c.bf16 %v386_v22, %v386_v22  ;;  %1989 = vmatpush.bf16.msrb.mxu2 %v4925_v47  ;;  %v361_v32 = vadd.f32 %v5289_v5, %v325_v30  ;;  %514 = vst [vmem:[#allocation2 + $0x108] sm:$0x1] %v513_v27 }
  0x49   : > { %v4837_v10 = vld [vmem:[%s6528_s3 + $0x18] sm:$0xff]  ;;  %v3981_v34 = vor.u32 %v4886_v53, %v3980_v31  ;;  %v6551_v9 = vshrl.u32 %v5648_v48, 16  ;;  %v6552_v45 = vshll.u32 %v5648_v48, 16  ;;  %459 = vst [vmem:[#allocation2 + $0xac] sm:$0xf] %v5648_v48  ;;  %v832_v40 = vsel %vm5376_vm7, %v570_v35, %v831_v37  ;;  %v4836_v27 = vld [vmem:[%s6528_s3 + $0x10] sm:$0xff]  ;;  %2566 = vmatpush.bf16.msrb.mxu0 %v4846_v18 }
  0x4a   : > { %v579_v16 = vsel %vm5360_vm6, %v571_v15, %v578_v44  ;;  %v362_v31 = vadd.f32 %v5289_v5, %v326_v13  ;;  %v4917_v22 = vld [vmem:[%s6528_s3 + $0x118] sm:$0xff]  ;;  %833 = vst [vmem:[#allocation2 + $0x48] sm:$0xf] %v832_v40  ;;  %v6553_v35 = vshrl.u32 %v5668_v33, 16  ;;  %v6558_v37 = vshll.u32 %v5668_v33, 16  ;;  %2478 = vmatpush.bf16.msrb.mxu3 %v4837_v10 }
  0x4b   : > { %v5148_v47 = vld [vmem:[%s5284_s29 + $0x18] sm:$0xff]   ;;  %1860 = vmatmul.bf16.gmra.mxu2 %v3981_v34  ;;  %v631_v15 = vrot.slane %v6551_v9, 7  ;;  %v333_v30 = vmul.f32 %v5272_v2, %v5060_v25  ;;  %834 = vst [vmem:[#allocation2 + $0x54] sm:$0xf] %v579_v16  ;;  %v393_v53 = vmax.f32 %v361_v32, 0.0  ;;  %v334_v34 = vmul.f32 %v5272_v2, %v5061_v49  ;;  %1900 = vmatpush.bf16.msrb.mxu1 %v4917_v22 }
  0x4c   : > { %v394_v44 = vmax.f32 %v362_v31, 0.0  ;;  %v525_v13 = vsel %vm5275_vm2, 0, %v524_v43  ;;  %v4845_v40 = vld [vmem:[%s6528_s3 + $0x58] sm:$0xff]  ;;  %v4028_v9 = vld [vmem:[#allocation2 + $0x150] sm:$0xf]  ;;  %v639_v16 = vrot.slane %v6553_v35, 7  ;;  %1990 = vmatpush.bf16.msrb.mxu2 %v4924_v21 }
  0x4d   : > { %v634_v25 = vor.u32 %v6552_v45, %v631_v15  ;;  %v635_v10 = vrot.slane %v631_v15, 4  ;;  %460 = vst [vmem:[#allocation2 + $0xb8] sm:$0xf] %v5668_v33  ;;  %v369_v32 = vadd.f32 %v5289_v5, %v333_v30  ;;  %v4898_v43 = vld [vmem:[#allocation2 + $0x158] sm:$0xf0]  ;;  %v5706_v49 = vpack.c.bf16 %v393_v53, %v393_v53  ;;  %2567 = vmatpush.bf16.msrb.mxu0 %v4845_v40 }
  0x4e   : > { %v5708_v18 = vpack.c.bf16 %v394_v44, %v394_v44  ;;  %v370_v31 = vadd.f32 %v5289_v5, %v334_v34  ;;  %526 = vst [vmem:[#allocation2 + $0x168] sm:$0x1] %v525_v13  ;;  %v5016_v45 = vunpack.c.l.bf16 %v5148_v47  ;;  %v4029_v15 = vor.u32 %v4898_v43, %v4028_v9  ;;  %v847_v1 = vld [vmem:[#allocation2 + $0xa8] sm:$0xf]  ;;  %2479 = vmatpush.bf16.msrb.mxu3 %v4836_v27  ;;  %v5152_v9 = vld [vmem:[%s5284_s29 + $0x38] sm:$0xff]  }
  0x4f   : > { %v642_v35 = vor.u32 %v6558_v37, %v639_v16  ;;  %v401_v4 = vmax.f32 %v369_v32, 0.0  ;;  %v5017_v30 = vunpack.c.h.bf16 %v5148_v47  ;;  %v848_v22 = vsel %vm5376_vm7, %v634_v25, %v847_v1  ;;  %467 = vst [vmem:[#allocation2 + $0x10c] sm:$0xf] %v5706_v49  ;;  %v863_v27 = vld [vmem:[#allocation2 + $0x108] sm:$0xf] }
  0x50   : > { %v6556_v21 = vshrl.u32 %v5706_v49, 16  ;;  %v6561_v53 = vshll.u32 %v5706_v49, 16  ;;  %v6557_v44 = vshrl.u32 %v5708_v18, 16  ;;  %1880 = vmatmul.bf16.gmra.mxu3 %v4029_v15  ;;  %849 = vst [vmem:[#allocation2 + $0xa8] sm:$0xf] %v848_v22  ;;  %v6559_v47 = vshll.u32 %v5708_v18, 16 }
  0x51   : > { %v643_v34 = vsel %vm5360_vm6, %v635_v10, %v642_v35  ;;  %v402_v13 = vmax.f32 %v370_v31, 0.0  ;;  %v5723_v1 = vpack.c.bf16 %v401_v4, %v401_v4  ;;  %v491_v25 = vld [vmem:[#allocation2 + $0x60] sm:$0x1]  ;;  %v3896_v16 = vld [vmem:[#allocation2 + $0x48] sm:$0xf]  ;;  %v311_v43 = vmul.f32 %v5272_v2, %v5016_v45 }
  0x52   : > { %850 = vst [vmem:[#allocation2 + $0xb4] sm:$0xf] %v643_v34  ;;  %v695_v32 = vrot.slane %v6556_v21, 7  ;;  %v703_v40 = vrot.slane %v6557_v44, 7  ;;  %v4865_v15 = vld [vmem:[#allocation2 + $0x50] sm:$0xf0]  ;;  %v312_v4 = vmul.f32 %v5272_v2, %v5017_v30  ;;  %v5032_v31 = vunpack.c.l.bf16 %v5152_v9 }
  0x53   : > { %468 = vst [vmem:[#allocation2 + $0x118] sm:$0xf] %v5708_v18  ;;  %v5731_v35 = vpack.c.bf16 %v402_v13, %v402_v13  ;;  %v6560_v10 = vshrl.u32 %v5723_v1, 16  ;;  %v3897_v22 = vor.u32 %v4865_v15, %v3896_v16  ;;  %v6565_v13 = vshll.u32 %v5723_v1, 16  ;;  %v503_v16 = vld [vmem:[#allocation2 + $0xc0] sm:$0x1] }
  0x54   : > { %v698_v34 = vor.u32 %v6561_v53, %v695_v32  ;;  %v699_v21 = vrot.slane %v695_v32, 4  ;;  %v706_v44 = vor.u32 %v6559_v47, %v703_v40  ;;  %475 = vst [vmem:[#allocation2 + $0x16c] sm:$0xf] %v5723_v1  ;;  %v347_v47 = vadd.f32 %v5289_v5, %v311_v43  ;;  %v5156_v53 = vld [vmem:[%s5284_s29 + $0x58] sm:$0xff]  }
  0x55   : > { %v759_v45 = vrot.slane %v6560_v10, 7  ;;  %v6566_v37 = vshrl.u32 %v5731_v35, 16  ;;  %v6567_v30 = vshll.u32 %v5731_v35, 16  ;;  %1825 = vmatmul.bf16.gmra.mxu0 %v3897_v22  ;;  %v879_v40 = vld [vmem:[#allocation2 + $0x168] sm:$0xf]  ;;  %v492_v10 = vsel %vm5275_vm2, 0, %v491_v25 }
  0x56   : > { %v707_v15 = vsel %vm5360_vm6, %v699_v21, %v706_v44  ;;  %v864_v32 = vsel %vm5376_vm7, %v698_v34, %v863_v27  ;;  %476 = vst [vmem:[#allocation2 + $0x178] sm:$0xf] %v5731_v35  ;;  %v348_v43 = vadd.f32 %v5289_v5, %v312_v4  ;;  %v379_v34 = vmax.f32 %v347_v47, 0.0  ;;  %v515_v47 = vld [vmem:[#allocation2 + $0x120] sm:$0x1] }
  0x57   : > { %865 = vst [vmem:[#allocation2 + $0x108] sm:$0xf] %v864_v32  ;;  %v762_v21 = vor.u32 %v6565_v13, %v759_v45  ;;  %v763_v44 = vrot.slane %v759_v45, 4  ;;  %v767_v27 = vrot.slane %v6566_v37, 7  ;;  %v3944_v22 = vld [vmem:[#allocation2 + $0xa8] sm:$0xf]  ;;  %v5033_v63 = vunpack.c.h.bf16 %v5152_v9 }
  0x58   : > { %866 = vst [vmem:[#allocation2 + $0x114] sm:$0xf] %v707_v15  ;;  %v319_v25 = vmul.f32 %v5272_v2, %v5032_v31  ;;  %v504_v45 = vsel %vm5275_vm2, 0, %v503_v16  ;;  %v5048_v13 = vunpack.c.l.bf16 %v5156_v53  ;;  %v380_v15 = vmax.f32 %v348_v43, 0.0  ;;  %v5779_v16 = vld [vmem:[%s6526_s1] ss:$0 sm:$0xff] }
  0x59   : > { %v4877_v11 = vld [vmem:[#allocation2 + $0xb0] sm:$0xf0]  ;;  %v770_v60 = vor.u32 %v6567_v30, %v767_v27  ;;  %v880_v32 = vsel %vm5376_vm7, %v762_v21, %v879_v40  ;;  %493 = vst [vmem:[#allocation2 + $0x60] sm:$0x1] %v492_v10  ;;  %v5770_v4 = vpack.c.bf16 %v379_v34, %v379_v34  ;;  %v320_v9 = vmul.f32 %v5272_v2, %v5033_v63  ;;  %v5793_v21 = vld [vmem:[%s5284_s29 + $0x78] sm:$0xff]  }
  0x5a   : > { %v3945_v37 = vor.u32 %v4877_v11, %v3944_v22  ;;  %881 = vst [vmem:[#allocation2 + $0x168] sm:$0xf] %v880_v32  ;;  %v355_v27 = vadd.f32 %v5289_v5, %v319_v25  ;;  %v5049_v10 = vunpack.c.h.bf16 %v5156_v53  ;;  %v327_v11 = vmul.f32 %v5779_v16, %v5048_v13  ;;  %v5789_v5 = vld [vmem:[%s6527_s2] ss:$0 sm:$0xff] }
  0x5b   : > { %v771_v31 = vsel %vm5360_vm6, %v763_v44, %v770_v60  ;;  %505 = vst [vmem:[#allocation2 + $0xc0] sm:$0x1] %v504_v45  ;;  %v5782_v40 = vpack.c.bf16 %v380_v15, %v380_v15  ;;  %v6568_v2 = vshrl.u32 %v5770_v4, 16  ;;  %v6573_v63 = vshll.u32 %v5770_v4, 16 }
  0x5c   : > { %1845 = vmatmul.bf16.gmra.mxu1 %v3945_v37  ;;  %882 = vst [vmem:[#allocation2 + $0x174] sm:$0xf] %v771_v31  ;;  %v356_v53 = vadd.f32 %v5789_v5, %v320_v9  ;;  %v387_v13 = vmax.f32 %v355_v27, 0.0  ;;  %v328_v37 = vmul.f32 %v5779_v16, %v5049_v10  ;;  %v363_v44 = vadd.f32 %v5789_v5, %v327_v11 }
  0x5d   : > { %453 = vst [vmem:[#allocation2 + $0x64] sm:$0xf] %v5770_v4  ;;  %v516_v22 = vsel %vm5275_vm2, 0, %v515_v47  ;;  %v583_v34 = vrot.slane %v6568_v2, 7  ;;  %v6571_v25 = vshrl.u32 %v5782_v40, 16  ;;  %v6572_v60 = vshll.u32 %v5782_v40, 16 }
  0x5e   : > { %v3992_v43 = vld [vmem:[#allocation2 + $0x108] sm:$0xf]  ;;  %v388_v32 = vmax.f32 %v356_v53, 0.0  ;;  %454 = vst [vmem:[#allocation2 + $0x70] sm:$0xf] %v5782_v40  ;;  %v5805_v15 = vpack.c.bf16 %v387_v13, %v387_v13  ;;  %v364_v9 = vadd.f32 %v5789_v5, %v328_v37  ;;  %v395_v31 = vmax.f32 %v363_v44, 0.0 }
  0x5f   : > { %v4889_v45 = vld [vmem:[#allocation2 + $0x110] sm:$0xf0]  ;;  %v5064_v27 = vunpack.c.l.bf16 %v5793_v21  ;;  %v586_v11 = vor.u32 %v6573_v63, %v583_v34  ;;  %v587_v30 = vrot.slane %v583_v34, 4  ;;  %v591_v53 = vrot.slane %v6571_v25, 7  ;;  %517 = vst [vmem:[#allocation2 + $0x120] sm:$0x1] %v516_v22 }
  0x60   : > { %v4916_v47 = vld [vmem:[%s6528_s3 + $0x110] sm:$0xff]  ;;  %v3993_v10 = vor.u32 %v4889_v45, %v3992_v43  ;;  %v835_v2 = vld [vmem:[#allocation2 + $0x60] sm:$0xf]  ;;  %v5816_v42 = vpack.c.bf16 %v388_v32, %v388_v32  ;;  %v6574_v37 = vshrl.u32 %v5805_v15, 16  ;;  %v6577_v44 = vshll.u32 %v5805_v15, 16  ;;  %v4923_v25 = vld [vmem:[%s6528_s3 + $0x148] sm:$0xff] }
  0x61   : > { %v4040_v13 = vld [vmem:[#allocation2 + $0x168] sm:$0xf]  ;;  %461 = vst [vmem:[#allocation2 + $0xc4] sm:$0xf] %v5805_v15  ;;  %v5821_v7 = vpack.c.bf16 %v395_v31, %v395_v31  ;;  %1901 = vmatpush.bf16.msrb.mxu1 %v4916_v47  ;;  %v594_v43 = vor.u32 %v6572_v60, %v591_v53  ;;  %v836_v34 = vsel %vm5376_vm7, %v586_v11, %v835_v2  ;;  %v396_v45 = vmax.f32 %v364_v9, 0.0 }
  0x62   : > { %1865 = vmatmul.bf16.gmra.mxu2 %v3993_v10  ;;  %v851_v22 = vld [vmem:[#allocation2 + $0xc0] sm:$0xf]  ;;  %v5065_v32 = vunpack.c.h.bf16 %v5793_v21  ;;  %v4835_v31 = vld [vmem:[%s6528_s3 + $0x8] sm:$0xff]  ;;  %837 = vst [vmem:[#allocation2 + $0x60] sm:$0xf] %v836_v34  ;;  %v647_v10 = vrot.slane %v6574_v37, 7  ;;  %v335_v2 = vmul.f32 %v5779_v16, %v5064_v27 }
  0x63   : > { %v4901_v47 = vld [vmem:[#allocation2 + $0x170] sm:$0xf0]  ;;  %v6576_v53 = vshrl.u32 %v5816_v42, 16  ;;  %v527_v9 = vld [vmem:[#allocation2 + $0x180] sm:$0x1]  ;;  %v595_v21 = vsel %vm5360_vm6, %v587_v30, %v594_v43  ;;  %v6580_v60 = vshll.u32 %v5816_v42, 16  ;;  %v5842_v63 = vpack.c.bf16 %v396_v45, %v396_v45  ;;  %1991 = vmatpush.bf16.msrb.mxu2 %v4923_v25  ;;  %2480 = vmatpush.bf16.msrb.mxu3 %v4835_v31 }
  0x64   : > { %v4041_v11 = vor.u32 %v4901_v47, %v4040_v13  ;;  %462 = vst [vmem:[#allocation2 + $0xd0] sm:$0xf] %v5816_v42  ;;  %v4844_v34 = vld [vmem:[%s6528_s3 + $0x50] sm:$0xff]  ;;  %v4915_v27 = vld [vmem:[%s6528_s3 + $0x108] sm:$0xff]  ;;  %v4922_v13 = vld [vmem:[%s6528_s3 + $0x140] sm:$0xff]  ;;  %v650_v30 = vor.u32 %v6577_v44, %v647_v10  ;;  %v651_v43 = vrot.slane %v647_v10, 4  ;;  %v336_v10 = vmul.f32 %v5779_v16, %v5065_v32 }
  0x65   : > { %838 = vst [vmem:[#allocation2 + $0x6c] sm:$0xf] %v595_v21  ;;  %v655_v25 = vrot.slane %v6576_v53, 7  ;;  %v6579_v45 = vshrl.u32 %v5821_v7, 16  ;;  %v4834_v47 = vld [vmem:[%s6528_s3] sm:$0xff]  ;;  %v6586_v37 = vshll.u32 %v5821_v7, 16  ;;  %2568 = vmatpush.bf16.msrb.mxu0 %v4844_v34  ;;  %v371_v23 = vadd.f32 %v5789_v5, %v335_v2  ;;  %1902 = vmatpush.bf16.msrb.mxu1 %v4915_v27 }
  0x66   : > { %1885 = vmatmul.bf16.gmra.mxu3 %v4041_v11  ;;  %v6587_v46 = vshrl.u32 %v5842_v63, 16  ;;  %v6585_v21 = vshll.u32 %v5842_v63, 16  ;;  %469 = vst [vmem:[#allocation2 + $0x124] sm:$0xf] %v5821_v7  ;;  %v4843_v31 = vld [vmem:[%s6528_s3 + $0x48] sm:$0xff]  ;;  %v852_v11 = vsel %vm5376_vm7, %v650_v30, %v851_v22  ;;  %v4914_v16 = vld [vmem:[%s6528_s3 + $0x100] sm:$0xff] }
  0x67   : > { %v658_v53 = vor.u32 %v6580_v60, %v655_v25  ;;  %v711_v44 = vrot.slane %v6579_v45, 7  ;;  %470 = vst [vmem:[#allocation2 + $0x130] sm:$0xf] %v5842_v63  ;;  %v867_v34 = vld [vmem:[#allocation2 + $0x120] sm:$0xf]  ;;  %v372_v25 = vadd.f32 %v5789_v5, %v336_v10  ;;  %v528_v22 = vsel %vm5275_vm2, 0, %v527_v9  ;;  %1992 = vmatpush.bf16.msrb.mxu2 %v4922_v13  ;;  %2481 = vmatpush.bf16.msrb.mxu3 %v4834_v47 }
  0x68   : > { %853 = vst [vmem:[#allocation2 + $0xc0] sm:$0xf] %v852_v11  ;;  %v719_v32 = vrot.slane %v6587_v46, 7  ;;  %v890_v30 = vld [vmem:[#allocation2 + $0x2c] sm:$0x8]  ;;  %v403_v60 = vmax.f32 %v371_v23, 0.0 }
  0x69   : > { %v659_v2 = vsel %vm5360_vm6, %v651_v43, %v658_v53  ;;  %v714_v27 = vor.u32 %v6586_v37, %v711_v44  ;;  %v715_v45 = vrot.slane %v711_v44, 4  ;;  %529 = vst [vmem:[#allocation2 + $0x180] sm:$0x1] %v528_v22  ;;  %v4842_v11 = vld [vmem:[%s6528_s3 + $0x40] sm:$0xff]  ;;  %v404_v9 = vmax.f32 %v372_v25, 0.0  ;;  %2569 = vmatpush.bf16.msrb.mxu0 %v4843_v31  ;;  %1903 = vmatpush.bf16.msrb.mxu1 %v4914_v16 }
  0x6a   : > { %v3908_v5 = vld [vmem:[#allocation2 + $0x60] sm:$0xf]  ;;  %854 = vst [vmem:[#allocation2 + $0xcc] sm:$0xf] %v659_v2  ;;  %v722_v3 = vor.u32 %v6585_v21, %v719_v32  ;;  %v5896_v13 = vpack.c.bf16 %v403_v60, %v403_v60  ;;  %vm938_vm10 = vsmask.f32 3328 }
  0x6b   : > { %v868_v53 = vsel %vm5376_vm7, %v714_v27, %v867_v34  ;;  %v5900_v43 = vpack.c.bf16 %v404_v9, %v404_v9  ;;  %vm939_vm12 = vsmask.f32 7440  ;;  %v891_v16 = vsel %vm5902_vm11, 0, %v890_v30  ;;  %v4993_v9 = vld [vmem:[%s6528_s3 + $0x1f8] sm:$0xff]  ;;  %vm5955_vm14 = vmand %vm820_vm4, %vm938_vm10  ;;  %v4986_v47 = vld [vmem:[%s6528_s3 + $0x1c0] sm:$0xff] }
  0x6c   : > { %v4868_v23 = vld [vmem:[#allocation2 + $0x68] sm:$0xf0]  ;;  %v723_v44 = vsel %vm5360_vm6, %v715_v45, %v722_v3  ;;  %869 = vst [vmem:[#allocation2 + $0x120] sm:$0xf] %v868_v53  ;;  %v6583_v60 = vshrl.u32 %v5896_v13, 16  ;;  %v6582_v31 = vshll.u32 %v5896_v13, 16  ;;  %vm5926_vm13 = vmor %vm938_vm10, %vm939_vm12  ;;  %3344 = vmatpush.bf16.msra.mxu3 %v4993_v9 }
  0x6d   : > { %v3909_v10 = vor.u32 %v4868_v23, %v3908_v5  ;;  %870 = vst [vmem:[#allocation2 + $0x12c] sm:$0xf] %v723_v44  ;;  %v6584_v32 = vshrl.u32 %v5900_v43, 16  ;;  %v6581_v45 = vshll.u32 %v5900_v43, 16  ;;  %2570 = vmatpush.bf16.msrb.mxu0 %v4842_v11  ;;  %v941_v34 = vrot.slane %v533_v58, 4 }
  0x6e   : > { %477 = vst [vmem:[#allocation2 + $0x184] sm:$0xf] %v5896_v13  ;;  %v942_v25 = vrot.slane %v536_v59, 5  ;;  %v775_v2 = vrot.slane %v6583_v60, 7  ;;  %v945_v30 = vrot.slane %v544_v61, 5  ;;  %v4985_v61 = vld [vmem:[%s6528_s3 + $0x1b8] sm:$0xff] }
  0x6f   : > { %1830 = vmatmul.bf16.gmra.mxu0 %v3909_v10  ;;  %v3956_v22 = vld [vmem:[#allocation2 + $0xc0] sm:$0xf]  ;;  %478 = vst [vmem:[#allocation2 + $0x190] sm:$0xf] %v5900_v43  ;;  %v783_v27 = vrot.slane %v6584_v32, 7  ;;  %v5221_v10 = vmov 0   ;;  %3255 = vmatpush.bf16.msra.mxu2 %v4985_v61 }
  0x70   : > { %v883_v11 = vld [vmem:[#allocation2 + $0x180] sm:$0xf]  ;;  %892 = vst [vmem:[#allocation2 + $0x2c] sm:$0x8] %v891_v16  ;;  %v943_v58 = vor.u32 %v942_v25, %v941_v34  ;;  %v778_v5 = vor.u32 %v6582_v31, %v775_v2  ;;  %v779_v3 = vrot.slane %v775_v2, 4  ;;  %v948_v51 = vor.u32 %v5756_v0, %v945_v30  ;;  %v4857_v16 = vld [vmem:[%s6528_s3 + $0xb8] sm:$0xff] }
  0x71   : > { %v4880_v59 = vld [vmem:[#allocation2 + $0xc8] sm:$0xf0]  ;;  %v786_v23 = vor.u32 %v6581_v45, %v783_v27  ;;  %437 = vst [vmem:[#allocation2] sm:$0xff] %v5221_v10  ;;  %v5001_v0 = vld [vmem:[%s6528_s3 + $0x238] sm:$0xff]  ;;  %2652 = vmatpush.bf16.msra.mxu1 %v4857_v16  ;;  %v951_v6 = vrot.slane %v552_v20, 5  ;;  %v6600_v57 = vshrl.u32 %v5483_v62, 16 }
  0x72   : > { %v3957_v53 = vor.u32 %v4880_v59, %v3956_v22  ;;  %v944_v44 = vrot.slane %v943_v58, 4  ;;  %v884_v25 = vsel %vm5376_vm7, %v778_v5, %v883_v11  ;;  %439 = vst [vmem:[#allocation2 + $0xc] sm:$0xff] %v5221_v10  ;;  %v949_v58 = vrot.slane %v948_v51, 4  ;;  %3433 = vmatpush.bf16.msra.mxu0 %v5001_v0  ;;  %v893_v51 = vld [vmem:[#allocation2 + $0x44] sm:$0x8]  ;;  %v4997_v45 = vld [vmem:[%s6528_s3 + $0x218] sm:$0xff] }
  0x73   : > { %v4004_v34 = vld [vmem:[#allocation2 + $0x120] sm:$0xf]  ;;  %v787_v2 = vsel %vm5360_vm6, %v779_v3, %v786_v23  ;;  %885 = vst [vmem:[#allocation2 + $0x180] sm:$0xf] %v884_v25  ;;  %v950_v11 = vrot.slane %v549_v19, 4  ;;  %v954_v19 = vrot.slane %v560_v24, 5 }
  0x74   : > { %1850 = vmatmul.bf16.gmra.mxu1 %v3957_v53  ;;  %v4892_v22 = vld [vmem:[#allocation2 + $0x128] sm:$0xf0]  ;;  %v946_v27 = vsel %vm5926_vm13, %v944_v44, %v945_v30  ;;  %886 = vst [vmem:[#allocation2 + $0x18c] sm:$0xf] %v787_v2  ;;  %v956_v20 = vrot.slane %v6600_v57, 4  ;;  %v894_v16 = vsel %vm5902_vm11, 0, %v893_v51 }
  0x75   : > { %v4005_v59 = vor.u32 %v4892_v22, %v4004_v34  ;;  %1117 = vst [vmem:[#allocation2 + $0x20] sm:$0xf] %v946_v27  ;;  %v952_v5 = vor.u32 %v951_v6, %v950_v11  ;;  %v4858_v22 = vld [vmem:[#allocation2 + $0x1c] sm:$0xf]  ;;  %v3874_v2 = vld [vmem:[#allocation2 + $0x24] sm:$0xf0] }
  0x76   : > { %438 = vst [vmem:[#allocation2 + $0x8] sm:$0xf] %v5221_v10  ;;  %v957_v24 = vor.u32 %v956_v20, %v954_v19  ;;  %v896_v27 = vld [vmem:[#allocation2 + $0x5c] sm:$0x8]  ;;  %v6601_v62 = vshrl.u32 %v5615_v29, 16  ;;  %v3877_v6 = vor.u32 %v4858_v22, %v3874_v2  ;;  %v6639_v60 = vshll.u32 %v5706_v49, 16 }
  0x77   : > { %1870 = vmatmul.bf16.gmra.mxu2 %v4005_v59  ;;  %v1119_v30 = vld [vmem:[#allocation2 + $0x2c] sm:$0xf]  ;;  %440 = vst [vmem:[#allocation2 + $0x14] sm:$0xf] %v5221_v10  ;;  %v953_v53 = vrot.slane %v952_v5, 4  ;;  %v6602_v59 = vshll.u32 %v5615_v29, 16 }
  0x78   : > { %v1120_v3 = vsel %vm5955_vm14, %v949_v58, %v1119_v30  ;;  %v4786_v61 = vld [vmem:[#allocation2 + $0x4] sm:$0xf]  ;;  %442 = vst [vmem:[#allocation2 + $0x198] sm:$0xff] %v5221_v10  ;;  %v959_v58 = vrot.slane %v6601_v62, 4  ;;  %v4174_v22 = vld [vmem:[#allocation2 + $0x24] sm:$0xf0] }
  0x79   : > { %1121 = vst [vmem:[#allocation2 + $0x2c] sm:$0xf] %v1120_v3  ;;  %v4162_v9 = vld [vmem:[#allocation2 + $0xc] sm:$0xf0]  ;;  %v955_v34 = vsel %vm5926_vm13, %v953_v53, %v954_v19  ;;  %v960_v11 = vrot.slane %v6602_v59, 5  ;;  %v897_v3 = vsel %vm5902_vm11, 0, %v896_v27 }
  0x7a   : > { %v4052_v23 = vld [vmem:[#allocation2 + $0x180] sm:$0xf]  ;;  %443 = vst [vmem:[#allocation2 + $0x1a0] sm:$0xf] %v5221_v10  ;;  %v4165_v44 = vor.u32 %v4786_v61, %v4162_v9  ;;  %v6604_v9 = vshrl.u32 %v5622_v36, 16  ;;  %v958_v19 = vrot.slane %v957_v24, 4 }
  0x7b   : > { %v4904_v0 = vld [vmem:[#allocation2 + $0x188] sm:$0xf0]  ;;  %444 = vst [vmem:[#allocation2 + $0x1a4] sm:$0xff] %v5221_v10  ;;  %v961_v51 = vor.u32 %v960_v11, %v959_v58  ;;  %v899_v27 = vld [vmem:[#allocation2 + $0x74] sm:$0x8]  ;;  %v1032_v32 = vrot.slane %v6639_v60, 5 }
  0x7c   : > { %v4053_v25 = vor.u32 %v4904_v0, %v4052_v23  ;;  %445 = vst [vmem:[#allocation2 + $0x1ac] sm:$0xf] %v5221_v10  ;;  %v3880_v30 = vld [vmem:[#allocation2 + $0x20] sm:$0xf]  ;;  %v6603_v10 = vshll.u32 %v5622_v36, 16  ;;  %v965_v53 = vrot.slane %v6604_v9, 4 }
  0x7d   : > { %895 = vst [vmem:[#allocation2 + $0x44] sm:$0x8] %v894_v16  ;;  %v962_v29 = vrot.slane %v961_v51, 4  ;;  %v4789_v36 = vld [vmem:[#allocation2 + $0x1c] sm:$0xf]  ;;  %v900_v59 = vsel %vm5902_vm11, 0, %v899_v27 }
  0x7e   : > { %1890 = vmatmul.bf16.gmra.mxu3 %v4053_v25  ;;  %1122 = vst [vmem:[#allocation2 + $0x38] sm:$0xf] %v955_v34  ;;  %v963_v61 = vrot.slane %v6603_v10, 5  ;;  %v4160_v34 = vld [vmem:[#allocation2] sm:$0xf]  ;;  %v4177_v58 = vor.u32 %v4789_v36, %v4174_v22  ;;  %v6607_v10 = vshll.u32 %v5782_v40, 16 }
  0x7f   : > { %2571 = vmatmul.bf16.vlgmr.msrb.gmra.mxu0 %v4165_v44  ;;  %898 = vst [vmem:[#allocation2 + $0x5c] sm:$0x8] %v897_v3  ;;  %v4787_v25 = vld [vmem:[#allocation2 + $0x8] sm:$0xf0]  ;;  %v4861_v11 = vld [vmem:[#allocation2 + $0x34] sm:$0xf] }
  0x80   : > { %v4860_v5 = vld [vmem:[#allocation2 + $0x28] sm:$0xf0]  ;;  %v966_v20 = vor.u32 %v965_v53, %v963_v61  ;;  %v964_v23 = vsel %vm5926_vm13, %v962_v29, %v963_v61  ;;  %v4161_v62 = vor.u32 %v4787_v25, %v4160_v34  ;;  %901 = vst [vmem:[#allocation2 + $0x74] sm:$0x8] %v900_v59  ;;  %v6606_v3 = vshll.u32 %v5770_v4, 16  ;;  %v4992_v29 = vld [vmem:[%s6528_s3 + $0x1f0] sm:$0xff] }
  0x81   : > { %v3881_v57 = vor.u32 %v4860_v5, %v3880_v30  ;;  %1126 = vst [vmem:[#allocation2 + $0x50] sm:$0xf] %v964_v23  ;;  %v6605_v30 = vshrl.u32 %v5770_v4, 16  ;;  %v972_v61 = vrot.slane %v6607_v10, 5  ;;  %v6608_v9 = vshrl.u32 %v5782_v40, 16  ;;  %v4856_v4 = vld [vmem:[%s6528_s3 + $0xb0] sm:$0xff]  ;;  %3345 = vmatpush.bf16.msra.mxu3 %v4992_v29 }
  0x82   : > { %v967_v16 = vrot.slane %v966_v20, 4  ;;  %v969_v51 = vrot.slane %v6606_v3, 5  ;;  %v5000_v40 = vld [vmem:[%s6528_s3 + $0x230] sm:$0xff]  ;;  %2653 = vmatpush.bf16.msra.mxu1 %v4856_v4  ;;  %v4790_v27 = vld [vmem:[#allocation2 + $0x20] sm:$0xf0]  ;;  %v6612_v29 = vshrl.u32 %v5341_v54, 16 }
  0x83   : > { %v968_v5 = vrot.slane %v6605_v30, 4  ;;  %v974_v53 = vrot.slane %v6608_v9, 4  ;;  %3434 = vmatpush.bf16.msra.mxu0 %v5000_v40  ;;  %v902_v59 = vld [vmem:[#allocation2 + $0x8c] sm:$0x8]  ;;  %v3898_v3 = vld [vmem:[#allocation2 + $0x54] sm:$0xf0] }
  0x84   : > { %1904 = vmatmul.bf16.vlgmr.msrb.gmra.mxu1 %v3877_v6  ;;  %v1123_v44 = vld [vmem:[#allocation2 + $0x44] sm:$0xf]  ;;  %v3886_v6 = vld [vmem:[#allocation2 + $0x3c] sm:$0xf0]  ;;  %v903_v30 = vsel %vm5902_vm11, 0, %v902_v59  ;;  %v983_v4 = vrot.slane %v6612_v29, 4 }
  0x85   : > { %v1124_v0 = vsel %vm5955_vm14, %v958_v19, %v1123_v44  ;;  %v4984_v19 = vld [vmem:[%s6528_s3 + $0x1b0] sm:$0xff]  ;;  %v3892_v20 = vld [vmem:[#allocation2 + $0x38] sm:$0xf]  ;;  %v970_v44 = vor.u32 %v969_v51, %v968_v5  ;;  %v4864_v5 = vld [vmem:[#allocation2 + $0x4c] sm:$0xf]  ;;  %v6609_v51 = vshrl.u32 %v5336_v52, 16 }
  0x86   : > { %1125 = vst [vmem:[#allocation2 + $0x44] sm:$0xf] %v1124_v0  ;;  %v1127_v2 = vld [vmem:[#allocation2 + $0x5c] sm:$0xf]  ;;  %3256 = vmatpush.bf16.msra.mxu2 %v4984_v19 }
  0x87   : > { %1993 = vmatmul.bf16.vlgmr.msrb.gmra.mxu2 %v3881_v57  ;;  %v1128_v24 = vsel %vm5955_vm14, %v967_v16, %v1127_v2  ;;  %v3889_v57 = vor.u32 %v4861_v11, %v3886_v6  ;;  %v975_v16 = vor.u32 %v974_v53, %v972_v61  ;;  %v971_v0 = vrot.slane %v970_v44, 4  ;;  %v1131_v22 = vld [vmem:[#allocation2 + $0x74] sm:$0xf]  ;;  %904 = vst [vmem:[#allocation2 + $0x8c] sm:$0x8] %v903_v30 }
  0x88   : > { %1129 = vst [vmem:[#allocation2 + $0x5c] sm:$0xf] %v1128_v24  ;;  %v4172_v24 = vld [vmem:[#allocation2 + $0x18] sm:$0xf]  ;;  %v977_v10 = vrot.slane %v6609_v51, 4  ;;  %v6611_v53 = vshll.u32 %v5341_v54, 16 }
  0x89   : > { %v976_v34 = vrot.slane %v975_v16, 4  ;;  %v973_v36 = vsel %vm5926_vm13, %v971_v0, %v972_v61  ;;  %v4173_v11 = vor.u32 %v4790_v27, %v4172_v24  ;;  %v6610_v61 = vshll.u32 %v5336_v52, 16  ;;  %v4184_v54 = vld [vmem:[#allocation2 + $0x30] sm:$0xf]  ;;  %v4198_v24 = vld [vmem:[#allocation2 + $0x54] sm:$0xf0] }
  0x8a   : > { %1130 = vst [vmem:[#allocation2 + $0x68] sm:$0xf] %v973_v36  ;;  %v981_v19 = vrot.slane %v6611_v53, 5  ;;  %v905_v27 = vld [vmem:[#allocation2 + $0xa4] sm:$0x8]  ;;  %v6613_v30 = vshrl.u32 %v5493_v26, 16 }
  0x8b   : > { %v1132_v2 = vsel %vm5955_vm14, %v976_v34, %v1131_v22  ;;  %v978_v9 = vrot.slane %v6610_v61, 5  ;;  %v4793_v22 = vld [vmem:[#allocation2 + $0x38] sm:$0xf0]  ;;  %v906_v59 = vsel %vm5902_vm11, 0, %v905_v27  ;;  %v4991_v53 = vld [vmem:[%s6528_s3 + $0x1e8] sm:$0xff] }
  0x8c   : > { %1133 = vst [vmem:[#allocation2 + $0x74] sm:$0xf] %v1132_v2  ;;  %v984_v44 = vor.u32 %v983_v4, %v981_v19  ;;  %v4795_v2 = vld [vmem:[#allocation2 + $0x4c] sm:$0xf]  ;;  %3346 = vmatpush.bf16.msra.mxu3 %v4991_v53  ;;  %v4210_v27 = vld [vmem:[#allocation2 + $0x6c] sm:$0xf0] }
  0x8d   : > { %v4863_v23 = vld [vmem:[#allocation2 + $0x40] sm:$0xf0]  ;;  %v979_v40 = vor.u32 %v978_v9, %v977_v10  ;;  %907 = vst [vmem:[#allocation2 + $0xa4] sm:$0x8] %v906_v59  ;;  %v6615_v10 = vshll.u32 %v5495_v28, 16  ;;  %v4983_v9 = vld [vmem:[%s6528_s3 + $0x1a8] sm:$0xff] }
  0x8e   : > { %2482 = vmatmul.bf16.vlgmr.msrb.gmra.mxu3 %v4161_v62  ;;  %v3893_v25 = vor.u32 %v4863_v23, %v3892_v20  ;;  %v4792_v62 = vld [vmem:[#allocation2 + $0x34] sm:$0xf]  ;;  %v3904_v20 = vld [vmem:[#allocation2 + $0x50] sm:$0xf]  ;;  %v985_v34 = vrot.slane %v984_v44, 4  ;;  %3257 = vmatpush.bf16.msra.mxu2 %v4983_v9  ;;  %v6619_v53 = vshll.u32 %v5668_v33, 16 }
  0x8f   : > { %2576 = vmatmul.bf16.gmra.mxu0 %v4177_v58  ;;  %v4186_v58 = vld [vmem:[#allocation2 + $0x3c] sm:$0xf0]  ;;  %v4866_v23 = vld [vmem:[#allocation2 + $0x58] sm:$0xf0]  ;;  %v980_v16 = vrot.slane %v979_v40, 4  ;;  %v990_v61 = vrot.slane %v6615_v10, 5 }
  0x90   : > { %v4189_v6 = vor.u32 %v4792_v62, %v4186_v58  ;;  %v3905_v0 = vor.u32 %v4866_v23, %v3904_v20  ;;  %v4185_v62 = vor.u32 %v4793_v22, %v4184_v54  ;;  %v4201_v58 = vor.u32 %v4795_v2, %v4198_v24  ;;  %v4999_v40 = vld [vmem:[%s6528_s3 + $0x228] sm:$0xff]  ;;  %v4796_v2 = vld [vmem:[#allocation2 + $0x50] sm:$0xf0]  ;;  %v4798_v24 = vld [vmem:[#allocation2 + $0x64] sm:$0xf] }
  0x91   : > { %v982_v52 = vsel %vm5926_vm13, %v980_v16, %v981_v19  ;;  %v4855_v19 = vld [vmem:[%s6528_s3 + $0xa8] sm:$0xff]  ;;  %3435 = vmatpush.bf16.msra.mxu0 %v4999_v40 }
  0x92   : > { %1134 = vst [vmem:[#allocation2 + $0x80] sm:$0xf] %v982_v52  ;;  %2654 = vmatpush.bf16.msra.mxu1 %v4855_v19  ;;  %v4196_v22 = vld [vmem:[#allocation2 + $0x48] sm:$0xf]  ;;  %v999_v19 = vrot.slane %v6619_v53, 5 }
  0x93   : > { %v4869_v20 = vld [vmem:[#allocation2 + $0x70] sm:$0xf0]  ;;  %v4197_v59 = vor.u32 %v4796_v2, %v4196_v22  ;;  %v4208_v22 = vld [vmem:[#allocation2 + $0x60] sm:$0xf]  ;;  %v4799_v2 = vld [vmem:[#allocation2 + $0x68] sm:$0xf0] }
  0x94   : > { %1909 = vmatmul.bf16.gmra.mxu1 %v3889_v57  ;;  %v3901_v57 = vor.u32 %v4864_v5, %v3898_v3  ;;  %v986_v5 = vrot.slane %v6613_v30, 4  ;;  %v6614_v3 = vshll.u32 %v5493_v26, 16  ;;  %v6616_v26 = vshrl.u32 %v5495_v28, 16  ;;  %v4870_v30 = vld [vmem:[#allocation2 + $0x7c] sm:$0xf] }
  0x96   : > { %v987_v51 = vrot.slane %v6614_v3, 5  ;;  %v992_v29 = vrot.slane %v6616_v26, 4 }
  0x97   : > { %1998 = vmatmul.bf16.gmra.mxu2 %v3893_v25  ;;  %v1135_v25 = vld [vmem:[#allocation2 + $0x8c] sm:$0xf] }
  0x98   : > { %v1136_v36 = vsel %vm5955_vm14, %v985_v34, %v1135_v25  ;;  %v988_v44 = vor.u32 %v987_v51, %v986_v5  ;;  %v993_v16 = vor.u32 %v992_v29, %v990_v61  ;;  %v1139_v25 = vld [vmem:[#allocation2 + $0xa4] sm:$0xf]  ;;  %v3922_v5 = vld [vmem:[#allocation2 + $0x84] sm:$0xf0]  ;;  %v6617_v51 = vshrl.u32 %v5648_v48, 16 }
  0x99   : > { %1137 = vst [vmem:[#allocation2 + $0x8c] sm:$0xf] %v1136_v36  ;;  %v6620_v29 = vshrl.u32 %v5668_v33, 16 }
  0x9a   : > { %v994_v52 = vrot.slane %v993_v16, 4  ;;  %v995_v10 = vrot.slane %v6617_v51, 4  ;;  %v4873_v51 = vld [vmem:[#allocation2 + $0x94] sm:$0xf] }
  0x9c   : > { %v1140_v54 = vsel %vm5955_vm14, %v994_v52, %v1139_v25 }
  0x9d   : > { %1141 = vst [vmem:[#allocation2 + $0xa4] sm:$0xf] %v1140_v54 }
  0x9e   : > { %2487 = vmatmul.bf16.gmra.mxu3 %v4173_v11  ;;  %v4867_v11 = vld [vmem:[#allocation2 + $0x64] sm:$0xf] }
  0x9f   : > { %2581 = vmatmul.bf16.gmra.mxu0 %v4189_v6  ;;  %v3910_v6 = vld [vmem:[#allocation2 + $0x6c] sm:$0xf0] }
  0xa0   : > { %v3913_v4 = vor.u32 %v4867_v11, %v3910_v6  ;;  %v4213_v11 = vor.u32 %v4798_v24, %v4210_v27  ;;  %v4872_v40 = vld [vmem:[#allocation2 + $0x88] sm:$0xf0]  ;;  %v4801_v27 = vld [vmem:[#allocation2 + $0x7c] sm:$0xf] }
  0xa4   : > { %1914 = vmatmul.bf16.gmra.mxu1 %v3901_v57  ;;  %v3916_v57 = vld [vmem:[#allocation2 + $0x68] sm:$0xf] }
  0xa5   : > { %v3917_v34 = vor.u32 %v4869_v20, %v3916_v57  ;;  %v3925_v57 = vor.u32 %v4870_v30, %v3922_v5  ;;  %v3928_v20 = vld [vmem:[#allocation2 + $0x80] sm:$0xf] }
  0xa7   : > { %2003 = vmatmul.bf16.gmra.mxu2 %v3905_v0  ;;  %v989_v0 = vrot.slane %v988_v44, 4 }
  0xa9   : > { %v991_v28 = vsel %vm5926_vm13, %v989_v0, %v990_v61  ;;  %v6618_v61 = vshll.u32 %v5648_v48, 16 }
  0xaa   : > { %1138 = vst [vmem:[#allocation2 + $0x98] sm:$0xf] %v991_v28 }
  0xab   : > { %v6048_v23 = vpop.f32.mrf.mxu0  ;;  %v996_v9 = vrot.slane %v6618_v61, 5 }
  0xad   : > { %v6055_v36 = vpop.f32.mrf.mxu1  ;;  %v997_v44 = vor.u32 %v996_v9, %v995_v10  ;;  %v3934_v10 = vld [vmem:[#allocation2 + $0x9c] sm:$0xf0]  ;;  %v6621_v9 = vshrl.u32 %v5805_v15, 16 }
  0xae   : > { %2492 = vmatmul.bf16.gmra.mxu3 %v4185_v62 }
  0xaf   : > { %2586 = vmatmul.bf16.gmra.mxu0 %v4201_v58  ;;  %v908_v58 = vld [vmem:[#allocation2 + $0xbc] sm:$0x8]  ;;  %v998_v0 = vrot.slane %v997_v44, 4  ;;  %v1004_v53 = vrot.slane %v6621_v9, 4  ;;  %v4854_v44 = vld [vmem:[%s6528_s3 + $0xa0] sm:$0xff] }
  0xb0   : > { %v909_v6 = vsel %vm5902_vm11, 0, %v908_v58  ;;  %v4222_v58 = vld [vmem:[#allocation2 + $0x84] sm:$0xf0]  ;;  %2655 = vmatpush.bf16.msra.mxu1 %v4854_v44  ;;  %v6626_v44 = vshrl.u32 %v5345_v56, 16 }
  0xb1   : > { %910 = vst [vmem:[#allocation2 + $0xbc] sm:$0x8] %v909_v6  ;;  %v1000_v28 = vsel %vm5926_vm13, %v998_v0, %v999_v19  ;;  %v4209_v6 = vor.u32 %v4799_v2, %v4208_v22  ;;  %v4225_v30 = vor.u32 %v4801_v27, %v4222_v58 }
  0xb2   : > { %1142 = vst [vmem:[#allocation2 + $0xb0] sm:$0xf] %v1000_v28  ;;  %v4875_v28 = vld [vmem:[#allocation2 + $0xa0] sm:$0xf0] }
  0xb3   : > { %v6059_v62 = vpop.f32.mrf.mxu0 }
  0xb4   : > { %1919 = vmatmul.bf16.gmra.mxu1 %v3913_v4  ;;  %v1001_v4 = vrot.slane %v6620_v29, 4 }
  0xb5   : > { %v6063_v3 = vpop.f32.mrf.mxu2  ;;  %v6071_v26 = vpop.f32.mrf.mxu1 }
  0xb6   : > { %v1002_v16 = vor.u32 %v1001_v4, %v999_v19  ;;  %v6622_v19 = vshll.u32 %v5805_v15, 16  ;;  %v6623_v4 = vshll.u32 %v5816_v42, 16  ;;  %v6624_v15 = vshrl.u32 %v5816_v42, 16 }
  0xb7   : > { %2008 = vmatmul.bf16.gmra.mxu2 %v3917_v34  ;;  %v3929_v34 = vor.u32 %v4872_v40, %v3928_v20  ;;  %v4982_v20 = vld [vmem:[%s6528_s3 + $0x1a0] sm:$0xff] }
  0xb8   : > { %v1003_v52 = vrot.slane %v1002_v16, 4  ;;  %v1143_v25 = vld [vmem:[#allocation2 + $0xbc] sm:$0xf]  ;;  %v1005_v29 = vrot.slane %v6622_v19, 5  ;;  %v4990_v40 = vld [vmem:[%s6528_s3 + $0x1e0] sm:$0xff]  ;;  %v1010_v16 = vrot.slane %v6624_v15, 4  ;;  %3258 = vmatpush.bf16.msra.mxu2 %v4982_v20 }
  0xb9   : > { %3347 = vmatpush.bf16.msra.mxu3 %v4990_v40  ;;  %v4234_v19 = vld [vmem:[#allocation2 + $0x9c] sm:$0xf0]  ;;  %v1019_v15 = vrot.slane %v6626_v44, 4 }
  0xba   : > { %v1144_v33 = vsel %vm5955_vm14, %v1003_v52, %v1143_v25  ;;  %v3940_v52 = vld [vmem:[#allocation2 + $0x98] sm:$0xf]  ;;  %v4998_v25 = vld [vmem:[%s6528_s3 + $0x220] sm:$0xff] }
  0xbb   : > { %v6081_v54 = vpop.f32.mrf.mxu3  ;;  %1145 = vst [vmem:[#allocation2 + $0xbc] sm:$0xf] %v1144_v33  ;;  %v1006_v33 = vor.u32 %v1005_v29, %v1004_v53  ;;  %3436 = vmatpush.bf16.msra.mxu0 %v4998_v25  ;;  %v3941_v42 = vor.u32 %v4875_v28, %v3940_v52  ;;  %v4804_v53 = vld [vmem:[#allocation2 + $0x94] sm:$0xf]  ;;  %v4876_v52 = vld [vmem:[#allocation2 + $0xac] sm:$0xf] }
  0xbc   : > { %v4237_v40 = vor.u32 %v4804_v53, %v4234_v19  ;;  %v3946_v28 = vld [vmem:[#allocation2 + $0xb4] sm:$0xf0]  ;;  %v6627_v25 = vshrl.u32 %v5343_v55, 16 }
  0xbd   : > { %v6083_v24 = vpop.f32.mrf.mxu2  ;;  %v1007_v27 = vrot.slane %v1006_v33, 4 }
  0xbe   : > { %2497 = vmatmul.bf16.gmra.mxu3 %v4197_v59  ;;  %v6075_v48 = vpop.f32.mrf.mxu0  ;;  %v1013_v33 = vrot.slane %v6627_v25, 4  ;;  %v4807_v25 = vld [vmem:[#allocation2 + $0xac] sm:$0xf] }
  0xbf   : > { %2591 = vmatmul.bf16.gmra.mxu0 %v4213_v11  ;;  %v911_v11 = vld [vmem:[#allocation2 + $0xd4] sm:$0x8] }
  0xc0   : > { %v6085_v59 = vpop.f32.mrf.mxu1  ;;  %v912_v5 = vsel %vm5902_vm11, 0, %v911_v11  ;;  %3437 = vmatpush.bf16.msra.mxu0 %v4997_v45 }
  0xc1   : > { %913 = vst [vmem:[#allocation2 + $0xd4] sm:$0x8] %v912_v5 }
  0xc3   : > { %v6108_v0 = vpop.f32.mrf.mxu3 }
  0xc4   : > { %1924 = vmatmul.bf16.gmra.mxu1 %v3925_v57  ;;  %v1008_v57 = vrot.slane %v6623_v4, 5  ;;  %v914_v4 = vld [vmem:[#allocation2 + $0xec] sm:$0x8] }
  0xc6   : > { %v6089_v61 = vpop.f32.mrf.mxu0  ;;  %v1011_v22 = vor.u32 %v1010_v16, %v1008_v57 }
  0xc7   : > { %2013 = vmatmul.bf16.gmra.mxu2 %v3929_v34  ;;  %v3937_v34 = vor.u32 %v4873_v51, %v3934_v10  ;;  %v4220_v51 = vld [vmem:[#allocation2 + $0x78] sm:$0xf]  ;;  %v4802_v10 = vld [vmem:[#allocation2 + $0x80] sm:$0xf0] }
  0xc8   : > { %v6115_v58 = vpop.f32.mrf.mxu1  ;;  %v1012_v11 = vrot.slane %v1011_v22, 4  ;;  %v4221_v20 = vor.u32 %v4802_v10, %v4220_v51  ;;  %v6628_v22 = vshll.u32 %v5343_v55, 16 }
  0xce   : > { %2502 = vmatmul.bf16.gmra.mxu3 %v4209_v6  ;;  %v6113_v2 = vpop.f32.mrf.mxu2  ;;  %v1009_v6 = vsel %vm5926_vm13, %v1007_v27, %v1008_v57  ;;  %v915_v57 = vsel %vm5902_vm11, 0, %v914_v4  ;;  %v1014_v27 = vrot.slane %v6628_v22, 5 }
  0xcf   : > { %2596 = vmatmul.bf16.gmra.mxu0 %v4225_v30  ;;  %v1147_v30 = vld [vmem:[#allocation2 + $0xd4] sm:$0xf]  ;;  %1146 = vst [vmem:[#allocation2 + $0xc8] sm:$0xf] %v1009_v6  ;;  %v3949_v6 = vor.u32 %v4876_v52, %v3946_v28  ;;  %v4805_v28 = vld [vmem:[#allocation2 + $0x98] sm:$0xf0] }
  0xd0   : > { %v1148_v5 = vsel %vm5955_vm14, %v1012_v11, %v1147_v30  ;;  %916 = vst [vmem:[#allocation2 + $0xec] sm:$0x8] %v915_v57  ;;  %v3952_v30 = vld [vmem:[#allocation2 + $0xb0] sm:$0xf]  ;;  %v1015_v51 = vor.u32 %v1014_v27, %v1013_v33  ;;  %v4246_v33 = vld [vmem:[#allocation2 + $0xb4] sm:$0xf0] }
  0xd1   : > { %1149 = vst [vmem:[#allocation2 + $0xd4] sm:$0xf] %v1148_v5  ;;  %v4878_v5 = vld [vmem:[#allocation2 + $0xb8] sm:$0xf0]  ;;  %v4249_v27 = vor.u32 %v4807_v25, %v4246_v33 }
  0xd2   : > { %v6121_v9 = vpop.f32.mrf.mxu0  ;;  %v1016_v19 = vrot.slane %v1015_v51, 4  ;;  %v3953_v57 = vor.u32 %v4878_v5, %v3952_v30  ;;  %v4879_v5 = vld [vmem:[#allocation2 + $0xc4] sm:$0xf]  ;;  %v3958_v51 = vld [vmem:[#allocation2 + $0xcc] sm:$0xf0]  ;;  %v4989_v25 = vld [vmem:[%s6528_s3 + $0x1d8] sm:$0xff] }
  0xd3   : > { %v6123_v29 = vpop.f32.mrf.mxu3  ;;  %3348 = vmatpush.bf16.msra.mxu3 %v4989_v25  ;;  %v4808_v25 = vld [vmem:[#allocation2 + $0xb0] sm:$0xf0] }
  0xd4   : > { %1929 = vmatmul.bf16.gmra.mxu1 %v3937_v34  ;;  %6625 = vst [vmem:[#allocation3_spill] sm:$0xff] %v6123_v29 }
  0xd6   : > { %v6129_v16 = vpop.f32.mrf.mxu2 }
  0xd7   : > { %2018 = vmatmul.bf16.gmra.mxu2 %v3941_v42  ;;  %v6629_v42 = vshll.u32 %v5345_v56, 16  ;;  %v1151_v56 = vld [vmem:[#allocation2 + $0xec] sm:$0xf] }
  0xd9   : > { %v6131_v34 = vpop.f32.mrf.mxu1  ;;  %v1017_v11 = vrot.slane %v6629_v42, 5  ;;  %v917_v42 = vld [vmem:[#allocation2 + $0x104] sm:$0x8] }
  0xda   : > { %v6139_v53 = vpop.f32.mrf.mxu0 }
  0xdb   : > { %v1020_v10 = vor.u32 %v1019_v15, %v1017_v11  ;;  %v6141_v44 = vpop.f32.mrf.mxu3  ;;  %v1018_v55 = vsel %vm5926_vm13, %v1016_v19, %v1017_v11  ;;  %v4232_v15 = vld [vmem:[#allocation2 + $0x90] sm:$0xf]  ;;  %v6631_v11 = vshrl.u32 %v5564_v17, 16 }
  0xdc   : > { %6630 = vst [vmem:[#allocation4_spill] sm:$0xff] %v6141_v44  ;;  %v4233_v22 = vor.u32 %v4805_v28, %v4232_v15  ;;  %v4981_v28 = vld [vmem:[%s6528_s3 + $0x198] sm:$0xff] }
  0xdd   : > { %v1021_v4 = vrot.slane %v1020_v10, 4  ;;  %1150 = vst [vmem:[#allocation2 + $0xe0] sm:$0xf] %v1018_v55  ;;  %v918_v10 = vsel %vm5902_vm11, 0, %v917_v42  ;;  %v6634_v55 = vshll.u32 %v5549_v41, 16  ;;  %v3961_v42 = vor.u32 %v4879_v5, %v3958_v51  ;;  %3259 = vmatpush.bf16.msra.mxu2 %v4981_v28 }
  0xde   : > { %2507 = vmatmul.bf16.gmra.mxu3 %v4221_v20  ;;  %919 = vst [vmem:[#allocation2 + $0x104] sm:$0x8] %v918_v10  ;;  %v4881_v10 = vld [vmem:[#allocation2 + $0xd0] sm:$0xf0] }
  0xdf   : > { %2601 = vmatmul.bf16.gmra.mxu0 %v4237_v40  ;;  %v1152_v20 = vsel %vm5955_vm14, %v1021_v4, %v1151_v56  ;;  %v6633_v4 = vshrl.u32 %v5549_v41, 16  ;;  %v1023_v56 = vrot.slane %v6634_v55, 5 }
  0xe0   : > { %1153 = vst [vmem:[#allocation2 + $0xec] sm:$0xf] %v1152_v20  ;;  %v6635_v20 = vshll.u32 %v5564_v17, 16 }
  0xe1   : > { %v6149_v52 = vpop.f32.mrf.mxu1 }
  0xe2   : > { %v1026_v15 = vrot.slane %v6635_v20, 5  ;;  %v4853_v20 = vld [vmem:[%s6528_s3 + $0x98] sm:$0xff] }
  0xe3   : > { %2656 = vmatpush.bf16.msra.mxu1 %v4853_v20  ;;  %v6637_v20 = vshrl.u32 %v5708_v18, 16 }
  0xe4   : > { %1934 = vmatmul.bf16.gmra.mxu1 %v3949_v6  ;;  %v1028_v6 = vrot.slane %v6631_v11, 4  ;;  %v3964_v11 = vld [vmem:[#allocation2 + $0xc8] sm:$0xf] }
  0xe5   : > { %v6147_v40 = vpop.f32.mrf.mxu2  ;;  %v1155_v51 = vld [vmem:[#allocation2 + $0x104] sm:$0xf] }
  0xe7   : > { %2023 = vmatmul.bf16.gmra.mxu2 %v3953_v57  ;;  %v1022_v57 = vrot.slane %v6633_v4, 4  ;;  %v1029_v4 = vor.u32 %v1028_v6, %v1026_v15 }
  0xe9   : > { %v6157_v19 = vpop.f32.mrf.mxu3  ;;  %v1024_v41 = vor.u32 %v1023_v56, %v1022_v57  ;;  %v4244_v56 = vld [vmem:[#allocation2 + $0xa8] sm:$0xf] }
  0xea   : > { %6632 = vst [vmem:[#allocation5_spill] sm:$0xff] %v6157_v19 }
  0xeb   : > { %v1025_v17 = vrot.slane %v1024_v41, 4 }
  0xec   : > { %v6153_v30 = vpop.f32.mrf.mxu0 }
  0xed   : > { %v6171_v33 = vpop.f32.mrf.mxu2  ;;  %v1027_v6 = vsel %vm5926_vm13, %v1025_v17, %v1026_v15  ;;  %v920_v15 = vld [vmem:[#allocation2 + $0x11c] sm:$0x8] }
  0xee   : > { %2512 = vmatmul.bf16.gmra.mxu3 %v4233_v22  ;;  %v1030_v22 = vrot.slane %v1029_v4, 4  ;;  %1154 = vst [vmem:[#allocation2 + $0xf8] sm:$0xf] %v1027_v6  ;;  %v4245_v4 = vor.u32 %v4808_v25, %v4244_v56  ;;  %v3970_v6 = vld [vmem:[#allocation2 + $0xe4] sm:$0xf0]  ;;  %v6640_v56 = vshll.u32 %v5708_v18, 16 }
  0xef   : > { %2606 = vmatmul.bf16.gmra.mxu0 %v4249_v27  ;;  %v3965_v27 = vor.u32 %v4881_v10, %v3964_v11  ;;  %v4810_v11 = vld [vmem:[#allocation2 + $0xc4] sm:$0xf] }
  0xf0   : > { %v1156_v57 = vsel %vm5955_vm14, %v1030_v22, %v1155_v51  ;;  %v1037_v22 = vrot.slane %v6637_v20, 4  ;;  %v921_v51 = vsel %vm5902_vm11, 0, %v920_v15  ;;  %v1035_v25 = vrot.slane %v6640_v56, 5  ;;  %v4884_v20 = vld [vmem:[#allocation2 + $0xe8] sm:$0xf0] }
  0xf1   : > { %v6173_v55 = vpop.f32.mrf.mxu1  ;;  %1157 = vst [vmem:[#allocation2 + $0x104] sm:$0xf] %v1156_v57  ;;  %v6187_v28 = vpop.f32.mrf.mxu3  ;;  %v6638_v57 = vshrl.u32 %v5706_v49, 16  ;;  %v923_v56 = vld [vmem:[#allocation2 + $0x134] sm:$0x8] }
  0xf2   : > { %6636 = vst [vmem:[#allocation6_spill] sm:$0xff] %v6187_v28  ;;  %v1038_v46 = vor.u32 %v1037_v22, %v1035_v25  ;;  %v4270_v22 = vld [vmem:[#allocation2 + $0xe4] sm:$0xf0] }
  0xf3   : > { %922 = vst [vmem:[#allocation2 + $0x11c] sm:$0x8] %v921_v51  ;;  %v1031_v31 = vrot.slane %v6638_v57, 4 }
  0xf4   : > { %1939 = vmatmul.bf16.gmra.mxu1 %v3961_v42  ;;  %v6181_v5 = vpop.f32.mrf.mxu0  ;;  %v4258_v42 = vld [vmem:[#allocation2 + $0xcc] sm:$0xf0]  ;;  %v1039_v19 = vrot.slane %v1038_v46, 4 }
  0xf5   : > { %v4261_v45 = vor.u32 %v4810_v11, %v4258_v42  ;;  %v3976_v42 = vld [vmem:[#allocation2 + $0xe0] sm:$0xf]  ;;  %v1033_v21 = vor.u32 %v1032_v32, %v1031_v31 }
  0xf6   : > { %v3977_v57 = vor.u32 %v4884_v20, %v3976_v42  ;;  %v4256_v32 = vld [vmem:[#allocation2 + $0xc0] sm:$0xf] }
  0xf7   : > { %2028 = vmatmul.bf16.gmra.mxu2 %v3965_v27  ;;  %v4882_v27 = vld [vmem:[#allocation2 + $0xdc] sm:$0xf]  ;;  %v1034_v51 = vrot.slane %v1033_v21, 4 }
  0xf8   : > { %v3973_v11 = vor.u32 %v4882_v27, %v3970_v6 }
  0xf9   : > { %v6189_v10 = vpop.f32.mrf.mxu1  ;;  %v1036_v18 = vsel %vm5926_vm13, %v1034_v51, %v1035_v25 }
  0xfa   : > { %v6191_v41 = vpop.f32.mrf.mxu2  ;;  %1158 = vst [vmem:[#allocation2 + $0x110] sm:$0xf] %v1036_v18  ;;  %v1159_v60 = vld [vmem:[#allocation2 + $0x11c] sm:$0xf]  ;;  %v3982_v18 = vld [vmem:[#allocation2 + $0xfc] sm:$0xf0] }
  0xfb   : > { %v1160_v31 = vsel %vm5955_vm14, %v1039_v19, %v1159_v60  ;;  %v6643_v19 = vshrl.u32 %v5842_v63, 16  ;;  %v924_v60 = vsel %vm5902_vm11, 0, %v923_v56  ;;  %v4887_v56 = vld [vmem:[#allocation2 + $0x100] sm:$0xf0] }
  0xfc   : > { %v6193_v17 = vpop.f32.mrf.mxu0  ;;  %1161 = vst [vmem:[#allocation2 + $0x11c] sm:$0xf] %v1160_v31  ;;  %v6645_v31 = vshll.u32 %v5821_v7, 16 }
  0xfd   : > { %v1046_v51 = vrot.slane %v6643_v19, 4  ;;  %925 = vst [vmem:[#allocation2 + $0x134] sm:$0x8] %v924_v60 }
  0xfe   : > { %2517 = vmatmul.bf16.gmra.mxu3 %v4245_v4  ;;  %v4811_v4 = vld [vmem:[#allocation2 + $0xc8] sm:$0xf0] }
  0xff   : > { %2611 = vmatmul.bf16.gmra.mxu0 %v4261_v45  ;;  %v4813_v45 = vld [vmem:[#allocation2 + $0xdc] sm:$0xf] }
 0x100   : > { %v4273_v42 = vor.u32 %v4813_v45, %v4270_v22  ;;  %v6646_v45 = vshll.u32 %v5842_v63, 16  ;;  %v4852_v63 = vld [vmem:[%s6528_s3 + $0x90] sm:$0xff] }
 0x101   : > { %v1905_v37 = vpop.f32.mrf.mxu1  ;;  %v6205_v28 = vpop.f32.mrf.mxu3  ;;  %2657 = vmatpush.bf16.msra.mxu1 %v4852_v63  ;;  %v3994_v63 = vld [vmem:[#allocation2 + $0x114] sm:$0xf0] }
 0x102   : > { %6641 = vst [vmem:[#allocation7_spill] sm:$0xff] %v6205_v28  ;;  %v6207_v15 = vpop.f32.mrf.mxu2  ;;  %v1906_v21 = vadd.f32 %v1905_v37, %v6048_v23  ;;  %v6644_v37 = vshrl.u32 %v5821_v7, 16  ;;  %v1044_v22 = vrot.slane %v6646_v45, 5  ;;  %v4282_v45 = vld [vmem:[#allocation2 + $0xfc] sm:$0xf0] }
 0x104   : > { %1944 = vmatmul.bf16.gmra.mxu1 %v3973_v11  ;;  %v6209_v49 = vpop.f32.mrf.mxu0  ;;  %v4257_v11 = vor.u32 %v4811_v4, %v4256_v32  ;;  %v1040_v23 = vrot.slane %v6644_v37, 4  ;;  %v4980_v32 = vld [vmem:[%s6528_s3 + $0x190] sm:$0xff] }
 0x105   : > { %v4988_v4 = vld [vmem:[%s6528_s3 + $0x1d0] sm:$0xff]  ;;  %3260 = vmatpush.bf16.msra.mxu2 %v4980_v32  ;;  %v4814_v32 = vld [vmem:[#allocation2 + $0xe0] sm:$0xf0] }
 0x106   : > { %3349 = vmatpush.bf16.msra.mxu3 %v4988_v4  ;;  %v4816_v4 = vld [vmem:[#allocation2 + $0xf4] sm:$0xf] }
 0x107   : > { %2033 = vmatmul.bf16.gmra.mxu2 %v3977_v57  ;;  %v4885_v57 = vld [vmem:[#allocation2 + $0xf4] sm:$0xf] }
 0x109   : > { %v1907_v46 = vpop.f32.mrf.mxu1  ;;  %v6216_v27 = vpop.f32.mrf.mxu3 }
 0x10a   : > { %6642 = vst [vmem:[#allocation8_spill] sm:$0xff] %v6216_v27  ;;  %v1994_v6 = vpop.f32.mrf.mxu2  ;;  %v1041_v27 = vrot.slane %v6645_v31, 5  ;;  %v1908_v7 = vadd.f32 %v1907_v46, %v6059_v62 }
 0x10b   : > { %v1995_v25 = vadd.f32 %v1994_v6, %v1906_v21  ;;  %v3985_v21 = vor.u32 %v4885_v57, %v3982_v18  ;;  %v3988_v6 = vld [vmem:[#allocation2 + $0xf8] sm:$0xf] }
 0x10c   : > { %v6218_v20 = vpop.f32.mrf.mxu0  ;;  %v1042_v19 = vor.u32 %v1041_v27, %v1040_v23  ;;  %v3989_v29 = vor.u32 %v4887_v56, %v3988_v6  ;;  %v4996_v27 = vld [vmem:[%s6528_s3 + $0x210] sm:$0xff]  ;;  %v4268_v23 = vld [vmem:[#allocation2 + $0xd8] sm:$0xf] }
 0x10d   : > { %3438 = vmatpush.bf16.msra.mxu0 %v4996_v27 }
 0x10e   : > { %2522 = vmatmul.bf16.gmra.mxu3 %v4257_v11  ;;  %v1047_v11 = vor.u32 %v1046_v51, %v1044_v22  ;;  %v1043_v31 = vrot.slane %v1042_v19, 4  ;;  %v926_v19 = vld [vmem:[#allocation2 + $0x14c] sm:$0x8] }
 0x10f   : > { %2616 = vmatmul.bf16.gmra.mxu0 %v4273_v42  ;;  %v927_v27 = vsel %vm5902_vm11, 0, %v926_v19 }
 0x110   : > { %v1048_v57 = vrot.slane %v1047_v11, 4  ;;  %v1045_v46 = vsel %vm5926_vm13, %v1043_v31, %v1044_v22  ;;  %v4269_v11 = vor.u32 %v4814_v32, %v4268_v23  ;;  %v4888_v31 = vld [vmem:[#allocation2 + $0x10c] sm:$0xf]  ;;  %928 = vst [vmem:[#allocation2 + $0x14c] sm:$0x8] %v927_v27 }
 0x111   : > { %v1910_v60 = vpop.f32.mrf.mxu1  ;;  %v2483_v42 = vpop.f32.mrf.mxu3  ;;  %1162 = vst [vmem:[#allocation2 + $0x128] sm:$0xf] %v1045_v46  ;;  %v3997_v23 = vor.u32 %v4888_v31, %v3994_v63  ;;  %v4000_v32 = vld [vmem:[#allocation2 + $0x110] sm:$0xf]  ;;  %v4294_v63 = vld [vmem:[#allocation2 + $0x114] sm:$0xf0] }
 0x112   : > { %v1996_v37 = vpop.f32.mrf.mxu2  ;;  %v2484_v28 = vadd.f32 %v2483_v42, %v1995_v25  ;;  %v1163_v25 = vld [vmem:[#allocation2 + $0x134] sm:$0xf] }
 0x113   : > { %v1997_v44 = vadd.f32 %v1996_v37, %v1908_v7  ;;  %v1164_v18 = vsel %vm5955_vm14, %v1048_v57, %v1163_v25  ;;  %v6647_v37 = vshrl.u32 %v5421_v39, 16  ;;  %v6649_v57 = vshll.u32 %v5419_v38, 16 }
 0x114   : > { %1949 = vmatmul.bf16.gmra.mxu1 %v3985_v21  ;;  %v6243_v62 = vpop.f32.mrf.mxu0  ;;  %v6248_v51 = vadd.f32 %v6193_v17, %v2484_v28  ;;  %1165 = vst [vmem:[#allocation2 + $0x134] sm:$0xf] %v1164_v18  ;;  %v1911_v21 = vadd.f32 %v1910_v60, %v6075_v48  ;;  %v4285_v28 = vor.u32 %v4816_v4, %v4282_v45  ;;  %v6648_v60 = vshrl.u32 %v5419_v38, 16  ;;  %v4890_v4 = vld [vmem:[#allocation2 + $0x118] sm:$0xf0] }
 0x115   : > { %v1050_v46 = vrot.slane %v6649_v57, 5  ;;  %v6650_v25 = vshll.u32 %v5421_v39, 16  ;;  %v4001_v38 = vor.u32 %v4890_v4, %v4000_v32 }
 0x117   : > { %2038 = vmatmul.bf16.gmra.mxu2 %v3989_v29  ;;  %v1055_v29 = vrot.slane %v6647_v37, 4  ;;  %v1053_v18 = vrot.slane %v6650_v25, 5 }
 0x119   : > { %v1912_v6 = vpop.f32.mrf.mxu1  ;;  %v2485_v22 = vpop.f32.mrf.mxu3 }
 0x11a   : > { %v1999_v56 = vpop.f32.mrf.mxu2  ;;  %v2486_v7 = vadd.f32 %v2485_v22, %v1997_v44  ;;  %v1049_v44 = vrot.slane %v6648_v60, 4  ;;  %v1056_v22 = vor.u32 %v1055_v29, %v1053_v18  ;;  %v4819_v29 = vld [vmem:[#allocation2 + $0x10c] sm:$0xf] }
 0x11b   : > { %v2000_v42 = vadd.f32 %v1999_v56, %v1911_v21  ;;  %v1913_v21 = vadd.f32 %v1912_v6, %v6089_v61  ;;  %v4280_v6 = vld [vmem:[#allocation2 + $0xf0] sm:$0xf] }
 0x11c   : > { %v6253_v17 = vpop.f32.mrf.mxu0  ;;  %v6260_v48 = vadd.f32 %v6209_v49, %v2486_v7  ;;  %v1051_v45 = vor.u32 %v1050_v46, %v1049_v44  ;;  %v1057_v60 = vrot.slane %v1056_v22, 4  ;;  %v6651_v22 = vshrl.u32 %v5596_v14, 16 }
 0x11e   : > { %2527 = vmatmul.bf16.gmra.mxu3 %v4269_v11  ;;  %v1052_v7 = vrot.slane %v1051_v45, 4  ;;  %v4297_v45 = vor.u32 %v4819_v29, %v4294_v63 }
 0x11f   : > { %2621 = vmatmul.bf16.gmra.mxu0 %v4285_v28  ;;  %v1167_v28 = vld [vmem:[#allocation2 + $0x14c] sm:$0xf] }
 0x120   : > { %v1054_v39 = vsel %vm5926_vm13, %v1052_v7, %v1053_v18  ;;  %v1168_v61 = vsel %vm5955_vm14, %v1057_v60, %v1167_v28  ;;  %v4006_v7 = vld [vmem:[#allocation2 + $0x12c] sm:$0xf0]  ;;  %v4979_v60 = vld [vmem:[%s6528_s3 + $0x188] sm:$0xff] }
 0x121   : > { %v1915_v49 = vpop.f32.mrf.mxu1  ;;  %v2488_v56 = vpop.f32.mrf.mxu3  ;;  %1166 = vst [vmem:[#allocation2 + $0x140] sm:$0xf] %v1054_v39  ;;  %v4987_v39 = vld [vmem:[%s6528_s3 + $0x1c8] sm:$0xff]  ;;  %3261 = vmatpush.bf16.msra.mxu2 %v4979_v60 }
 0x122   : > { %v2001_v19 = vpop.f32.mrf.mxu2  ;;  %v2489_v37 = vadd.f32 %v2488_v56, %v2000_v42  ;;  %1169 = vst [vmem:[#allocation2 + $0x14c] sm:$0xf] %v1168_v61  ;;  %v4817_v42 = vld [vmem:[#allocation2 + $0xf8] sm:$0xf0]  ;;  %v1916_v44 = vadd.f32 %v1915_v49, %v6121_v9  ;;  %v1064_v56 = vrot.slane %v6651_v22, 4  ;;  %3350 = vmatpush.bf16.msra.mxu3 %v4987_v39 }
 0x123   : > { %v2002_v27 = vadd.f32 %v2001_v19, %v1913_v21  ;;  %v4891_v19 = vld [vmem:[#allocation2 + $0x124] sm:$0xf] }
 0x124   : > { %1954 = vmatmul.bf16.gmra.mxu1 %v3997_v23  ;;  %v6269_v11 = vpop.f32.mrf.mxu0  ;;  %v6274_v31 = vadd.f32 %v6218_v20, %v2489_v37  ;;  %v929_v23 = vld [vmem:[#allocation2 + $0x164] sm:$0x8]  ;;  %v4281_v20 = vor.u32 %v4817_v42, %v4280_v6  ;;  %v4009_v61 = vor.u32 %v4891_v19, %v4006_v7  ;;  %v4012_v6 = vld [vmem:[#allocation2 + $0x128] sm:$0xf]  ;;  %v4893_v42 = vld [vmem:[#allocation2 + $0x130] sm:$0xf0] }
 0x125   : > { %v930_v9 = vsel %vm5902_vm11, 0, %v929_v23  ;;  %v4292_v7 = vld [vmem:[#allocation2 + $0x108] sm:$0xf] }
 0x126   : > { %931 = vst [vmem:[#allocation2 + $0x164] sm:$0x8] %v930_v9  ;;  %v4820_v9 = vld [vmem:[#allocation2 + $0x110] sm:$0xf0]  ;;  %3351 = vmatpush.bf16.msra.mxu3 %v4986_v47  ;;  %v4900_v47 = vld [vmem:[#allocation2 + $0x16c] sm:$0xf] }
 0x127   : > { %2043 = vmatmul.bf16.gmra.mxu2 %v4001_v38 }
 0x129   : > { %v1917_v57 = vpop.f32.mrf.mxu1  ;;  %v2490_v46 = vpop.f32.mrf.mxu3 }
 0x12a   : > { %v2004_v25 = vpop.f32.mrf.mxu2  ;;  %v1918_v18 = vadd.f32 %v1917_v57, %v6139_v53  ;;  %v2491_v32 = vadd.f32 %v2490_v46, %v2002_v27  ;;  %v6652_v53 = vshrl.u32 %v5585_v8, 16  ;;  %v6653_v27 = vshll.u32 %v5585_v8, 16 }
 0x12b   : > { %v2005_v4 = vadd.f32 %v2004_v25, %v1916_v44 }
 0x12c   : > { %v6280_v21 = vpop.f32.mrf.mxu0  ;;  %v6287_v49 = vadd.f32 %v6243_v62, %v2491_v32  ;;  %v1058_v37 = vrot.slane %v6652_v53, 4  ;;  %v1059_v38 = vrot.slane %v6653_v27, 5  ;;  %v6654_v62 = vshll.u32 %v5596_v14, 16  ;;  %v4851_v14 = vld [vmem:[%s6528_s3 + $0x88] sm:$0xff]  ;;  %v4822_v53 = vld [vmem:[#allocation2 + $0x124] sm:$0xf] }
 0x12d   : > { %2658 = vmatpush.bf16.msra.mxu1 %v4851_v14 }
 0x12e   : > { %2532 = vmatmul.bf16.gmra.mxu3 %v4281_v20  ;;  %v1062_v28 = vrot.slane %v6654_v62, 5  ;;  %v1060_v29 = vor.u32 %v1059_v38, %v1058_v37  ;;  %v4013_v20 = vor.u32 %v4893_v42, %v4012_v6  ;;  %v4306_v37 = vld [vmem:[#allocation2 + $0x12c] sm:$0xf0]  ;;  %v932_v62 = vld [vmem:[#allocation2 + $0x17c] sm:$0x8] }
 0x12f   : > { %2626 = vmatmul.bf16.gmra.mxu0 %v4297_v45  ;;  %v4995_v45 = vld [vmem:[%s6528_s3 + $0x208] sm:$0xff] }
 0x130   : > { %v1065_v8 = vor.u32 %v1064_v56, %v1062_v28  ;;  %v1061_v25 = vrot.slane %v1060_v29, 4  ;;  %3439 = vmatpush.bf16.msra.mxu0 %v4995_v45  ;;  %v6655_v29 = vshrl.u32 %v5731_v35, 16 }
 0x131   : > { %v1920_v63 = vpop.f32.mrf.mxu1  ;;  %v2493_v44 = vpop.f32.mrf.mxu3 }
 0x132   : > { %v2006_v57 = vpop.f32.mrf.mxu2  ;;  %v1921_v46 = vadd.f32 %v1920_v63, %v6153_v30  ;;  %v2494_v23 = vadd.f32 %v2493_v44, %v2005_v4  ;;  %v1066_v22 = vrot.slane %v1065_v8, 4  ;;  %v1063_v56 = vsel %vm5926_vm13, %v1061_v25, %v1062_v28  ;;  %v1171_v30 = vld [vmem:[#allocation2 + $0x164] sm:$0xf]  ;;  %v4894_v8 = vld [vmem:[#allocation2 + $0x13c] sm:$0xf] }
 0x133   : > { %v2007_v32 = vadd.f32 %v2006_v57, %v1918_v18  ;;  %1170 = vst [vmem:[#allocation2 + $0x158] sm:$0xf] %v1063_v56  ;;  %v1073_v63 = vrot.slane %v6655_v29, 4  ;;  %v4018_v44 = vld [vmem:[#allocation2 + $0x144] sm:$0xf0]  ;;  %v933_v57 = vsel %vm5902_vm11, 0, %v932_v62 }
 0x134   : > { %1959 = vmatmul.bf16.gmra.mxu1 %v4009_v61  ;;  %v6308_v19 = vpop.f32.mrf.mxu0  ;;  %v6313_v18 = vadd.f32 %v6253_v17, %v2494_v23  ;;  %v1172_v4 = vsel %vm5955_vm14, %v1066_v22, %v1171_v30  ;;  %v4293_v61 = vor.u32 %v4820_v9, %v4292_v7  ;;  %v4309_v17 = vor.u32 %v4822_v53, %v4306_v37  ;;  %v4024_v22 = vld [vmem:[#allocation2 + $0x140] sm:$0xf]  ;;  %v4896_v56 = vld [vmem:[#allocation2 + $0x148] sm:$0xf0]  ;;  %v4318_v29 = vld [vmem:[#allocation2 + $0x144] sm:$0xf0] }
 0x135   : > { %1173 = vst [vmem:[#allocation2 + $0x164] sm:$0xf] %v1172_v4  ;;  %v4021_v45 = vor.u32 %v4894_v8, %v4018_v44 }
 0x136   : > { %934 = vst [vmem:[#allocation2 + $0x17c] sm:$0x8] %v933_v57 }
 0x137   : > { %2048 = vmatmul.bf16.gmra.mxu2 %v4013_v20  ;;  %v6658_v20 = vshll.u32 %v5731_v35, 16 }
 0x139   : > { %v1922_v27 = vpop.f32.mrf.mxu1  ;;  %v2495_v38 = vpop.f32.mrf.mxu3  ;;  %v1071_v14 = vrot.slane %v6658_v20, 5 }
 0x13a   : > { %v2009_v60 = vpop.f32.mrf.mxu2  ;;  %v1923_v39 = vadd.f32 %v1922_v27, %v6181_v5  ;;  %v2496_v28 = vadd.f32 %v2495_v38, %v2007_v32  ;;  %v6656_v5 = vshrl.u32 %v5723_v1, 16  ;;  %v4025_v38 = vor.u32 %v4896_v56, %v4024_v22  ;;  %v4897_v22 = vld [vmem:[#allocation2 + $0x154] sm:$0xf]  ;;  %v4030_v56 = vld [vmem:[#allocation2 + $0x15c] sm:$0xf0] }
 0x13b   : > { %v2010_v6 = vadd.f32 %v2009_v60, %v1921_v46  ;;  %v6657_v46 = vshll.u32 %v5723_v1, 16  ;;  %v1074_v7 = vor.u32 %v1073_v63, %v1071_v14 }
 0x13c   : > { %v6318_v42 = vpop.f32.mrf.mxu0  ;;  %v6325_v25 = vadd.f32 %v6269_v11, %v2496_v28  ;;  %v1067_v23 = vrot.slane %v6656_v5, 4  ;;  %v935_v5 = vld [vmem:[#allocation2 + $0x194] sm:$0x8] }
 0x13d   : > { %v1068_v32 = vrot.slane %v6657_v46, 5  ;;  %v1075_v60 = vrot.slane %v1074_v7, 4  ;;  %v1175_v62 = vld [vmem:[#allocation2 + $0x17c] sm:$0xf] }
 0x13e   : > { %2537 = vmatmul.bf16.gmra.mxu3 %v4293_v61 }
 0x13f   : > { %2631 = vmatmul.bf16.gmra.mxu0 %v4309_v17  ;;  %v1069_v30 = vor.u32 %v1068_v32, %v1067_v23  ;;  %v1176_v61 = vsel %vm5955_vm14, %v1075_v60, %v1175_v62  ;;  %v4304_v17 = vld [vmem:[#allocation2 + $0x120] sm:$0xf]  ;;  %v4899_v60 = vld [vmem:[#allocation2 + $0x160] sm:$0xf0] }
 0x140   : > { %1177 = vst [vmem:[#allocation2 + $0x17c] sm:$0xf] %v1176_v61 }
 0x141   : > { %v1925_v4 = vpop.f32.mrf.mxu1  ;;  %v2498_v11 = vpop.f32.mrf.mxu3  ;;  %v1070_v53 = vrot.slane %v1069_v30, 4  ;;  %v936_v30 = vsel %vm5902_vm11, 0, %v935_v5 }
 0x142   : > { %v2011_v9 = vpop.f32.mrf.mxu2  ;;  %v2499_v37 = vadd.f32 %v2498_v11, %v2010_v6  ;;  %v4825_v6 = vld [vmem:[#allocation2 + $0x13c] sm:$0xf]  ;;  %v1926_v63 = vadd.f32 %v1925_v4, %v6055_v36  ;;  %937 = vst [vmem:[#allocation2 + $0x194] sm:$0x8] %v936_v30  ;;  %v6660_v4 = vshrl.u32 %v5896_v13, 16  ;;  %v6661_v11 = vshll.u32 %v5896_v13, 16 }
 0x143   : > { %v2012_v27 = vadd.f32 %v2011_v9, %v1923_v39  ;;  %v1072_v35 = vsel %vm5926_vm13, %v1070_v53, %v1071_v14  ;;  %v4823_v39 = vld [vmem:[#allocation2 + $0x128] sm:$0xf0]  ;;  %v6659_v14 = vshrl.u32 %v5900_v43, 16  ;;  %v4978_v53 = vld [vmem:[%s6528_s3 + $0x180] sm:$0xff] }
 0x144   : > { %1964 = vmatmul.bf16.gmra.mxu1 %v4021_v45  ;;  %v6333_v1 = vpop.f32.mrf.mxu0  ;;  %1174 = vst [vmem:[#allocation2 + $0x170] sm:$0xf] %v1072_v35  ;;  %v6338_v28 = vadd.f32 %v6280_v21, %v2499_v37  ;;  %v4305_v46 = vor.u32 %v4823_v39, %v4304_v17  ;;  %v4321_v21 = vor.u32 %v4825_v6, %v4318_v29  ;;  %v1076_v7 = vrot.slane %v6660_v4, 4 }
 0x145   : > { %v1082_v45 = vrot.slane %v6659_v14, 4  ;;  %v1077_v9 = vrot.slane %v6661_v11, 5  ;;  %3262 = vmatpush.bf16.msra.mxu2 %v4978_v53  ;;  %v4826_v14 = vld [vmem:[#allocation2 + $0x140] sm:$0xf0] }
 0x147   : > { %2053 = vmatmul.bf16.gmra.mxu2 %v4025_v38  ;;  %v4036_v38 = vld [vmem:[#allocation2 + $0x158] sm:$0xf]  ;;  %v1078_v35 = vor.u32 %v1077_v9, %v1076_v7 }
 0x149   : > { %v1927_v8 = vpop.f32.mrf.mxu1  ;;  %v2500_v44 = vpop.f32.mrf.mxu3  ;;  %v1079_v6 = vrot.slane %v1078_v35, 4 }
 0x14a   : > { %v2014_v57 = vpop.f32.mrf.mxu2  ;;  %v2501_v23 = vadd.f32 %v2500_v44, %v2012_v27  ;;  %v4033_v27 = vor.u32 %v4897_v22, %v4030_v56  ;;  %v1928_v13 = vadd.f32 %v1927_v8, %v6071_v26  ;;  %v4037_v44 = vor.u32 %v4899_v60, %v4036_v38  ;;  %v4330_v22 = vld [vmem:[#allocation2 + $0x15c] sm:$0xf0]  ;;  %v4902_v38 = vld [vmem:[#allocation2 + $0x178] sm:$0xf0] }
 0x14b   : > { %v2015_v32 = vadd.f32 %v2014_v57, %v1926_v63  ;;  %v4994_v57 = vld [vmem:[%s6528_s3 + $0x200] sm:$0xff] }
 0x14c   : > { %v6343_v20 = vpop.f32.mrf.mxu0  ;;  %v6350_v36 = vadd.f32 %v6308_v19, %v2501_v23  ;;  %v6662_v19 = vshll.u32 %v5900_v43, 16  ;;  %v4850_v43 = vld [vmem:[%s6528_s3 + $0x80] sm:$0xff]  ;;  %3440 = vmatpush.bf16.msra.mxu0 %v4994_v57  ;;  %v1179_v23 = vld [vmem:[#allocation2 + $0x194] sm:$0xf] }
 0x14d   : > { %2659 = vmatpush.bf16.msra.mxu1 %v4850_v43 }
 0x14e   : > { %2542 = vmatmul.bf16.gmra.mxu3 %v4305_v46  ;;  %v1080_v37 = vrot.slane %v6662_v19, 5  ;;  %v4042_v19 = vld [vmem:[#allocation2 + $0x174] sm:$0xf0] }
 0x14f   : > { %2636 = vmatmul.bf16.gmra.mxu0 %v4321_v21  ;;  %v4316_v21 = vld [vmem:[#allocation2 + $0x138] sm:$0xf] }
 0x150   : > { %v1083_v61 = vor.u32 %v1082_v45, %v1080_v37  ;;  %v1081_v8 = vsel %vm5926_vm13, %v1079_v6, %v1080_v37  ;;  %v4828_v45 = vld [vmem:[#allocation2 + $0x154] sm:$0xf]  ;;  %v4317_v11 = vor.u32 %v4826_v14, %v4316_v21  ;;  %v4045_v37 = vor.u32 %v4900_v47, %v4042_v19 }
 0x151   : > { %v1930_v62 = vpop.f32.mrf.mxu1  ;;  %v2503_v17 = vpop.f32.mrf.mxu3  ;;  %1178 = vst [vmem:[#allocation2 + $0x188] sm:$0xf] %v1081_v8  ;;  %v4333_v53 = vor.u32 %v4828_v45, %v4330_v22  ;;  %v4903_v45 = vld [vmem:[#allocation2 + $0x184] sm:$0xf]  ;;  %v4054_v22 = vld [vmem:[#allocation2 + $0x18c] sm:$0xf0] }
 0x152   : > { %v2016_v39 = vpop.f32.mrf.mxu2  ;;  %v2504_v29 = vadd.f32 %v2503_v17, %v2015_v32  ;;  %v1084_v5 = vrot.slane %v1083_v61, 4  ;;  %v1931_v56 = vadd.f32 %v1930_v62, %v6085_v59 }
 0x153   : > { %v2017_v63 = vadd.f32 %v2016_v39, %v1928_v13 }
 0x154   : > { %1969 = vmatmul.bf16.gmra.mxu1 %v4033_v27  ;;  %v2599_v26 = vpop.f32.mrf.mxu0  ;;  %v6374_v46 = vadd.f32 %v6318_v42, %v2504_v29  ;;  %v1180_v32 = vsel %vm5955_vm14, %v1084_v5, %v1179_v23  ;;  %v4048_v27 = vld [vmem:[#allocation2 + $0x170] sm:$0xf]  ;;  %v4829_v29 = vld [vmem:[#allocation2 + $0x158] sm:$0xf0] }
 0x155   : > { %1181 = vst [vmem:[#allocation2 + $0x194] sm:$0xf] %v1180_v32  ;;  %v4049_v17 = vor.u32 %v4902_v38, %v4048_v27  ;;  %v4832_v27 = vld [vmem:[#allocation2 + $0x170] sm:$0xf0]  ;;  %v4504_v38 = vld [vmem:[#allocation2 + $0x38] sm:$0xf] }
 0x157   : > { %2058 = vmatmul.bf16.gmra.mxu2 %v4037_v44  ;;  %v4342_v44 = vld [vmem:[#allocation2 + $0x174] sm:$0xf0] }
 0x159   : > { %v1932_v50 = vpop.f32.mrf.mxu1  ;;  %v2505_v30 = vpop.f32.mrf.mxu3 }
 0x15a   : > { %v2019_v4 = vpop.f32.mrf.mxu2  ;;  %v2506_v7 = vadd.f32 %v2505_v30, %v2017_v63  ;;  %v1933_v59 = vadd.f32 %v1932_v50, %v6115_v58  ;;  %v4831_v63 = vld [vmem:[#allocation2 + $0x16c] sm:$0xf]  ;;  %v4060_v50 = vld [vmem:[#allocation2 + $0x188] sm:$0xf] }
 0x15b   : > { %v2020_v9 = vadd.f32 %v2019_v4, %v1931_v56  ;;  %v4345_v21 = vor.u32 %v4831_v63, %v4342_v44  ;;  %v4168_v63 = vld [vmem:[#allocation2 + $0x8] sm:$0xf]  ;;  %v4788_v44 = vld [vmem:[#allocation2 + $0x10] sm:$0xf0] }
 0x15c   : > { %v2602_v42 = vpop.f32.mrf.mxu0  ;;  %v6380_v12 = vadd.f32 %v6333_v1, %v2506_v7  ;;  %v4328_v1 = vld [vmem:[#allocation2 + $0x150] sm:$0xf]  ;;  %v4905_v30 = vld [vmem:[#allocation2 + $0x190] sm:$0xf0] }
 0x15d   : > { %v4329_v23 = vor.u32 %v4829_v29, %v4328_v1  ;;  %v4061_v47 = vor.u32 %v4905_v30, %v4060_v50  ;;  %v4498_v50 = vld [vmem:[#allocation2 + $0x3c] sm:$0xf0]  ;;  %v4516_v30 = vld [vmem:[#allocation2 + $0x50] sm:$0xf] }
 0x15e   : > { %2547 = vmatmul.bf16.gmra.mxu3 %v4317_v11 }
 0x15f   : > { %2641 = vmatmul.bf16.gmra.mxu0 %v4333_v53 }
 0x161   : > { %v1935_v60 = vpop.f32.mrf.mxu1  ;;  %v2508_v35 = vpop.f32.mrf.mxu3 }
 0x162   : > { %v2021_v13 = vpop.f32.mrf.mxu2  ;;  %v2509_v62 = vadd.f32 %v2508_v35, %v2020_v9  ;;  %v1936_v43 = vadd.f32 %v1935_v60, %v6131_v34 }
 0x163   : > { %v2022_v61 = vadd.f32 %v2021_v13, %v1933_v59  ;;  %v4932_v59 = vld [vmem:[#allocation2 + $0x40] sm:$0xf0] }
 0x164   : > { %1974 = vmatmul.bf16.gmra.mxu1 %v4045_v37  ;;  %v2604_v39 = vpop.f32.mrf.mxu0  ;;  %v6384_v6 = vadd.f32 %v6343_v20, %v2509_v62  ;;  %v4057_v20 = vor.u32 %v4903_v45, %v4054_v22  ;;  %v4505_v1 = vor.u32 %v4932_v59, %v4504_v38  ;;  %v4180_v38 = vld [vmem:[#allocation2 + $0x20] sm:$0xf]  ;;  %v4791_v59 = vld [vmem:[#allocation2 + $0x28] sm:$0xf0] }
 0x167   : > { %2063 = vmatmul.bf16.gmra.mxu2 %v4049_v17 }
 0x169   : > { %v1937_v57 = vpop.f32.mrf.mxu1  ;;  %v2510_v58 = vpop.f32.mrf.mxu3 }
 0x16a   : > { %v2024_v5 = vpop.f32.mrf.mxu2  ;;  %v2511_v8 = vadd.f32 %v2510_v58, %v2022_v61  ;;  %v1938_v4 = vadd.f32 %v1937_v57, %v6149_v52  ;;  %v4496_v57 = vld [vmem:[#allocation2 + $0x30] sm:$0xf]  ;;  %v4931_v58 = vld [vmem:[#allocation2 + $0x38] sm:$0xf0] }
 0x16b   : > { %v2025_v32 = vadd.f32 %v2024_v5, %v1936_v43  ;;  %v4497_v45 = vor.u32 %v4931_v58, %v4496_v57  ;;  %v4510_v57 = vld [vmem:[#allocation2 + $0x54] sm:$0xf0]  ;;  %v4528_v58 = vld [vmem:[#allocation2 + $0x68] sm:$0xf] }
 0x16c   : > { %v2607_v14 = vpop.f32.mrf.mxu0  ;;  %v6387_v56 = vadd.f32 %v2599_v26, %v2511_v8  ;;  %v4340_v26 = vld [vmem:[#allocation2 + $0x168] sm:$0xf] }
 0x16d   : > { %v4341_v61 = vor.u32 %v4832_v27, %v4340_v26 }
 0x16e   : > { %2552 = vmatmul.bf16.gmra.mxu3 %v4329_v23 }
 0x16f   : > { %2646 = vmatmul.bf16.gmra.mxu0 %v4345_v21 }
 0x171   : > { %v1940_v34 = vpop.f32.mrf.mxu1  ;;  %v2513_v7 = vpop.f32.mrf.mxu3 }
 0x172   : > { %v2026_v11 = vpop.f32.mrf.mxu2  ;;  %v2514_v9 = vadd.f32 %v2513_v7, %v2025_v32  ;;  %v1941_v60 = vadd.f32 %v1940_v34, %v6173_v55 }
 0x173   : > { %v2027_v53 = vadd.f32 %v2026_v11, %v1938_v4  ;;  %v4935_v4 = vld [vmem:[#allocation2 + $0x58] sm:$0xf0] }
 0x174   : > { %1979 = vmatmul.bf16.gmra.mxu1 %v4057_v20  ;;  %v2609_v19 = vpop.f32.mrf.mxu0  ;;  %v6390_v37 = vadd.f32 %v2602_v42, %v2514_v9  ;;  %v4169_v42 = vor.u32 %v4788_v44, %v4168_v63  ;;  %v4517_v26 = vor.u32 %v4935_v4, %v4516_v30  ;;  %v4192_v30 = vld [vmem:[#allocation2 + $0x38] sm:$0xf]  ;;  %v4794_v4 = vld [vmem:[#allocation2 + $0x40] sm:$0xf0] }
 0x177   : > { %2068 = vmatmul.bf16.gmra.mxu2 %v4061_v47 }
 0x179   : > { %v1942_v35 = vpop.f32.mrf.mxu1  ;;  %v2515_v13 = vpop.f32.mrf.mxu3 }
 0x17a   : > { %v2029_v52 = vpop.f32.mrf.mxu2  ;;  %v2516_v62 = vadd.f32 %v2515_v13, %v2027_v53  ;;  %v1943_v5 = vadd.f32 %v1942_v35, %v6189_v10  ;;  %v4508_v35 = vld [vmem:[#allocation2 + $0x48] sm:$0xf]  ;;  %v4934_v13 = vld [vmem:[#allocation2 + $0x50] sm:$0xf0] }
 0x17b   : > { %v2030_v17 = vadd.f32 %v2029_v52, %v1941_v60  ;;  %v4509_v63 = vor.u32 %v4934_v13, %v4508_v35  ;;  %v4522_v35 = vld [vmem:[#allocation2 + $0x6c] sm:$0xf0]  ;;  %v4540_v13 = vld [vmem:[#allocation2 + $0x80] sm:$0xf] }
 0x17c   : > { %v2612_v29 = vpop.f32.mrf.mxu0  ;;  %v6393_v43 = vadd.f32 %v2604_v39, %v2516_v62  ;;  %v4930_v39 = vld [vmem:[#allocation2 + $0x34] sm:$0xf] }
 0x17d   : > { %v4501_v53 = vor.u32 %v4930_v39, %v4498_v50 }
 0x17e   : > { %2557 = vmatmul.bf16.gmra.mxu3 %v4341_v61 }
 0x17f   : > { %3441 = vmatmul.bf16.vlgmr.msra.gmra.mxu0 %v4505_v1 }
 0x181   : > { %v1945_v55 = vpop.f32.mrf.mxu1  ;;  %v2518_v8 = vpop.f32.mrf.mxu3 }
 0x182   : > { %v2031_v23 = vpop.f32.mrf.mxu2  ;;  %v2519_v32 = vadd.f32 %v2518_v8, %v2030_v17  ;;  %v1946_v34 = vadd.f32 %v1945_v55, %v6063_v3 }
 0x183   : > { %v2032_v21 = vadd.f32 %v2031_v23, %v1943_v5  ;;  %v4938_v5 = vld [vmem:[#allocation2 + $0x70] sm:$0xf0] }
 0x184   : > { %2660 = vmatmul.bf16.vlgmr.msra.gmra.mxu1 %v4169_v42  ;;  %v2614_v22 = vpop.f32.mrf.mxu0  ;;  %v6396_v20 = vadd.f32 %v2607_v14, %v2519_v32  ;;  %v4181_v14 = vor.u32 %v4791_v59, %v4180_v38  ;;  %v4529_v39 = vor.u32 %v4938_v5, %v4528_v58  ;;  %v4204_v58 = vld [vmem:[#allocation2 + $0x50] sm:$0xf]  ;;  %v4797_v5 = vld [vmem:[#allocation2 + $0x58] sm:$0xf0] }
 0x187   : > { %3263 = vmatmul.bf16.vlgmr.msra.gmra.mxu2 %v4497_v45 }
 0x189   : > { %v1947_v7 = vpop.f32.mrf.mxu1  ;;  %v2520_v11 = vpop.f32.mrf.mxu3 }
 0x18a   : > { %v2034_v10 = vpop.f32.mrf.mxu2  ;;  %v2521_v9 = vadd.f32 %v2520_v11, %v2032_v21  ;;  %v1948_v52 = vadd.f32 %v1947_v7, %v6083_v24  ;;  %v4520_v7 = vld [vmem:[#allocation2 + $0x60] sm:$0xf]  ;;  %v4937_v11 = vld [vmem:[#allocation2 + $0x68] sm:$0xf0] }
 0x18b   : > { %v2035_v47 = vadd.f32 %v2034_v10, %v1946_v34  ;;  %v4521_v38 = vor.u32 %v4937_v11, %v4520_v7  ;;  %v4534_v7 = vld [vmem:[#allocation2 + $0x84] sm:$0xf0]  ;;  %v4552_v11 = vld [vmem:[#allocation2 + $0x98] sm:$0xf] }
 0x18c   : > { %v2617_v27 = vpop.f32.mrf.mxu0  ;;  %v6399_v60 = vadd.f32 %v2609_v19, %v2521_v9  ;;  %v4933_v19 = vld [vmem:[#allocation2 + $0x4c] sm:$0xf] }
 0x18d   : > { %v4513_v21 = vor.u32 %v4933_v19, %v4510_v57 }
 0x18e   : > { %3352 = vmatmul.bf16.vlgmr.msra.gmra.mxu3 %v4501_v53 }
 0x18f   : > { %3446 = vmatmul.bf16.gmra.mxu0 %v4517_v26 }
 0x191   : > { %v1950_v3 = vpop.f32.mrf.mxu1  ;;  %v2523_v62 = vpop.f32.mrf.mxu3 }
 0x192   : > { %v2036_v61 = vpop.f32.mrf.mxu2  ;;  %v2524_v17 = vadd.f32 %v2523_v62, %v2035_v47  ;;  %v1951_v55 = vadd.f32 %v1950_v3, %v6113_v2 }
 0x193   : > { %v2037_v1 = vadd.f32 %v2036_v61, %v1948_v52  ;;  %v4941_v52 = vld [vmem:[#allocation2 + $0x88] sm:$0xf0] }
 0x194   : > { %2665 = vmatmul.bf16.gmra.mxu1 %v4181_v14  ;;  %v2619_v44 = vpop.f32.mrf.mxu0  ;;  %v6402_v42 = vadd.f32 %v2612_v29, %v2524_v17  ;;  %v4193_v29 = vor.u32 %v4794_v4, %v4192_v30  ;;  %v4541_v19 = vor.u32 %v4941_v52, %v4540_v13  ;;  %v4216_v13 = vld [vmem:[#allocation2 + $0x68] sm:$0xf]  ;;  %v4800_v52 = vld [vmem:[#allocation2 + $0x70] sm:$0xf0] }
 0x197   : > { %3268 = vmatmul.bf16.gmra.mxu2 %v4509_v63 }
 0x199   : > { %v1952_v8 = vpop.f32.mrf.mxu1  ;;  %v2525_v23 = vpop.f32.mrf.mxu3 }
 0x19a   : > { %v2039_v24 = vpop.f32.mrf.mxu2  ;;  %v2526_v32 = vadd.f32 %v2525_v23, %v2037_v1  ;;  %v1953_v10 = vadd.f32 %v1952_v8, %v6129_v16  ;;  %v4532_v8 = vld [vmem:[#allocation2 + $0x78] sm:$0xf]  ;;  %v4940_v23 = vld [vmem:[#allocation2 + $0x80] sm:$0xf0] }
 0x19b   : > { %v2040_v45 = vadd.f32 %v2039_v24, %v1951_v55  ;;  %v4533_v30 = vor.u32 %v4940_v23, %v4532_v8  ;;  %v4546_v8 = vld [vmem:[#allocation2 + $0x9c] sm:$0xf0]  ;;  %v4564_v23 = vld [vmem:[#allocation2 + $0xb0] sm:$0xf] }
 0x19c   : > { %v2622_v50 = vpop.f32.mrf.mxu0  ;;  %v6405_v34 = vadd.f32 %v2614_v22, %v2526_v32  ;;  %v4936_v22 = vld [vmem:[#allocation2 + $0x64] sm:$0xf] }
 0x19d   : > { %v4525_v1 = vor.u32 %v4936_v22, %v4522_v35 }
 0x19e   : > { %3357 = vmatmul.bf16.gmra.mxu3 %v4513_v21 }
 0x19f   : > { %3451 = vmatmul.bf16.gmra.mxu0 %v4529_v39 }
 0x1a1   : > { %v1955_v2 = vpop.f32.mrf.mxu1  ;;  %v2528_v9 = vpop.f32.mrf.mxu3 }
 0x1a2   : > { %v2041_v53 = vpop.f32.mrf.mxu2  ;;  %v2529_v47 = vadd.f32 %v2528_v9, %v2040_v45  ;;  %v1956_v3 = vadd.f32 %v1955_v2, %v6147_v40 }
 0x1a3   : > { %v2042_v26 = vadd.f32 %v2041_v53, %v1953_v10  ;;  %v4944_v10 = vld [vmem:[#allocation2 + $0xa0] sm:$0xf0] }
 0x1a4   : > { %2670 = vmatmul.bf16.gmra.mxu1 %v4193_v29  ;;  %v2624_v59 = vpop.f32.mrf.mxu0  ;;  %v6408_v14 = vadd.f32 %v2617_v27, %v2529_v47  ;;  %v4205_v27 = vor.u32 %v4797_v5, %v4204_v58  ;;  %v4553_v22 = vor.u32 %v4944_v10, %v4552_v11  ;;  %v4228_v11 = vld [vmem:[#allocation2 + $0x80] sm:$0xf]  ;;  %v4803_v10 = vld [vmem:[#allocation2 + $0x88] sm:$0xf0] }
 0x1a7   : > { %3273 = vmatmul.bf16.gmra.mxu2 %v4521_v38 }
 0x1a9   : > { %v1957_v62 = vpop.f32.mrf.mxu1  ;;  %v2530_v61 = vpop.f32.mrf.mxu3 }
 0x1aa   : > { %v2044_v16 = vpop.f32.mrf.mxu2  ;;  %v2531_v17 = vadd.f32 %v2530_v61, %v2042_v26  ;;  %v1958_v24 = vadd.f32 %v1957_v62, %v6171_v33  ;;  %v4544_v62 = vld [vmem:[#allocation2 + $0x90] sm:$0xf]  ;;  %v4943_v61 = vld [vmem:[#allocation2 + $0x98] sm:$0xf0] }
 0x1ab   : > { %v2045_v63 = vadd.f32 %v2044_v16, %v1956_v3  ;;  %v4545_v58 = vor.u32 %v4943_v61, %v4544_v62  ;;  %v4558_v62 = vld [vmem:[#allocation2 + $0xb4] sm:$0xf0]  ;;  %v4576_v61 = vld [vmem:[#allocation2 + $0xc8] sm:$0xf] }
 0x1ac   : > { %v2627_v57 = vpop.f32.mrf.mxu0  ;;  %v6411_v55 = vadd.f32 %v2619_v44, %v2531_v17  ;;  %v4939_v44 = vld [vmem:[#allocation2 + $0x7c] sm:$0xf] }
 0x1ad   : > { %v4537_v26 = vor.u32 %v4939_v44, %v4534_v7 }
 0x1ae   : > { %3362 = vmatmul.bf16.gmra.mxu3 %v4525_v1 }
 0x1af   : > { %3456 = vmatmul.bf16.gmra.mxu0 %v4541_v19 }
 0x1b1   : > { %v1960_v40 = vpop.f32.mrf.mxu1  ;;  %v2533_v32 = vpop.f32.mrf.mxu3 }
 0x1b2   : > { %v2046_v21 = vpop.f32.mrf.mxu2  ;;  %v2534_v45 = vadd.f32 %v2533_v32, %v2045_v63  ;;  %v1961_v2 = vadd.f32 %v1960_v40, %v6191_v41 }
 0x1b3   : > { %v2047_v39 = vadd.f32 %v2046_v21, %v1958_v24  ;;  %v4947_v24 = vld [vmem:[#allocation2 + $0xb8] sm:$0xf0] }
 0x1b4   : > { %2675 = vmatmul.bf16.gmra.mxu1 %v4205_v27  ;;  %v2629_v4 = vpop.f32.mrf.mxu0  ;;  %v6414_v29 = vadd.f32 %v2622_v50, %v2534_v45  ;;  %v4217_v50 = vor.u32 %v4800_v52, %v4216_v13  ;;  %v4565_v44 = vor.u32 %v4947_v24, %v4564_v23  ;;  %v4240_v24 = vld [vmem:[#allocation2 + $0x98] sm:$0xf] }
 0x1b7   : > { %3278 = vmatmul.bf16.gmra.mxu2 %v4533_v30 }
 0x1b9   : > { %v1962_v9 = vpop.f32.mrf.mxu1  ;;  %v2535_v53 = vpop.f32.mrf.mxu3 }
 0x1ba   : > { %v2049_v33 = vpop.f32.mrf.mxu2  ;;  %v2536_v47 = vadd.f32 %v2535_v53, %v2047_v39  ;;  %v1963_v16 = vadd.f32 %v1962_v9, %v6207_v15  ;;  %v4556_v9 = vld [vmem:[#allocation2 + $0xa8] sm:$0xf]  ;;  %v4946_v53 = vld [vmem:[#allocation2 + $0xb0] sm:$0xf0] }
 0x1bb   : > { %v2050_v38 = vadd.f32 %v2049_v33, %v1961_v2  ;;  %v4557_v13 = vor.u32 %v4946_v53, %v4556_v9 }
 0x1bc   : > { %v2632_v35 = vpop.f32.mrf.mxu0  ;;  %v6417_v3 = vadd.f32 %v2624_v59, %v2536_v47  ;;  %v4942_v59 = vld [vmem:[#allocation2 + $0x94] sm:$0xf] }
 0x1bd   : > { %v4549_v39 = vor.u32 %v4942_v59, %v4546_v8 }
 0x1be   : > { %3367 = vmatmul.bf16.gmra.mxu3 %v4537_v26 }
 0x1bf   : > { %3461 = vmatmul.bf16.gmra.mxu0 %v4553_v22 }
 0x1c1   : > { %v1965_v41 = vpop.f32.mrf.mxu1  ;;  %v2538_v17 = vpop.f32.mrf.mxu3 }
 0x1c2   : > { %v2051_v1 = vpop.f32.mrf.mxu2  ;;  %v2539_v63 = vadd.f32 %v2538_v17, %v2050_v38  ;;  %v1966_v40 = vadd.f32 %v1965_v41, %v6081_v54  ;;  %v6663_v41 = vld [vmem:[#allocation3_spill] sm:$0xff] }
 0x1c3   : > { %v2052_v19 = vadd.f32 %v2051_v1, %v1963_v16  ;;  %v4950_v16 = vld [vmem:[#allocation2 + $0xd0] sm:$0xf0] }
 0x1c4   : > { %2680 = vmatmul.bf16.gmra.mxu1 %v4217_v50  ;;  %v2634_v5 = vpop.f32.mrf.mxu0  ;;  %v6420_v27 = vadd.f32 %v2627_v57, %v2539_v63  ;;  %v4229_v57 = vor.u32 %v4803_v10, %v4228_v11  ;;  %v4577_v8 = vor.u32 %v4950_v16, %v4576_v61 }
 0x1c7   : > { %3283 = vmatmul.bf16.gmra.mxu2 %v4545_v58 }
 0x1c9   : > { %v1967_v32 = vpop.f32.mrf.mxu1  ;;  %v2540_v21 = vpop.f32.mrf.mxu3 }
 0x1ca   : > { %v2054_v15 = vpop.f32.mrf.mxu2  ;;  %v2541_v45 = vadd.f32 %v2540_v21, %v2052_v19  ;;  %v1968_v33 = vadd.f32 %v1967_v32, %v6108_v0  ;;  %v4568_v21 = vld [vmem:[#allocation2 + $0xc0] sm:$0xf] }
 0x1cb   : > { %v2055_v30 = vadd.f32 %v2054_v15, %v1966_v40  ;;  %v4806_v40 = vld [vmem:[#allocation2 + $0xa0] sm:$0xf0]  ;;  %v4949_v15 = vld [vmem:[#allocation2 + $0xc8] sm:$0xf0] }
 0x1cc   : > { %v2637_v7 = vpop.f32.mrf.mxu0  ;;  %v6423_v2 = vadd.f32 %v2629_v4, %v2541_v45  ;;  %v4945_v4 = vld [vmem:[#allocation2 + $0xac] sm:$0xf]  ;;  %v6664_v45 = vld [vmem:[#allocation4_spill] sm:$0xff]  ;;  %v4569_v9 = vor.u32 %v4949_v15, %v4568_v21 }
 0x1cd   : > { %v4561_v58 = vor.u32 %v4945_v4, %v4558_v62 }
 0x1ce   : > { %3372 = vmatmul.bf16.gmra.mxu3 %v4549_v39 }
 0x1cf   : > { %3466 = vmatmul.bf16.gmra.mxu0 %v4565_v44 }
 0x1d1   : > { %v1970_v54 = vpop.f32.mrf.mxu1  ;;  %v2543_v47 = vpop.f32.mrf.mxu3 }
 0x1d2   : > { %v2056_v26 = vpop.f32.mrf.mxu2  ;;  %v2544_v38 = vadd.f32 %v2543_v47, %v2055_v30  ;;  %v1971_v17 = vadd.f32 %v1970_v54, %v6663_v41  ;;  %v4570_v54 = vld [vmem:[#allocation2 + $0xcc] sm:$0xf0]  ;;  %v4588_v47 = vld [vmem:[#allocation2 + $0xe0] sm:$0xf] }
 0x1d3   : > { %v2057_v22 = vadd.f32 %v2056_v26, %v1968_v33  ;;  %v4953_v26 = vld [vmem:[#allocation2 + $0xe8] sm:$0xf0] }
 0x1d4   : > { %2685 = vmatmul.bf16.gmra.mxu1 %v4229_v57  ;;  %v2639_v52 = vpop.f32.mrf.mxu0  ;;  %v6426_v50 = vadd.f32 %v2632_v35, %v2544_v38  ;;  %v4241_v35 = vor.u32 %v4806_v40, %v4240_v24  ;;  %v6665_v38 = vld [vmem:[#allocation5_spill] sm:$0xff] }
 0x1d7   : > { %3288 = vmatmul.bf16.gmra.mxu2 %v4557_v13 }
 0x1d9   : > { %v1972_v1 = vpop.f32.mrf.mxu1  ;;  %v2545_v63 = vpop.f32.mrf.mxu3 }
 0x1da   : > { %v2059_v0 = vpop.f32.mrf.mxu2  ;;  %v2546_v19 = vadd.f32 %v2545_v63, %v2057_v22  ;;  %v1973_v39 = vadd.f32 %v1972_v1, %v6664_v45  ;;  %v4252_v63 = vld [vmem:[#allocation2 + $0xb0] sm:$0xf] }
 0x1db   : > { %v2060_v59 = vadd.f32 %v2059_v0, %v1971_v17  ;;  %v4589_v17 = vor.u32 %v4953_v26, %v4588_v47  ;;  %v4809_v0 = vld [vmem:[#allocation2 + $0xb8] sm:$0xf0] }
 0x1dc   : > { %v2642_v23 = vpop.f32.mrf.mxu0  ;;  %v6429_v32 = vadd.f32 %v2634_v5, %v2546_v19  ;;  %v4948_v5 = vld [vmem:[#allocation2 + $0xc4] sm:$0xf] }
 0x1dd   : > { %v4573_v16 = vor.u32 %v4948_v5, %v4570_v54 }
 0x1de   : > { %3377 = vmatmul.bf16.gmra.mxu3 %v4561_v58  ;;  %v4580_v58 = vld [vmem:[#allocation2 + $0xd8] sm:$0xf] }
 0x1df   : > { %3471 = vmatmul.bf16.gmra.mxu0 %v4577_v8  ;;  %v6666_v8 = vld [vmem:[#allocation6_spill] sm:$0xff] }
 0x1e1   : > { %v1975_v30 = vpop.f32.mrf.mxu1  ;;  %v2548_v44 = vpop.f32.mrf.mxu3 }
 0x1e2   : > { %v2061_v11 = vpop.f32.mrf.mxu2  ;;  %v2549_v10 = vadd.f32 %v2548_v44, %v2060_v59  ;;  %v1976_v22 = vadd.f32 %v1975_v30, %v6665_v38  ;;  %v4952_v59 = vld [vmem:[#allocation2 + $0xe0] sm:$0xf0] }
 0x1e3   : > { %v2062_v57 = vadd.f32 %v2061_v11, %v1973_v39  ;;  %v4581_v39 = vor.u32 %v4952_v59, %v4580_v58  ;;  %v4582_v11 = vld [vmem:[#allocation2 + $0xe4] sm:$0xf0] }
 0x1e4   : > { %2690 = vmatmul.bf16.gmra.mxu1 %v4241_v35  ;;  %v2644_v53 = vpop.f32.mrf.mxu0  ;;  %v6432_v33 = vadd.f32 %v2637_v7, %v2549_v10  ;;  %v4253_v7 = vor.u32 %v4809_v0, %v4252_v63  ;;  %v4600_v10 = vld [vmem:[#allocation2 + $0xf8] sm:$0xf]  ;;  %v4955_v63 = vld [vmem:[#allocation2 + $0xf8] sm:$0xf0] }
 0x1e5   : > { %v6668_v0 = vld [vmem:[#allocation8_spill] sm:$0xff] }
 0x1e7   : > { %3293 = vmatmul.bf16.gmra.mxu2 %v4569_v9  ;;  %v6667_v9 = vld [vmem:[#allocation7_spill] sm:$0xff] }
 0x1e9   : > { %v1977_v13 = vpop.f32.mrf.mxu1  ;;  %v2550_v4 = vpop.f32.mrf.mxu3 }
 0x1ea   : > { %v2064_v62 = vpop.f32.mrf.mxu2  ;;  %v2551_v61 = vadd.f32 %v2550_v4, %v2062_v57  ;;  %v1978_v24 = vadd.f32 %v1977_v13, %v6666_v8  ;;  %v4956_v57 = vld [vmem:[#allocation2 + $0x100] sm:$0xf0] }
 0x1eb   : > { %v2065_v41 = vadd.f32 %v2064_v62, %v1976_v22  ;;  %v4601_v4 = vor.u32 %v4956_v57, %v4600_v10 }
 0x1ec   : > { %v2647_v1 = vpop.f32.mrf.mxu0  ;;  %v6435_v19 = vadd.f32 %v2639_v52, %v2551_v61  ;;  %v4951_v52 = vld [vmem:[#allocation2 + $0xdc] sm:$0xf]  ;;  %v4264_v61 = vld [vmem:[#allocation2 + $0xc8] sm:$0xf] }
 0x1ed   : > { %v4585_v22 = vor.u32 %v4951_v52, %v4582_v11  ;;  %v4959_v52 = vld [vmem:[#allocation2 + $0x118] sm:$0xf0] }
 0x1ee   : > { %3382 = vmatmul.bf16.gmra.mxu3 %v4573_v16  ;;  %v4812_v16 = vld [vmem:[#allocation2 + $0xd0] sm:$0xf0] }
 0x1ef   : > { %3476 = vmatmul.bf16.gmra.mxu0 %v4589_v17  ;;  %v4592_v17 = vld [vmem:[#allocation2 + $0xf0] sm:$0xf] }
 0x1f1   : > { %v1980_v40 = vpop.f32.mrf.mxu1  ;;  %v2553_v35 = vpop.f32.mrf.mxu3 }
 0x1f2   : > { %v2066_v21 = vpop.f32.mrf.mxu2  ;;  %v2554_v15 = vadd.f32 %v2553_v35, %v2065_v41  ;;  %v1981_v5 = vadd.f32 %v1980_v40, %v6667_v9  ;;  %v4593_v35 = vor.u32 %v4955_v63, %v4592_v17 }
 0x1f3   : > { %v2067_v45 = vadd.f32 %v2066_v21, %v1978_v24 }
 0x1f4   : > { %2695 = vmatmul.bf16.gmra.mxu1 %v4253_v7  ;;  %v2649_v30 = vpop.f32.mrf.mxu0  ;;  %v6438_v44 = vadd.f32 %v2642_v23, %v2554_v15  ;;  %v4265_v23 = vor.u32 %v4812_v16, %v4264_v61 }
 0x1f7   : > { %3298 = vmatmul.bf16.gmra.mxu2 %v4581_v39  ;;  %v4612_v39 = vld [vmem:[#allocation2 + $0x110] sm:$0xf] }
 0x1f9   : > { %v1982_v54 = vpop.f32.mrf.mxu1  ;;  %v2555_v47 = vpop.f32.mrf.mxu3 }
 0x1fa   : > { %v2069_v26 = vpop.f32.mrf.mxu2  ;;  %v2556_v38 = vadd.f32 %v2555_v47, %v2067_v45  ;;  %v1983_v7 = vadd.f32 %v1982_v54, %v6668_v0  ;;  %v4594_v45 = vld [vmem:[#allocation2 + $0xfc] sm:$0xf0]  ;;  %v4613_v54 = vor.u32 %v4959_v52, %v4612_v39 }
 0x1fb   : > { %v2070_v13 = vadd.f32 %v2069_v26, %v1981_v5  ;;  %v4276_v26 = vld [vmem:[#allocation2 + $0xe0] sm:$0xf] }
 0x1fc   : > { %v3442_v62 = vpop.f32.mrf.mxu0  ;;  %v6441_v41 = vadd.f32 %v2644_v53, %v2556_v38  ;;  %v4954_v53 = vld [vmem:[#allocation2 + $0xf4] sm:$0xf]  ;;  %v4815_v38 = vld [vmem:[#allocation2 + $0xe8] sm:$0xf0] }
 0x1fd   : > { %v4597_v5 = vor.u32 %v4954_v53, %v4594_v45 }
 0x1fe   : > { %3387 = vmatmul.bf16.gmra.mxu3 %v4585_v22 }
 0x1ff   : > { %3481 = vmatmul.bf16.gmra.mxu0 %v4601_v4  ;;  %v4958_v4 = vld [vmem:[#allocation2 + $0x110] sm:$0xf0] }
 0x201   : > { %v2661_v58 = vpop.f32.mrf.mxu1  ;;  %v2558_v59 = vpop.f32.mrf.mxu3 }
 0x202   : > { %v2071_v8 = vpop.f32.mrf.mxu2  ;;  %v2559_v24 = vadd.f32 %v2558_v59, %v2070_v13  ;;  %v4604_v13 = vld [vmem:[#allocation2 + $0x108] sm:$0xf]  ;;  %v4606_v59 = vld [vmem:[#allocation2 + $0x114] sm:$0xf0]  ;;  %v2662_v45 = vadd.f32 %v2661_v58, %v6248_v51  ;;  %v4961_v58 = vld [vmem:[#allocation2 + $0x128] sm:$0xf0] }
 0x203   : > { %v2072_v40 = vadd.f32 %v2071_v8, %v1983_v7  ;;  %v4605_v17 = vor.u32 %v4958_v4, %v4604_v13  ;;  %v4957_v7 = vld [vmem:[#allocation2 + $0x10c] sm:$0xf]  ;;  %v4624_v8 = vld [vmem:[#allocation2 + $0x128] sm:$0xf] }
 0x204   : > { %2700 = vmatmul.bf16.gmra.mxu1 %v4265_v23  ;;  %v3444_v21 = vpop.f32.mrf.mxu0  ;;  %v6444_v15 = vadd.f32 %v2647_v1, %v2559_v24  ;;  %v4277_v1 = vor.u32 %v4815_v38, %v4276_v26  ;;  %v4962_v24 = vld [vmem:[#allocation2 + $0x130] sm:$0xf0]  ;;  %v4609_v52 = vor.u32 %v4957_v7, %v4606_v59  ;;  %v4288_v26 = vld [vmem:[#allocation2 + $0xf8] sm:$0xf]  ;;  %v4818_v38 = vld [vmem:[#allocation2 + $0x100] sm:$0xf0] }
 0x205   : > { %v4289_v51 = vor.u32 %v4818_v38, %v4288_v26 }
 0x207   : > { %3303 = vmatmul.bf16.gmra.mxu2 %v4593_v35 }
 0x209   : > { %v2663_v11 = vpop.f32.mrf.mxu1  ;;  %v2560_v10 = vpop.f32.mrf.mxu3 }
 0x20a   : > { %v3264_v57 = vpop.f32.mrf.mxu2  ;;  %v2561_v9 = vadd.f32 %v2560_v10, %v2072_v40  ;;  %v4625_v10 = vor.u32 %v4962_v24, %v4624_v8 }
 0x20c   : > { %v3447_v47 = vpop.f32.mrf.mxu0  ;;  %v6446_v22 = vadd.f32 %v2649_v30, %v2561_v9 }
 0x20e   : > { %3392 = vmatmul.bf16.gmra.mxu3 %v4597_v5 }
 0x20f   : > { %3486 = vmatmul.bf16.gmra.mxu0 %v4613_v54 }
 0x211   : > { %v2666_v61 = vpop.f32.mrf.mxu1  ;;  %v3353_v16 = vpop.f32.mrf.mxu3 }
 0x212   : > { %v3266_v23 = vpop.f32.mrf.mxu2  ;;  %v3354_v0 = vadd.f32 %v3353_v16, %v3264_v57  ;;  %v2664_v57 = vadd.f32 %v2663_v11, %v6260_v48  ;;  %v2667_v8 = vadd.f32 %v2666_v61, %v6274_v31  ;;  %v4300_v61 = vld [vmem:[#allocation2 + $0x110] sm:$0xf] }
 0x214   : > { %2705 = vmatmul.bf16.gmra.mxu1 %v4277_v1  ;;  %v3449_v63 = vpop.f32.mrf.mxu0  ;;  %v3443_v40 = vadd.f32 %v3442_v62, %v3354_v0  ;;  %v4616_v62 = vld [vmem:[#allocation2 + $0x120] sm:$0xf] }
 0x215   : > { %v4617_v7 = vor.u32 %v4961_v58, %v4616_v62  ;;  %v4821_v58 = vld [vmem:[#allocation2 + $0x118] sm:$0xf0] }
 0x216   : > { %v3522_v5 = vadd.f32 %v3443_v40, %v2662_v45  ;;  %v4618_v45 = vld [vmem:[#allocation2 + $0x12c] sm:$0xf0] }
 0x217   : > { %3308 = vmatmul.bf16.gmra.mxu2 %v4605_v17 }
 0x218   : > { %v3656_v13 = vmul.f32 %v3522_v5, %v3522_v5 }
 0x219   : > { %v2668_v30 = vpop.f32.mrf.mxu1  ;;  %v3355_v35 = vpop.f32.mrf.mxu3 }
 0x21a   : > { %v3269_v53 = vpop.f32.mrf.mxu2  ;;  %v3356_v39 = vadd.f32 %v3355_v35, %v3266_v23  ;;  %v4960_v35 = vld [vmem:[#allocation2 + $0x124] sm:$0xf]  ;;  %v2669_v31 = vadd.f32 %v2668_v30, %v6287_v49 }
 0x21c   : > { %v6449_v9 = vpop.f32.mrf.mxu0  ;;  %v3445_v54 = vadd.f32 %v3444_v21, %v3356_v39  ;;  %v4636_v39 = vld [vmem:[#allocation2 + $0x140] sm:$0xf] }
 0x21e   : > { %v3523_v1 = vadd.f32 %v3445_v54, %v2664_v57  ;;  %3397 = vmatmul.bf16.gmra.mxu3 %v4609_v52  ;;  %v4965_v52 = vld [vmem:[#allocation2 + $0x148] sm:$0xf0] }
 0x21f   : > { %3491 = vmatmul.bf16.gmra.mxu0 %v4625_v10  ;;  %v4637_v62 = vor.u32 %v4965_v52, %v4636_v39  ;;  %v4963_v52 = vld [vmem:[#allocation2 + $0x13c] sm:$0xf] }
 0x220   : > { %v5069_v4 = vpack.c.bf16 %v3523_v1, %v3522_v5  ;;  %v3618_v16 = vadd.f32 %v3523_v1, %v3522_v5  ;;  %v3657_v48 = vmul.f32 %v3523_v1, %v3523_v1 }
 0x221   : > { %v2671_v21 = vpop.f32.mrf.mxu1  ;;  %v3358_v11 = vpop.f32.mrf.mxu3 }
 0x222   : > { %v3271_v23 = vpop.f32.mrf.mxu2  ;;  %5070 = vst [vmem:[%s6457_s26] sm:$0xff] %v5069_v4   ;;  %v3688_v17 = vadd.f32 %v3657_v48, %v3656_v13  ;;  %v3359_v0 = vadd.f32 %v3358_v11, %v3269_v53  ;;  %v4621_v53 = vor.u32 %v4960_v35, %v4618_v45  ;;  %v4301_v4 = vor.u32 %v4821_v58, %v4300_v61  ;;  %v4964_v48 = vld [vmem:[#allocation2 + $0x140] sm:$0xf0] }
 0x223   : > { %v2672_v30 = vadd.f32 %v2671_v21, %v6313_v18  ;;  %v4312_v21 = vld [vmem:[#allocation2 + $0x128] sm:$0xf] }
 0x224   : > { %2710 = vmatmul.bf16.gmra.mxu1 %v4289_v51  ;;  %v3454_v59 = vpop.f32.mrf.mxu0  ;;  %v3448_v24 = vadd.f32 %v3447_v47, %v3359_v0 }
 0x226   : > { %v3524_v40 = vadd.f32 %v3448_v24, %v2667_v8 }
 0x227   : > { %3313 = vmatmul.bf16.gmra.mxu2 %v4617_v7 }
 0x228   : > { %v3619_v10 = vadd.f32 %v3618_v16, %v3524_v40  ;;  %v3658_v5 = vmul.f32 %v3524_v40, %v3524_v40  ;;  %v4628_v16 = vld [vmem:[#allocation2 + $0x138] sm:$0xf] }
 0x229   : > { %v2673_v57 = vpop.f32.mrf.mxu1  ;;  %v3360_v54 = vpop.f32.mrf.mxu3  ;;  %v4629_v49 = vor.u32 %v4964_v48, %v4628_v16  ;;  %v4640_v48 = vld [vmem:[#allocation2 + $0x150] sm:$0xf] }
 0x22a   : > { %v3274_v26 = vpop.f32.mrf.mxu2  ;;  %v3689_v38 = vadd.f32 %v3688_v17, %v3658_v5  ;;  %v3361_v1 = vadd.f32 %v3360_v54, %v3271_v23  ;;  %v4630_v5 = vld [vmem:[#allocation2 + $0x144] sm:$0xf0]  ;;  %v2674_v18 = vadd.f32 %v2673_v57, %v6325_v25 }
 0x22c   : > { %v6461_v51 = vpop.f32.mrf.mxu0  ;;  %v3450_v47 = vadd.f32 %v3449_v63, %v3361_v1 }
 0x22e   : > { %v3525_v13 = vadd.f32 %v3450_v47, %v2669_v31  ;;  %3402 = vmatmul.bf16.gmra.mxu3 %v4621_v53  ;;  %v4633_v47 = vor.u32 %v4963_v52, %v4630_v5  ;;  %v4966_v5 = vld [vmem:[#allocation2 + $0x154] sm:$0xf] }
 0x22f   : > { %3496 = vmatmul.bf16.gmra.mxu0 %v4637_v62 }
 0x230   : > { %v5074_v11 = vpack.c.bf16 %v3525_v13, %v3524_v40  ;;  %v3620_v0 = vadd.f32 %v3619_v10, %v3525_v13  ;;  %v3659_v17 = vmul.f32 %v3525_v13, %v3525_v13  ;;  %v4648_v40 = vld [vmem:[#allocation2 + $0x158] sm:$0xf]  ;;  %v4968_v10 = vld [vmem:[#allocation2 + $0x160] sm:$0xf0]  ;;  %v4824_v13 = vld [vmem:[#allocation2 + $0x130] sm:$0xf0] }
 0x231   : > { %v2676_v23 = vpop.f32.mrf.mxu1  ;;  %v3363_v7 = vpop.f32.mrf.mxu3  ;;  %v4649_v61 = vor.u32 %v4968_v10, %v4648_v40  ;;  %v4313_v16 = vor.u32 %v4824_v13, %v4312_v21  ;;  %v4642_v40 = vld [vmem:[#allocation2 + $0x15c] sm:$0xf0]  ;;  %v4971_v10 = vld [vmem:[#allocation2 + $0x178] sm:$0xf0]  ;;  %v4827_v21 = vld [vmem:[#allocation2 + $0x148] sm:$0xf0] }
 0x232   : > { %v3276_v8 = vpop.f32.mrf.mxu2  ;;  %5161 = vst [vmem:[%s6457_s26 + $0x8] sm:$0xff] %v5074_v11   ;;  %v3690_v24 = vadd.f32 %v3689_v38, %v3659_v17  ;;  %v3364_v35 = vadd.f32 %v3363_v7, %v3274_v26  ;;  %v4967_v11 = vld [vmem:[#allocation2 + $0x158] sm:$0xf0]  ;;  %v2677_v57 = vadd.f32 %v2676_v23, %v6338_v28  ;;  %v4324_v23 = vld [vmem:[#allocation2 + $0x140] sm:$0xf] }
 0x233   : > { %v4641_v25 = vor.u32 %v4967_v11, %v4640_v48  ;;  %v4970_v48 = vld [vmem:[#allocation2 + $0x170] sm:$0xf0] }
 0x234   : > { %2715 = vmatmul.bf16.gmra.mxu1 %v4301_v4  ;;  %v3459_v63 = vpop.f32.mrf.mxu0  ;;  %v3453_v45 = vadd.f32 %v6449_v9, %v3364_v35 }
 0x236   : > { %v3526_v39 = vadd.f32 %v3453_v45, %v2672_v30 }
 0x237   : > { %3318 = vmatmul.bf16.gmra.mxu2 %v4629_v49 }
 0x238   : > { %v3621_v54 = vadd.f32 %v3620_v0, %v3526_v39  ;;  %v3660_v1 = vmul.f32 %v3526_v39, %v3526_v39 }
 0x239   : > { %v2678_v53 = vpop.f32.mrf.mxu1  ;;  %v3365_v62 = vpop.f32.mrf.mxu3 }
 0x23a   : > { %v3279_v31 = vpop.f32.mrf.mxu2  ;;  %v3691_v38 = vadd.f32 %v3690_v24, %v3660_v1  ;;  %v3366_v26 = vadd.f32 %v3365_v62, %v3276_v8  ;;  %v2679_v28 = vadd.f32 %v2678_v53, %v6350_v36 }
 0x23c   : > { %v6467_v58 = vpop.f32.mrf.mxu0  ;;  %v3455_v9 = vadd.f32 %v3454_v59, %v3366_v26 }
 0x23e   : > { %v3527_v4 = vadd.f32 %v3455_v9, %v2674_v18  ;;  %3407 = vmatmul.bf16.gmra.mxu3 %v4633_v47 }
 0x23f   : > { %3501 = vmatmul.bf16.gmra.mxu0 %v4649_v61  ;;  %v4645_v61 = vor.u32 %v4966_v5, %v4642_v40  ;;  %v4654_v5 = vld [vmem:[#allocation2 + $0x174] sm:$0xf0]  ;;  %v4974_v40 = vld [vmem:[#allocation2 + $0x190] sm:$0xf0] }
 0x240   : > { %v5079_v0 = vpack.c.bf16 %v3527_v4, %v3526_v39  ;;  %v3622_v17 = vadd.f32 %v3621_v54, %v3527_v4  ;;  %v3661_v7 = vmul.f32 %v3527_v4, %v3527_v4  ;;  %v4660_v39 = vld [vmem:[#allocation2 + $0x170] sm:$0xf]  ;;  %v4325_v4 = vor.u32 %v4827_v21, %v4324_v23  ;;  %v4664_v21 = vld [vmem:[#allocation2 + $0x180] sm:$0xf] }
 0x241   : > { %v2681_v8 = vpop.f32.mrf.mxu1  ;;  %v3368_v24 = vpop.f32.mrf.mxu3  ;;  %v4661_v18 = vor.u32 %v4971_v10, %v4660_v39 }
 0x242   : > { %v3281_v35 = vpop.f32.mrf.mxu2  ;;  %5162 = vst [vmem:[%s6457_s26 + $0x10] sm:$0xff] %v5079_v0   ;;  %v3692_v49 = vadd.f32 %v3691_v38, %v3661_v7  ;;  %v3369_v30 = vadd.f32 %v3368_v24, %v3279_v31  ;;  %v2682_v53 = vadd.f32 %v2681_v8, %v6374_v46  ;;  %v4336_v8 = vld [vmem:[#allocation2 + $0x158] sm:$0xf] }
 0x244   : > { %2720 = vmatmul.bf16.gmra.mxu1 %v4313_v16  ;;  %v3464_v59 = vpop.f32.mrf.mxu0  ;;  %v3458_v45 = vadd.f32 %v6461_v51, %v3369_v30  ;;  %v4652_v16 = vld [vmem:[#allocation2 + $0x168] sm:$0xf] }
 0x245   : > { %v4653_v36 = vor.u32 %v4970_v48, %v4652_v16 }
 0x246   : > { %v3528_v52 = vadd.f32 %v3458_v45, %v2677_v57  ;;  %v4969_v45 = vld [vmem:[#allocation2 + $0x16c] sm:$0xf] }
 0x247   : > { %3323 = vmatmul.bf16.gmra.mxu2 %v4641_v25 }
 0x248   : > { %v3623_v54 = vadd.f32 %v3622_v17, %v3528_v52  ;;  %v3662_v1 = vmul.f32 %v3528_v52, %v3528_v52 }
 0x249   : > { %v2683_v62 = vpop.f32.mrf.mxu1  ;;  %v3370_v26 = vpop.f32.mrf.mxu3 }
 0x24a   : > { %v3284_v47 = vpop.f32.mrf.mxu2  ;;  %v3693_v38 = vadd.f32 %v3692_v49, %v3662_v1  ;;  %v3371_v31 = vadd.f32 %v3370_v26, %v3281_v35  ;;  %v2684_v46 = vadd.f32 %v2683_v62, %v6380_v12 }
 0x24c   : > { %v6473_v9 = vpop.f32.mrf.mxu0  ;;  %v3460_v51 = vadd.f32 %v3459_v63, %v3371_v31  ;;  %v4657_v31 = vor.u32 %v4969_v45, %v4654_v5 }
 0x24e   : > { %v3529_v13 = vadd.f32 %v3460_v51, %v2679_v28  ;;  %3412 = vmatmul.bf16.gmra.mxu3 %v4645_v61  ;;  %v4830_v28 = vld [vmem:[#allocation2 + $0x160] sm:$0xf0] }
 0x24f   : > { %3506 = vmatmul.bf16.gmra.mxu0 %v4661_v18  ;;  %v4337_v23 = vor.u32 %v4830_v28, %v4336_v8  ;;  %v4976_v8 = vld [vmem:[#allocation2 + $0x1a0] sm:$0xf0] }
 0x250   : > { %v5084_v11 = vpack.c.bf16 %v3529_v13, %v3528_v52  ;;  %v3624_v0 = vadd.f32 %v3623_v54, %v3529_v13  ;;  %v3663_v17 = vmul.f32 %v3529_v13, %v3529_v13  ;;  %v4672_v52 = vld [vmem:[#allocation2 + $0x188] sm:$0xf]  ;;  %v4973_v13 = vld [vmem:[#allocation2 + $0x188] sm:$0xf0] }
 0x251   : > { %v2686_v7 = vpop.f32.mrf.mxu1  ;;  %v3373_v24 = vpop.f32.mrf.mxu3  ;;  %v4673_v61 = vor.u32 %v4974_v40, %v4672_v52  ;;  %v4665_v12 = vor.u32 %v4973_v13, %v4664_v21 }
 0x252   : > { %v3286_v35 = vpop.f32.mrf.mxu2  ;;  %5163 = vst [vmem:[%s6457_s26 + $0x18] sm:$0xff] %v5084_v11   ;;  %v3694_v49 = vadd.f32 %v3693_v38, %v3663_v17  ;;  %v3374_v30 = vadd.f32 %v3373_v24, %v3284_v47  ;;  %v2687_v62 = vadd.f32 %v2686_v7, %v6384_v6  ;;  %v4348_v7 = vld [vmem:[#allocation2 + $0x170] sm:$0xf] }
 0x254   : > { %2725 = vmatmul.bf16.gmra.mxu1 %v4325_v4  ;;  %v3469_v63 = vpop.f32.mrf.mxu0  ;;  %v3463_v25 = vadd.f32 %v6467_v58, %v3374_v30 }
 0x256   : > { %v3530_v57 = vadd.f32 %v3463_v25, %v2682_v53  ;;  %v4666_v53 = vld [vmem:[#allocation2 + $0x18c] sm:$0xf0]  ;;  %v4684_v25 = vld [vmem:[#allocation2 + $0x1a0] sm:$0xf] }
 0x257   : > { %3328 = vmatmul.bf16.gmra.mxu2 %v4653_v36  ;;  %v4972_v36 = vld [vmem:[#allocation2 + $0x184] sm:$0xf] }
 0x258   : > { %v3625_v39 = vadd.f32 %v3624_v0, %v3530_v57  ;;  %v3664_v10 = vmul.f32 %v3530_v57, %v3530_v57 }
 0x259   : > { %v2688_v54 = vpop.f32.mrf.mxu1  ;;  %v3375_v1 = vpop.f32.mrf.mxu3 }
 0x25a   : > { %v3289_v26 = vpop.f32.mrf.mxu2  ;;  %v3695_v38 = vadd.f32 %v3694_v49, %v3664_v10  ;;  %v3376_v47 = vadd.f32 %v3375_v1, %v3286_v35  ;;  %v2689_v6 = vadd.f32 %v2688_v54, %v6387_v56 }
 0x25c   : > { %v6479_v18 = vpop.f32.mrf.mxu0  ;;  %v3465_v58 = vadd.f32 %v3464_v59, %v3376_v47 }
 0x25e   : > { %v3531_v51 = vadd.f32 %v3465_v58, %v2684_v46  ;;  %3417 = vmatmul.bf16.gmra.mxu3 %v4657_v31  ;;  %v4833_v31 = vld [vmem:[#allocation2 + $0x178] sm:$0xf0]  ;;  %v4676_v58 = vld [vmem:[#allocation2 + $0x198] sm:$0xf] }
 0x25f   : > { %3511 = vmatmul.bf16.gmra.mxu0 %v4673_v61  ;;  %v4349_v46 = vor.u32 %v4833_v31, %v4348_v7  ;;  %v4677_v56 = vor.u32 %v4976_v8, %v4676_v58 }
 0x260   : > { %v5089_v4 = vpack.c.bf16 %v3531_v51, %v3530_v57  ;;  %v3626_v16 = vadd.f32 %v3625_v39, %v3531_v51  ;;  %v3665_v48 = vmul.f32 %v3531_v51, %v3531_v51  ;;  %v4977_v57 = vld [vmem:[#allocation2 + $0x1a8] sm:$0xf0] }
 0x261   : > { %v2691_v11 = vpop.f32.mrf.mxu1  ;;  %v3378_v0 = vpop.f32.mrf.mxu3 }
 0x262   : > { %v3291_v17 = vpop.f32.mrf.mxu2  ;;  %5164 = vst [vmem:[%s6457_s26 + $0x20] sm:$0xff] %v5089_v4   ;;  %v3696_v24 = vadd.f32 %v3695_v38, %v3665_v48  ;;  %v3379_v35 = vadd.f32 %v3378_v0, %v3289_v26  ;;  %v4669_v26 = vor.u32 %v4972_v36, %v4666_v53  ;;  %v4685_v38 = vor.u32 %v4977_v57, %v4684_v25 }
 0x263   : > { %v2692_v54 = vadd.f32 %v2691_v11, %v6390_v37 }
 0x264   : > { %2730 = vmatmul.bf16.gmra.mxu1 %v4337_v23  ;;  %v3474_v59 = vpop.f32.mrf.mxu0  ;;  %v3468_v49 = vadd.f32 %v6473_v9, %v3379_v35  ;;  %v4678_v35 = vld [vmem:[#allocation2 + $0x1a4] sm:$0xf0] }
 0x266   : > { %v3532_v30 = vadd.f32 %v3468_v49, %v2687_v62 }
 0x267   : > { %3333 = vmatmul.bf16.gmra.mxu2 %v4665_v12 }
 0x268   : > { %v3627_v45 = vadd.f32 %v3626_v16, %v3532_v30  ;;  %v3666_v5 = vmul.f32 %v3532_v30, %v3532_v30 }
 0x269   : > { %v2693_v52 = vpop.f32.mrf.mxu1  ;;  %v3380_v40 = vpop.f32.mrf.mxu3 }
 0x26a   : > { %v3294_v39 = vpop.f32.mrf.mxu2  ;;  %v3697_v10 = vadd.f32 %v3696_v24, %v3666_v5  ;;  %v3381_v1 = vadd.f32 %v3380_v40, %v3291_v17  ;;  %v4975_v24 = vld [vmem:[#allocation2 + $0x19c] sm:$0xf]  ;;  %v2694_v5 = vadd.f32 %v2693_v52, %v6393_v43 }
 0x26b   : > { %v4681_v57 = vor.u32 %v4975_v24, %v4678_v35 }
 0x26c   : > { %v3477_v47 = vpop.f32.mrf.mxu0  ;;  %v3470_v9 = vadd.f32 %v3469_v63, %v3381_v1 }
 0x26e   : > { %v3533_v61 = vadd.f32 %v3470_v9, %v2689_v6  ;;  %3422 = vmatmul.bf16.gmra.mxu3 %v4669_v26 }
 0x26f   : > { %3516 = vmatmul.bf16.gmra.mxu0 %v4685_v38 }
 0x270   : > { %v5094_v28 = vpack.c.bf16 %v3533_v61, %v3532_v30  ;;  %v3628_v51 = vadd.f32 %v3627_v45, %v3533_v61  ;;  %v3667_v23 = vmul.f32 %v3533_v61, %v3533_v61 }
 0x271   : > { %v2696_v21 = vpop.f32.mrf.mxu1  ;;  %v3383_v13 = vpop.f32.mrf.mxu3 }
 0x272   : > { %v3296_v4 = vpop.f32.mrf.mxu2  ;;  %5165 = vst [vmem:[%s6457_s26 + $0x28] sm:$0xff] %v5094_v28   ;;  %v3698_v16 = vadd.f32 %v3697_v10, %v3667_v23  ;;  %v3384_v48 = vadd.f32 %v3383_v13, %v3294_v39  ;;  %v2697_v7 = vadd.f32 %v2696_v21, %v6396_v20 }
 0x274   : > { %2735 = vmatmul.bf16.gmra.mxu1 %v4349_v46  ;;  %v3479_v63 = vpop.f32.mrf.mxu0  ;;  %v3473_v0 = vadd.f32 %v6479_v18, %v3384_v48 }
 0x276   : > { %v3534_v17 = vadd.f32 %v3473_v0, %v2692_v54 }
 0x277   : > { %3338 = vmatmul.bf16.gmra.mxu2 %v4677_v56 }
 0x278   : > { %v3629_v12 = vadd.f32 %v3628_v51, %v3534_v17  ;;  %v3668_v62 = vmul.f32 %v3534_v17, %v3534_v17 }
 0x279   : > { %v2698_v49 = vpop.f32.mrf.mxu1  ;;  %v3385_v30 = vpop.f32.mrf.mxu3 }
 0x27a   : > { %v3299_v36 = vpop.f32.mrf.mxu2  ;;  %v3699_v53 = vadd.f32 %v3698_v16, %v3668_v62  ;;  %v3386_v25 = vadd.f32 %v3385_v30, %v3296_v4  ;;  %v2699_v23 = vadd.f32 %v2698_v49, %v6399_v60 }
 0x27c   : > { %v3482_v45 = vpop.f32.mrf.mxu0  ;;  %v3475_v40 = vadd.f32 %v3474_v59, %v3386_v25 }
 0x27e   : > { %v3535_v37 = vadd.f32 %v3475_v40, %v2694_v5  ;;  %3427 = vmatmul.bf16.gmra.mxu3 %v4681_v57 }
 0x280   : > { %v5099_v18 = vpack.c.bf16 %v3535_v37, %v3534_v17  ;;  %v3630_v11 = vadd.f32 %v3629_v12, %v3535_v37  ;;  %v3669_v39 = vmul.f32 %v3535_v37, %v3535_v37 }
 0x281   : > { %v2701_v10 = vpop.f32.mrf.mxu1  ;;  %v3388_v1 = vpop.f32.mrf.mxu3 }
 0x282   : > { %v3301_v26 = vpop.f32.mrf.mxu2  ;;  %5166 = vst [vmem:[%s6457_s26 + $0x30] sm:$0xff] %v5099_v18   ;;  %v3700_v38 = vadd.f32 %v3699_v53, %v3669_v39  ;;  %v3389_v6 = vadd.f32 %v3388_v1, %v3299_v36  ;;  %v2702_v24 = vadd.f32 %v2701_v10, %v6402_v42 }
 0x284   : > { %v3484_v9 = vpop.f32.mrf.mxu0  ;;  %v3478_v31 = vadd.f32 %v3477_v47, %v3389_v6 }
 0x286   : > { %v3536_v61 = vadd.f32 %v3478_v31, %v2697_v7 }
 0x288   : > { %v3631_v46 = vadd.f32 %v3630_v11, %v3536_v61  ;;  %v3670_v58 = vmul.f32 %v3536_v61, %v3536_v61 }
 0x289   : > { %v2703_v43 = vpop.f32.mrf.mxu1  ;;  %v3390_v59 = vpop.f32.mrf.mxu3 }
 0x28a   : > { %v3304_v52 = vpop.f32.mrf.mxu2  ;;  %v3701_v8 = vadd.f32 %v3700_v38, %v3670_v58  ;;  %v3391_v28 = vadd.f32 %v3390_v59, %v3301_v26  ;;  %v2704_v25 = vadd.f32 %v2703_v43, %v6405_v34 }
 0x28c   : > { %v3487_v51 = vpop.f32.mrf.mxu0  ;;  %v3480_v13 = vadd.f32 %v3479_v63, %v3391_v28 }
 0x28e   : > { %v3537_v4 = vadd.f32 %v3480_v13, %v2699_v23 }
 0x290   : > { %v5104_v16 = vpack.c.bf16 %v3537_v4, %v3536_v61  ;;  %v3632_v48 = vadd.f32 %v3631_v46, %v3537_v4  ;;  %v3671_v56 = vmul.f32 %v3537_v4, %v3537_v4 }
 0x291   : > { %v2706_v54 = vpop.f32.mrf.mxu1  ;;  %v3393_v20 = vpop.f32.mrf.mxu3 }
 0x292   : > { %v3306_v47 = vpop.f32.mrf.mxu2  ;;  %5167 = vst [vmem:[%s6457_s26 + $0x38] sm:$0xff] %v5104_v16   ;;  %v3702_v21 = vadd.f32 %v3701_v8, %v3671_v56  ;;  %v3394_v0 = vadd.f32 %v3393_v20, %v3304_v52  ;;  %v2707_v26 = vadd.f32 %v2706_v54, %v6408_v14 }
 0x294   : > { %v3489_v17 = vpop.f32.mrf.mxu0  ;;  %v3483_v35 = vadd.f32 %v3482_v45, %v3394_v0 }
 0x296   : > { %v3538_v12 = vadd.f32 %v3483_v35, %v2702_v24 }
 0x298   : > { %v3633_v62 = vadd.f32 %v3632_v48, %v3538_v12  ;;  %v3672_v30 = vmul.f32 %v3538_v12, %v3538_v12 }
 0x299   : > { %v2708_v60 = vpop.f32.mrf.mxu1  ;;  %v3395_v63 = vpop.f32.mrf.mxu3 }
 0x29a   : > { %v3309_v49 = vpop.f32.mrf.mxu2  ;;  %v3703_v36 = vadd.f32 %v3702_v21, %v3672_v30  ;;  %v3396_v53 = vadd.f32 %v3395_v63, %v3306_v47  ;;  %v2709_v59 = vadd.f32 %v2708_v60, %v6411_v55 }
 0x29c   : > { %v3485_v57 = vadd.f32 %v3484_v9, %v3396_v53  ;;  %v3492_v5 = vpop.f32.mrf.mxu0 }
 0x29e   : > { %v3539_v40 = vadd.f32 %v3485_v57, %v2704_v25 }
 0x2a0   : > { %v5109_v37 = vpack.c.bf16 %v3539_v40, %v3538_v12  ;;  %v3634_v18 = vadd.f32 %v3633_v62, %v3539_v40  ;;  %v3673_v11 = vmul.f32 %v3539_v40, %v3539_v40 }
 0x2a1   : > { %v2711_v39 = vpop.f32.mrf.mxu1  ;;  %v3398_v42 = vpop.f32.mrf.mxu3 }
 0x2a2   : > { %v3311_v45 = vpop.f32.mrf.mxu2  ;;  %5168 = vst [vmem:[%s6457_s26 + $0x40] sm:$0xff] %v5109_v37   ;;  %v3704_v10 = vadd.f32 %v3703_v36, %v3673_v11  ;;  %v3399_v1 = vadd.f32 %v3398_v42, %v3309_v49  ;;  %v2712_v54 = vadd.f32 %v2711_v39, %v6414_v29 }
 0x2a4   : > { %v3488_v38 = vadd.f32 %v3487_v51, %v3399_v1  ;;  %v3494_v7 = vpop.f32.mrf.mxu0 }
 0x2a6   : > { %v3540_v6 = vadd.f32 %v3488_v38, %v2707_v26 }
 0x2a8   : > { %v3635_v31 = vadd.f32 %v3634_v18, %v3540_v6  ;;  %v3674_v61 = vmul.f32 %v3540_v6, %v3540_v6 }
 0x2a9   : > { %v2713_v34 = vpop.f32.mrf.mxu1  ;;  %v3400_v9 = vpop.f32.mrf.mxu3 }
 0x2aa   : > { %v3314_v46 = vpop.f32.mrf.mxu2  ;;  %v3705_v58 = vadd.f32 %v3704_v10, %v3674_v61  ;;  %v3401_v43 = vadd.f32 %v3400_v9, %v3311_v45  ;;  %v2714_v30 = vadd.f32 %v2713_v34, %v6417_v3 }
 0x2ac   : > { %v3490_v52 = vadd.f32 %v3489_v17, %v3401_v43  ;;  %v3497_v14 = vpop.f32.mrf.mxu0 }
 0x2ae   : > { %v3541_v8 = vadd.f32 %v3490_v52, %v2709_v59 }
 0x2b0   : > { %v5114_v28 = vpack.c.bf16 %v3541_v8, %v3540_v6  ;;  %v3636_v23 = vadd.f32 %v3635_v31, %v3541_v8  ;;  %v3675_v13 = vmul.f32 %v3541_v8, %v3541_v8 }
 0x2b1   : > { %v2716_v4 = vpop.f32.mrf.mxu1  ;;  %v3403_v51 = vpop.f32.mrf.mxu3 }
 0x2b2   : > { %v3316_v16 = vpop.f32.mrf.mxu2  ;;  %5169 = vst [vmem:[%s6457_s26 + $0x48] sm:$0xff] %v5114_v28   ;;  %v3706_v48 = vadd.f32 %v3705_v58, %v3675_v13  ;;  %v3404_v56 = vadd.f32 %v3403_v51, %v3314_v46  ;;  %v2717_v37 = vadd.f32 %v2716_v4, %v6420_v27 }
 0x2b4   : > { %v3493_v20 = vadd.f32 %v3492_v5, %v3404_v56  ;;  %v3499_v62 = vpop.f32.mrf.mxu0 }
 0x2b6   : > { %v3542_v47 = vadd.f32 %v3493_v20, %v2712_v54 }
 0x2b8   : > { %v3637_v21 = vadd.f32 %v3636_v23, %v3542_v47  ;;  %v3676_v0 = vmul.f32 %v3542_v47, %v3542_v47 }
 0x2b9   : > { %v2718_v55 = vpop.f32.mrf.mxu1  ;;  %v3405_v17 = vpop.f32.mrf.mxu3 }
 0x2ba   : > { %v3319_v24 = vpop.f32.mrf.mxu2  ;;  %v3707_v35 = vadd.f32 %v3706_v48, %v3676_v0  ;;  %v3406_v12 = vadd.f32 %v3405_v17, %v3316_v16  ;;  %v2719_v38 = vadd.f32 %v2718_v55, %v6423_v2 }
 0x2bc   : > { %v3495_v60 = vadd.f32 %v3494_v7, %v3406_v12  ;;  %v3502_v11 = vpop.f32.mrf.mxu0 }
 0x2be   : > { %v3543_v63 = vadd.f32 %v3495_v60, %v2714_v30 }
 0x2c0   : > { %v5119_v49 = vpack.c.bf16 %v3543_v63, %v3542_v47  ;;  %v3638_v36 = vadd.f32 %v3637_v21, %v3543_v63  ;;  %v3677_v53 = vmul.f32 %v3543_v63, %v3543_v63 }
 0x2c1   : > { %v3408_v25 = vpop.f32.mrf.mxu3  ;;  %v2721_v40 = vpop.f32.mrf.mxu1 }
 0x2c2   : > { %v3321_v29 = vpop.f32.mrf.mxu2  ;;  %5170 = vst [vmem:[%s6457_s26 + $0x50] sm:$0xff] %v5119_v49   ;;  %v3708_v57 = vadd.f32 %v3707_v35, %v3677_v53  ;;  %v3409_v5 = vadd.f32 %v3408_v25, %v3319_v24  ;;  %v2722_v52 = vadd.f32 %v2721_v40, %v6426_v50 }
 0x2c4   : > { %v3498_v18 = vadd.f32 %v3497_v14, %v3409_v5  ;;  %v3504_v61 = vpop.f32.mrf.mxu0 }
 0x2c6   : > { %v3544_v39 = vadd.f32 %v3498_v18, %v2717_v37 }
 0x2c8   : > { %v3639_v42 = vadd.f32 %v3638_v36, %v3544_v39  ;;  %v3678_v45 = vmul.f32 %v3544_v39, %v3544_v39 }
 0x2c9   : > { %v3410_v3 = vpop.f32.mrf.mxu3  ;;  %v2723_v7 = vpop.f32.mrf.mxu1 }
 0x2ca   : > { %v3324_v10 = vpop.f32.mrf.mxu2  ;;  %v3709_v1 = vadd.f32 %v3708_v57, %v3678_v45  ;;  %v3411_v26 = vadd.f32 %v3410_v3, %v3321_v29  ;;  %v2724_v56 = vadd.f32 %v2723_v7, %v6429_v32 }
 0x2cc   : > { %v3500_v6 = vadd.f32 %v3499_v62, %v3411_v26  ;;  %v3507_v4 = vpop.f32.mrf.mxu0 }
 0x2ce   : > { %v3545_v31 = vadd.f32 %v3500_v6, %v2719_v38 }
 0x2d0   : > { %v5124_v34 = vpack.c.bf16 %v3545_v31, %v3544_v39  ;;  %v3640_v9 = vadd.f32 %v3639_v42, %v3545_v31  ;;  %v3679_v46 = vmul.f32 %v3545_v31, %v3545_v31 }
 0x2d1   : > { %v3413_v27 = vpop.f32.mrf.mxu3  ;;  %v2726_v23 = vpop.f32.mrf.mxu1 }
 0x2d2   : > { %v3326_v58 = vpop.f32.mrf.mxu2  ;;  %5171 = vst [vmem:[%s6457_s26 + $0x58] sm:$0xff] %v5124_v34   ;;  %v3710_v43 = vadd.f32 %v3709_v1, %v3679_v46  ;;  %v3414_v59 = vadd.f32 %v3413_v27, %v3324_v10  ;;  %v2727_v62 = vadd.f32 %v2726_v23, %v6432_v33 }
 0x2d4   : > { %v3503_v8 = vadd.f32 %v3502_v11, %v3414_v59  ;;  %v3509_v12 = vpop.f32.mrf.mxu0 }
 0x2d6   : > { %v3546_v28 = vadd.f32 %v3503_v8, %v2722_v52 }
 0x2d8   : > { %v3641_v13 = vadd.f32 %v3640_v9, %v3546_v28  ;;  %v3680_v2 = vmul.f32 %v3546_v28, %v3546_v28 }
 0x2d9   : > { %v3415_v14 = vpop.f32.mrf.mxu3  ;;  %v2728_v55 = vpop.f32.mrf.mxu1 }
 0x2da   : > { %v3329_v51 = vpop.f32.mrf.mxu2  ;;  %v3711_v16 = vadd.f32 %v3710_v43, %v3680_v2  ;;  %v3416_v48 = vadd.f32 %v3415_v14, %v3326_v58  ;;  %v2729_v57 = vadd.f32 %v2728_v55, %v6435_v19 }
 0x2dc   : > { %v3505_v54 = vadd.f32 %v3504_v61, %v3416_v48  ;;  %v3512_v40 = vpop.f32.mrf.mxu0 }
 0x2de   : > { %v3547_v20 = vadd.f32 %v3505_v54, %v2724_v56 }
 0x2e0   : > { %v5129_v47 = vpack.c.bf16 %v3547_v20, %v3546_v28  ;;  %v3642_v21 = vadd.f32 %v3641_v13, %v3547_v20  ;;  %v3681_v0 = vmul.f32 %v3547_v20, %v3547_v20 }
 0x2e1   : > { %v3418_v50 = vpop.f32.mrf.mxu3  ;;  %v2731_v29 = vpop.f32.mrf.mxu1 }
 0x2e2   : > { %v3331_v17 = vpop.f32.mrf.mxu2  ;;  %5172 = vst [vmem:[%s6457_s26 + $0x60] sm:$0xff] %v5129_v47   ;;  %v3712_v24 = vadd.f32 %v3711_v16, %v3681_v0  ;;  %v3419_v35 = vadd.f32 %v3418_v50, %v3329_v51  ;;  %v2732_v10 = vadd.f32 %v2731_v29, %v6438_v44 }
 0x2e4   : > { %v3508_v30 = vadd.f32 %v3507_v4, %v3419_v35  ;;  %v3514_v6 = vpop.f32.mrf.mxu0 }
 0x2e6   : > { %v3548_v60 = vadd.f32 %v3508_v30, %v2727_v62 }
 0x2e8   : > { %v3643_v63 = vadd.f32 %v3642_v21, %v3548_v60  ;;  %v3682_v49 = vmul.f32 %v3548_v60, %v3548_v60 }
 0x2e9   : > { %v3420_v32 = vpop.f32.mrf.mxu3  ;;  %v2733_v26 = vpop.f32.mrf.mxu1 }
 0x2ea   : > { %v3334_v36 = vpop.f32.mrf.mxu2  ;;  %v3713_v53 = vadd.f32 %v3712_v24, %v3682_v49  ;;  %v3421_v25 = vadd.f32 %v3420_v32, %v3331_v17  ;;  %v2734_v9 = vadd.f32 %v2733_v26, %v6441_v41 }
 0x2ec   : > { %v3510_v5 = vadd.f32 %v3509_v12, %v3421_v25  ;;  %v3517_v44 = vpop.f32.mrf.mxu0 }
 0x2ee   : > { %v3549_v37 = vadd.f32 %v3510_v5, %v2729_v57 }
 0x2f0   : > { %v5134_v18 = vpack.c.bf16 %v3549_v37, %v3548_v60  ;;  %v3644_v11 = vadd.f32 %v3643_v63, %v3549_v37  ;;  %v3683_v39 = vmul.f32 %v3549_v37, %v3549_v37 }
 0x2f1   : > { %v3423_v42 = vpop.f32.mrf.mxu3  ;;  %v2736_v43 = vpop.f32.mrf.mxu1 }
 0x2f2   : > { %5173 = vst [vmem:[%s6457_s26 + $0x68] sm:$0xff] %v5134_v18   ;;  %v3714_v33 = vadd.f32 %v3713_v53, %v3683_v39  ;;  %v3424_v45 = vadd.f32 %v3423_v42, %v3334_v36  ;;  %v3336_v3 = vpop.f32.mrf.mxu2  ;;  %v2737_v2 = vadd.f32 %v2736_v43, %v6444_v15 }
 0x2f4   : > { %v3513_v1 = vadd.f32 %v3512_v40, %v3424_v45  ;;  %v3519_v47 = vpop.f32.mrf.mxu0 }
 0x2f6   : > { %v3550_v38 = vadd.f32 %v3513_v1, %v2732_v10 }
 0x2f8   : > { %v3645_v7 = vadd.f32 %v3644_v11, %v3550_v38  ;;  %v3684_v19 = vmul.f32 %v3550_v38, %v3550_v38 }
 0x2f9   : > { %v3425_v31 = vpop.f32.mrf.mxu3  ;;  %v2738_v48 = vpop.f32.mrf.mxu1 }
 0x2fa   : > { %v3715_v61 = vadd.f32 %v3714_v33, %v3684_v19  ;;  %v3426_v34 = vadd.f32 %v3425_v31, %v3336_v3  ;;  %v3339_v27 = vpop.f32.mrf.mxu2  ;;  %v2739_v21 = vadd.f32 %v2738_v48, %v6446_v22 }
 0x2fc   : > { %v3515_v46 = vadd.f32 %v3514_v6, %v3426_v34 }
 0x2fe   : > { %v3551_v58 = vadd.f32 %v3515_v46, %v2734_v9 }
 0x300   : > { %v5139_v59 = vpack.c.bf16 %v3551_v58, %v3550_v38  ;;  %v3646_v52 = vadd.f32 %v3645_v7, %v3551_v58  ;;  %v3685_v8 = vmul.f32 %v3551_v58, %v3551_v58 }
 0x301   : > { %v3428_v28 = vpop.f32.mrf.mxu3 }
 0x302   : > { %5174 = vst [vmem:[%s6457_s26 + $0x70] sm:$0xff] %v5139_v59   ;;  %v3716_v23 = vadd.f32 %v3715_v61, %v3685_v8  ;;  %v3429_v13 = vadd.f32 %v3428_v28, %v3339_v27  ;;  %v3341_v51 = vpop.f32.mrf.mxu2 }
 0x304   : > { %v3518_v4 = vadd.f32 %v3517_v44, %v3429_v13 }
 0x306   : > { %v3552_v14 = vadd.f32 %v3518_v4, %v2737_v2 }
 0x308   : > { %v3647_v16 = vadd.f32 %v3646_v52, %v3552_v14  ;;  %v3686_v41 = vmul.f32 %v3552_v14, %v3552_v14 }
 0x309   : > { %v3430_v56 = vpop.f32.mrf.mxu3 }
 0x30a   : > { %v3717_v54 = vadd.f32 %v3716_v23, %v3686_v41  ;;  %v3431_v20 = vadd.f32 %v3430_v56, %v3341_v51 }
 0x30c   : > { %v3520_v0 = vadd.f32 %v3519_v47, %v3431_v20 }
 0x30e   : > { %v3553_v55 = vadd.f32 %v3520_v0, %v2739_v21 }
 0x310   : > { %v5144_v50 = vpack.c.bf16 %v3553_v55, %v3552_v14  ;;  %v3648_v17 = vadd.f32 %v3647_v16, %v3553_v55  ;;  %v3687_v24 = vmul.f32 %v3553_v55, %v3553_v55 }
 0x312   : > { %5175 = vst [vmem:[%s6457_s26 + $0x78] sm:$0xff] %v5144_v50   ;;  %v3649_v15 = vrot.slane %v3648_v17, 4  ;;  %v3718_v35 = vadd.f32 %v3717_v54, %v3687_v24 }
 0x314   : > { %v3650_v12 = vadd.f32 %v3649_v15, %v3648_v17  ;;  %v3719_v62 = vrot.slane %v3718_v35, 4 }
 0x316   : > { %v3651_v30 = vrot.slane %v3650_v12, 2  ;;  %v3720_v60 = vadd.f32 %v3719_v62, %v3718_v35 }
 0x318   : > { %v3652_v63 = vadd.f32 %v3651_v30, %v3650_v12  ;;  %v3721_v49 = vrot.slane %v3720_v60, 2 }
 0x31a   : > { %v3653_v32 = vrot.slane %v3652_v63, 1  ;;  %v3722_v36 = vadd.f32 %v3721_v49, %v3720_v60 }
 0x31c   : > { %v3654_v22 = vadd.f32 %v3653_v32, %v3652_v63  ;;  %v3723_v53 = vrot.slane %v3722_v36, 1 }
 0x31e   : > { %3655 = vst [vmem:[%s235_s28] sm:$0x1] %v3654_v22  ;;  %v3724_v25 = vadd.f32 %v3723_v53, %v3722_v36 }
 0x320   : > { %3725 = vst [vmem:[%s235_s28 + $0x1] sm:$0x1] %v3724_v25 }
 0x321 PF: > { %s16_s18 = sadd.s32 1, %s5219_s18  }
 0x322   : > { %p13_p4 = scmp.ge.s32.totalorder %s16_s18, 4  }
 0x324   :  { %15 = sbr.rel (!%p13_p4) target bundleno = 1 (0x1), region = 83 }

</bundles_post_ra>
